<compile_context>
chip_gen: v7x
topology: tpu7x:2x2x1
jax: 0.10.0
libtpu: 0.0.40
codegen_flags: <defaults>
</compile_context>

<pallas_src>
import functools

import jax
import jax.numpy as jnp
import numpy as np
from jax.experimental import pallas as pl
from jax.experimental.pallas import tpu as pltpu

OUT_CHANNELS = 32
GN_EPS = 1e-5
NUM_BLOCKS = 4
PACK = 4                          # images packed side-by-side on the lane axis
LANES = PACK * OUT_CHANNELS       # 128


def _align8(x):
    return ((x + 7) // 8) * 8


def _conv_gn_relu_pool(x, w_ref, gamma, beta, hp, wp, wo):
    """One [Conv3x3(pad=2) + GroupNorm(C groups) + ReLU + MaxPool(2,2)] block
    for 4 lane-packed images.

    x      : (hp*wp, 4*cin) zero-padded input, rows = flattened (h, w) grid.
    w_ref  : (9, 4*cin, 128) block-diagonal conv taps (tap t = kh*3 + kw).
    gamma, beta : (1, 128) GroupNorm affine params tiled over the 4 images.
    wo     : true conv-output width (w + 2); wp >= wo + 2 and wp % 8 == 0.
    Returns (lb, 128); the pooled value of output (i, j) sits at row
    2*i*wp + 2*j.  All other rows are never consumed downstream.
    """
    ho = hp - 2                        # conv output height (= h + 2)
    lc = (ho - 1) * wp + wo            # materialized conv rows

    # Conv as 9 shifted-row matmul accumulations.  No bias: a per-channel bias
    # is cancelled exactly by the GroupNorm mean subtraction below.
    y = jnp.dot(x[0:lc, :], w_ref[0], preferred_element_type=jnp.float32)
    for t in range(1, 9):
        d = (t // 3) * wp + (t % 3)
        y = y + jnp.dot(x[d:d + lc, :], w_ref[t],
                        preferred_element_type=jnp.float32)

    # GroupNorm (num_groups == num_channels): per-(image, channel) stats over
    # the ho*wo valid rows.  Out-of-image rows of y are exactly zero (all of
    # their taps read zero padding), so plain column sums are already correct.
    inv_n = 1.0 / float(ho * wo)
    mean = jnp.sum(y, axis=0, keepdims=True) * inv_n
    ex2 = jnp.sum(y * y, axis=0, keepdims=True) * inv_n
    var = jnp.maximum(ex2 - mean * mean, 0.0)        # biased var, as in PyTorch
    scale = gamma * jax.lax.rsqrt(var + GN_EPS)
    shift = beta - mean * scale
    y = jnp.maximum(y * scale + shift, 0.0)          # GN affine + ReLU

    # MaxPool2d(2, 2): neighbour max along w, then along h (wp-aligned shift).
    a = jnp.maximum(y[:lc - 1, :], y[1:, :])
    lb = lc - 1 - wp
    return jnp.maximum(a[:lb, :], a[wp:, :])


def _fused_forward_kernel(x_ref, w1_ref, w2_ref, w3_ref, w4_ref,
                          g_ref, be_ref,
                          g1_ref, s1_ref, g2_ref, s2_ref, g3_ref, s3_ref,
                          g4_ref, wfc_ref, bfc_ref, out_ref, *, dims):
    """Whole SimpleConvNet forward for one group of 4 lane-packed images."""
    w_refs = (w1_ref, w2_ref, w3_ref, w4_ref)
    gather_refs = (g1_ref, g2_ref, g3_ref, g4_ref)
    scatter_refs = (s1_ref, s2_ref, s3_ref)
    gamma = g_ref[...]
    beta = be_ref[...]

    x = x_ref[0]                                      # (hp1*wp1, 4*cin)
    compact = None
    for k, (hp, wp, wo) in enumerate(dims):
        bm = _conv_gn_relu_pool(x, w_refs[k], gamma, beta, hp, wp, wo)
        # Gather the real pooled outputs into a compact (hq*wq, 128) block.
        compact = jnp.dot(gather_refs[k][...], bm,
                          preferred_element_type=jnp.float32)
        if k + 1 < len(dims):
            # Scatter the compact block into the next block's zero-padded grid.
            x = jnp.dot(scatter_refs[k][...], compact,
                        preferred_element_type=jnp.float32)

    # Fused Linear on the final 3x3x32 features: block-diagonal over the 4
    # lane-packed images, classes zero-padded to 32 -> lane-dense (1, 128) out.
    logits = bfc_ref[...]                             # (1, 4*ncp)
    for p in range(wfc_ref.shape[0]):
        logits = logits + jnp.dot(compact[p:p + 1, :], wfc_ref[p],
                                  preferred_element_type=jnp.float32)
    out_ref[0] = logits


def _gather_matrix(hp, wp, wo):
    """0/1 matrix picking the real pooled rows (2*i*wp + 2*j) into compact
    (hq*wq, lb) row-major order."""
    ho = hp - 2
    hq, wq = ho // 2, wo // 2
    lb = (ho - 1) * wp + wo - 1 - wp
    g = np.zeros((hq * wq, lb), np.float32)
    for i in range(hq):
        for j in range(wq):
            g[i * wq + j, 2 * i * wp + 2 * j] = 1.0
    return g


def _scatter_matrix(hq, wq, hp2, wp2):
    """0/1 matrix placing the compact pooled block into the next block's
    zero-padded, flattened (hp2, wp2) grid."""
    s = np.zeros((hp2 * wp2, hq * wq), np.float32)
    for i in range(hq):
        for j in range(wq):
            s[(i + 2) * wp2 + (j + 2), i * wq + j] = 1.0
    return s


def pack_params(params):
    """One-time repack of PyTorch-layout params into kernel layouts (outside jit).

    * conv weights -> (9, 4*cin, 128) block-diagonal over the 4 lane-packed
      images (conv biases are dropped: GroupNorm cancels them exactly),
    * GroupNorm gamma / beta -> (1, 128) tiled over the 4 images,
    * fc weight -> (9, 128, 4*ncp) block-diagonal per spatial position, rows
      converted from PyTorch (c, h, w) flatten order, classes padded to a
      multiple of 32; fc bias -> (1, 4*ncp).
    """
    packed = []
    for (wgt, _bias) in params["blocks"]:
        cin = wgt.shape[1]
        wt = np.transpose(np.asarray(wgt, np.float32), (2, 3, 1, 0))
        wt = wt.reshape(9, cin, OUT_CHANNELS)
        blk = np.zeros((9, PACK * cin, LANES), np.float32)
        for i in range(PACK):
            blk[:, i * cin:(i + 1) * cin,
                i * OUT_CHANNELS:(i + 1) * OUT_CHANNELS] = wt
        packed.append(jnp.asarray(blk))
    packed.append(jnp.asarray(
        np.tile(np.asarray(params["gn_w"], np.float32), PACK).reshape(1, LANES)))
    packed.append(jnp.asarray(
        np.tile(np.asarray(params["gn_b"], np.float32), PACK).reshape(1, LANES)))

    fc_w = np.asarray(params["fc_w"], np.float32)     # (C*npos, nc), (c,h,w) rows
    fc_b = np.asarray(params["fc_b"], np.float32)
    nc = fc_b.shape[-1]
    npos = fc_w.shape[0] // OUT_CHANNELS
    ncp = -(-nc // 32) * 32                           # padded classes per image
    wpos = fc_w.reshape(OUT_CHANNELS, npos, nc).transpose(1, 0, 2)  # (npos,C,nc)
    wblk = np.zeros((npos, LANES, PACK * ncp), np.float32)
    bblk = np.zeros((1, PACK * ncp), np.float32)
    for i in range(PACK):
        wblk[:, i * OUT_CHANNELS:(i + 1) * OUT_CHANNELS,
             i * ncp:i * ncp + nc] = wpos
        bblk[0, i * ncp:i * ncp + nc] = fc_b
    packed.append(jnp.asarray(wblk))
    packed.append(jnp.asarray(bblk))
    return tuple(packed)


def simple_conv_net_forward(x_nchw, packed, *, num_classes):
    n, cin, h, w = x_nchw.shape
    w1, w2, w3, w4, gamma, beta, wfc, bfc = packed
    npos = wfc.shape[0]
    ncp = wfc.shape[2] // PACK

    # Static per-block dims: (padded height, 8-aligned padded width, conv width).
    dims = []
    hh, ww = h, w
    for _ in range(NUM_BLOCKS):
        dims.append((hh + 4, _align8(ww + 4), ww + 2))
        hh, ww = (hh + 2) // 2, (ww + 2) // 2
    assert hh * ww == npos, "fc in_features must match the final feature map"

    # Pad batch to a multiple of PACK and lane-pack 4 images per group:
    # lane index = img_in_group * cin + channel.
    n4 = -(-n // PACK) * PACK
    if n4 != n:
        x_nchw = jnp.pad(x_nchw, ((0, n4 - n), (0, 0), (0, 0), (0, 0)))
    ngroups = n4 // PACK
    hp1, wp1, _ = dims[0]
    xh = jnp.transpose(x_nchw, (0, 2, 3, 1))
    xp = jnp.pad(xh, ((0, 0), (2, hp1 - h - 2), (2, wp1 - w - 2), (0, 0)))
    x0 = xp.reshape(ngroups, PACK, hp1, wp1, cin)
    x0 = jnp.transpose(x0, (0, 2, 3, 1, 4)).reshape(ngroups, hp1 * wp1, PACK * cin)

    # Gather / scatter 0/1 matrices: compile-time constants, shared by all groups.
    gathers = [jnp.asarray(_gather_matrix(*dims[k])) for k in range(NUM_BLOCKS)]
    scatters = []
    for k in range(NUM_BLOCKS - 1):
        hpk, _wpk, wok = dims[k]
        scatters.append(jnp.asarray(_scatter_matrix(
            (hpk - 2) // 2, wok // 2, dims[k + 1][0], dims[k + 1][1])))

    operands = [w1, w2, w3, w4, gamma, beta,
                gathers[0], scatters[0], gathers[1], scatters[1],
                gathers[2], scatters[2], gathers[3], wfc, bfc]

    def _full_spec(arr):
        nd = arr.ndim
        return pl.BlockSpec(arr.shape, lambda g, nd=nd: (0,) * nd)

    kern = functools.partial(_fused_forward_kernel, dims=tuple(dims))
    out = pl.pallas_call(
        kern,
        out_shape=jax.ShapeDtypeStruct((ngroups, 1, PACK * ncp), jnp.float32),
        grid=(ngroups,),
        in_specs=[pl.BlockSpec((1, hp1 * wp1, PACK * cin), lambda g: (g, 0, 0))]
                 + [_full_spec(a) for a in operands],
        out_specs=pl.BlockSpec((1, 1, PACK * ncp), lambda g: (g, 0, 0)),
        compiler_params=pltpu.CompilerParams(dimension_semantics=("parallel",)),
    )(x0, *operands)
    # Dropout(p=0) is an exact identity.  Unpack lane-packed, class-padded logits.
    return out[:, 0, :].reshape(n4, ncp)[:n, :num_classes]


def init_params(key, in_channels, num_classes):
    params = {"blocks": []}
    in_dim = in_channels
    for _ in range(NUM_BLOCKS):
        key, k1, k2 = jax.random.split(key, 3)
        bound = 1.0 / float(in_dim * 9) ** 0.5
        wgt = jax.random.uniform(k1, (OUT_CHANNELS, in_dim, 3, 3), jnp.float32,
                                 -bound, bound)
        bias = jax.random.uniform(k2, (OUT_CHANNELS,), jnp.float32, -bound, bound)
        params["blocks"].append((wgt, bias))   # bias is provably a no-op (GN)
        in_dim = OUT_CHANNELS
    # A single GroupNorm instance is shared by all 4 blocks in the PyTorch module.
    params["gn_w"] = jnp.ones((OUT_CHANNELS,), jnp.float32)
    params["gn_b"] = jnp.zeros((OUT_CHANNELS,), jnp.float32)
    num_features = OUT_CHANNELS * (1 + 2) * (1 + 2)   # 288
    key, k1, k2 = jax.random.split(key, 3)
    bound = 1.0 / float(num_features) ** 0.5
    # Rows in PyTorch (c, h, w) flatten order, i.e. fc_w == torch fc.weight.T.
    params["fc_w"] = jax.random.uniform(k1, (num_features, num_classes),
                                        jnp.float32, -bound, bound)
    params["fc_b"] = jax.random.uniform(k2, (num_classes,), jnp.float32,
                                        -bound, bound)
    return params


if __name__ == "__main__":
    key = jax.random.PRNGKey(0)
    kx, kp = jax.random.split(key)
    in_channels, num_classes = 3, 10
    # 18x18 spatial: conv(+2)/pool(//2) four times -> 3x3, matching fc
    # in_features = 288.  Batch 8 -> grid of 2 lane-packed groups (even, so
    # both v7x TensorCores get work).
    x = jax.random.normal(kx, (8, in_channels, 18, 18), jnp.float32)
    params = init_params(kp, in_channels, num_classes)
    packed = pack_params(params)                      # one-time layout repack
    fwd = jax.jit(functools.partial(simple_conv_net_forward,
                                    num_classes=num_classes))
    out = jax.block_until_ready(fwd(x, packed))
    assert out.shape == (8, num_classes)
    assert bool(jnp.all(jnp.isfinite(out)))
    print("KERNEL_OK")
</pallas_src>

<mosaic_0001>
module attributes {stable_mosaic.version = 11 : i64} {
  func.func @_fused_forward_kernel(%arg0: i32, %arg1: memref<1x528x12xf32, #tpu.memory_space<vmem>>, %arg2: memref<9x12x128xf32, #tpu.memory_space<vmem>>, %arg3: memref<9x128x128xf32, #tpu.memory_space<vmem>>, %arg4: memref<9x128x128xf32, #tpu.memory_space<vmem>>, %arg5: memref<9x128x128xf32, #tpu.memory_space<vmem>>, %arg6: memref<1x128xf32, #tpu.memory_space<vmem>>, %arg7: memref<1x128xf32, #tpu.memory_space<vmem>>, %arg8: memref<100x451xf32, #tpu.memory_space<vmem>>, %arg9: memref<224x100xf32, #tpu.memory_space<vmem>>, %arg10: memref<36x171xf32, #tpu.memory_space<vmem>>, %arg11: memref<160x36xf32, #tpu.memory_space<vmem>>, %arg12: memref<16x103xf32, #tpu.memory_space<vmem>>, %arg13: memref<64x16xf32, #tpu.memory_space<vmem>>, %arg14: memref<9x37xf32, #tpu.memory_space<vmem>>, %arg15: memref<9x128x128xf32, #tpu.memory_space<vmem>>, %arg16: memref<1x128xf32, #tpu.memory_space<vmem>>, %arg17: memref<1x1x128xf32, #tpu.memory_space<vmem>>) attributes {dimension_semantics = [#tpu.dimension_semantics<parallel>], iteration_bounds = array<i64: 2>, scalar_prefetch = 0 : i64, scratch_operands = 0 : i64, tpu.core_type = #tpu.core_type<tc>, window_params = [{transform_indices = @transform_0, window_bounds = array<i64: 1, 528, 12>}, {pipeline_mode = #tpu.pipeline_mode<synchronous>, transform_indices = @transform_1, window_bounds = array<i64: 9, 12, 128>}, {pipeline_mode = #tpu.pipeline_mode<synchronous>, transform_indices = @transform_2, window_bounds = array<i64: 9, 128, 128>}, {pipeline_mode = #tpu.pipeline_mode<synchronous>, transform_indices = @transform_3, window_bounds = array<i64: 9, 128, 128>}, {pipeline_mode = #tpu.pipeline_mode<synchronous>, transform_indices = @transform_4, window_bounds = array<i64: 9, 128, 128>}, {pipeline_mode = #tpu.pipeline_mode<synchronous>, transform_indices = @transform_5, window_bounds = array<i64: 1, 128>}, {pipeline_mode = #tpu.pipeline_mode<synchronous>, transform_indices = @transform_6, window_bounds = array<i64: 1, 128>}, {pipeline_mode = #tpu.pipeline_mode<synchronous>, transform_indices = @transform_7, window_bounds = array<i64: 100, 451>}, {pipeline_mode = #tpu.pipeline_mode<synchronous>, transform_indices = @transform_8, window_bounds = array<i64: 224, 100>}, {pipeline_mode = #tpu.pipeline_mode<synchronous>, transform_indices = @transform_9, window_bounds = array<i64: 36, 171>}, {pipeline_mode = #tpu.pipeline_mode<synchronous>, transform_indices = @transform_10, window_bounds = array<i64: 160, 36>}, {pipeline_mode = #tpu.pipeline_mode<synchronous>, transform_indices = @transform_11, window_bounds = array<i64: 16, 103>}, {pipeline_mode = #tpu.pipeline_mode<synchronous>, transform_indices = @transform_12, window_bounds = array<i64: 64, 16>}, {pipeline_mode = #tpu.pipeline_mode<synchronous>, transform_indices = @transform_13, window_bounds = array<i64: 9, 37>}, {pipeline_mode = #tpu.pipeline_mode<synchronous>, transform_indices = @transform_14, window_bounds = array<i64: 9, 128, 128>}, {pipeline_mode = #tpu.pipeline_mode<synchronous>, transform_indices = @transform_15, window_bounds = array<i64: 1, 128>}, {transform_indices = @transform_16, window_bounds = array<i64: 1, 1, 128>}]} {
    %c0 = arith.constant 0 : index
    %c0_0 = arith.constant 0 : index
    %0 = vector.load %arg6[%c0, %c0_0] : memref<1x128xf32, #tpu.memory_space<vmem>>, vector<1x128xf32>
    %c0_1 = arith.constant 0 : index
    %c0_2 = arith.constant 0 : index
    %1 = vector.load %arg7[%c0_1, %c0_2] : memref<1x128xf32, #tpu.memory_space<vmem>>, vector<1x128xf32>
    %c0_3 = arith.constant 0 : index
    %c0_4 = arith.constant 0 : index
    %c0_5 = arith.constant 0 : index
    %2 = vector.load %arg1[%c0_3, %c0_4, %c0_5] : memref<1x528x12xf32, #tpu.memory_space<vmem>>, vector<1x528x12xf32>
    %3 = vector.shape_cast %2 : vector<1x528x12xf32> to vector<528x12xf32>
    %4 = vector.extract_strided_slice %3 {offsets = [0, 0], sizes = [476, 12], strides = [1, 1]} : vector<528x12xf32> to vector<476x12xf32>
    %c0_6 = arith.constant 0 : index
    %c0_7 = arith.constant 0 : index
    %c0_8 = arith.constant 0 : index
    %5 = vector.load %arg2[%c0_6, %c0_7, %c0_8] : memref<9x12x128xf32, #tpu.memory_space<vmem>>, vector<1x12x128xf32>
    %6 = vector.shape_cast %5 : vector<1x12x128xf32> to vector<12x128xf32>
    %cst = arith.constant dense<0.000000e+00> : vector<476x128xf32>
    %7 = tpu.matmul %4, %6, %cst {dimension_numbers = #tpu.dot_dimension_numbers<[1], [0], [0], [1], [0, 0, 1, 1], [], []>} : vector<476x12xf32>, vector<12x128xf32>, vector<476x128xf32> -> vector<476x128xf32>
    %8 = vector.extract_strided_slice %3 {offsets = [1, 0], sizes = [476, 12], strides = [1, 1]} : vector<528x12xf32> to vector<476x12xf32>
    %c1 = arith.constant 1 : index
    %c0_9 = arith.constant 0 : index
    %c0_10 = arith.constant 0 : index
    %9 = vector.load %arg2[%c1, %c0_9, %c0_10] : memref<9x12x128xf32, #tpu.memory_space<vmem>>, vector<1x12x128xf32>
    %10 = vector.shape_cast %9 : vector<1x12x128xf32> to vector<12x128xf32>
    %cst_11 = arith.constant dense<0.000000e+00> : vector<476x128xf32>
    %11 = tpu.matmul %8, %10, %cst_11 {dimension_numbers = #tpu.dot_dimension_numbers<[1], [0], [0], [1], [0, 0, 1, 1], [], []>} : vector<476x12xf32>, vector<12x128xf32>, vector<476x128xf32> -> vector<476x128xf32>
    %12 = arith.addf %7, %11 : vector<476x128xf32>
    %13 = vector.extract_strided_slice %3 {offsets = [2, 0], sizes = [476, 12], strides = [1, 1]} : vector<528x12xf32> to vector<476x12xf32>
    %c2 = arith.constant 2 : index
    %c0_12 = arith.constant 0 : index
    %c0_13 = arith.constant 0 : index
    %14 = vector.load %arg2[%c2, %c0_12, %c0_13] : memref<9x12x128xf32, #tpu.memory_space<vmem>>, vector<1x12x128xf32>
    %15 = vector.shape_cast %14 : vector<1x12x128xf32> to vector<12x128xf32>
    %cst_14 = arith.constant dense<0.000000e+00> : vector<476x128xf32>
    %16 = tpu.matmul %13, %15, %cst_14 {dimension_numbers = #tpu.dot_dimension_numbers<[1], [0], [0], [1], [0, 0, 1, 1], [], []>} : vector<476x12xf32>, vector<12x128xf32>, vector<476x128xf32> -> vector<476x128xf32>
    %17 = arith.addf %12, %16 : vector<476x128xf32>
    %18 = vector.extract_strided_slice %3 {offsets = [24, 0], sizes = [476, 12], strides = [1, 1]} : vector<528x12xf32> to vector<476x12xf32>
    %c3 = arith.constant 3 : index
    %c0_15 = arith.constant 0 : index
    %c0_16 = arith.constant 0 : index
    %19 = vector.load %arg2[%c3, %c0_15, %c0_16] : memref<9x12x128xf32, #tpu.memory_space<vmem>>, vector<1x12x128xf32>
    %20 = vector.shape_cast %19 : vector<1x12x128xf32> to vector<12x128xf32>
    %cst_17 = arith.constant dense<0.000000e+00> : vector<476x128xf32>
    %21 = tpu.matmul %18, %20, %cst_17 {dimension_numbers = #tpu.dot_dimension_numbers<[1], [0], [0], [1], [0, 0, 1, 1], [], []>} : vector<476x12xf32>, vector<12x128xf32>, vector<476x128xf32> -> vector<476x128xf32>
    %22 = arith.addf %17, %21 : vector<476x128xf32>
    %23 = vector.extract_strided_slice %3 {offsets = [25, 0], sizes = [476, 12], strides = [1, 1]} : vector<528x12xf32> to vector<476x12xf32>
    %c4 = arith.constant 4 : index
    %c0_18 = arith.constant 0 : index
    %c0_19 = arith.constant 0 : index
    %24 = vector.load %arg2[%c4, %c0_18, %c0_19] : memref<9x12x128xf32, #tpu.memory_space<vmem>>, vector<1x12x128xf32>
    %25 = vector.shape_cast %24 : vector<1x12x128xf32> to vector<12x128xf32>
    %cst_20 = arith.constant dense<0.000000e+00> : vector<476x128xf32>
    %26 = tpu.matmul %23, %25, %cst_20 {dimension_numbers = #tpu.dot_dimension_numbers<[1], [0], [0], [1], [0, 0, 1, 1], [], []>} : vector<476x12xf32>, vector<12x128xf32>, vector<476x128xf32> -> vector<476x128xf32>
    %27 = arith.addf %22, %26 : vector<476x128xf32>
    %28 = vector.extract_strided_slice %3 {offsets = [26, 0], sizes = [476, 12], strides = [1, 1]} : vector<528x12xf32> to vector<476x12xf32>
    %c5 = arith.constant 5 : index
    %c0_21 = arith.constant 0 : index
    %c0_22 = arith.constant 0 : index
    %29 = vector.load %arg2[%c5, %c0_21, %c0_22] : memref<9x12x128xf32, #tpu.memory_space<vmem>>, vector<1x12x128xf32>
    %30 = vector.shape_cast %29 : vector<1x12x128xf32> to vector<12x128xf32>
    %cst_23 = arith.constant dense<0.000000e+00> : vector<476x128xf32>
    %31 = tpu.matmul %28, %30, %cst_23 {dimension_numbers = #tpu.dot_dimension_numbers<[1], [0], [0], [1], [0, 0, 1, 1], [], []>} : vector<476x12xf32>, vector<12x128xf32>, vector<476x128xf32> -> vector<476x128xf32>
    %32 = arith.addf %27, %31 : vector<476x128xf32>
    %33 = vector.extract_strided_slice %3 {offsets = [48, 0], sizes = [476, 12], strides = [1, 1]} : vector<528x12xf32> to vector<476x12xf32>
    %c6 = arith.constant 6 : index
    %c0_24 = arith.constant 0 : index
    %c0_25 = arith.constant 0 : index
    %34 = vector.load %arg2[%c6, %c0_24, %c0_25] : memref<9x12x128xf32, #tpu.memory_space<vmem>>, vector<1x12x128xf32>
    %35 = vector.shape_cast %34 : vector<1x12x128xf32> to vector<12x128xf32>
    %cst_26 = arith.constant dense<0.000000e+00> : vector<476x128xf32>
    %36 = tpu.matmul %33, %35, %cst_26 {dimension_numbers = #tpu.dot_dimension_numbers<[1], [0], [0], [1], [0, 0, 1, 1], [], []>} : vector<476x12xf32>, vector<12x128xf32>, vector<476x128xf32> -> vector<476x128xf32>
    %37 = arith.addf %32, %36 : vector<476x128xf32>
    %38 = vector.extract_strided_slice %3 {offsets = [49, 0], sizes = [476, 12], strides = [1, 1]} : vector<528x12xf32> to vector<476x12xf32>
    %c7 = arith.constant 7 : index
    %c0_27 = arith.constant 0 : index
    %c0_28 = arith.constant 0 : index
    %39 = vector.load %arg2[%c7, %c0_27, %c0_28] : memref<9x12x128xf32, #tpu.memory_space<vmem>>, vector<1x12x128xf32>
    %40 = vector.shape_cast %39 : vector<1x12x128xf32> to vector<12x128xf32>
    %cst_29 = arith.constant dense<0.000000e+00> : vector<476x128xf32>
    %41 = tpu.matmul %38, %40, %cst_29 {dimension_numbers = #tpu.dot_dimension_numbers<[1], [0], [0], [1], [0, 0, 1, 1], [], []>} : vector<476x12xf32>, vector<12x128xf32>, vector<476x128xf32> -> vector<476x128xf32>
    %42 = arith.addf %37, %41 : vector<476x128xf32>
    %43 = vector.extract_strided_slice %3 {offsets = [50, 0], sizes = [476, 12], strides = [1, 1]} : vector<528x12xf32> to vector<476x12xf32>
    %c8 = arith.constant 8 : index
    %c0_30 = arith.constant 0 : index
    %c0_31 = arith.constant 0 : index
    %44 = vector.load %arg2[%c8, %c0_30, %c0_31] : memref<9x12x128xf32, #tpu.memory_space<vmem>>, vector<1x12x128xf32>
    %45 = vector.shape_cast %44 : vector<1x12x128xf32> to vector<12x128xf32>
    %cst_32 = arith.constant dense<0.000000e+00> : vector<476x128xf32>
    %46 = tpu.matmul %43, %45, %cst_32 {dimension_numbers = #tpu.dot_dimension_numbers<[1], [0], [0], [1], [0, 0, 1, 1], [], []>} : vector<476x12xf32>, vector<12x128xf32>, vector<476x128xf32> -> vector<476x128xf32>
    %47 = arith.addf %42, %46 : vector<476x128xf32>
    %cst_33 = arith.constant dense<0.000000e+00> : vector<128xf32>
    %48 = vector.multi_reduction <add>, %47, %cst_33 [0] : vector<476x128xf32> to vector<128xf32>
    %49 = vector.shape_cast %48 : vector<128xf32> to vector<1x128xf32>
    %cst_34 = arith.constant 2.500000e-03 : f32
    %50 = vector.broadcast %cst_34 : f32 to vector<1x128xf32>
    %51 = arith.mulf %49, %50 : vector<1x128xf32>
    %52 = arith.mulf %47, %47 : vector<476x128xf32>
    %cst_35 = arith.constant dense<0.000000e+00> : vector<128xf32>
    %53 = vector.multi_reduction <add>, %52, %cst_35 [0] : vector<476x128xf32> to vector<128xf32>
    %54 = vector.shape_cast %53 : vector<128xf32> to vector<1x128xf32>
    %cst_36 = arith.constant 2.500000e-03 : f32
    %55 = vector.broadcast %cst_36 : f32 to vector<1x128xf32>
    %56 = arith.mulf %54, %55 : vector<1x128xf32>
    %57 = arith.mulf %51, %51 : vector<1x128xf32>
    %58 = arith.subf %56, %57 : vector<1x128xf32>
    %cst_37 = arith.constant 0.000000e+00 : f32
    %59 = vector.broadcast %cst_37 : f32 to vector<1x128xf32>
    %60 = arith.maximumf %58, %59 : vector<1x128xf32>
    %cst_38 = arith.constant 9.99999974E-6 : f32
    %61 = vector.broadcast %cst_38 : f32 to vector<1x128xf32>
    %62 = arith.addf %60, %61 : vector<1x128xf32>
    %63 = math.rsqrt %62 : vector<1x128xf32>
    %64 = arith.mulf %0, %63 : vector<1x128xf32>
    %65 = arith.mulf %51, %64 : vector<1x128xf32>
    %66 = arith.subf %1, %65 : vector<1x128xf32>
    %67 = vector.broadcast %64 : vector<1x128xf32> to vector<476x128xf32>
    %68 = arith.mulf %47, %67 : vector<476x128xf32>
    %69 = vector.broadcast %66 : vector<1x128xf32> to vector<476x128xf32>
    %70 = arith.addf %68, %69 : vector<476x128xf32>
    %cst_39 = arith.constant 0.000000e+00 : f32
    %71 = vector.broadcast %cst_39 : f32 to vector<476x128xf32>
    %72 = arith.maximumf %70, %71 : vector<476x128xf32>
    %73 = vector.extract_strided_slice %72 {offsets = [0, 0], sizes = [475, 128], strides = [1, 1]} : vector<476x128xf32> to vector<475x128xf32>
    %74 = vector.extract_strided_slice %72 {offsets = [1, 0], sizes = [475, 128], strides = [1, 1]} : vector<476x128xf32> to vector<475x128xf32>
    %75 = arith.maximumf %73, %74 : vector<475x128xf32>
    %76 = vector.extract_strided_slice %75 {offsets = [0, 0], sizes = [451, 128], strides = [1, 1]} : vector<475x128xf32> to vector<451x128xf32>
    %77 = vector.extract_strided_slice %75 {offsets = [24, 0], sizes = [451, 128], strides = [1, 1]} : vector<475x128xf32> to vector<451x128xf32>
    %78 = arith.maximumf %76, %77 : vector<451x128xf32>
    %c0_40 = arith.constant 0 : index
    %c0_41 = arith.constant 0 : index
    %79 = vector.load %arg8[%c0_40, %c0_41] : memref<100x451xf32, #tpu.memory_space<vmem>>, vector<100x451xf32>
    %cst_42 = arith.constant dense<0.000000e+00> : vector<100x128xf32>
    %80 = tpu.matmul %79, %78, %cst_42 {dimension_numbers = #tpu.dot_dimension_numbers<[1], [0], [0], [1], [0, 0, 1, 1], [], []>} : vector<100x451xf32>, vector<451x128xf32>, vector<100x128xf32> -> vector<100x128xf32>
    %c0_43 = arith.constant 0 : index
    %c0_44 = arith.constant 0 : index
    %81 = vector.load %arg9[%c0_43, %c0_44] : memref<224x100xf32, #tpu.memory_space<vmem>>, vector<224x100xf32>
    %cst_45 = arith.constant dense<0.000000e+00> : vector<224x128xf32>
    %82 = tpu.matmul %81, %80, %cst_45 {dimension_numbers = #tpu.dot_dimension_numbers<[1], [0], [0], [1], [0, 0, 1, 1], [], []>} : vector<224x100xf32>, vector<100x128xf32>, vector<224x128xf32> -> vector<224x128xf32>
    %83 = vector.extract_strided_slice %82 {offsets = [0, 0], sizes = [188, 128], strides = [1, 1]} : vector<224x128xf32> to vector<188x128xf32>
    %c0_46 = arith.constant 0 : index
    %c0_47 = arith.constant 0 : index
    %c0_48 = arith.constant 0 : index
    %84 = vector.load %arg3[%c0_46, %c0_47, %c0_48] : memref<9x128x128xf32, #tpu.memory_space<vmem>>, vector<1x128x128xf32>
    %85 = vector.shape_cast %84 : vector<1x128x128xf32> to vector<128x128xf32>
    %cst_49 = arith.constant dense<0.000000e+00> : vector<188x128xf32>
    %86 = tpu.matmul %83, %85, %cst_49 {dimension_numbers = #tpu.dot_dimension_numbers<[1], [0], [0], [1], [0, 0, 1, 1], [], []>} : vector<188x128xf32>, vector<128x128xf32>, vector<188x128xf32> -> vector<188x128xf32>
    %87 = vector.extract_strided_slice %82 {offsets = [1, 0], sizes = [188, 128], strides = [1, 1]} : vector<224x128xf32> to vector<188x128xf32>
    %c1_50 = arith.constant 1 : index
    %c0_51 = arith.constant 0 : index
    %c0_52 = arith.constant 0 : index
    %88 = vector.load %arg3[%c1_50, %c0_51, %c0_52] : memref<9x128x128xf32, #tpu.memory_space<vmem>>, vector<1x128x128xf32>
    %89 = vector.shape_cast %88 : vector<1x128x128xf32> to vector<128x128xf32>
    %cst_53 = arith.constant dense<0.000000e+00> : vector<188x128xf32>
    %90 = tpu.matmul %87, %89, %cst_53 {dimension_numbers = #tpu.dot_dimension_numbers<[1], [0], [0], [1], [0, 0, 1, 1], [], []>} : vector<188x128xf32>, vector<128x128xf32>, vector<188x128xf32> -> vector<188x128xf32>
    %91 = arith.addf %86, %90 : vector<188x128xf32>
    %92 = vector.extract_strided_slice %82 {offsets = [2, 0], sizes = [188, 128], strides = [1, 1]} : vector<224x128xf32> to vector<188x128xf32>
    %c2_54 = arith.constant 2 : index
    %c0_55 = arith.constant 0 : index
    %c0_56 = arith.constant 0 : index
    %93 = vector.load %arg3[%c2_54, %c0_55, %c0_56] : memref<9x128x128xf32, #tpu.memory_space<vmem>>, vector<1x128x128xf32>
    %94 = vector.shape_cast %93 : vector<1x128x128xf32> to vector<128x128xf32>
    %cst_57 = arith.constant dense<0.000000e+00> : vector<188x128xf32>
    %95 = tpu.matmul %92, %94, %cst_57 {dimension_numbers = #tpu.dot_dimension_numbers<[1], [0], [0], [1], [0, 0, 1, 1], [], []>} : vector<188x128xf32>, vector<128x128xf32>, vector<188x128xf32> -> vector<188x128xf32>
    %96 = arith.addf %91, %95 : vector<188x128xf32>
    %97 = vector.extract_strided_slice %82 {offsets = [16, 0], sizes = [188, 128], strides = [1, 1]} : vector<224x128xf32> to vector<188x128xf32>
    %c3_58 = arith.constant 3 : index
    %c0_59 = arith.constant 0 : index
    %c0_60 = arith.constant 0 : index
    %98 = vector.load %arg3[%c3_58, %c0_59, %c0_60] : memref<9x128x128xf32, #tpu.memory_space<vmem>>, vector<1x128x128xf32>
    %99 = vector.shape_cast %98 : vector<1x128x128xf32> to vector<128x128xf32>
    %cst_61 = arith.constant dense<0.000000e+00> : vector<188x128xf32>
    %100 = tpu.matmul %97, %99, %cst_61 {dimension_numbers = #tpu.dot_dimension_numbers<[1], [0], [0], [1], [0, 0, 1, 1], [], []>} : vector<188x128xf32>, vector<128x128xf32>, vector<188x128xf32> -> vector<188x128xf32>
    %101 = arith.addf %96, %100 : vector<188x128xf32>
    %102 = vector.extract_strided_slice %82 {offsets = [17, 0], sizes = [188, 128], strides = [1, 1]} : vector<224x128xf32> to vector<188x128xf32>
    %c4_62 = arith.constant 4 : index
    %c0_63 = arith.constant 0 : index
    %c0_64 = arith.constant 0 : index
    %103 = vector.load %arg3[%c4_62, %c0_63, %c0_64] : memref<9x128x128xf32, #tpu.memory_space<vmem>>, vector<1x128x128xf32>
    %104 = vector.shape_cast %103 : vector<1x128x128xf32> to vector<128x128xf32>
    %cst_65 = arith.constant dense<0.000000e+00> : vector<188x128xf32>
    %105 = tpu.matmul %102, %104, %cst_65 {dimension_numbers = #tpu.dot_dimension_numbers<[1], [0], [0], [1], [0, 0, 1, 1], [], []>} : vector<188x128xf32>, vector<128x128xf32>, vector<188x128xf32> -> vector<188x128xf32>
    %106 = arith.addf %101, %105 : vector<188x128xf32>
    %107 = vector.extract_strided_slice %82 {offsets = [18, 0], sizes = [188, 128], strides = [1, 1]} : vector<224x128xf32> to vector<188x128xf32>
    %c5_66 = arith.constant 5 : index
    %c0_67 = arith.constant 0 : index
    %c0_68 = arith.constant 0 : index
    %108 = vector.load %arg3[%c5_66, %c0_67, %c0_68] : memref<9x128x128xf32, #tpu.memory_space<vmem>>, vector<1x128x128xf32>
    %109 = vector.shape_cast %108 : vector<1x128x128xf32> to vector<128x128xf32>
    %cst_69 = arith.constant dense<0.000000e+00> : vector<188x128xf32>
    %110 = tpu.matmul %107, %109, %cst_69 {dimension_numbers = #tpu.dot_dimension_numbers<[1], [0], [0], [1], [0, 0, 1, 1], [], []>} : vector<188x128xf32>, vector<128x128xf32>, vector<188x128xf32> -> vector<188x128xf32>
    %111 = arith.addf %106, %110 : vector<188x128xf32>
    %112 = vector.extract_strided_slice %82 {offsets = [32, 0], sizes = [188, 128], strides = [1, 1]} : vector<224x128xf32> to vector<188x128xf32>
    %c6_70 = arith.constant 6 : index
    %c0_71 = arith.constant 0 : index
    %c0_72 = arith.constant 0 : index
    %113 = vector.load %arg3[%c6_70, %c0_71, %c0_72] : memref<9x128x128xf32, #tpu.memory_space<vmem>>, vector<1x128x128xf32>
    %114 = vector.shape_cast %113 : vector<1x128x128xf32> to vector<128x128xf32>
    %cst_73 = arith.constant dense<0.000000e+00> : vector<188x128xf32>
    %115 = tpu.matmul %112, %114, %cst_73 {dimension_numbers = #tpu.dot_dimension_numbers<[1], [0], [0], [1], [0, 0, 1, 1], [], []>} : vector<188x128xf32>, vector<128x128xf32>, vector<188x128xf32> -> vector<188x128xf32>
    %116 = arith.addf %111, %115 : vector<188x128xf32>
    %117 = vector.extract_strided_slice %82 {offsets = [33, 0], sizes = [188, 128], strides = [1, 1]} : vector<224x128xf32> to vector<188x128xf32>
    %c7_74 = arith.constant 7 : index
    %c0_75 = arith.constant 0 : index
    %c0_76 = arith.constant 0 : index
    %118 = vector.load %arg3[%c7_74, %c0_75, %c0_76] : memref<9x128x128xf32, #tpu.memory_space<vmem>>, vector<1x128x128xf32>
    %119 = vector.shape_cast %118 : vector<1x128x128xf32> to vector<128x128xf32>
    %cst_77 = arith.constant dense<0.000000e+00> : vector<188x128xf32>
    %120 = tpu.matmul %117, %119, %cst_77 {dimension_numbers = #tpu.dot_dimension_numbers<[1], [0], [0], [1], [0, 0, 1, 1], [], []>} : vector<188x128xf32>, vector<128x128xf32>, vector<188x128xf32> -> vector<188x128xf32>
    %121 = arith.addf %116, %120 : vector<188x128xf32>
    %122 = vector.extract_strided_slice %82 {offsets = [34, 0], sizes = [188, 128], strides = [1, 1]} : vector<224x128xf32> to vector<188x128xf32>
    %c8_78 = arith.constant 8 : index
    %c0_79 = arith.constant 0 : index
    %c0_80 = arith.constant 0 : index
    %123 = vector.load %arg3[%c8_78, %c0_79, %c0_80] : memref<9x128x128xf32, #tpu.memory_space<vmem>>, vector<1x128x128xf32>
    %124 = vector.shape_cast %123 : vector<1x128x128xf32> to vector<128x128xf32>
    %cst_81 = arith.constant dense<0.000000e+00> : vector<188x128xf32>
    %125 = tpu.matmul %122, %124, %cst_81 {dimension_numbers = #tpu.dot_dimension_numbers<[1], [0], [0], [1], [0, 0, 1, 1], [], []>} : vector<188x128xf32>, vector<128x128xf32>, vector<188x128xf32> -> vector<188x128xf32>
    %126 = arith.addf %121, %125 : vector<188x128xf32>
    %cst_82 = arith.constant dense<0.000000e+00> : vector<128xf32>
    %127 = vector.multi_reduction <add>, %126, %cst_82 [0] : vector<188x128xf32> to vector<128xf32>
    %128 = vector.shape_cast %127 : vector<128xf32> to vector<1x128xf32>
    %cst_83 = arith.constant 0.0069444445 : f32
    %129 = vector.broadcast %cst_83 : f32 to vector<1x128xf32>
    %130 = arith.mulf %128, %129 : vector<1x128xf32>
    %131 = arith.mulf %126, %126 : vector<188x128xf32>
    %cst_84 = arith.constant dense<0.000000e+00> : vector<128xf32>
    %132 = vector.multi_reduction <add>, %131, %cst_84 [0] : vector<188x128xf32> to vector<128xf32>
    %133 = vector.shape_cast %132 : vector<128xf32> to vector<1x128xf32>
    %cst_85 = arith.constant 0.0069444445 : f32
    %134 = vector.broadcast %cst_85 : f32 to vector<1x128xf32>
    %135 = arith.mulf %133, %134 : vector<1x128xf32>
    %136 = arith.mulf %130, %130 : vector<1x128xf32>
    %137 = arith.subf %135, %136 : vector<1x128xf32>
    %cst_86 = arith.constant 0.000000e+00 : f32
    %138 = vector.broadcast %cst_86 : f32 to vector<1x128xf32>
    %139 = arith.maximumf %137, %138 : vector<1x128xf32>
    %cst_87 = arith.constant 9.99999974E-6 : f32
    %140 = vector.broadcast %cst_87 : f32 to vector<1x128xf32>
    %141 = arith.addf %139, %140 : vector<1x128xf32>
    %142 = math.rsqrt %141 : vector<1x128xf32>
    %143 = arith.mulf %0, %142 : vector<1x128xf32>
    %144 = arith.mulf %130, %143 : vector<1x128xf32>
    %145 = arith.subf %1, %144 : vector<1x128xf32>
    %146 = vector.broadcast %143 : vector<1x128xf32> to vector<188x128xf32>
    %147 = arith.mulf %126, %146 : vector<188x128xf32>
    %148 = vector.broadcast %145 : vector<1x128xf32> to vector<188x128xf32>
    %149 = arith.addf %147, %148 : vector<188x128xf32>
    %cst_88 = arith.constant 0.000000e+00 : f32
    %150 = vector.broadcast %cst_88 : f32 to vector<188x128xf32>
    %151 = arith.maximumf %149, %150 : vector<188x128xf32>
    %152 = vector.extract_strided_slice %151 {offsets = [0, 0], sizes = [187, 128], strides = [1, 1]} : vector<188x128xf32> to vector<187x128xf32>
    %153 = vector.extract_strided_slice %151 {offsets = [1, 0], sizes = [187, 128], strides = [1, 1]} : vector<188x128xf32> to vector<187x128xf32>
    %154 = arith.maximumf %152, %153 : vector<187x128xf32>
    %155 = vector.extract_strided_slice %154 {offsets = [0, 0], sizes = [171, 128], strides = [1, 1]} : vector<187x128xf32> to vector<171x128xf32>
    %156 = vector.extract_strided_slice %154 {offsets = [16, 0], sizes = [171, 128], strides = [1, 1]} : vector<187x128xf32> to vector<171x128xf32>
    %157 = arith.maximumf %155, %156 : vector<171x128xf32>
    %c0_89 = arith.constant 0 : index
    %c0_90 = arith.constant 0 : index
    %158 = vector.load %arg10[%c0_89, %c0_90] : memref<36x171xf32, #tpu.memory_space<vmem>>, vector<36x171xf32>
    %cst_91 = arith.constant dense<0.000000e+00> : vector<36x128xf32>
    %159 = tpu.matmul %158, %157, %cst_91 {dimension_numbers = #tpu.dot_dimension_numbers<[1], [0], [0], [1], [0, 0, 1, 1], [], []>} : vector<36x171xf32>, vector<171x128xf32>, vector<36x128xf32> -> vector<36x128xf32>
    %c0_92 = arith.constant 0 : index
    %c0_93 = arith.constant 0 : index
    %160 = vector.load %arg11[%c0_92, %c0_93] : memref<160x36xf32, #tpu.memory_space<vmem>>, vector<160x36xf32>
    %cst_94 = arith.constant dense<0.000000e+00> : vector<160x128xf32>
    %161 = tpu.matmul %160, %159, %cst_94 {dimension_numbers = #tpu.dot_dimension_numbers<[1], [0], [0], [1], [0, 0, 1, 1], [], []>} : vector<160x36xf32>, vector<36x128xf32>, vector<160x128xf32> -> vector<160x128xf32>
    %162 = vector.extract_strided_slice %161 {offsets = [0, 0], sizes = [120, 128], strides = [1, 1]} : vector<160x128xf32> to vector<120x128xf32>
    %c0_95 = arith.constant 0 : index
    %c0_96 = arith.constant 0 : index
    %c0_97 = arith.constant 0 : index
    %163 = vector.load %arg4[%c0_95, %c0_96, %c0_97] : memref<9x128x128xf32, #tpu.memory_space<vmem>>, vector<1x128x128xf32>
    %164 = vector.shape_cast %163 : vector<1x128x128xf32> to vector<128x128xf32>
    %cst_98 = arith.constant dense<0.000000e+00> : vector<120x128xf32>
    %165 = tpu.matmul %162, %164, %cst_98 {dimension_numbers = #tpu.dot_dimension_numbers<[1], [0], [0], [1], [0, 0, 1, 1], [], []>} : vector<120x128xf32>, vector<128x128xf32>, vector<120x128xf32> -> vector<120x128xf32>
    %166 = vector.extract_strided_slice %161 {offsets = [1, 0], sizes = [120, 128], strides = [1, 1]} : vector<160x128xf32> to vector<120x128xf32>
    %c1_99 = arith.constant 1 : index
    %c0_100 = arith.constant 0 : index
    %c0_101 = arith.constant 0 : index
    %167 = vector.load %arg4[%c1_99, %c0_100, %c0_101] : memref<9x128x128xf32, #tpu.memory_space<vmem>>, vector<1x128x128xf32>
    %168 = vector.shape_cast %167 : vector<1x128x128xf32> to vector<128x128xf32>
    %cst_102 = arith.constant dense<0.000000e+00> : vector<120x128xf32>
    %169 = tpu.matmul %166, %168, %cst_102 {dimension_numbers = #tpu.dot_dimension_numbers<[1], [0], [0], [1], [0, 0, 1, 1], [], []>} : vector<120x128xf32>, vector<128x128xf32>, vector<120x128xf32> -> vector<120x128xf32>
    %170 = arith.addf %165, %169 : vector<120x128xf32>
    %171 = vector.extract_strided_slice %161 {offsets = [2, 0], sizes = [120, 128], strides = [1, 1]} : vector<160x128xf32> to vector<120x128xf32>
    %c2_103 = arith.constant 2 : index
    %c0_104 = arith.constant 0 : index
    %c0_105 = arith.constant 0 : index
    %172 = vector.load %arg4[%c2_103, %c0_104, %c0_105] : memref<9x128x128xf32, #tpu.memory_space<vmem>>, vector<1x128x128xf32>
    %173 = vector.shape_cast %172 : vector<1x128x128xf32> to vector<128x128xf32>
    %cst_106 = arith.constant dense<0.000000e+00> : vector<120x128xf32>
    %174 = tpu.matmul %171, %173, %cst_106 {dimension_numbers = #tpu.dot_dimension_numbers<[1], [0], [0], [1], [0, 0, 1, 1], [], []>} : vector<120x128xf32>, vector<128x128xf32>, vector<120x128xf32> -> vector<120x128xf32>
    %175 = arith.addf %170, %174 : vector<120x128xf32>
    %176 = vector.extract_strided_slice %161 {offsets = [16, 0], sizes = [120, 128], strides = [1, 1]} : vector<160x128xf32> to vector<120x128xf32>
    %c3_107 = arith.constant 3 : index
    %c0_108 = arith.constant 0 : index
    %c0_109 = arith.constant 0 : index
    %177 = vector.load %arg4[%c3_107, %c0_108, %c0_109] : memref<9x128x128xf32, #tpu.memory_space<vmem>>, vector<1x128x128xf32>
    %178 = vector.shape_cast %177 : vector<1x128x128xf32> to vector<128x128xf32>
    %cst_110 = arith.constant dense<0.000000e+00> : vector<120x128xf32>
    %179 = tpu.matmul %176, %178, %cst_110 {dimension_numbers = #tpu.dot_dimension_numbers<[1], [0], [0], [1], [0, 0, 1, 1], [], []>} : vector<120x128xf32>, vector<128x128xf32>, vector<120x128xf32> -> vector<120x128xf32>
    %180 = arith.addf %175, %179 : vector<120x128xf32>
    %181 = vector.extract_strided_slice %161 {offsets = [17, 0], sizes = [120, 128], strides = [1, 1]} : vector<160x128xf32> to vector<120x128xf32>
    %c4_111 = arith.constant 4 : index
    %c0_112 = arith.constant 0 : index
    %c0_113 = arith.constant 0 : index
    %182 = vector.load %arg4[%c4_111, %c0_112, %c0_113] : memref<9x128x128xf32, #tpu.memory_space<vmem>>, vector<1x128x128xf32>
    %183 = vector.shape_cast %182 : vector<1x128x128xf32> to vector<128x128xf32>
    %cst_114 = arith.constant dense<0.000000e+00> : vector<120x128xf32>
    %184 = tpu.matmul %181, %183, %cst_114 {dimension_numbers = #tpu.dot_dimension_numbers<[1], [0], [0], [1], [0, 0, 1, 1], [], []>} : vector<120x128xf32>, vector<128x128xf32>, vector<120x128xf32> -> vector<120x128xf32>
    %185 = arith.addf %180, %184 : vector<120x128xf32>
    %186 = vector.extract_strided_slice %161 {offsets = [18, 0], sizes = [120, 128], strides = [1, 1]} : vector<160x128xf32> to vector<120x128xf32>
    %c5_115 = arith.constant 5 : index
    %c0_116 = arith.constant 0 : index
    %c0_117 = arith.constant 0 : index
    %187 = vector.load %arg4[%c5_115, %c0_116, %c0_117] : memref<9x128x128xf32, #tpu.memory_space<vmem>>, vector<1x128x128xf32>
    %188 = vector.shape_cast %187 : vector<1x128x128xf32> to vector<128x128xf32>
    %cst_118 = arith.constant dense<0.000000e+00> : vector<120x128xf32>
    %189 = tpu.matmul %186, %188, %cst_118 {dimension_numbers = #tpu.dot_dimension_numbers<[1], [0], [0], [1], [0, 0, 1, 1], [], []>} : vector<120x128xf32>, vector<128x128xf32>, vector<120x128xf32> -> vector<120x128xf32>
    %190 = arith.addf %185, %189 : vector<120x128xf32>
    %191 = vector.extract_strided_slice %161 {offsets = [32, 0], sizes = [120, 128], strides = [1, 1]} : vector<160x128xf32> to vector<120x128xf32>
    %c6_119 = arith.constant 6 : index
    %c0_120 = arith.constant 0 : index
    %c0_121 = arith.constant 0 : index
    %192 = vector.load %arg4[%c6_119, %c0_120, %c0_121] : memref<9x128x128xf32, #tpu.memory_space<vmem>>, vector<1x128x128xf32>
    %193 = vector.shape_cast %192 : vector<1x128x128xf32> to vector<128x128xf32>
    %cst_122 = arith.constant dense<0.000000e+00> : vector<120x128xf32>
    %194 = tpu.matmul %191, %193, %cst_122 {dimension_numbers = #tpu.dot_dimension_numbers<[1], [0], [0], [1], [0, 0, 1, 1], [], []>} : vector<120x128xf32>, vector<128x128xf32>, vector<120x128xf32> -> vector<120x128xf32>
    %195 = arith.addf %190, %194 : vector<120x128xf32>
    %196 = vector.extract_strided_slice %161 {offsets = [33, 0], sizes = [120, 128], strides = [1, 1]} : vector<160x128xf32> to vector<120x128xf32>
    %c7_123 = arith.constant 7 : index
    %c0_124 = arith.constant 0 : index
    %c0_125 = arith.constant 0 : index
    %197 = vector.load %arg4[%c7_123, %c0_124, %c0_125] : memref<9x128x128xf32, #tpu.memory_space<vmem>>, vector<1x128x128xf32>
    %198 = vector.shape_cast %197 : vector<1x128x128xf32> to vector<128x128xf32>
    %cst_126 = arith.constant dense<0.000000e+00> : vector<120x128xf32>
    %199 = tpu.matmul %196, %198, %cst_126 {dimension_numbers = #tpu.dot_dimension_numbers<[1], [0], [0], [1], [0, 0, 1, 1], [], []>} : vector<120x128xf32>, vector<128x128xf32>, vector<120x128xf32> -> vector<120x128xf32>
    %200 = arith.addf %195, %199 : vector<120x128xf32>
    %201 = vector.extract_strided_slice %161 {offsets = [34, 0], sizes = [120, 128], strides = [1, 1]} : vector<160x128xf32> to vector<120x128xf32>
    %c8_127 = arith.constant 8 : index
    %c0_128 = arith.constant 0 : index
    %c0_129 = arith.constant 0 : index
    %202 = vector.load %arg4[%c8_127, %c0_128, %c0_129] : memref<9x128x128xf32, #tpu.memory_space<vmem>>, vector<1x128x128xf32>
    %203 = vector.shape_cast %202 : vector<1x128x128xf32> to vector<128x128xf32>
    %cst_130 = arith.constant dense<0.000000e+00> : vector<120x128xf32>
    %204 = tpu.matmul %201, %203, %cst_130 {dimension_numbers = #tpu.dot_dimension_numbers<[1], [0], [0], [1], [0, 0, 1, 1], [], []>} : vector<120x128xf32>, vector<128x128xf32>, vector<120x128xf32> -> vector<120x128xf32>
    %205 = arith.addf %200, %204 : vector<120x128xf32>
    %cst_131 = arith.constant dense<0.000000e+00> : vector<128xf32>
    %206 = vector.multi_reduction <add>, %205, %cst_131 [0] : vector<120x128xf32> to vector<128xf32>
    %207 = vector.shape_cast %206 : vector<128xf32> to vector<1x128xf32>
    %cst_132 = arith.constant 1.562500e-02 : f32
    %208 = vector.broadcast %cst_132 : f32 to vector<1x128xf32>
    %209 = arith.mulf %207, %208 : vector<1x128xf32>
    %210 = arith.mulf %205, %205 : vector<120x128xf32>
    %cst_133 = arith.constant dense<0.000000e+00> : vector<128xf32>
    %211 = vector.multi_reduction <add>, %210, %cst_133 [0] : vector<120x128xf32> to vector<128xf32>
    %212 = vector.shape_cast %211 : vector<128xf32> to vector<1x128xf32>
    %cst_134 = arith.constant 1.562500e-02 : f32
    %213 = vector.broadcast %cst_134 : f32 to vector<1x128xf32>
    %214 = arith.mulf %212, %213 : vector<1x128xf32>
    %215 = arith.mulf %209, %209 : vector<1x128xf32>
    %216 = arith.subf %214, %215 : vector<1x128xf32>
    %cst_135 = arith.constant 0.000000e+00 : f32
    %217 = vector.broadcast %cst_135 : f32 to vector<1x128xf32>
    %218 = arith.maximumf %216, %217 : vector<1x128xf32>
    %cst_136 = arith.constant 9.99999974E-6 : f32
    %219 = vector.broadcast %cst_136 : f32 to vector<1x128xf32>
    %220 = arith.addf %218, %219 : vector<1x128xf32>
    %221 = math.rsqrt %220 : vector<1x128xf32>
    %222 = arith.mulf %0, %221 : vector<1x128xf32>
    %223 = arith.mulf %209, %222 : vector<1x128xf32>
    %224 = arith.subf %1, %223 : vector<1x128xf32>
    %225 = vector.broadcast %222 : vector<1x128xf32> to vector<120x128xf32>
    %226 = arith.mulf %205, %225 : vector<120x128xf32>
    %227 = vector.broadcast %224 : vector<1x128xf32> to vector<120x128xf32>
    %228 = arith.addf %226, %227 : vector<120x128xf32>
    %cst_137 = arith.constant 0.000000e+00 : f32
    %229 = vector.broadcast %cst_137 : f32 to vector<120x128xf32>
    %230 = arith.maximumf %228, %229 : vector<120x128xf32>
    %231 = vector.extract_strided_slice %230 {offsets = [0, 0], sizes = [119, 128], strides = [1, 1]} : vector<120x128xf32> to vector<119x128xf32>
    %232 = vector.extract_strided_slice %230 {offsets = [1, 0], sizes = [119, 128], strides = [1, 1]} : vector<120x128xf32> to vector<119x128xf32>
    %233 = arith.maximumf %231, %232 : vector<119x128xf32>
    %234 = vector.extract_strided_slice %233 {offsets = [0, 0], sizes = [103, 128], strides = [1, 1]} : vector<119x128xf32> to vector<103x128xf32>
    %235 = vector.extract_strided_slice %233 {offsets = [16, 0], sizes = [103, 128], strides = [1, 1]} : vector<119x128xf32> to vector<103x128xf32>
    %236 = arith.maximumf %234, %235 : vector<103x128xf32>
    %c0_138 = arith.constant 0 : index
    %c0_139 = arith.constant 0 : index
    %237 = vector.load %arg12[%c0_138, %c0_139] : memref<16x103xf32, #tpu.memory_space<vmem>>, vector<16x103xf32>
    %cst_140 = arith.constant dense<0.000000e+00> : vector<16x128xf32>
    %238 = tpu.matmul %237, %236, %cst_140 {dimension_numbers = #tpu.dot_dimension_numbers<[1], [0], [0], [1], [0, 0, 1, 1], [], []>} : vector<16x103xf32>, vector<103x128xf32>, vector<16x128xf32> -> vector<16x128xf32>
    %c0_141 = arith.constant 0 : index
    %c0_142 = arith.constant 0 : index
    %239 = vector.load %arg13[%c0_141, %c0_142] : memref<64x16xf32, #tpu.memory_space<vmem>>, vector<64x16xf32>
    %cst_143 = arith.constant dense<0.000000e+00> : vector<64x128xf32>
    %240 = tpu.matmul %239, %238, %cst_143 {dimension_numbers = #tpu.dot_dimension_numbers<[1], [0], [0], [1], [0, 0, 1, 1], [], []>} : vector<64x16xf32>, vector<16x128xf32>, vector<64x128xf32> -> vector<64x128xf32>
    %241 = vector.extract_strided_slice %240 {offsets = [0, 0], sizes = [46, 128], strides = [1, 1]} : vector<64x128xf32> to vector<46x128xf32>
    %c0_144 = arith.constant 0 : index
    %c0_145 = arith.constant 0 : index
    %c0_146 = arith.constant 0 : index
    %242 = vector.load %arg5[%c0_144, %c0_145, %c0_146] : memref<9x128x128xf32, #tpu.memory_space<vmem>>, vector<1x128x128xf32>
    %243 = vector.shape_cast %242 : vector<1x128x128xf32> to vector<128x128xf32>
    %cst_147 = arith.constant dense<0.000000e+00> : vector<46x128xf32>
    %244 = tpu.matmul %241, %243, %cst_147 {dimension_numbers = #tpu.dot_dimension_numbers<[1], [0], [0], [1], [0, 0, 1, 1], [], []>} : vector<46x128xf32>, vector<128x128xf32>, vector<46x128xf32> -> vector<46x128xf32>
    %245 = vector.extract_strided_slice %240 {offsets = [1, 0], sizes = [46, 128], strides = [1, 1]} : vector<64x128xf32> to vector<46x128xf32>
    %c1_148 = arith.constant 1 : index
    %c0_149 = arith.constant 0 : index
    %c0_150 = arith.constant 0 : index
    %246 = vector.load %arg5[%c1_148, %c0_149, %c0_150] : memref<9x128x128xf32, #tpu.memory_space<vmem>>, vector<1x128x128xf32>
    %247 = vector.shape_cast %246 : vector<1x128x128xf32> to vector<128x128xf32>
    %cst_151 = arith.constant dense<0.000000e+00> : vector<46x128xf32>
    %248 = tpu.matmul %245, %247, %cst_151 {dimension_numbers = #tpu.dot_dimension_numbers<[1], [0], [0], [1], [0, 0, 1, 1], [], []>} : vector<46x128xf32>, vector<128x128xf32>, vector<46x128xf32> -> vector<46x128xf32>
    %249 = arith.addf %244, %248 : vector<46x128xf32>
    %250 = vector.extract_strided_slice %240 {offsets = [2, 0], sizes = [46, 128], strides = [1, 1]} : vector<64x128xf32> to vector<46x128xf32>
    %c2_152 = arith.constant 2 : index
    %c0_153 = arith.constant 0 : index
    %c0_154 = arith.constant 0 : index
    %251 = vector.load %arg5[%c2_152, %c0_153, %c0_154] : memref<9x128x128xf32, #tpu.memory_space<vmem>>, vector<1x128x128xf32>
    %252 = vector.shape_cast %251 : vector<1x128x128xf32> to vector<128x128xf32>
    %cst_155 = arith.constant dense<0.000000e+00> : vector<46x128xf32>
    %253 = tpu.matmul %250, %252, %cst_155 {dimension_numbers = #tpu.dot_dimension_numbers<[1], [0], [0], [1], [0, 0, 1, 1], [], []>} : vector<46x128xf32>, vector<128x128xf32>, vector<46x128xf32> -> vector<46x128xf32>
    %254 = arith.addf %249, %253 : vector<46x128xf32>
    %255 = vector.extract_strided_slice %240 {offsets = [8, 0], sizes = [46, 128], strides = [1, 1]} : vector<64x128xf32> to vector<46x128xf32>
    %c3_156 = arith.constant 3 : index
    %c0_157 = arith.constant 0 : index
    %c0_158 = arith.constant 0 : index
    %256 = vector.load %arg5[%c3_156, %c0_157, %c0_158] : memref<9x128x128xf32, #tpu.memory_space<vmem>>, vector<1x128x128xf32>
    %257 = vector.shape_cast %256 : vector<1x128x128xf32> to vector<128x128xf32>
    %cst_159 = arith.constant dense<0.000000e+00> : vector<46x128xf32>
    %258 = tpu.matmul %255, %257, %cst_159 {dimension_numbers = #tpu.dot_dimension_numbers<[1], [0], [0], [1], [0, 0, 1, 1], [], []>} : vector<46x128xf32>, vector<128x128xf32>, vector<46x128xf32> -> vector<46x128xf32>
    %259 = arith.addf %254, %258 : vector<46x128xf32>
    %260 = vector.extract_strided_slice %240 {offsets = [9, 0], sizes = [46, 128], strides = [1, 1]} : vector<64x128xf32> to vector<46x128xf32>
    %c4_160 = arith.constant 4 : index
    %c0_161 = arith.constant 0 : index
    %c0_162 = arith.constant 0 : index
    %261 = vector.load %arg5[%c4_160, %c0_161, %c0_162] : memref<9x128x128xf32, #tpu.memory_space<vmem>>, vector<1x128x128xf32>
    %262 = vector.shape_cast %261 : vector<1x128x128xf32> to vector<128x128xf32>
    %cst_163 = arith.constant dense<0.000000e+00> : vector<46x128xf32>
    %263 = tpu.matmul %260, %262, %cst_163 {dimension_numbers = #tpu.dot_dimension_numbers<[1], [0], [0], [1], [0, 0, 1, 1], [], []>} : vector<46x128xf32>, vector<128x128xf32>, vector<46x128xf32> -> vector<46x128xf32>
    %264 = arith.addf %259, %263 : vector<46x128xf32>
    %265 = vector.extract_strided_slice %240 {offsets = [10, 0], sizes = [46, 128], strides = [1, 1]} : vector<64x128xf32> to vector<46x128xf32>
    %c5_164 = arith.constant 5 : index
    %c0_165 = arith.constant 0 : index
    %c0_166 = arith.constant 0 : index
    %266 = vector.load %arg5[%c5_164, %c0_165, %c0_166] : memref<9x128x128xf32, #tpu.memory_space<vmem>>, vector<1x128x128xf32>
    %267 = vector.shape_cast %266 : vector<1x128x128xf32> to vector<128x128xf32>
    %cst_167 = arith.constant dense<0.000000e+00> : vector<46x128xf32>
    %268 = tpu.matmul %265, %267, %cst_167 {dimension_numbers = #tpu.dot_dimension_numbers<[1], [0], [0], [1], [0, 0, 1, 1], [], []>} : vector<46x128xf32>, vector<128x128xf32>, vector<46x128xf32> -> vector<46x128xf32>
    %269 = arith.addf %264, %268 : vector<46x128xf32>
    %270 = vector.extract_strided_slice %240 {offsets = [16, 0], sizes = [46, 128], strides = [1, 1]} : vector<64x128xf32> to vector<46x128xf32>
    %c6_168 = arith.constant 6 : index
    %c0_169 = arith.constant 0 : index
    %c0_170 = arith.constant 0 : index
    %271 = vector.load %arg5[%c6_168, %c0_169, %c0_170] : memref<9x128x128xf32, #tpu.memory_space<vmem>>, vector<1x128x128xf32>
    %272 = vector.shape_cast %271 : vector<1x128x128xf32> to vector<128x128xf32>
    %cst_171 = arith.constant dense<0.000000e+00> : vector<46x128xf32>
    %273 = tpu.matmul %270, %272, %cst_171 {dimension_numbers = #tpu.dot_dimension_numbers<[1], [0], [0], [1], [0, 0, 1, 1], [], []>} : vector<46x128xf32>, vector<128x128xf32>, vector<46x128xf32> -> vector<46x128xf32>
    %274 = arith.addf %269, %273 : vector<46x128xf32>
    %275 = vector.extract_strided_slice %240 {offsets = [17, 0], sizes = [46, 128], strides = [1, 1]} : vector<64x128xf32> to vector<46x128xf32>
    %c7_172 = arith.constant 7 : index
    %c0_173 = arith.constant 0 : index
    %c0_174 = arith.constant 0 : index
    %276 = vector.load %arg5[%c7_172, %c0_173, %c0_174] : memref<9x128x128xf32, #tpu.memory_space<vmem>>, vector<1x128x128xf32>
    %277 = vector.shape_cast %276 : vector<1x128x128xf32> to vector<128x128xf32>
    %cst_175 = arith.constant dense<0.000000e+00> : vector<46x128xf32>
    %278 = tpu.matmul %275, %277, %cst_175 {dimension_numbers = #tpu.dot_dimension_numbers<[1], [0], [0], [1], [0, 0, 1, 1], [], []>} : vector<46x128xf32>, vector<128x128xf32>, vector<46x128xf32> -> vector<46x128xf32>
    %279 = arith.addf %274, %278 : vector<46x128xf32>
    %280 = vector.extract_strided_slice %240 {offsets = [18, 0], sizes = [46, 128], strides = [1, 1]} : vector<64x128xf32> to vector<46x128xf32>
    %c8_176 = arith.constant 8 : index
    %c0_177 = arith.constant 0 : index
    %c0_178 = arith.constant 0 : index
    %281 = vector.load %arg5[%c8_176, %c0_177, %c0_178] : memref<9x128x128xf32, #tpu.memory_space<vmem>>, vector<1x128x128xf32>
    %282 = vector.shape_cast %281 : vector<1x128x128xf32> to vector<128x128xf32>
    %cst_179 = arith.constant dense<0.000000e+00> : vector<46x128xf32>
    %283 = tpu.matmul %280, %282, %cst_179 {dimension_numbers = #tpu.dot_dimension_numbers<[1], [0], [0], [1], [0, 0, 1, 1], [], []>} : vector<46x128xf32>, vector<128x128xf32>, vector<46x128xf32> -> vector<46x128xf32>
    %284 = arith.addf %279, %283 : vector<46x128xf32>
    %cst_180 = arith.constant dense<0.000000e+00> : vector<128xf32>
    %285 = vector.multi_reduction <add>, %284, %cst_180 [0] : vector<46x128xf32> to vector<128xf32>
    %286 = vector.shape_cast %285 : vector<128xf32> to vector<1x128xf32>
    %cst_181 = arith.constant 0.027777778 : f32
    %287 = vector.broadcast %cst_181 : f32 to vector<1x128xf32>
    %288 = arith.mulf %286, %287 : vector<1x128xf32>
    %289 = arith.mulf %284, %284 : vector<46x128xf32>
    %cst_182 = arith.constant dense<0.000000e+00> : vector<128xf32>
    %290 = vector.multi_reduction <add>, %289, %cst_182 [0] : vector<46x128xf32> to vector<128xf32>
    %291 = vector.shape_cast %290 : vector<128xf32> to vector<1x128xf32>
    %cst_183 = arith.constant 0.027777778 : f32
    %292 = vector.broadcast %cst_183 : f32 to vector<1x128xf32>
    %293 = arith.mulf %291, %292 : vector<1x128xf32>
    %294 = arith.mulf %288, %288 : vector<1x128xf32>
    %295 = arith.subf %293, %294 : vector<1x128xf32>
    %cst_184 = arith.constant 0.000000e+00 : f32
    %296 = vector.broadcast %cst_184 : f32 to vector<1x128xf32>
    %297 = arith.maximumf %295, %296 : vector<1x128xf32>
    %cst_185 = arith.constant 9.99999974E-6 : f32
    %298 = vector.broadcast %cst_185 : f32 to vector<1x128xf32>
    %299 = arith.addf %297, %298 : vector<1x128xf32>
    %300 = math.rsqrt %299 : vector<1x128xf32>
    %301 = arith.mulf %0, %300 : vector<1x128xf32>
    %302 = arith.mulf %288, %301 : vector<1x128xf32>
    %303 = arith.subf %1, %302 : vector<1x128xf32>
    %304 = vector.broadcast %301 : vector<1x128xf32> to vector<46x128xf32>
    %305 = arith.mulf %284, %304 : vector<46x128xf32>
    %306 = vector.broadcast %303 : vector<1x128xf32> to vector<46x128xf32>
    %307 = arith.addf %305, %306 : vector<46x128xf32>
    %cst_186 = arith.constant 0.000000e+00 : f32
    %308 = vector.broadcast %cst_186 : f32 to vector<46x128xf32>
    %309 = arith.maximumf %307, %308 : vector<46x128xf32>
    %310 = vector.extract_strided_slice %309 {offsets = [0, 0], sizes = [45, 128], strides = [1, 1]} : vector<46x128xf32> to vector<45x128xf32>
    %311 = vector.extract_strided_slice %309 {offsets = [1, 0], sizes = [45, 128], strides = [1, 1]} : vector<46x128xf32> to vector<45x128xf32>
    %312 = arith.maximumf %310, %311 : vector<45x128xf32>
    %313 = vector.extract_strided_slice %312 {offsets = [0, 0], sizes = [37, 128], strides = [1, 1]} : vector<45x128xf32> to vector<37x128xf32>
    %314 = vector.extract_strided_slice %312 {offsets = [8, 0], sizes = [37, 128], strides = [1, 1]} : vector<45x128xf32> to vector<37x128xf32>
    %315 = arith.maximumf %313, %314 : vector<37x128xf32>
    %c0_187 = arith.constant 0 : index
    %c0_188 = arith.constant 0 : index
    %316 = vector.load %arg14[%c0_187, %c0_188] : memref<9x37xf32, #tpu.memory_space<vmem>>, vector<9x37xf32>
    %cst_189 = arith.constant dense<0.000000e+00> : vector<9x128xf32>
    %317 = tpu.matmul %316, %315, %cst_189 {dimension_numbers = #tpu.dot_dimension_numbers<[1], [0], [0], [1], [0, 0, 1, 1], [], []>} : vector<9x37xf32>, vector<37x128xf32>, vector<9x128xf32> -> vector<9x128xf32>
    %c0_190 = arith.constant 0 : index
    %c0_191 = arith.constant 0 : index
    %318 = vector.load %arg16[%c0_190, %c0_191] : memref<1x128xf32, #tpu.memory_space<vmem>>, vector<1x128xf32>
    %319 = vector.extract_strided_slice %317 {offsets = [0, 0], sizes = [1, 128], strides = [1, 1]} : vector<9x128xf32> to vector<1x128xf32>
    %c0_192 = arith.constant 0 : index
    %c0_193 = arith.constant 0 : index
    %c0_194 = arith.constant 0 : index
    %320 = vector.load %arg15[%c0_192, %c0_193, %c0_194] : memref<9x128x128xf32, #tpu.memory_space<vmem>>, vector<1x128x128xf32>
    %321 = vector.shape_cast %320 : vector<1x128x128xf32> to vector<128x128xf32>
    %cst_195 = arith.constant dense<0.000000e+00> : vector<1x128xf32>
    %322 = tpu.matmul %319, %321, %cst_195 {dimension_numbers = #tpu.dot_dimension_numbers<[1], [0], [0], [1], [0, 0, 1, 1], [], []>} : vector<1x128xf32>, vector<128x128xf32>, vector<1x128xf32> -> vector<1x128xf32>
    %323 = arith.addf %318, %322 : vector<1x128xf32>
    %324 = vector.extract_strided_slice %317 {offsets = [1, 0], sizes = [1, 128], strides = [1, 1]} : vector<9x128xf32> to vector<1x128xf32>
    %c1_196 = arith.constant 1 : index
    %c0_197 = arith.constant 0 : index
    %c0_198 = arith.constant 0 : index
    %325 = vector.load %arg15[%c1_196, %c0_197, %c0_198] : memref<9x128x128xf32, #tpu.memory_space<vmem>>, vector<1x128x128xf32>
    %326 = vector.shape_cast %325 : vector<1x128x128xf32> to vector<128x128xf32>
    %cst_199 = arith.constant dense<0.000000e+00> : vector<1x128xf32>
    %327 = tpu.matmul %324, %326, %cst_199 {dimension_numbers = #tpu.dot_dimension_numbers<[1], [0], [0], [1], [0, 0, 1, 1], [], []>} : vector<1x128xf32>, vector<128x128xf32>, vector<1x128xf32> -> vector<1x128xf32>
    %328 = arith.addf %323, %327 : vector<1x128xf32>
    %329 = vector.extract_strided_slice %317 {offsets = [2, 0], sizes = [1, 128], strides = [1, 1]} : vector<9x128xf32> to vector<1x128xf32>
    %c2_200 = arith.constant 2 : index
    %c0_201 = arith.constant 0 : index
    %c0_202 = arith.constant 0 : index
    %330 = vector.load %arg15[%c2_200, %c0_201, %c0_202] : memref<9x128x128xf32, #tpu.memory_space<vmem>>, vector<1x128x128xf32>
    %331 = vector.shape_cast %330 : vector<1x128x128xf32> to vector<128x128xf32>
    %cst_203 = arith.constant dense<0.000000e+00> : vector<1x128xf32>
    %332 = tpu.matmul %329, %331, %cst_203 {dimension_numbers = #tpu.dot_dimension_numbers<[1], [0], [0], [1], [0, 0, 1, 1], [], []>} : vector<1x128xf32>, vector<128x128xf32>, vector<1x128xf32> -> vector<1x128xf32>
    %333 = arith.addf %328, %332 : vector<1x128xf32>
    %334 = vector.extract_strided_slice %317 {offsets = [3, 0], sizes = [1, 128], strides = [1, 1]} : vector<9x128xf32> to vector<1x128xf32>
    %c3_204 = arith.constant 3 : index
    %c0_205 = arith.constant 0 : index
    %c0_206 = arith.constant 0 : index
    %335 = vector.load %arg15[%c3_204, %c0_205, %c0_206] : memref<9x128x128xf32, #tpu.memory_space<vmem>>, vector<1x128x128xf32>
    %336 = vector.shape_cast %335 : vector<1x128x128xf32> to vector<128x128xf32>
    %cst_207 = arith.constant dense<0.000000e+00> : vector<1x128xf32>
    %337 = tpu.matmul %334, %336, %cst_207 {dimension_numbers = #tpu.dot_dimension_numbers<[1], [0], [0], [1], [0, 0, 1, 1], [], []>} : vector<1x128xf32>, vector<128x128xf32>, vector<1x128xf32> -> vector<1x128xf32>
    %338 = arith.addf %333, %337 : vector<1x128xf32>
    %339 = vector.extract_strided_slice %317 {offsets = [4, 0], sizes = [1, 128], strides = [1, 1]} : vector<9x128xf32> to vector<1x128xf32>
    %c4_208 = arith.constant 4 : index
    %c0_209 = arith.constant 0 : index
    %c0_210 = arith.constant 0 : index
    %340 = vector.load %arg15[%c4_208, %c0_209, %c0_210] : memref<9x128x128xf32, #tpu.memory_space<vmem>>, vector<1x128x128xf32>
    %341 = vector.shape_cast %340 : vector<1x128x128xf32> to vector<128x128xf32>
    %cst_211 = arith.constant dense<0.000000e+00> : vector<1x128xf32>
    %342 = tpu.matmul %339, %341, %cst_211 {dimension_numbers = #tpu.dot_dimension_numbers<[1], [0], [0], [1], [0, 0, 1, 1], [], []>} : vector<1x128xf32>, vector<128x128xf32>, vector<1x128xf32> -> vector<1x128xf32>
    %343 = arith.addf %338, %342 : vector<1x128xf32>
    %344 = vector.extract_strided_slice %317 {offsets = [5, 0], sizes = [1, 128], strides = [1, 1]} : vector<9x128xf32> to vector<1x128xf32>
    %c5_212 = arith.constant 5 : index
    %c0_213 = arith.constant 0 : index
    %c0_214 = arith.constant 0 : index
    %345 = vector.load %arg15[%c5_212, %c0_213, %c0_214] : memref<9x128x128xf32, #tpu.memory_space<vmem>>, vector<1x128x128xf32>
    %346 = vector.shape_cast %345 : vector<1x128x128xf32> to vector<128x128xf32>
    %cst_215 = arith.constant dense<0.000000e+00> : vector<1x128xf32>
    %347 = tpu.matmul %344, %346, %cst_215 {dimension_numbers = #tpu.dot_dimension_numbers<[1], [0], [0], [1], [0, 0, 1, 1], [], []>} : vector<1x128xf32>, vector<128x128xf32>, vector<1x128xf32> -> vector<1x128xf32>
    %348 = arith.addf %343, %347 : vector<1x128xf32>
    %349 = vector.extract_strided_slice %317 {offsets = [6, 0], sizes = [1, 128], strides = [1, 1]} : vector<9x128xf32> to vector<1x128xf32>
    %c6_216 = arith.constant 6 : index
    %c0_217 = arith.constant 0 : index
    %c0_218 = arith.constant 0 : index
    %350 = vector.load %arg15[%c6_216, %c0_217, %c0_218] : memref<9x128x128xf32, #tpu.memory_space<vmem>>, vector<1x128x128xf32>
    %351 = vector.shape_cast %350 : vector<1x128x128xf32> to vector<128x128xf32>
    %cst_219 = arith.constant dense<0.000000e+00> : vector<1x128xf32>
    %352 = tpu.matmul %349, %351, %cst_219 {dimension_numbers = #tpu.dot_dimension_numbers<[1], [0], [0], [1], [0, 0, 1, 1], [], []>} : vector<1x128xf32>, vector<128x128xf32>, vector<1x128xf32> -> vector<1x128xf32>
    %353 = arith.addf %348, %352 : vector<1x128xf32>
    %354 = vector.extract_strided_slice %317 {offsets = [7, 0], sizes = [1, 128], strides = [1, 1]} : vector<9x128xf32> to vector<1x128xf32>
    %c7_220 = arith.constant 7 : index
    %c0_221 = arith.constant 0 : index
    %c0_222 = arith.constant 0 : index
    %355 = vector.load %arg15[%c7_220, %c0_221, %c0_222] : memref<9x128x128xf32, #tpu.memory_space<vmem>>, vector<1x128x128xf32>
    %356 = vector.shape_cast %355 : vector<1x128x128xf32> to vector<128x128xf32>
    %cst_223 = arith.constant dense<0.000000e+00> : vector<1x128xf32>
    %357 = tpu.matmul %354, %356, %cst_223 {dimension_numbers = #tpu.dot_dimension_numbers<[1], [0], [0], [1], [0, 0, 1, 1], [], []>} : vector<1x128xf32>, vector<128x128xf32>, vector<1x128xf32> -> vector<1x128xf32>
    %358 = arith.addf %353, %357 : vector<1x128xf32>
    %359 = vector.extract_strided_slice %317 {offsets = [8, 0], sizes = [1, 128], strides = [1, 1]} : vector<9x128xf32> to vector<1x128xf32>
    %c8_224 = arith.constant 8 : index
    %c0_225 = arith.constant 0 : index
    %c0_226 = arith.constant 0 : index
    %360 = vector.load %arg15[%c8_224, %c0_225, %c0_226] : memref<9x128x128xf32, #tpu.memory_space<vmem>>, vector<1x128x128xf32>
    %361 = vector.shape_cast %360 : vector<1x128x128xf32> to vector<128x128xf32>
    %cst_227 = arith.constant dense<0.000000e+00> : vector<1x128xf32>
    %362 = tpu.matmul %359, %361, %cst_227 {dimension_numbers = #tpu.dot_dimension_numbers<[1], [0], [0], [1], [0, 0, 1, 1], [], []>} : vector<1x128xf32>, vector<128x128xf32>, vector<1x128xf32> -> vector<1x128xf32>
    %363 = arith.addf %358, %362 : vector<1x128xf32>
    %c0_228 = arith.constant 0 : index
    %c0_229 = arith.constant 0 : index
    %c0_230 = arith.constant 0 : index
    %364 = vector.load %arg17[%c0_228, %c0_229, %c0_230] : memref<1x1x128xf32, #tpu.memory_space<vmem>>, vector<1x1x128xf32>
    %365 = vector.shape_cast %364 : vector<1x1x128xf32> to vector<1x128xf32>
    %366 = vector.shape_cast %363 : vector<1x128xf32> to vector<1x1x128xf32>
    tpu.vector_store %arg17[%c0_228, %c0_229, %c0_230], %366 {strides = array<i32>} : memref<1x1x128xf32, #tpu.memory_space<vmem>>, vector<1x1x128xf32>,
    return
  }
  func.func @transform_0(%arg0: i32) -> (i32, i32, i32) {
    %c0_i32 = arith.constant 0 : i32
    %c0_i32_0 = arith.constant 0 : i32
    %c0_i32_1 = arith.constant 0 : i32
    return %arg0, %c0_i32, %c0_i32_0 : i32, i32, i32
  }
  func.func @transform_1(%arg0: i32) -> (i32, i32, i32) {
    %c0_i32 = arith.constant 0 : i32
    %c0_i32_0 = arith.constant 0 : i32
    %c0_i32_1 = arith.constant 0 : i32
    %c0_i32_2 = arith.constant 0 : i32
    return %c0_i32, %c0_i32_0, %c0_i32_1 : i32, i32, i32
  }
  func.func @transform_2(%arg0: i32) -> (i32, i32, i32) {
    %c0_i32 = arith.constant 0 : i32
    %c0_i32_0 = arith.constant 0 : i32
    %c0_i32_1 = arith.constant 0 : i32
    %c0_i32_2 = arith.constant 0 : i32
    return %c0_i32, %c0_i32_0, %c0_i32_1 : i32, i32, i32
  }
  func.func @transform_3(%arg0: i32) -> (i32, i32, i32) {
    %c0_i32 = arith.constant 0 : i32
    %c0_i32_0 = arith.constant 0 : i32
    %c0_i32_1 = arith.constant 0 : i32
    %c0_i32_2 = arith.constant 0 : i32
    return %c0_i32, %c0_i32_0, %c0_i32_1 : i32, i32, i32
  }
  func.func @transform_4(%arg0: i32) -> (i32, i32, i32) {
    %c0_i32 = arith.constant 0 : i32
    %c0_i32_0 = arith.constant 0 : i32
    %c0_i32_1 = arith.constant 0 : i32
    %c0_i32_2 = arith.constant 0 : i32
    return %c0_i32, %c0_i32_0, %c0_i32_1 : i32, i32, i32
  }
  func.func @transform_5(%arg0: i32) -> (i32, i32) {
    %c0_i32 = arith.constant 0 : i32
    %c0_i32_0 = arith.constant 0 : i32
    %c0_i32_1 = arith.constant 0 : i32
    return %c0_i32, %c0_i32_0 : i32, i32
  }
  func.func @transform_6(%arg0: i32) -> (i32, i32) {
    %c0_i32 = arith.constant 0 : i32
    %c0_i32_0 = arith.constant 0 : i32
    %c0_i32_1 = arith.constant 0 : i32
    return %c0_i32, %c0_i32_0 : i32, i32
  }
  func.func @transform_7(%arg0: i32) -> (i32, i32) {
    %c0_i32 = arith.constant 0 : i32
    %c0_i32_0 = arith.constant 0 : i32
    %c0_i32_1 = arith.constant 0 : i32
    return %c0_i32, %c0_i32_0 : i32, i32
  }
  func.func @transform_8(%arg0: i32) -> (i32, i32) {
    %c0_i32 = arith.constant 0 : i32
    %c0_i32_0 = arith.constant 0 : i32
    %c0_i32_1 = arith.constant 0 : i32
    return %c0_i32, %c0_i32_0 : i32, i32
  }
  func.func @transform_9(%arg0: i32) -> (i32, i32) {
    %c0_i32 = arith.constant 0 : i32
    %c0_i32_0 = arith.constant 0 : i32
    %c0_i32_1 = arith.constant 0 : i32
    return %c0_i32, %c0_i32_0 : i32, i32
  }
  func.func @transform_10(%arg0: i32) -> (i32, i32) {
    %c0_i32 = arith.constant 0 : i32
    %c0_i32_0 = arith.constant 0 : i32
    %c0_i32_1 = arith.constant 0 : i32
    return %c0_i32, %c0_i32_0 : i32, i32
  }
  func.func @transform_11(%arg0: i32) -> (i32, i32) {
    %c0_i32 = arith.constant 0 : i32
    %c0_i32_0 = arith.constant 0 : i32
    %c0_i32_1 = arith.constant 0 : i32
    return %c0_i32, %c0_i32_0 : i32, i32
  }
  func.func @transform_12(%arg0: i32) -> (i32, i32) {
    %c0_i32 = arith.constant 0 : i32
    %c0_i32_0 = arith.constant 0 : i32
    %c0_i32_1 = arith.constant 0 : i32
    return %c0_i32, %c0_i32_0 : i32, i32
  }
  func.func @transform_13(%arg0: i32) -> (i32, i32) {
    %c0_i32 = arith.constant 0 : i32
    %c0_i32_0 = arith.constant 0 : i32
    %c0_i32_1 = arith.constant 0 : i32
    return %c0_i32, %c0_i32_0 : i32, i32
  }
  func.func @transform_14(%arg0: i32) -> (i32, i32, i32) {
    %c0_i32 = arith.constant 0 : i32
    %c0_i32_0 = arith.constant 0 : i32
    %c0_i32_1 = arith.constant 0 : i32
    %c0_i32_2 = arith.constant 0 : i32
    return %c0_i32, %c0_i32_0, %c0_i32_1 : i32, i32, i32
  }
  func.func @transform_15(%arg0: i32) -> (i32, i32) {
    %c0_i32 = arith.constant 0 : i32
    %c0_i32_0 = arith.constant 0 : i32
    %c0_i32_1 = arith.constant 0 : i32
    return %c0_i32, %c0_i32_0 : i32, i32
  }
  func.func @transform_16(%arg0: i32) -> (i32, i32, i32) {
    %c0_i32 = arith.constant 0 : i32
    %c0_i32_0 = arith.constant 0 : i32
    %c0_i32_1 = arith.constant 0 : i32
    return %arg0, %c0_i32, %c0_i32_0 : i32, i32, i32
  }
}

</mosaic_0001>

<bundles_post_ra>
// kernel: squeeze.1
= control target key start
LH: loop header
LB: loop body
LE: loop exit
PB: predicated region body
PF: predicated region fallthrough
CT: control target
= control target key end

     0   :  { %s95_s0 = inlined_call_operand.vmem [shape: f32[2,128], index: 0, kind: input, shape index: {}]   ;;  %s96_s1 = inlined_call_operand.hbm [shape: f32[8,32], index: 1, kind: output, shape index: {}]  }
   0x1   :  { %v5_v0 = vld [vmem:[%s95_s0] sm:$0x3] }
   0x2   :  { %6 = vst [vmem:[#allocation2] sm:$0x3] %v5_v0 }
   0x3   :  { %2 = vsyncpa [#allocation1], 0  ;;  %s66_s0 = smov 96   ;;  %s67_s8 = smov 32   ;;  %vm8_vm0 = vcmask 261120  }
   0x4   :  { %s68_s9 = smov 64   ;;  %s69_s10 = smov [#allocation0]  }
   0x5   :  { %s32_s11 = sshll.u32 %s69_s10, 4  ;;  %s33_s11 = int_to_ptr.vmem [resolvable:$true] %s32_s11 }
   0x6   :  { %s42_s12 = scalar_lea.vmem %s33_s11, 128  ;;  %p47_p1 = scmp.lt.s32.totalorder %s33_s11, %s33_s11 }
   0x7   :  { %p43_p0 = scmp.ne.s32.totalorder %s33_s11, %s42_s12  ;;  %p48_p2 = scmp.lt.s32.totalorder %s42_s12, %s42_s12 }
   0x9   :  { %v10_v1 = vld [vmem:[#allocation2] sm:$0x3]   ;;  %p49_p3 = por %p48_p2, %p47_p1 }
   0xa   :  { %v22_v2 = vld [vmem:[#allocation2] sm:$0x3]   ;;  %11 = vrot.lane.b32.xlu0 %v10_v1, %s66_s0 }
   0xb   :  { %23 = vrot.lane.b32.xlu1 %v22_v2, %s67_s8  ;;  %v7_v3 = vld [vmem:[#allocation2] sm:$0x3]   ;;  %p50_p4 = pnand %p49_p3, %p43_p0 }
   0xc   :  { %v16_v4 = vld [vmem:[#allocation2] sm:$0x3]   ;;  %9 = vst.msk [vmem:[#allocation0] ss:$4 sm:$0x3] %vm8_vm0, %v7_v3  }
   0xe   :  { %17 = vrot.lane.b32.xlu0 %v16_v4, %s68_s9 }
  0x7c   :  { %v12_v5 = vpop.permute.xlu0 %11  }
  0x7d   :  { %v24_v6 = vpop.permute.xlu1 %23   ;;  %15 = vst.msk [vmem:[#allocation0 + $0x1] ss:$4 sm:$0x3] %vm8_vm0, %v12_v5  }
  0x7e   :  { %27 = vst.msk [vmem:[#allocation0 + $0x3] ss:$4 sm:$0x3] %vm8_vm0, %v24_v6  }
  0x80   :  { %v18_v7 = vpop.permute.xlu0 %17  }
  0x81   :  { %21 = vst.msk [vmem:[#allocation0 + $0x2] ss:$4 sm:$0x3] %vm8_vm0, %v18_v7  }
  0x82   :  { %53 = shalt.err (!%p50_p4)
}
  0x83   :  { %s54_s15 = scalar_lea.hbm %s96_s1, 128 }
  0x84   :  { %p55_p5 = scmp.ne.s32.totalorder %s96_s1, %s54_s15  ;;  %p58_p6 = scmp.lt.u32.totalorder %s54_s15, %s96_s1 }
  0x86   :  { %p60_p7 = pnand %p58_p6, %p55_p5 }
  0x88   :  { %63 = shalt.err (!%p60_p7)
}
  0x89   :  { %35 = dma.vmem_to_hbm [thread:$0]  %s33_s11, 128, %s96_s1, [#allocation1]  }
  0x8a   :  { %64 = dma.done.wait [#allocation1], 128  }
  0x8b   :  { %65 = vsyncadd [#allocation1], 4294967168 }
  0x8c   :  { %37 = vsyncpa [#allocation1], 1 }

// kernel: simple_conv_net_forward.1
= control target key start
LH: loop header
LB: loop body
LE: loop exit
PB: predicated region body
PF: predicated region fallthrough
CT: control target
= control target key end

     0   :  { %s28965_s0 = inlined_call_operand.vmem [shape: f32[2,528,12], index: 0, kind: input, shape index: {}]   ;;  %s28966_s1 = inlined_call_operand.hbm [shape: f32[9,12,128], index: 1, kind: input, shape index: {}]   ;;  %s28967_s2 = inlined_call_operand.vmem [shape: f32[9,128,128], index: 2, kind: input, shape index: {}]   ;;  %s28968_s3 = inlined_call_operand.vmem [shape: f32[9,128,128], index: 3, kind: input, shape index: {}]   ;;  %s28969_s4 = inlined_call_operand.vmem [shape: f32[9,128,128], index: 4, kind: input, shape index: {}]   ;;  %s28970_s5 = inlined_call_operand.vmem [shape: f32[1,128], index: 5, kind: input, shape index: {}]   ;;  %s28971_s6 = inlined_call_operand.vmem [shape: f32[1,128], index: 6, kind: input, shape index: {}]   ;;  %s28972_s7 = inlined_call_operand.vmem [shape: f32[100,451], index: 7, kind: input, shape index: {}]   ;;  %s28973_s8 = inlined_call_operand.hbm [shape: f32[224,100], index: 8, kind: input, shape index: {}]   ;;  %s28974_s9 = inlined_call_operand.vmem [shape: f32[36,171], index: 9, kind: input, shape index: {}]   ;;  %s28975_s10 = inlined_call_operand.hbm [shape: f32[160,36], index: 10, kind: input, shape index: {}]   ;;  %s28976_s11 = inlined_call_operand.vmem [shape: f32[16,103], index: 11, kind: input, shape index: {}]   ;;  %s28977_s12 = inlined_call_operand.hbm [shape: f32[64,16], index: 12, kind: input, shape index: {}]   ;;  %s28978_s13 = inlined_call_operand.hbm [shape: f32[9,37], index: 13, kind: input, shape index: {}]   ;;  %s28979_s14 = inlined_call_operand.hbm [shape: f32[9,128,128], index: 14, kind: input, shape index: {}]   ;;  %s28980_s15 = inlined_call_operand.vmem [shape: f32[1,128], index: 15, kind: input, shape index: {}]   ;;  %s28981_s16 = inlined_call_operand.vmem [shape: f32[2,1,128], index: 16, kind: output, shape index: {}]  }
   0x1   :  { %29378 = sst [smem:[#allocation133_spill]] %s28965_s0 }
   0x2   :  { %29379 = sst [smem:[#allocation134_spill]] %s28969_s4 }
   0x3   :  { %29380 = sst [smem:[#allocation135_spill]] %s28976_s11 }
   0x4   :  { %29381 = sst [smem:[#allocation136_spill]] %s28980_s15 }
   0x5   :  { %29382 = sst [smem:[#allocation137_spill]] %s28981_s16 }
   0x6   :  { %21 = vsyncpa [#allocation3], 0 }
   0x7   :  { %22 = vsyncpa [#allocation5], 0 }
   0x8   :  { %23 = vsyncpa [#allocation8], 0 }
   0x9   :  { %24 = vsyncpa [#allocation11], 0  ;;  %s22148_s21 = smov 0  }
   0xa LB: > { %29383 = sst [smem:[#allocation16_spill]] %s22049_s21  ;;  %s22154_s22 = sadd.s32 4294967295, %s22049_s21   ;;  %s22049_s21 = sphi %s22148_s21, %s30_s21  }
   0xb   : > { %p13768_p0 = scmp.ge.s32.totalorder %s22049_s21, 1  ;;  %p402_p1 = scmp.lt.s32.totalorder %s22049_s21, 3 }
   0xc   : > { %p28985_p2 = scmp.eq.s32.totalorder %s22154_s22, 0  ;;  %s22051_s24 = smov [#allocation4]  }
   0xd   : > { %p22159_p3 = pnand %p13768_p0, %p402_p1  ;;  %s445_s25 = sshll.u32 %s22051_s24, 4  ;;  %s22163_s25 = int_to_ptr.vmem [resolvable:$true] %s445_s25 }
   0xe   : > { %s22052_s26 = smov [#allocation7]   ;;  %s22053_s29 = smov [#allocation2]  }
   0xf   : > { %s29384_s23 = scalar_select %p22159_p3, 1, 0 }
  0x10   : > { %p21740_p4 = pneg %p22159_p3  ;;  %s477_s27 = sshll.u32 %s22052_s26, 4  ;;  %s22167_s27 = int_to_ptr.vmem [resolvable:$true] %s477_s27 }
  0x11   : > { %s414_s30 = sshll.u32 %s22053_s29, 4  ;;  %s22054_s0 = smov [#allocation6]   ;;  %s22175_s30 = int_to_ptr.vmem [resolvable:$true] %s414_s30 }
  0x12   : > { %p22171_p5 = pnand %p28985_p2, %p21740_p4  ;;  %s22177_s17 = sshll.u32 %s22054_s0, 4  ;;  %s462_s17 = int_to_ptr.vmem [resolvable:$true] %s22177_s17 }
  0x13   : > { %s21859_s20 = scalar_lea.hbm %s28973_s8, 3584 }
  0x14   : > { %p21860_p6 = scmp.ne.s32.totalorder %s28973_s8, %s21859_s20  ;;  %p22187_p7 = pneg %p22171_p5 }
  0x15   : > { %p21866_p10 = scmp.lt.u32.totalorder %s21859_s20, %s28973_s8 }
  0x16   : > { %p21862_p8 = pnand %p22187_p7, %p21860_p6 }
  0x18   : > { %p21863_p9 = pneg %p21862_p8 }
  0x1a   : > { %p21868_p11 = pnand %p21866_p10, %p21863_p9 }
  0x1c   : > { %21871 = shalt.err (!%p21868_p11)
}
  0x1d   : > { %s21872_s18 = scalar_lea.vmem %s22163_s25, 3584  ;;  %p21880_p1 = scmp.lt.s32.totalorder %s22163_s25, %s22163_s25 }
  0x1e   : > { %p21873_p12 = scmp.ne.s32.totalorder %s22163_s25, %s21872_s18  ;;  %p21881_p4 = scmp.lt.s32.totalorder %s21872_s18, %s21872_s18 }
  0x20   : > { %p21875_p13 = pnand %p21873_p12, %p22187_p7  ;;  %p21882_p6 = por %p21881_p4, %p21880_p1 }
  0x22   : > { %p21876_p0 = pneg %p21875_p13 }
  0x24   : > { %p21883_p8 = pnand %p21882_p6, %p21876_p0 }
  0x26   : > { %21886 = shalt.err (!%p21883_p8)
}
  0x27   : > { %s22055_s19 = smov 128   ;;  %s22056_s20 = smov 8  }
  0x28   : > { %21746 = dma.hbm_to_vmem [thread:$0]  (!%p22171_p5), %s28973_s8, 3584, %s22163_s25, [#allocation5], %s22055_s19, %s22055_s19, %s22056_s20  }
  0x29   : > { %s21887_s18 = scalar_lea.hbm %s28977_s12, 1024 }
  0x2a   : > { %p21888_p9 = scmp.ne.s32.totalorder %s28977_s12, %s21887_s18  ;;  %p21894_p12 = scmp.lt.u32.totalorder %s21887_s18, %s28977_s12 }
  0x2c   : > { %p21890_p10 = pnand %p21888_p9, %p22187_p7 }
  0x2e   : > { %p21891_p11 = pneg %p21890_p10 }
  0x30   : > { %p21896_p13 = pnand %p21894_p12, %p21891_p11 }
  0x32   : > { %21899 = shalt.err (!%p21896_p13)
}
  0x33   : > { %s21900_s25 = scalar_lea.vmem %s22167_s27, 1024  ;;  %p21908_p6 = scmp.lt.s32.totalorder %s22167_s27, %s22167_s27 }
  0x34   : > { %p21901_p0 = scmp.ne.s32.totalorder %s22167_s27, %s21900_s25  ;;  %p21909_p8 = scmp.lt.s32.totalorder %s21900_s25, %s21900_s25 }
  0x36   : > { %p21903_p1 = pnand %p21901_p0, %p22187_p7  ;;  %p21910_p9 = por %p21909_p8, %p21908_p6 }
  0x38   : > { %p21904_p4 = pneg %p21903_p1 }
  0x3a   : > { %p21911_p10 = pnand %p21910_p9, %p21904_p4 }
  0x3c   : > { %21914 = shalt.err (!%p21911_p10)
}
  0x3d   : > { %21752 = dma.hbm_to_vmem [thread:$0]  (!%p22171_p5), %s28977_s12, 1024, %s22167_s27, [#allocation8], %s22055_s19, %s22055_s19, %s22056_s20  }
  0x3e   : > { %s21915_s24 = scalar_lea.hbm %s28966_s1, 2304 }
  0x3f   : > { %p21916_p11 = scmp.ne.s32.totalorder %s28966_s1, %s21915_s24  ;;  %p21922_p0 = scmp.lt.u32.totalorder %s21915_s24, %s28966_s1 }
  0x41   : > { %p21918_p12 = pnand %p21916_p11, %p22187_p7 }
  0x43   : > { %p21919_p13 = pneg %p21918_p12 }
  0x45   : > { %p21924_p1 = pnand %p21922_p0, %p21919_p13 }
  0x47   : > { %21927 = shalt.err (!%p21924_p1)
}
  0x48   : > { %s21928_s27 = scalar_lea.vmem %s22175_s30, 2304  ;;  %p21936_p9 = scmp.lt.s32.totalorder %s22175_s30, %s22175_s30 }
  0x49   : > { %p21929_p4 = scmp.ne.s32.totalorder %s22175_s30, %s21928_s27  ;;  %p21937_p10 = scmp.lt.s32.totalorder %s21928_s27, %s21928_s27 }
  0x4b   : > { %p21931_p6 = pnand %p21929_p4, %p22187_p7  ;;  %p21938_p11 = por %p21937_p10, %p21936_p9 }
  0x4d   : > { %p21932_p8 = pneg %p21931_p6 }
  0x4f   : > { %p21939_p12 = pnand %p21938_p11, %p21932_p8 }
  0x51   : > { %21942 = shalt.err (!%p21939_p12)
}
  0x52   : > { %21743 = dma.hbm_to_vmem [thread:$0]  (!%p22171_p5), %s28966_s1, 2304, %s22175_s30, [#allocation3], %s22055_s19, %s22055_s19, %s22056_s20  }
  0x53   : > { %s21943_s16 = scalar_lea.hbm %s28975_s10, 2560 }
  0x54   : > { %p21944_p13 = scmp.ne.s32.totalorder %s28975_s10, %s21943_s16  ;;  %p21950_p4 = scmp.lt.u32.totalorder %s21943_s16, %s28975_s10 }
  0x56   : > { %p21946_p0 = pnand %p21944_p13, %p22187_p7 }
  0x58   : > { %p21947_p1 = pneg %p21946_p0 }
  0x5a   : > { %p21952_p6 = pnand %p21950_p4, %p21947_p1 }
  0x5c   : > { %21955 = shalt.err (!%p21952_p6)
}
  0x5d   : > { %s21956_s18 = scalar_lea.vmem %s462_s17, 2560  ;;  %p21964_p11 = scmp.lt.s32.totalorder %s462_s17, %s462_s17 }
  0x5e   : > { %p21957_p8 = scmp.ne.s32.totalorder %s462_s17, %s21956_s18  ;;  %p21965_p12 = scmp.lt.s32.totalorder %s21956_s18, %s21956_s18 }
  0x60   : > { %p21959_p9 = pnand %p21957_p8, %p22187_p7  ;;  %p21966_p2 = por %p21965_p12, %p21964_p11 }
  0x62   : > { %p21960_p10 = pneg %p21959_p9 }
  0x64   : > { %p21967_p3 = pnand %p21966_p2, %p21960_p10 }
  0x66   : > { %21970 = shalt.err (!%p21967_p3)
}
  0x67   : > { %21749 = dma.hbm_to_vmem [thread:$0]  (!%p22171_p5), %s28975_s10, 2560, %s462_s17, [#allocation5], %s22055_s19, %s22055_s19, %s22056_s20  }
  0x68   : > { %s22057_s25 = smov [#allocation9]   ;;  %s22058_s11 = smov [#allocation10]  }
  0x69   : > { %s490_s4 = sshll.u32 %s22057_s25, 4  ;;  %s503_s15 = sshll.u32 %s22058_s11, 4  ;;  %s491_s4 = int_to_ptr.vmem [resolvable:$true] %s490_s4  ;;  %s504_s15 = int_to_ptr.vmem [resolvable:$true] %s503_s15 }
  0x6a   : > { %s21971_s26 = scalar_lea.hbm %s28978_s13, 256 }
  0x6b   : > { %p21972_p2 = scmp.ne.s32.totalorder %s28978_s13, %s21971_s26  ;;  %p21978_p0 = scmp.lt.u32.totalorder %s21971_s26, %s28978_s13 }
  0x6d   : > { %p21974_p3 = pnand %p21972_p2, %p22187_p7 }
  0x6f   : > { %p21975_p13 = pneg %p21974_p3 }
  0x71   : > { %p21980_p1 = pnand %p21978_p0, %p21975_p13 }
  0x73   : > { %21983 = shalt.err (!%p21980_p1)
}
  0x74   : > { %s21984_s17 = scalar_lea.vmem %s491_s4, 256  ;;  %p21992_p9 = scmp.lt.s32.totalorder %s491_s4, %s491_s4 }
  0x75   : > { %p21985_p4 = scmp.ne.s32.totalorder %s491_s4, %s21984_s17  ;;  %p21993_p10 = scmp.lt.s32.totalorder %s21984_s17, %s21984_s17 }
  0x77   : > { %p21987_p6 = pnand %p21985_p4, %p22187_p7  ;;  %p21994_p11 = por %p21993_p10, %p21992_p9 }
  0x79   : > { %p21988_p8 = pneg %p21987_p6 }
  0x7b   : > { %p21995_p12 = pnand %p21994_p11, %p21988_p8 }
  0x7d   : > { %21998 = shalt.err (!%p21995_p12)
}
  0x7e   : > { %21755 = dma.hbm_to_vmem [thread:$0]  (!%p22171_p5), %s28978_s13, 256, %s491_s4, [#allocation8], %s22055_s19, %s22055_s19, %s22056_s20  }
  0x7f   : > { %s21999_s24 = scalar_lea.hbm %s28979_s14, 18432 }
  0x80   : > { %p22000_p2 = scmp.ne.s32.totalorder %s28979_s14, %s21999_s24  ;;  %p22006_p0 = scmp.lt.u32.totalorder %s21999_s24, %s28979_s14 }
  0x82   : > { %p22002_p3 = pnand %p22000_p2, %p22187_p7 }
  0x84   : > { %p22003_p13 = pneg %p22002_p3 }
  0x86   : > { %p22008_p1 = pnand %p22006_p0, %p22003_p13 }
  0x88   : > { %22011 = shalt.err (!%p22008_p1)
}
  0x89   : > { %s22012_s30 = scalar_lea.vmem %s504_s15, 18432  ;;  %p22020_p9 = scmp.lt.s32.totalorder %s504_s15, %s504_s15 }
  0x8a   : > { %p22013_p4 = scmp.ne.s32.totalorder %s504_s15, %s22012_s30  ;;  %p22021_p10 = scmp.lt.s32.totalorder %s22012_s30, %s22012_s30 }
  0x8c   : > { %p22015_p6 = pnand %p22013_p4, %p22187_p7  ;;  %p22022_p11 = por %p22021_p10, %p22020_p9 }
  0x8e   : > { %p22016_p8 = pneg %p22015_p6 }
  0x90   : > { %p22023_p12 = pnand %p22022_p11, %p22016_p8 }
  0x92   : > { %22026 = shalt.err (!%p22023_p12)
}
  0x93   : > { %21758 = dma.hbm_to_vmem [thread:$0]  (!%p22171_p5), %s28979_s14, 18432, %s504_s15, [#allocation11], %s22055_s19, %s22055_s19, %s22056_s20  }
  0x94   : > { %p29387_p2 = scmp.ne.s32.totalorder %s29384_s23, 0 }
  0x96   : > { %530 = sbr.rel (%p29387_p2) target bundleno = 5808 (0x16b0), region = 84 }
  0x9d   : > { %p29388_p7 = scmp.eq.s32.totalorder %s22154_s22, 0 }
  0x9f   : > { %22032 = dma.done.wait (%p29388_p7), [#allocation3], 2304   ;;  %p29389_p3 = pmov %p29388_p7 }
  0xa1   : > { %22034 = vsyncadd (%p29389_p3), [#allocation3], 4294964992  ;;  %p29390_p13 = pmov %p29389_p3 }
  0xa2   : > { %p29391_p0 = pmov %p29389_p3 }
  0xa3   : > { %22036 = dma.done.wait (%p29390_p13), [#allocation5], 6144  }
  0xa4   : > { %22038 = vsyncadd (%p29391_p0), [#allocation5], 4294961152  ;;  %p29392_p1 = pmov %p29391_p0 }
  0xa5   : > { %p29393_p5 = pmov %p29391_p0 }
  0xa6   : > { %22040 = dma.done.wait (%p29392_p1), [#allocation8], 1280  }
  0xa7   : > { %22042 = vsyncadd (%p29393_p5), [#allocation8], 4294966016  ;;  %p29394_p4 = pmov %p29391_p0 }
  0xa8   : > { %p29395_p6 = pmov %p29391_p0 }
  0xa9   : > { %22044 = dma.done.wait (%p29394_p4), [#allocation11], 18432  }
  0xaa   : > { %22046 = vsyncadd (%p29395_p6), [#allocation11], 4294948864  ;;  %p598_p8 = scmp.lt.s32.totalorder %s22154_s22, 1  ;;  %vm980_vm0 = vcmask 1043456   ;;  %vm22059_vm1 = vmmov 1   ;;  %s29398_s19 = sld [smem:[#allocation133_spill]] }
  0xab   : > { %vm22352_vm2 = vmpackc.low %vm980_vm0, %vm22059_vm1  ;;  %v677_v1 = vld [vmem:[#allocation2 + $0x10] sm:$0xff]  ;;  %v678_v2 = vld [vmem:[#allocation2 + $0x18] sm:$0xf]  ;;  %vm739_vm3 = vcmask 1046528   ;;  %vm859_vm4 = vcmask 97280   ;;  %vm1840_vm5 = vcmask 1045504  }
  0xac   : > { %s30123_s22 = smov (!%p598_p8, %s22154_s22), 1  ;;  %v19521_v4 = vpack.c.bf16 %v678_v2, %v677_v1  ;;  %v674_v21 = vld [vmem:[#allocation2] sm:$0xff]  ;;  %v675_v22 = vld [vmem:[#allocation2 + $0x8] sm:$0xf]  ;;  %vm6010_vm6 = vcmask 1042432   ;;  %vm5970_vm7 = vcmask 547840  }
  0xad   : > { %s21715_s21 = smul.u32 528, %s30123_s22  ;;  %v19527_v29 = vpack.c.bf16 %v675_v22, %v674_v21  ;;  %v1838_v60 = vld [vmem:[#allocation2 + $0x20] sm:$0xff]  ;;  %v1839_v61 = vld [vmem:[#allocation2 + $0x28] sm:$0xf]  ;;  %vm6302_vm8 = vcmask 818176   ;;  %vm9107_vm9 = vcmask 351232   ;;  %vm19987_vm10 = vmpackc.low %vm6010_vm6, %vm22059_vm1 }
  0xae   : > { %19523 = vmatprep.subr.msk.bf16.mxu0 %vm22352_vm2, %v19521_v4  ;;  %v22517_v1 = vpack.c.bf16 %v1839_v61, %v1838_v60  ;;  %vm9236_vm11 = vcmask 293888   ;;  %vm22062_vm12 = vmmov 0   ;;  %s30112_s0 = sld [smem:[#allocation135_spill]]  ;;  %vm11329_vm13 = vcmask 842752   ;;  %s30119_s16 = sld [smem:[#allocation136_spill]] }
  0xaf   : > { %19526 = vmatpush3.bf16.msk.msra.mxu0 %vm22352_vm2, %v19521_v4  ;;  %vm11422_vm14 = vcmask 130048   ;;  %vm12765_vm15 = vcmask 302080   ;;  %s30120_s29 = sld [smem:[#allocation137_spill]] }
  0xb0   : > { %s22359_s20 = scalar_lea.vmem %s29398_s19, %s21715_s21  ;;  %19529 = vmatprep.subr.msk.bf16.mxu0 %vm22352_vm2, %v19527_v29 }
  0xb1   : > { %v22362_v3 = vld [vmem:[%s22359_s20] sm:$0xff]  ;;  %v22365_v5 = vld [vmem:[%s22359_s20 + $0x8] sm:$0xff]  ;;  %v22369_v7 = vld [vmem:[%s22359_s20 + $0x10] sm:$0xff] }
  0xb2   : > { %v740_v6 = vrot.slane %v22362_v3, 1  ;;  %v22372_v8 = vld [vmem:[%s22359_s20 + $0x18] sm:$0xff]  ;;  %v741_v9 = vrot.slane %v22365_v5, 1  ;;  %v743_v10 = vrot.slane %v22369_v7, 1  ;;  %v22378_v12 = vld [vmem:[%s22359_s20 + $0x20] sm:$0xff]  ;;  %v22381_v13 = vld [vmem:[%s22359_s20 + $0x28] sm:$0xff] }
  0xb3   : > { %29399 = vst [vmem:[#allocation17_spill] sm:$0xff] %v22372_v8  ;;  %v745_v11 = vrot.slane %v22372_v8, 1  ;;  %v747_v16 = vrot.slane %v22378_v12, 1  ;;  %v749_v18 = vrot.slane %v22381_v13, 1  ;;  %v22394_v19 = vld [vmem:[%s22359_s20 + $0x30] sm:$0xff]  ;;  %v22397_v20 = vld [vmem:[%s22359_s20 + $0x38] sm:$0xff] }
  0xb4   : > { %v742_v14 = vsel %vm739_vm3, %v740_v6, %v741_v9  ;;  %v744_v15 = vsel %vm739_vm3, %v741_v9, %v743_v10  ;;  %v751_v24 = vrot.slane %v22394_v19, 1  ;;  %v753_v26 = vrot.slane %v22397_v20, 1  ;;  %v22410_v27 = vld [vmem:[%s22359_s20 + $0x40] sm:$0xff]  ;;  %v22413_v28 = vld [vmem:[%s22359_s20 + $0x48] sm:$0xff]  ;;  %v22430_v34 = vld [vmem:[%s22359_s20 + $0x50] sm:$0xff] }
  0xb5   : > { %16524 = vmatprep.mubr.msk.f32.mxu0 %vm859_vm4, %v742_v14  ;;  %v746_v17 = vsel %vm739_vm3, %v743_v10, %v745_v11  ;;  %v22402_v23 = vsel %vm739_vm3, %v745_v11, %v747_v16  ;;  %v22406_v25 = vsel %vm739_vm3, %v747_v16, %v749_v18  ;;  %v755_v31 = vrot.slane %v22410_v27, 1  ;;  %v22435_v35 = vld [vmem:[%s22359_s20 + $0x58] sm:$0xff]  ;;  %v22450_v40 = vld [vmem:[%s22359_s20 + $0x60] sm:$0xff]  ;;  %v22453_v41 = vld [vmem:[%s22359_s20 + $0x68] sm:$0xff]  ;;  %s605_s18 = scalar_lea.vmem %s30120_s29, %s30123_s22 }
  0xb6   : > { %16525 = vmatmul.mubr.msk.f32.vlgmr.msra.gmra.mrb[0].mxu0 %vm859_vm4, %v744_v15  ;;  %29400 = vst [vmem:[#allocation18_spill] sm:$0xff] %v22402_v23  ;;  %29401 = vst [vmem:[#allocation19_spill] sm:$0xff] %v22406_v25  ;;  %v22420_v30 = vsel %vm739_vm3, %v749_v18, %v751_v24  ;;  %v22426_v32 = vsel %vm739_vm3, %v751_v24, %v753_v26  ;;  %v757_v33 = vrot.slane %v22413_v28, 1  ;;  %v759_v37 = vrot.slane %v22430_v34, 1  ;;  %v22468_v46 = vld [vmem:[%s22359_s20 + $0x70] sm:$0xff]  ;;  %v22471_v47 = vld [vmem:[%s22359_s20 + $0x78] sm:$0xff] }
  0xb7   : > { %16527 = vmatprep.mubr.msk.f32.mxu0 %vm859_vm4, %v746_v17  ;;  %29402 = vst [vmem:[#allocation20_spill] sm:$0xff] %v22420_v30  ;;  %29403 = vst [vmem:[#allocation21_spill] sm:$0xff] %v22426_v32  ;;  %19532 = vmatpush3.bf16.msk.msra.mxu0 %vm22352_vm2, %v19527_v29  ;;  %v22442_v36 = vsel %vm739_vm3, %v753_v26, %v755_v31  ;;  %v761_v39 = vrot.slane %v22435_v35, 1  ;;  %v763_v43 = vrot.slane %v22450_v40, 1  ;;  %v765_v45 = vrot.slane %v22453_v41, 1  ;;  %v22486_v52 = vld [vmem:[%s22359_s20 + $0x80] sm:$0xff] }
  0xb8   : > { %29404 = vst [vmem:[#allocation22_spill] sm:$0xff] %v22442_v36  ;;  %v22446_v38 = vsel %vm739_vm3, %v755_v31, %v757_v33  ;;  %v22460_v42 = vsel %vm739_vm3, %v757_v33, %v759_v37  ;;  %v767_v49 = vrot.slane %v22468_v46, 1  ;;  %v769_v51 = vrot.slane %v22471_v47, 1  ;;  %v22489_v53 = vld [vmem:[%s22359_s20 + $0x88] sm:$0xff]  ;;  %v22504_v58 = vld [vmem:[%s22359_s20 + $0x90] sm:$0xff]  ;;  %v22507_v59 = vld [vmem:[%s22359_s20 + $0x98] sm:$0xff]  ;;  %19535 = vmatprep.subr.msk.bf16.mxu0 %vm22352_vm2, %v22517_v1 }
  0xb9   : > { %29405 = vst [vmem:[#allocation23_spill] sm:$0xff] %v22446_v38  ;;  %29406 = vst [vmem:[#allocation24_spill] sm:$0xff] %v22460_v42  ;;  %v22464_v44 = vsel %vm739_vm3, %v759_v37, %v761_v39  ;;  %v22478_v48 = vsel %vm739_vm3, %v761_v39, %v763_v43  ;;  %v22482_v50 = vsel %vm739_vm3, %v763_v43, %v765_v45  ;;  %v771_v55 = vrot.slane %v22486_v52, 1  ;;  %v22524_v6 = vld [vmem:[%s22359_s20 + $0xa0] sm:$0xff]  ;;  %v22527_v9 = vld [vmem:[%s22359_s20 + $0xa8] sm:$0xff] }
  0xba   : > { %16528 = vmatmul.mubr.msk.f32.gmra.mrb[2].mxu0 %vm859_vm4, %v22402_v23  ;;  %29407 = vst [vmem:[#allocation25_spill] sm:$0xff] %v22464_v44  ;;  %29408 = vst [vmem:[#allocation26_spill] sm:$0xff] %v22478_v48  ;;  %v22496_v54 = vsel %vm739_vm3, %v765_v45, %v767_v49  ;;  %v22500_v56 = vsel %vm739_vm3, %v767_v49, %v769_v51  ;;  %v773_v57 = vrot.slane %v22489_v53, 1  ;;  %v775_v63 = vrot.slane %v22504_v58, 1  ;;  %v22545_v16 = vld [vmem:[%s22359_s20 + $0xb0] sm:$0xff]  ;;  %v22548_v17 = vld [vmem:[%s22359_s20 + $0xb8] sm:$0xff] }
  0xbb   : > { %16530 = vmatprep.mubr.msk.f32.mxu0 %vm859_vm4, %v22406_v25  ;;  %29409 = vst [vmem:[#allocation27_spill] sm:$0xff] %v22482_v50  ;;  %29410 = vst [vmem:[#allocation28_spill] sm:$0xff] %v22489_v53  ;;  %v22514_v62 = vsel %vm739_vm3, %v769_v51, %v771_v55  ;;  %v777_v4 = vrot.slane %v22507_v59, 1  ;;  %v779_v11 = vrot.slane %v22524_v6, 1  ;;  %v781_v15 = vrot.slane %v22527_v9, 1  ;;  %v22563_v26 = vld [vmem:[%s22359_s20 + $0xc0] sm:$0xff] }
  0xbc   : > { %29411 = vst [vmem:[#allocation29_spill] sm:$0xff] %v22496_v54  ;;  %29412 = vst [vmem:[#allocation30_spill] sm:$0xff] %v22500_v56  ;;  %v22520_v2 = vsel %vm739_vm3, %v771_v55, %v773_v57  ;;  %v22537_v10 = vsel %vm739_vm3, %v773_v57, %v775_v63  ;;  %v783_v21 = vrot.slane %v22545_v16, 1  ;;  %v785_v24 = vrot.slane %v22548_v17, 1  ;;  %v22566_v29 = vld [vmem:[%s22359_s20 + $0xc8] sm:$0xff]  ;;  %v22581_v43 = vld [vmem:[%s22359_s20 + $0xd0] sm:$0xff] }
  0xbd   : > { %29413 = vst [vmem:[#allocation31_spill] sm:$0xff] %v22514_v62  ;;  %29414 = vst [vmem:[#allocation32_spill] sm:$0xff] %v22520_v2  ;;  %v22541_v14 = vsel %vm739_vm3, %v775_v63, %v777_v4  ;;  %v22555_v18 = vsel %vm739_vm3, %v777_v4, %v779_v11  ;;  %v22559_v22 = vsel %vm739_vm3, %v779_v11, %v781_v15  ;;  %v787_v33 = vrot.slane %v22563_v26, 1  ;;  %v22584_v45 = vld [vmem:[%s22359_s20 + $0xd8] sm:$0xff]  ;;  %v22599_v60 = vld [vmem:[%s22359_s20 + $0xe0] sm:$0xff] }
  0xbe   : > { %16531 = vmatmul.mubr.msk.f32.gmra.mrb[4].mxu0 %vm859_vm4, %v22420_v30  ;;  %29415 = vst [vmem:[#allocation33_spill] sm:$0xff] %v22537_v10  ;;  %29416 = vst [vmem:[#allocation34_spill] sm:$0xff] %v22541_v14  ;;  %v22573_v31 = vsel %vm739_vm3, %v781_v15, %v783_v21  ;;  %v22577_v37 = vsel %vm739_vm3, %v783_v21, %v785_v24  ;;  %v789_v39 = vrot.slane %v22566_v29, 1  ;;  %v791_v51 = vrot.slane %v22581_v43, 1  ;;  %v22602_v61 = vld [vmem:[%s22359_s20 + $0xe8] sm:$0xff]  ;;  %v22617_v21 = vld [vmem:[%s22359_s20 + $0xf0] sm:$0xff] }
  0xbf   : > { %16533 = vmatprep.mubr.msk.f32.mxu0 %vm859_vm4, %v22426_v32  ;;  %29417 = vst [vmem:[#allocation35_spill] sm:$0xff] %v22555_v18  ;;  %29418 = vst [vmem:[#allocation36_spill] sm:$0xff] %v22559_v22  ;;  %v22591_v49 = vsel %vm739_vm3, %v785_v24, %v787_v33  ;;  %v793_v57 = vrot.slane %v22584_v45, 1  ;;  %v795_v4 = vrot.slane %v22599_v60, 1  ;;  %v797_v15 = vrot.slane %v22602_v61, 1  ;;  %v22620_v24 = vld [vmem:[%s22359_s20 + $0xf8] sm:$0xff] }
  0xc0   : > { %29419 = vst [vmem:[#allocation37_spill] sm:$0xff] %v22573_v31  ;;  %29420 = vst [vmem:[#allocation38_spill] sm:$0xff] %v22577_v37  ;;  %v22595_v55 = vsel %vm739_vm3, %v787_v33, %v789_v39  ;;  %v22609_v63 = vsel %vm739_vm3, %v789_v39, %v791_v51  ;;  %v799_v39 = vrot.slane %v22617_v21, 1  ;;  %v22782_v32 = vld [vmem:[%s22359_s20 + $0x188] sm:$0xff]  ;;  %v22797_v30 = vld [vmem:[%s22359_s20 + $0x190] sm:$0xff] }
  0xc1   : > { %29421 = vst [vmem:[#allocation39_spill] sm:$0xff] %v22591_v49  ;;  %29422 = vst [vmem:[#allocation40_spill] sm:$0xff] %v22595_v55  ;;  %v22613_v11 = vsel %vm739_vm3, %v791_v51, %v793_v57  ;;  %v22627_v33 = vsel %vm739_vm3, %v793_v57, %v795_v4  ;;  %v22631_v51 = vsel %vm739_vm3, %v795_v4, %v797_v15  ;;  %v22800_v25 = vld [vmem:[%s22359_s20 + $0x198] sm:$0xff]  ;;  %v22815_v23 = vld [vmem:[%s22359_s20 + $0x1a0] sm:$0xff] }
  0xc2   : > { %16534 = vmatmul.mubr.msk.f32.gmra.mrb[6].mxu0 %vm859_vm4, %v22442_v36  ;;  %29423 = vst [vmem:[#allocation41_spill] sm:$0xff] %v22609_v63  ;;  %29424 = vst [vmem:[#allocation42_spill] sm:$0xff] %v22613_v11  ;;  %v22645_v57 = vsel %vm739_vm3, %v797_v15, %v799_v39  ;;  %v22779_v36 = vld [vmem:[%s22359_s20 + $0x180] sm:$0xff] }
  0xc3   : > { %16536 = vmatprep.mubr.msk.f32.mxu0 %vm859_vm4, %v22446_v38  ;;  %29425 = vst [vmem:[#allocation43_spill] sm:$0xff] %v22627_v33  ;;  %29426 = vst [vmem:[#allocation44_spill] sm:$0xff] %v22631_v51  ;;  %v22764_v38 = vld [vmem:[%s22359_s20 + $0x178] sm:$0xff] }
  0xc4   : > { %29427 = vst [vmem:[#allocation45_spill] sm:$0xff] %v22645_v57  ;;  %29443 = vst [vmem:[#allocation61_spill] sm:$0xff] %v22782_v32 }
  0xc5   : > { %29446 = vst [vmem:[#allocation64_spill] sm:$0xff] %v22797_v30  ;;  %29447 = vst [vmem:[#allocation65_spill] sm:$0xff] %v22800_v25 }
  0xc6   : > { %16537 = vmatmul.mubr.msk.f32.gmra.mrb[8].mxu0 %vm859_vm4, %v22460_v42  ;;  %v22761_v42 = vld [vmem:[%s22359_s20 + $0x170] sm:$0xff]  ;;  %29450 = vst [vmem:[#allocation68_spill] sm:$0xff] %v22815_v23 }
  0xc7   : > { %16539 = vmatprep.mubr.msk.f32.mxu0 %vm859_vm4, %v22464_v44  ;;  %v22746_v44 = vld [vmem:[%s22359_s20 + $0x168] sm:$0xff] }
  0xca   : > { %16540 = vmatmul.mubr.msk.f32.gmra.mrb[10].mxu0 %vm859_vm4, %v22478_v48  ;;  %v22743_v48 = vld [vmem:[%s22359_s20 + $0x160] sm:$0xff] }
  0xcb   : > { %16542 = vmatprep.mubr.msk.f32.mxu0 %vm859_vm4, %v22482_v50  ;;  %v22728_v50 = vld [vmem:[%s22359_s20 + $0x158] sm:$0xff] }
  0xce   : > { %16543 = vmatmul.mubr.msk.f32.gmra.mrb[12].mxu0 %vm859_vm4, %v22496_v54  ;;  %v22725_v54 = vld [vmem:[%s22359_s20 + $0x150] sm:$0xff] }
  0xcf   : > { %16545 = vmatprep.mubr.msk.f32.mxu0 %vm859_vm4, %v22500_v56  ;;  %v22710_v56 = vld [vmem:[%s22359_s20 + $0x148] sm:$0xff] }
  0xd2   : > { %16546 = vmatmul.mubr.msk.f32.gmra.mrb[14].mxu0 %vm859_vm4, %v22514_v62  ;;  %v22707_v62 = vld [vmem:[%s22359_s20 + $0x140] sm:$0xff] }
  0xd3   : > { %16548 = vmatprep.mubr.msk.f32.mxu0 %vm859_vm4, %v22520_v2  ;;  %v22692_v2 = vld [vmem:[%s22359_s20 + $0x138] sm:$0xff] }
  0xd6   : > { %16549 = vmatmul.mubr.msk.f32.gmra.mrb[16].mxu0 %vm859_vm4, %v22537_v10  ;;  %v22689_v10 = vld [vmem:[%s22359_s20 + $0x130] sm:$0xff] }
  0xd7   : > { %16551 = vmatprep.mubr.msk.f32.mxu0 %vm859_vm4, %v22541_v14  ;;  %v22674_v14 = vld [vmem:[%s22359_s20 + $0x128] sm:$0xff] }
  0xda   : > { %16552 = vmatmul.mubr.msk.f32.gmra.mrb[18].mxu0 %vm859_vm4, %v22555_v18  ;;  %v22671_v18 = vld [vmem:[%s22359_s20 + $0x120] sm:$0xff] }
  0xdb   : > { %16554 = vmatprep.mubr.msk.f32.mxu0 %vm859_vm4, %v22559_v22  ;;  %v22656_v22 = vld [vmem:[%s22359_s20 + $0x118] sm:$0xff] }
  0xde   : > { %16555 = vmatmul.mubr.msk.f32.gmra.mrb[20].mxu0 %vm859_vm4, %v22573_v31  ;;  %v22653_v31 = vld [vmem:[%s22359_s20 + $0x110] sm:$0xff] }
  0xdf   : > { %16557 = vmatprep.mubr.msk.f32.mxu0 %vm859_vm4, %v22577_v37  ;;  %v22638_v37 = vld [vmem:[%s22359_s20 + $0x108] sm:$0xff] }
  0xe2   : > { %16558 = vmatmul.mubr.msk.f32.gmra.mrb[22].mxu0 %vm859_vm4, %v22591_v49  ;;  %v22635_v49 = vld [vmem:[%s22359_s20 + $0x100] sm:$0xff] }
  0xe3   : > { %16560 = vmatprep.mubr.msk.f32.mxu0 %vm859_vm4, %v22595_v55  ;;  %v801_v55 = vrot.slane %v22620_v24, 1  ;;  %v803_v4 = vrot.slane %v22635_v49, 1 }
  0xe5   : > { %v22663_v15 = vsel %vm739_vm3, %v801_v55, %v803_v4 }
  0xe6   : > { %16561 = vmatmul.mubr.msk.f32.gmra.mrb[24].mxu0 %vm859_vm4, %v22609_v63  ;;  %v805_v63 = vrot.slane %v22638_v37, 1  ;;  %29429 = vst [vmem:[#allocation47_spill] sm:$0xff] %v22663_v15 }
  0xe7   : > { %16563 = vmatprep.mubr.msk.f32.mxu0 %vm859_vm4, %v22613_v11  ;;  %v22649_v11 = vsel %vm739_vm3, %v799_v39, %v801_v55  ;;  %v807_v39 = vrot.slane %v22653_v31, 1 }
  0xe8   : > { %29428 = vst [vmem:[#allocation46_spill] sm:$0xff] %v22649_v11 }
  0xe9   : > { %v22681_v55 = vsel %vm739_vm3, %v805_v63, %v807_v39 }
  0xea   : > { %16564 = vmatmul.mubr.msk.f32.gmra.mrb[26].mxu0 %vm859_vm4, %v22627_v33  ;;  %v809_v33 = vrot.slane %v22656_v22, 1  ;;  %29431 = vst [vmem:[#allocation49_spill] sm:$0xff] %v22681_v55 }
  0xeb   : > { %16566 = vmatprep.mubr.msk.f32.mxu0 %vm859_vm4, %v22631_v51  ;;  %v22667_v51 = vsel %vm739_vm3, %v803_v4, %v805_v63  ;;  %v811_v4 = vrot.slane %v22671_v18, 1 }
  0xec   : > { %29430 = vst [vmem:[#allocation48_spill] sm:$0xff] %v22667_v51 }
  0xed   : > { %v22699_v63 = vsel %vm739_vm3, %v809_v33, %v811_v4 }
  0xee   : > { %16567 = vmatmul.mubr.msk.f32.gmra.mrb[28].mxu0 %vm859_vm4, %v22645_v57  ;;  %v813_v57 = vrot.slane %v22674_v14, 1  ;;  %29433 = vst [vmem:[#allocation51_spill] sm:$0xff] %v22699_v63 }
  0xef   : > { %16569 = vmatprep.mubr.msk.f32.mxu0 %vm859_vm4, %v22649_v11  ;;  %v22685_v11 = vsel %vm739_vm3, %v807_v39, %v809_v33  ;;  %v815_v39 = vrot.slane %v22689_v10, 1 }
  0xf0   : > { %29432 = vst [vmem:[#allocation50_spill] sm:$0xff] %v22685_v11 }
  0xf1   : > { %v22717_v33 = vsel %vm739_vm3, %v813_v57, %v815_v39 }
  0xf2   : > { %16570 = vmatmul.mubr.msk.f32.gmra.mrb[30].mxu0 %vm859_vm4, %v22663_v15  ;;  %v817_v15 = vrot.slane %v22692_v2, 1  ;;  %29435 = vst [vmem:[#allocation53_spill] sm:$0xff] %v22717_v33 }
  0xf3   : > { %16572 = vmatprep.mubr.msk.f32.mxu0 %vm859_vm4, %v22667_v51  ;;  %v22703_v51 = vsel %vm739_vm3, %v811_v4, %v813_v57  ;;  %v819_v4 = vrot.slane %v22707_v62, 1 }
  0xf4   : > { %29434 = vst [vmem:[#allocation52_spill] sm:$0xff] %v22703_v51 }
  0xf5   : > { %v22735_v57 = vsel %vm739_vm3, %v817_v15, %v819_v4 }
  0xf6   : > { %16573 = vmatmul.mubr.msk.f32.gmra.mrb[32].mxu0 %vm859_vm4, %v22681_v55  ;;  %v821_v55 = vrot.slane %v22710_v56, 1  ;;  %29437 = vst [vmem:[#allocation55_spill] sm:$0xff] %v22735_v57 }
  0xf7   : > { %16575 = vmatprep.mubr.msk.f32.mxu0 %vm859_vm4, %v22685_v11  ;;  %v22721_v11 = vsel %vm739_vm3, %v815_v39, %v817_v15  ;;  %v823_v39 = vrot.slane %v22725_v54, 1 }
  0xf8   : > { %29436 = vst [vmem:[#allocation54_spill] sm:$0xff] %v22721_v11 }
  0xf9   : > { %v22753_v15 = vsel %vm739_vm3, %v821_v55, %v823_v39 }
  0xfa   : > { %16576 = vmatmul.mubr.msk.f32.gmra.mrb[34].mxu0 %vm859_vm4, %v22699_v63  ;;  %v825_v63 = vrot.slane %v22728_v50, 1  ;;  %29439 = vst [vmem:[#allocation57_spill] sm:$0xff] %v22753_v15 }
  0xfb   : > { %16578 = vmatprep.mubr.msk.f32.mxu0 %vm859_vm4, %v22703_v51  ;;  %v22739_v51 = vsel %vm739_vm3, %v819_v4, %v821_v55  ;;  %v827_v4 = vrot.slane %v22743_v48, 1 }
  0xfc   : > { %29438 = vst [vmem:[#allocation56_spill] sm:$0xff] %v22739_v51 }
  0xfd   : > { %v22771_v55 = vsel %vm739_vm3, %v825_v63, %v827_v4 }
  0xfe   : > { %16579 = vmatmul.mubr.msk.f32.gmra.mrb[36].mxu0 %vm859_vm4, %v22717_v33  ;;  %v829_v33 = vrot.slane %v22746_v44, 1  ;;  %29441 = vst [vmem:[#allocation59_spill] sm:$0xff] %v22771_v55 }
  0xff   : > { %16581 = vmatprep.mubr.msk.f32.mxu0 %vm859_vm4, %v22721_v11  ;;  %v22757_v11 = vsel %vm739_vm3, %v823_v39, %v825_v63  ;;  %v831_v39 = vrot.slane %v22761_v42, 1 }
 0x100   : > { %29440 = vst [vmem:[#allocation58_spill] sm:$0xff] %v22757_v11 }
 0x101   : > { %v22789_v63 = vsel %vm739_vm3, %v829_v33, %v831_v39 }
 0x102   : > { %16582 = vmatmul.mubr.msk.f32.gmra.mrb[38].mxu0 %vm859_vm4, %v22735_v57  ;;  %v833_v57 = vrot.slane %v22764_v38, 1  ;;  %29444 = vst [vmem:[#allocation62_spill] sm:$0xff] %v22789_v63 }
 0x103   : > { %16584 = vmatprep.mubr.msk.f32.mxu0 %vm859_vm4, %v22739_v51  ;;  %v22775_v51 = vsel %vm739_vm3, %v827_v4, %v829_v33  ;;  %v835_v4 = vrot.slane %v22779_v36, 1 }
 0x104   : > { %29442 = vst [vmem:[#allocation60_spill] sm:$0xff] %v22775_v51 }
 0x105   : > { %v22807_v33 = vsel %vm739_vm3, %v833_v57, %v835_v4 }
 0x106   : > { %16585 = vmatmul.mubr.msk.f32.gmra.mrb[40].mxu0 %vm859_vm4, %v22753_v15  ;;  %v837_v15 = vrot.slane %v22782_v32, 1  ;;  %29448 = vst [vmem:[#allocation66_spill] sm:$0xff] %v22807_v33  ;;  %v22818_v32 = vld [vmem:[%s22359_s20 + $0x1a8] sm:$0xff] }
 0x107   : > { %16587 = vmatprep.mubr.msk.f32.mxu0 %vm859_vm4, %v22757_v11  ;;  %v22793_v11 = vsel %vm739_vm3, %v831_v39, %v833_v57  ;;  %v839_v39 = vrot.slane %v22797_v30, 1  ;;  %29451 = vst [vmem:[#allocation69_spill] sm:$0xff] %v22818_v32  ;;  %v22836_v30 = vld [vmem:[%s22359_s20 + $0x1b8] sm:$0xff] }
 0x108   : > { %29445 = vst [vmem:[#allocation63_spill] sm:$0xff] %v22793_v11  ;;  %29455 = vst [vmem:[#allocation73_spill] sm:$0xff] %v22836_v30 }
 0x109   : > { %v22825_v57 = vsel %vm739_vm3, %v837_v15, %v839_v39 }
 0x10a   : > { %16588 = vmatmul.mubr.msk.f32.gmra.mrb[42].mxu0 %vm859_vm4, %v22771_v55  ;;  %v841_v55 = vrot.slane %v22800_v25, 1  ;;  %29452 = vst [vmem:[#allocation70_spill] sm:$0xff] %v22825_v57  ;;  %v22833_v25 = vld [vmem:[%s22359_s20 + $0x1b0] sm:$0xff] }
 0x10b   : > { %16590 = vmatprep.mubr.msk.f32.mxu0 %vm859_vm4, %v22775_v51  ;;  %v22811_v51 = vsel %vm739_vm3, %v835_v4, %v837_v15  ;;  %v843_v4 = vrot.slane %v22815_v23, 1  ;;  %29454 = vst [vmem:[#allocation72_spill] sm:$0xff] %v22833_v25  ;;  %v22854_v23 = vld [vmem:[%s22359_s20 + $0x1c8] sm:$0xff] }
 0x10c   : > { %29449 = vst [vmem:[#allocation67_spill] sm:$0xff] %v22811_v51  ;;  %29458 = vst [vmem:[#allocation76_spill] sm:$0xff] %v22854_v23 }
 0x10d   : > { %v22843_v15 = vsel %vm739_vm3, %v841_v55, %v843_v4 }
 0x10e   : > { %16591 = vmatmul.mubr.msk.f32.gmra.mrb[44].mxu0 %vm859_vm4, %v22789_v63  ;;  %v845_v63 = vrot.slane %v22818_v32, 1  ;;  %29456 = vst [vmem:[#allocation74_spill] sm:$0xff] %v22843_v15  ;;  %v22851_v32 = vld [vmem:[%s22359_s20 + $0x1c0] sm:$0xff] }
 0x10f   : > { %16593 = vmatprep.mubr.msk.f32.mxu0 %vm859_vm4, %v22793_v11  ;;  %v22829_v11 = vsel %vm739_vm3, %v839_v39, %v841_v55  ;;  %v847_v39 = vrot.slane %v22833_v25, 1  ;;  %v22872_v25 = vld [vmem:[%s22359_s20 + $0x1d8] sm:$0xff] }
 0x110   : > { %29453 = vst [vmem:[#allocation71_spill] sm:$0xff] %v22829_v11 }
 0x111   : > { %v22861_v55 = vsel %vm739_vm3, %v845_v63, %v847_v39  ;;  %v29651_v0 = vld [vmem:[#allocation70_spill] sm:$0xff] }
 0x112   : > { %16594 = vmatmul.mubr.msk.f32.gmra.mrb[46].mxu0 %vm859_vm4, %v22807_v33  ;;  %v849_v33 = vrot.slane %v22836_v30, 1  ;;  %29459 = vst [vmem:[#allocation77_spill] sm:$0xff] %v22861_v55  ;;  %v22869_v30 = vld [vmem:[%s22359_s20 + $0x1d0] sm:$0xff] }
 0x113   : > { %16596 = vmatprep.mubr.msk.f32.mxu0 %vm859_vm4, %v22811_v51  ;;  %v22847_v51 = vsel %vm739_vm3, %v843_v4, %v845_v63 }
 0x114   : > { %29457 = vst [vmem:[#allocation75_spill] sm:$0xff] %v22847_v51  ;;  %v22865_v4 = vsel %vm739_vm3, %v847_v39, %v849_v33 }
 0x115   : > { %29460 = vst [vmem:[#allocation78_spill] sm:$0xff] %v22865_v4 }
 0x116   : > { %16597 = vmatmul.mubr.msk.f32.gmra.mrb[48].mxu0 %vm859_vm4, %v22825_v57  ;;  %v853_v57 = vrot.slane %v22854_v23, 1 }
 0x117   : > { %16599 = vmatprep.mubr.msk.f32.mxu0 %vm859_vm4, %v22829_v11  ;;  %v851_v11 = vrot.slane %v22851_v32, 1 }
 0x119   : > { %v22879_v63 = vsel %vm739_vm3, %v849_v33, %v851_v11  ;;  %v22883_v39 = vsel %vm739_vm3, %v851_v11, %v853_v57  ;;  %v2510_v11 = vld [vmem:[#allocation2 + $0x38] sm:$0xf] }
 0x11a   : > { %16600 = vmatmul.mubr.msk.f32.gmra.mrb[50].mxu0 %vm859_vm4, %v22843_v15  ;;  %29461 = vst [vmem:[#allocation79_spill] sm:$0xff] %v22879_v63  ;;  %29462 = vst [vmem:[#allocation80_spill] sm:$0xff] %v22883_v39  ;;  %v22886_v15 = vrot.slane %v22872_v25, 1 }
 0x11b   : > { %16602 = vmatprep.mubr.msk.f32.mxu0 %vm859_vm4, %v22847_v51  ;;  %v855_v51 = vrot.slane %v22869_v30, 1 }
 0x11c   : > { %29463 = vst [vmem:[#allocation81_spill] sm:$0xff] %v22886_v15 }
 0x11d   : > { %v22897_v33 = vsel %vm739_vm3, %v855_v51, %v22886_v15 }
 0x11e   : > { %16603 = vmatmul.mubr.msk.f32.gmra.mrb[52].mxu0 %vm859_vm4, %v22861_v55  ;;  %v22893_v55 = vsel %vm739_vm3, %v853_v57, %v855_v51  ;;  %29465 = vst [vmem:[#allocation83_spill] sm:$0xff] %v22897_v33  ;;  %v29466_v57 = vld [vmem:[#allocation61_spill] sm:$0xff] }
 0x11f   : > { %16605 = vmatprep.mubr.msk.f32.mxu0 %vm859_vm4, %v22865_v4  ;;  %29464 = vst [vmem:[#allocation82_spill] sm:$0xff] %v22893_v55  ;;  %v1842_v4 = vrot.slane %v22365_v5, 2 }
 0x122   : > { %16606 = vmatmul.mubr.msk.f32.gmra.mrb[54].mxu0 %vm859_vm4, %v22879_v63  ;;  %v1841_v63 = vrot.slane %v22362_v3, 2 }
 0x123   : > { %16608 = vmatprep.mubr.msk.f32.mxu0 %vm859_vm4, %v22883_v39  ;;  %v29472_v39 = vld [vmem:[#allocation73_spill] sm:$0xff] }
 0x126   : > { %16609 = vmatmul.mubr.msk.f32.gmra.mrb[56].mxu0 %vm859_vm4, %v22893_v55  ;;  %v29471_v55 = vld [vmem:[#allocation72_spill] sm:$0xff] }
 0x127   : > { %16611 = vmatprep.mubr.msk.f32.mxu0 %vm859_vm4, %v22897_v33  ;;  %v29469_v33 = vld [vmem:[#allocation68_spill] sm:$0xff] }
 0x12a   : > { %16612 = vmatmul.mubr.msk.f32.gmra.mrb[58].mxu0 %vm859_vm4, %v22886_v15  ;;  %v29470_v15 = vld [vmem:[#allocation69_spill] sm:$0xff] }
 0x12b   : > { %16618 = vmatprep.mubr.msk.f32.mxu0 %vm859_vm4, %v22362_v3 }
 0x12e   : > { %16619 = vmatmul.mubr.msk.f32.vlgmr.msra.gmra.mrb[0].mxu0 %vm859_vm4, %v22365_v5  ;;  %v1848_v5 = vrot.slane %v22378_v12, 2 }
 0x12f   : > { %16621 = vmatprep.mubr.msk.f32.mxu0 %vm859_vm4, %v22369_v7  ;;  %19538 = vmatpush3.bf16.msk.msra.mxu0 %vm22352_vm2, %v22517_v1  ;;  %v2509_v1 = vld [vmem:[#allocation2 + $0x30] sm:$0xff] }
 0x130   : > { %v19539_v51 = vpack.c.bf16 %v2510_v11, %v2509_v1  ;;  %v29467_v1 = vld [vmem:[#allocation64_spill] sm:$0xff]  ;;  %v29468_v11 = vld [vmem:[#allocation65_spill] sm:$0xff] }
 0x132   : > { %16622 = vmatmul.mubr.msk.f32.gmra.mrb[2].mxu0 %vm859_vm4, %v22372_v8  ;;  %19541 = vmatprep.subr.msk.bf16.mxu0 %vm22352_vm2, %v19539_v51 }
 0x133   : > { %16624 = vmatprep.mubr.msk.f32.mxu0 %vm859_vm4, %v22378_v12 }
 0x136   : > { %16625 = vmatmul.mubr.msk.f32.gmra.mrb[4].mxu0 %vm859_vm4, %v22381_v13 }
 0x137   : > { %16627 = vmatprep.mubr.msk.f32.mxu0 %vm859_vm4, %v22394_v19 }
 0x13a   : > { %16628 = vmatmul.mubr.msk.f32.gmra.mrb[6].mxu0 %vm859_vm4, %v22397_v20 }
 0x13b   : > { %16630 = vmatprep.mubr.msk.f32.mxu0 %vm859_vm4, %v22410_v27 }
 0x13e   : > { %16631 = vmatmul.mubr.msk.f32.gmra.mrb[8].mxu0 %vm859_vm4, %v22413_v28 }
 0x13f   : > { %16633 = vmatprep.mubr.msk.f32.mxu0 %vm859_vm4, %v22430_v34 }
 0x142   : > { %16634 = vmatmul.mubr.msk.f32.gmra.mrb[10].mxu0 %vm859_vm4, %v22435_v35 }
 0x143   : > { %16636 = vmatprep.mubr.msk.f32.mxu0 %vm859_vm4, %v22450_v40 }
 0x146   : > { %16637 = vmatmul.mubr.msk.f32.gmra.mrb[12].mxu0 %vm859_vm4, %v22453_v41 }
 0x147   : > { %16639 = vmatprep.mubr.msk.f32.mxu0 %vm859_vm4, %v22468_v46 }
 0x14a   : > { %16640 = vmatmul.mubr.msk.f32.gmra.mrb[14].mxu0 %vm859_vm4, %v22471_v47 }
 0x14b   : > { %16642 = vmatprep.mubr.msk.f32.mxu0 %vm859_vm4, %v22486_v52 }
 0x14e   : > { %16643 = vmatmul.mubr.msk.f32.gmra.mrb[16].mxu0 %vm859_vm4, %v22489_v53 }
 0x14f   : > { %16645 = vmatprep.mubr.msk.f32.mxu0 %vm859_vm4, %v22504_v58 }
 0x152   : > { %16646 = vmatmul.mubr.msk.f32.gmra.mrb[18].mxu0 %vm859_vm4, %v22507_v59 }
 0x153   : > { %16648 = vmatprep.mubr.msk.f32.mxu0 %vm859_vm4, %v22524_v6 }
 0x156   : > { %16649 = vmatmul.mubr.msk.f32.gmra.mrb[20].mxu0 %vm859_vm4, %v22527_v9 }
 0x157   : > { %16651 = vmatprep.mubr.msk.f32.mxu0 %vm859_vm4, %v22545_v16 }
 0x15a   : > { %16652 = vmatmul.mubr.msk.f32.gmra.mrb[22].mxu0 %vm859_vm4, %v22548_v17 }
 0x15b   : > { %16654 = vmatprep.mubr.msk.f32.mxu0 %vm859_vm4, %v22563_v26 }
 0x15e   : > { %16655 = vmatmul.mubr.msk.f32.gmra.mrb[24].mxu0 %vm859_vm4, %v22566_v29 }
 0x15f   : > { %16657 = vmatprep.mubr.msk.f32.mxu0 %vm859_vm4, %v22581_v43 }
 0x162   : > { %16658 = vmatmul.mubr.msk.f32.gmra.mrb[26].mxu0 %vm859_vm4, %v22584_v45 }
 0x163   : > { %16660 = vmatprep.mubr.msk.f32.mxu0 %vm859_vm4, %v22599_v60 }
 0x166   : > { %16661 = vmatmul.mubr.msk.f32.gmra.mrb[28].mxu0 %vm859_vm4, %v22602_v61 }
 0x167   : > { %16663 = vmatprep.mubr.msk.f32.mxu0 %vm859_vm4, %v22617_v21 }
 0x16a   : > { %16664 = vmatmul.mubr.msk.f32.gmra.mrb[30].mxu0 %vm859_vm4, %v22620_v24 }
 0x16b   : > { %16666 = vmatprep.mubr.msk.f32.mxu0 %vm859_vm4, %v22635_v49 }
 0x16e   : > { %16667 = vmatmul.mubr.msk.f32.gmra.mrb[32].mxu0 %vm859_vm4, %v22638_v37 }
 0x16f   : > { %16669 = vmatprep.mubr.msk.f32.mxu0 %vm859_vm4, %v22653_v31 }
 0x172   : > { %16670 = vmatmul.mubr.msk.f32.gmra.mrb[34].mxu0 %vm859_vm4, %v22656_v22 }
 0x173   : > { %16672 = vmatprep.mubr.msk.f32.mxu0 %vm859_vm4, %v22671_v18 }
 0x176   : > { %16673 = vmatmul.mubr.msk.f32.gmra.mrb[36].mxu0 %vm859_vm4, %v22674_v14 }
 0x177   : > { %16675 = vmatprep.mubr.msk.f32.mxu0 %vm859_vm4, %v22689_v10 }
 0x17a   : > { %16676 = vmatmul.mubr.msk.f32.gmra.mrb[38].mxu0 %vm859_vm4, %v22692_v2 }
 0x17b   : > { %16678 = vmatprep.mubr.msk.f32.mxu0 %vm859_vm4, %v22707_v62 }
 0x17e   : > { %16679 = vmatmul.mubr.msk.f32.gmra.mrb[40].mxu0 %vm859_vm4, %v22710_v56 }
 0x17f   : > { %16681 = vmatprep.mubr.msk.f32.mxu0 %vm859_vm4, %v22725_v54 }
 0x182   : > { %16682 = vmatmul.mubr.msk.f32.gmra.mrb[42].mxu0 %vm859_vm4, %v22728_v50 }
 0x183   : > { %16684 = vmatprep.mubr.msk.f32.mxu0 %vm859_vm4, %v22743_v48 }
 0x186   : > { %16685 = vmatmul.mubr.msk.f32.gmra.mrb[44].mxu0 %vm859_vm4, %v22746_v44 }
 0x187   : > { %16687 = vmatprep.mubr.msk.f32.mxu0 %vm859_vm4, %v22761_v42 }
 0x18a   : > { %16688 = vmatmul.mubr.msk.f32.gmra.mrb[46].mxu0 %vm859_vm4, %v22764_v38 }
 0x18b   : > { %16690 = vmatprep.mubr.msk.f32.mxu0 %vm859_vm4, %v22779_v36 }
 0x18e   : > { %16691 = vmatmul.mubr.msk.f32.gmra.mrb[48].mxu0 %vm859_vm4, %v29466_v57 }
 0x18f   : > { %16693 = vmatprep.mubr.msk.f32.mxu0 %vm859_vm4, %v29467_v1 }
 0x192   : > { %16694 = vmatmul.mubr.msk.f32.gmra.mrb[50].mxu0 %vm859_vm4, %v29468_v11 }
 0x193   : > { %16696 = vmatprep.mubr.msk.f32.mxu0 %vm859_vm4, %v29469_v33  ;;  %v1844_v33 = vrot.slane %v22369_v7, 2  ;;  %v1850_v7 = vrot.slane %v22381_v13, 2 }
 0x195   : > { %v1845_v3 = vsel %vm1840_vm5, %v1842_v4, %v1844_v33 }
 0x196   : > { %16697 = vmatmul.mubr.msk.f32.gmra.mrb[52].mxu0 %vm859_vm4, %v29470_v15 }
 0x197   : > { %16699 = vmatprep.mubr.msk.f32.mxu0 %vm859_vm4, %v29471_v55  ;;  %v1843_v55 = vsel %vm1840_vm5, %v1841_v63, %v1842_v4  ;;  %v1854_v4 = vrot.slane %v22397_v20, 2 }
 0x19a   : > { %16700 = vmatmul.mubr.msk.f32.gmra.mrb[54].mxu0 %vm859_vm4, %v29472_v39  ;;  %v1846_v39 = vrot.slane %v22372_v8, 2  ;;  %v1852_v8 = vrot.slane %v22394_v19, 2 }
 0x19b   : > { %16702 = vmatprep.mubr.msk.f32.mxu0 %vm859_vm4, %v22851_v32 }
 0x19c   : > { %v23043_v63 = vsel %vm1840_vm5, %v1846_v39, %v1848_v5 }
 0x19d   : > { %29473 = vst [vmem:[#allocation61_spill] sm:$0xff] %v23043_v63 }
 0x19e   : > { %16703 = vmatmul.mubr.msk.f32.gmra.mrb[56].mxu0 %vm859_vm4, %v22854_v23  ;;  %v1847_v23 = vsel %vm1840_vm5, %v1844_v33, %v1846_v39  ;;  %v1856_v39 = vrot.slane %v22410_v27, 2  ;;  %v23061_v33 = vsel %vm1840_vm5, %v1852_v8, %v1854_v4 }
 0x19f   : > { %16705 = vmatprep.mubr.msk.f32.mxu0 %vm859_vm4, %v22869_v30  ;;  %29476 = vst [vmem:[#allocation84_spill] sm:$0xff] %v23061_v33 }
 0x1a2   : > { %16706 = vmatmul.mubr.msk.f32.gmra.mrb[58].mxu0 %vm859_vm4, %v22872_v25 }
 0x1a3   : > { %16712 = vmatprep.mubr.msk.f32.mxu0 %vm859_vm4, %v1843_v55  ;;  %v23049_v55 = vsel %vm1840_vm5, %v1848_v5, %v1850_v7  ;;  %v1860_v5 = vrot.slane %v22430_v34, 2 }
 0x1a4   : > { %29474 = vst [vmem:[#allocation64_spill] sm:$0xff] %v23049_v55 }
 0x1a6   : > { %16713 = vmatmul.mubr.msk.f32.vlgmr.msra.gmra.mrb[0].mxu0 %vm859_vm4, %v1845_v3  ;;  %v23069_v3 = vsel %vm1840_vm5, %v1854_v4, %v1856_v39 }
 0x1a7   : > { %16715 = vmatprep.mubr.msk.f32.mxu0 %vm859_vm4, %v1847_v23  ;;  %19544 = vmatpush3.bf16.msk.msra.mxu0 %vm22352_vm2, %v19539_v51  ;;  %v23057_v23 = vsel %vm1840_vm5, %v1850_v7, %v1852_v8  ;;  %v1858_v51 = vrot.slane %v22413_v28, 2  ;;  %29477 = vst [vmem:[#allocation85_spill] sm:$0xff] %v23069_v3 }
 0x1a8   : > { %29475 = vst [vmem:[#allocation69_spill] sm:$0xff] %v23057_v23 }
 0x1a9   : > { %v23073_v7 = vsel %vm1840_vm5, %v1856_v39, %v1858_v51  ;;  %v23081_v8 = vsel %vm1840_vm5, %v1858_v51, %v1860_v5 }
 0x1aa   : > { %16716 = vmatmul.mubr.msk.f32.gmra.mrb[2].mxu0 %vm859_vm4, %v23043_v63  ;;  %29478 = vst [vmem:[#allocation86_spill] sm:$0xff] %v23073_v7  ;;  %29479 = vst [vmem:[#allocation87_spill] sm:$0xff] %v23081_v8  ;;  %v2950_v63 = vld [vmem:[#allocation2 + $0x48] sm:$0xf] }
 0x1ab   : > { %16718 = vmatprep.mubr.msk.f32.mxu0 %vm859_vm4, %v23049_v55  ;;  %v1862_v55 = vrot.slane %v22435_v35, 2 }
 0x1ad   : > { %v23085_v4 = vsel %vm1840_vm5, %v1860_v5, %v1862_v55 }
 0x1ae   : > { %16719 = vmatmul.mubr.msk.f32.gmra.mrb[4].mxu0 %vm859_vm4, %v23057_v23  ;;  %29480 = vst [vmem:[#allocation88_spill] sm:$0xff] %v23085_v4  ;;  %v1866_v23 = vrot.slane %v22453_v41, 2 }
 0x1af   : > { %16721 = vmatprep.mubr.msk.f32.mxu0 %vm859_vm4, %v23061_v33  ;;  %v1864_v33 = vrot.slane %v22450_v40, 2 }
 0x1b1   : > { %v23093_v39 = vsel %vm1840_vm5, %v1862_v55, %v1864_v33  ;;  %v23097_v51 = vsel %vm1840_vm5, %v1864_v33, %v1866_v23  ;;  %v2949_v33 = vld [vmem:[#allocation2 + $0x40] sm:$0xff] }
 0x1b2   : > { %16722 = vmatmul.mubr.msk.f32.gmra.mrb[6].mxu0 %vm859_vm4, %v23069_v3  ;;  %29481 = vst [vmem:[#allocation89_spill] sm:$0xff] %v23093_v39  ;;  %29482 = vst [vmem:[#allocation90_spill] sm:$0xff] %v23097_v51  ;;  %v1870_v3 = vrot.slane %v22471_v47, 2 }
 0x1b3   : > { %16724 = vmatprep.mubr.msk.f32.mxu0 %vm859_vm4, %v23073_v7  ;;  %v1868_v7 = vrot.slane %v22468_v46, 2 }
 0x1b5   : > { %v23105_v5 = vsel %vm1840_vm5, %v1866_v23, %v1868_v7  ;;  %v23109_v55 = vsel %vm1840_vm5, %v1868_v7, %v1870_v3  ;;  %v1876_v23 = vrot.slane %v22504_v58, 2 }
 0x1b6   : > { %16725 = vmatmul.mubr.msk.f32.gmra.mrb[8].mxu0 %vm859_vm4, %v23081_v8  ;;  %29483 = vst [vmem:[#allocation91_spill] sm:$0xff] %v23105_v5  ;;  %29484 = vst [vmem:[#allocation92_spill] sm:$0xff] %v23109_v55  ;;  %v1874_v8 = vrot.slane %v22489_v53, 2  ;;  %v1878_v53 = vrot.slane %v22507_v59, 2 }
 0x1b7   : > { %16727 = vmatprep.mubr.msk.f32.mxu0 %vm859_vm4, %v23085_v4  ;;  %v1872_v4 = vrot.slane %v22486_v52, 2 }
 0x1b9   : > { %v23123_v7 = vsel %vm1840_vm5, %v1872_v4, %v1874_v8 }
 0x1ba   : > { %16728 = vmatmul.mubr.msk.f32.gmra.mrb[10].mxu0 %vm859_vm4, %v23093_v39  ;;  %v23120_v39 = vpack.c.bf16 %v2950_v63, %v2949_v33  ;;  %29486 = vst [vmem:[#allocation94_spill] sm:$0xff] %v23123_v7  ;;  %v1880_v63 = vrot.slane %v22524_v6, 2  ;;  %v1882_v33 = vrot.slane %v22527_v9, 2 }
 0x1bb   : > { %16730 = vmatprep.mubr.msk.f32.mxu0 %vm859_vm4, %v23097_v51  ;;  %v23117_v51 = vsel %vm1840_vm5, %v1870_v3, %v1872_v4  ;;  %v23134_v3 = vsel %vm1840_vm5, %v1874_v8, %v1876_v23  ;;  %v23138_v4 = vsel %vm1840_vm5, %v1876_v23, %v1878_v53 }
 0x1bc   : > { %29485 = vst [vmem:[#allocation93_spill] sm:$0xff] %v23117_v51  ;;  %19547 = vmatprep.subr.msk.bf16.mxu0 %vm22352_vm2, %v23120_v39  ;;  %29487 = vst [vmem:[#allocation95_spill] sm:$0xff] %v23134_v3  ;;  %v23150_v8 = vsel %vm1840_vm5, %v1880_v63, %v1882_v33 }
 0x1bd   : > { %29488 = vst [vmem:[#allocation96_spill] sm:$0xff] %v23138_v4  ;;  %29490 = vst [vmem:[#allocation98_spill] sm:$0xff] %v23150_v8 }
 0x1be   : > { %16731 = vmatmul.mubr.msk.f32.gmra.mrb[12].mxu0 %vm859_vm4, %v23105_v5  ;;  %v1946_v5 = vrot.slane %v29470_v15, 2 }
 0x1bf   : > { %16733 = vmatprep.mubr.msk.f32.mxu0 %vm859_vm4, %v23109_v55  ;;  %v1886_v55 = vrot.slane %v22548_v17, 2 }
 0x1c2   : > { %16734 = vmatmul.mubr.msk.f32.gmra.mrb[14].mxu0 %vm859_vm4, %v23117_v51  ;;  %v23146_v51 = vsel %vm1840_vm5, %v1878_v53, %v1880_v63 }
 0x1c3   : > { %16736 = vmatprep.mubr.msk.f32.mxu0 %vm859_vm4, %v23123_v7  ;;  %29489 = vst [vmem:[#allocation97_spill] sm:$0xff] %v23146_v51  ;;  %v1884_v7 = vrot.slane %v22545_v16, 2 }
 0x1c5   : > { %v23158_v23 = vsel %vm1840_vm5, %v1882_v33, %v1884_v7  ;;  %v23162_v53 = vsel %vm1840_vm5, %v1884_v7, %v1886_v55 }
 0x1c6   : > { %16737 = vmatmul.mubr.msk.f32.gmra.mrb[16].mxu0 %vm859_vm4, %v23134_v3  ;;  %29491 = vst [vmem:[#allocation99_spill] sm:$0xff] %v23158_v23  ;;  %29492 = vst [vmem:[#allocation100_spill] sm:$0xff] %v23162_v53  ;;  %v1890_v3 = vrot.slane %v22566_v29, 2 }
 0x1c7   : > { %16739 = vmatprep.mubr.msk.f32.mxu0 %vm859_vm4, %v23138_v4  ;;  %v1888_v4 = vrot.slane %v22563_v26, 2 }
 0x1c9   : > { %v23170_v63 = vsel %vm1840_vm5, %v1886_v55, %v1888_v4  ;;  %v23174_v33 = vsel %vm1840_vm5, %v1888_v4, %v1890_v3 }
 0x1ca   : > { %16740 = vmatmul.mubr.msk.f32.gmra.mrb[18].mxu0 %vm859_vm4, %v23146_v51  ;;  %29493 = vst [vmem:[#allocation101_spill] sm:$0xff] %v23170_v63  ;;  %29494 = vst [vmem:[#allocation102_spill] sm:$0xff] %v23174_v33  ;;  %v1894_v51 = vrot.slane %v22584_v45, 2 }
 0x1cb   : > { %16742 = vmatprep.mubr.msk.f32.mxu0 %vm859_vm4, %v23150_v8  ;;  %v1892_v8 = vrot.slane %v22581_v43, 2 }
 0x1cd   : > { %v23182_v7 = vsel %vm1840_vm5, %v1890_v3, %v1892_v8  ;;  %v23186_v55 = vsel %vm1840_vm5, %v1892_v8, %v1894_v51 }
 0x1ce   : > { %16743 = vmatmul.mubr.msk.f32.gmra.mrb[20].mxu0 %vm859_vm4, %v23158_v23  ;;  %29495 = vst [vmem:[#allocation103_spill] sm:$0xff] %v23182_v7  ;;  %29496 = vst [vmem:[#allocation104_spill] sm:$0xff] %v23186_v55  ;;  %v1898_v23 = vrot.slane %v22602_v61, 2 }
 0x1cf   : > { %16745 = vmatprep.mubr.msk.f32.mxu0 %vm859_vm4, %v23162_v53  ;;  %v1896_v53 = vrot.slane %v22599_v60, 2 }
 0x1d1   : > { %v23194_v4 = vsel %vm1840_vm5, %v1894_v51, %v1896_v53  ;;  %v23198_v3 = vsel %vm1840_vm5, %v1896_v53, %v1898_v23 }
 0x1d2   : > { %16746 = vmatmul.mubr.msk.f32.gmra.mrb[22].mxu0 %vm859_vm4, %v23170_v63  ;;  %29497 = vst [vmem:[#allocation105_spill] sm:$0xff] %v23194_v4  ;;  %29498 = vst [vmem:[#allocation106_spill] sm:$0xff] %v23198_v3  ;;  %v1902_v63 = vrot.slane %v22620_v24, 2 }
 0x1d3   : > { %16748 = vmatprep.mubr.msk.f32.mxu0 %vm859_vm4, %v23174_v33  ;;  %v1900_v33 = vrot.slane %v22617_v21, 2 }
 0x1d5   : > { %v23206_v8 = vsel %vm1840_vm5, %v1898_v23, %v1900_v33  ;;  %v23210_v51 = vsel %vm1840_vm5, %v1900_v33, %v1902_v63 }
 0x1d6   : > { %16749 = vmatmul.mubr.msk.f32.gmra.mrb[24].mxu0 %vm859_vm4, %v23182_v7  ;;  %29499 = vst [vmem:[#allocation107_spill] sm:$0xff] %v23206_v8  ;;  %29500 = vst [vmem:[#allocation108_spill] sm:$0xff] %v23210_v51  ;;  %v1906_v7 = vrot.slane %v22638_v37, 2 }
 0x1d7   : > { %16751 = vmatprep.mubr.msk.f32.mxu0 %vm859_vm4, %v23186_v55  ;;  %v1904_v55 = vrot.slane %v22635_v49, 2 }
 0x1d9   : > { %v23218_v53 = vsel %vm1840_vm5, %v1902_v63, %v1904_v55  ;;  %v23222_v23 = vsel %vm1840_vm5, %v1904_v55, %v1906_v7 }
 0x1da   : > { %16752 = vmatmul.mubr.msk.f32.gmra.mrb[26].mxu0 %vm859_vm4, %v23194_v4  ;;  %29501 = vst [vmem:[#allocation109_spill] sm:$0xff] %v23218_v53  ;;  %29502 = vst [vmem:[#allocation110_spill] sm:$0xff] %v23222_v23  ;;  %v1910_v4 = vrot.slane %v22656_v22, 2 }
 0x1db   : > { %16754 = vmatprep.mubr.msk.f32.mxu0 %vm859_vm4, %v23198_v3  ;;  %v1908_v3 = vrot.slane %v22653_v31, 2 }
 0x1dd   : > { %v23230_v33 = vsel %vm1840_vm5, %v1906_v7, %v1908_v3  ;;  %v23234_v63 = vsel %vm1840_vm5, %v1908_v3, %v1910_v4 }
 0x1de   : > { %16755 = vmatmul.mubr.msk.f32.gmra.mrb[28].mxu0 %vm859_vm4, %v23206_v8  ;;  %29503 = vst [vmem:[#allocation111_spill] sm:$0xff] %v23230_v33  ;;  %29504 = vst [vmem:[#allocation112_spill] sm:$0xff] %v23234_v63  ;;  %v1914_v8 = vrot.slane %v22674_v14, 2 }
 0x1df   : > { %16757 = vmatprep.mubr.msk.f32.mxu0 %vm859_vm4, %v23210_v51  ;;  %v1912_v51 = vrot.slane %v22671_v18, 2 }
 0x1e1   : > { %v23242_v55 = vsel %vm1840_vm5, %v1910_v4, %v1912_v51  ;;  %v23246_v7 = vsel %vm1840_vm5, %v1912_v51, %v1914_v8 }
 0x1e2   : > { %16758 = vmatmul.mubr.msk.f32.gmra.mrb[30].mxu0 %vm859_vm4, %v23218_v53  ;;  %29505 = vst [vmem:[#allocation113_spill] sm:$0xff] %v23242_v55  ;;  %29506 = vst [vmem:[#allocation114_spill] sm:$0xff] %v23246_v7  ;;  %v1918_v53 = vrot.slane %v22692_v2, 2 }
 0x1e3   : > { %16760 = vmatprep.mubr.msk.f32.mxu0 %vm859_vm4, %v23222_v23  ;;  %v1916_v23 = vrot.slane %v22689_v10, 2 }
 0x1e5   : > { %v23254_v3 = vsel %vm1840_vm5, %v1914_v8, %v1916_v23  ;;  %v23258_v4 = vsel %vm1840_vm5, %v1916_v23, %v1918_v53 }
 0x1e6   : > { %16761 = vmatmul.mubr.msk.f32.gmra.mrb[32].mxu0 %vm859_vm4, %v23230_v33  ;;  %29507 = vst [vmem:[#allocation115_spill] sm:$0xff] %v23254_v3  ;;  %29508 = vst [vmem:[#allocation116_spill] sm:$0xff] %v23258_v4  ;;  %v1922_v33 = vrot.slane %v22710_v56, 2 }
 0x1e7   : > { %16763 = vmatprep.mubr.msk.f32.mxu0 %vm859_vm4, %v23234_v63  ;;  %v1920_v63 = vrot.slane %v22707_v62, 2 }
 0x1e9   : > { %v23266_v51 = vsel %vm1840_vm5, %v1918_v53, %v1920_v63  ;;  %v23270_v8 = vsel %vm1840_vm5, %v1920_v63, %v1922_v33 }
 0x1ea   : > { %16764 = vmatmul.mubr.msk.f32.gmra.mrb[34].mxu0 %vm859_vm4, %v23242_v55  ;;  %29509 = vst [vmem:[#allocation117_spill] sm:$0xff] %v23266_v51  ;;  %29510 = vst [vmem:[#allocation118_spill] sm:$0xff] %v23270_v8  ;;  %v1926_v55 = vrot.slane %v22728_v50, 2 }
 0x1eb   : > { %16766 = vmatprep.mubr.msk.f32.mxu0 %vm859_vm4, %v23246_v7  ;;  %v1924_v7 = vrot.slane %v22725_v54, 2 }
 0x1ed   : > { %v23278_v23 = vsel %vm1840_vm5, %v1922_v33, %v1924_v7  ;;  %v23282_v53 = vsel %vm1840_vm5, %v1924_v7, %v1926_v55 }
 0x1ee   : > { %16767 = vmatmul.mubr.msk.f32.gmra.mrb[36].mxu0 %vm859_vm4, %v23254_v3  ;;  %29511 = vst [vmem:[#allocation119_spill] sm:$0xff] %v23278_v23  ;;  %29512 = vst [vmem:[#allocation120_spill] sm:$0xff] %v23282_v53  ;;  %v1930_v3 = vrot.slane %v22746_v44, 2 }
 0x1ef   : > { %16769 = vmatprep.mubr.msk.f32.mxu0 %vm859_vm4, %v23258_v4  ;;  %v1928_v4 = vrot.slane %v22743_v48, 2 }
 0x1f1   : > { %v23290_v63 = vsel %vm1840_vm5, %v1926_v55, %v1928_v4  ;;  %v23294_v33 = vsel %vm1840_vm5, %v1928_v4, %v1930_v3 }
 0x1f2   : > { %16770 = vmatmul.mubr.msk.f32.gmra.mrb[38].mxu0 %vm859_vm4, %v23266_v51  ;;  %29513 = vst [vmem:[#allocation121_spill] sm:$0xff] %v23290_v63  ;;  %29514 = vst [vmem:[#allocation122_spill] sm:$0xff] %v23294_v33  ;;  %v1934_v51 = vrot.slane %v22764_v38, 2 }
 0x1f3   : > { %16772 = vmatprep.mubr.msk.f32.mxu0 %vm859_vm4, %v23270_v8  ;;  %v1932_v8 = vrot.slane %v22761_v42, 2 }
 0x1f5   : > { %v23302_v7 = vsel %vm1840_vm5, %v1930_v3, %v1932_v8  ;;  %v23306_v55 = vsel %vm1840_vm5, %v1932_v8, %v1934_v51 }
 0x1f6   : > { %16773 = vmatmul.mubr.msk.f32.gmra.mrb[40].mxu0 %vm859_vm4, %v23278_v23  ;;  %29515 = vst [vmem:[#allocation123_spill] sm:$0xff] %v23302_v7  ;;  %29516 = vst [vmem:[#allocation124_spill] sm:$0xff] %v23306_v55  ;;  %v1938_v23 = vrot.slane %v29466_v57, 2 }
 0x1f7   : > { %16775 = vmatprep.mubr.msk.f32.mxu0 %vm859_vm4, %v23282_v53  ;;  %v1936_v53 = vrot.slane %v22779_v36, 2 }
 0x1f9   : > { %v23314_v4 = vsel %vm1840_vm5, %v1934_v51, %v1936_v53  ;;  %v23318_v3 = vsel %vm1840_vm5, %v1936_v53, %v1938_v23 }
 0x1fa   : > { %16776 = vmatmul.mubr.msk.f32.gmra.mrb[42].mxu0 %vm859_vm4, %v23290_v63  ;;  %29517 = vst [vmem:[#allocation125_spill] sm:$0xff] %v23314_v4  ;;  %29518 = vst [vmem:[#allocation126_spill] sm:$0xff] %v23318_v3  ;;  %v1942_v63 = vrot.slane %v29468_v11, 2 }
 0x1fb   : > { %16778 = vmatprep.mubr.msk.f32.mxu0 %vm859_vm4, %v23294_v33  ;;  %v1940_v33 = vrot.slane %v29467_v1, 2 }
 0x1fd   : > { %v23326_v8 = vsel %vm1840_vm5, %v1938_v23, %v1940_v33  ;;  %v23330_v51 = vsel %vm1840_vm5, %v1940_v33, %v1942_v63 }
 0x1fe   : > { %16779 = vmatmul.mubr.msk.f32.gmra.mrb[44].mxu0 %vm859_vm4, %v23302_v7  ;;  %29519 = vst [vmem:[#allocation127_spill] sm:$0xff] %v23326_v8  ;;  %29521 = vst [vmem:[#allocation128_spill] sm:$0xff] %v23330_v51 }
 0x1ff   : > { %16781 = vmatprep.mubr.msk.f32.mxu0 %vm859_vm4, %v23306_v55  ;;  %v29520_v55 = vld [vmem:[#allocation68_spill] sm:$0xff] }
 0x200   : > { %v1944_v7 = vrot.slane %v29520_v55, 2  ;;  %v29525_v55 = vld [vmem:[#allocation73_spill] sm:$0xff] }
 0x201   : > { %v1950_v11 = vrot.slane %v29525_v55, 2 }
 0x202   : > { %16782 = vmatmul.mubr.msk.f32.gmra.mrb[46].mxu0 %vm859_vm4, %v23314_v4  ;;  %v23338_v53 = vsel %vm1840_vm5, %v1942_v63, %v1944_v7  ;;  %v23342_v23 = vsel %vm1840_vm5, %v1944_v7, %v1946_v5 }
 0x203   : > { %16784 = vmatprep.mubr.msk.f32.mxu0 %vm859_vm4, %v23318_v3  ;;  %29522 = vst [vmem:[#allocation129_spill] sm:$0xff] %v23338_v53  ;;  %v29523_v3 = vld [vmem:[#allocation72_spill] sm:$0xff]  ;;  %29524 = vst [vmem:[#allocation130_spill] sm:$0xff] %v23342_v23 }
 0x204   : > { %v1948_v4 = vrot.slane %v29523_v3, 2 }
 0x206   : > { %16785 = vmatmul.mubr.msk.f32.gmra.mrb[48].mxu0 %vm859_vm4, %v23326_v8  ;;  %v23350_v33 = vsel %vm1840_vm5, %v1946_v5, %v1948_v4  ;;  %v23354_v63 = vsel %vm1840_vm5, %v1948_v4, %v1950_v11  ;;  %v29528_v8 = vld [vmem:[#allocation76_spill] sm:$0xff] }
 0x207   : > { %16787 = vmatprep.mubr.msk.f32.mxu0 %vm859_vm4, %v23330_v51  ;;  %29526 = vst [vmem:[#allocation73_spill] sm:$0xff] %v23350_v33  ;;  %v1952_v51 = vrot.slane %v22851_v32, 2  ;;  %29527 = vst [vmem:[#allocation131_spill] sm:$0xff] %v23354_v63  ;;  %v1954_v3 = vrot.slane %v29528_v8, 2 }
 0x209   : > { %v23362_v7 = vsel %vm1840_vm5, %v1950_v11, %v1952_v51  ;;  %v23366_v5 = vsel %vm1840_vm5, %v1952_v51, %v1954_v3  ;;  %v29531_v51 = vld [vmem:[#allocation17_spill] sm:$0xff] }
 0x20a   : > { %16788 = vmatmul.mubr.msk.f32.gmra.mrb[50].mxu0 %vm859_vm4, %v23338_v53  ;;  %29529 = vst [vmem:[#allocation76_spill] sm:$0xff] %v23366_v5  ;;  %v23369_v53 = vrot.slane %v22872_v25, 2 }
 0x20b   : > { %16790 = vmatprep.mubr.msk.f32.mxu0 %vm859_vm4, %v23342_v23  ;;  %v1956_v23 = vrot.slane %v22869_v30, 2 }
 0x20d   : > { %v23376_v4 = vsel %vm1840_vm5, %v1954_v3, %v1956_v23  ;;  %v23380_v11 = vsel %vm1840_vm5, %v1956_v23, %v23369_v53  ;;  %v29575_v3 = vld [vmem:[#allocation58_spill] sm:$0xff]  ;;  %v29577_v23 = vld [vmem:[#allocation60_spill] sm:$0xff] }
 0x20e   : > { %16791 = vmatmul.mubr.msk.f32.gmra.mrb[52].mxu0 %vm859_vm4, %v23350_v33  ;;  %29530 = vst [vmem:[#allocation132_spill] sm:$0xff] %v23376_v4 }
 0x20f   : > { %16793 = vmatprep.mubr.msk.f32.mxu0 %vm859_vm4, %v23354_v63 }
 0x212   : > { %16794 = vmatmul.mubr.msk.f32.gmra.mrb[54].mxu0 %vm859_vm4, %v23362_v7 }
 0x213   : > { %16796 = vmatprep.mubr.msk.f32.mxu0 %vm859_vm4, %v23366_v5 }
 0x216   : > { %16797 = vmatmul.mubr.msk.f32.gmra.mrb[56].mxu0 %vm859_vm4, %v23376_v4 }
 0x217   : > { %16799 = vmatprep.mubr.msk.f32.mxu0 %vm859_vm4, %v23380_v11 }
 0x21a   : > { %16800 = vmatmul.mubr.msk.f32.gmra.mrb[58].mxu0 %vm859_vm4, %v23369_v53 }
 0x21b   : > { %16806 = vmatprep.mubr.msk.f32.mxu0 %vm859_vm4, %v29531_v51  ;;  %v29578_v51 = vld [vmem:[#allocation62_spill] sm:$0xff] }
 0x21e   : > { %16807 = vmatmul.mubr.msk.f32.vlgmr.msra.gmra.mrb[0].mxu0 %vm859_vm4, %v22378_v12  ;;  %v3394_v12 = vld [vmem:[#allocation2 + $0x50] sm:$0xff] }
 0x21f   : > { %16809 = vmatprep.mubr.msk.f32.mxu0 %vm859_vm4, %v22381_v13  ;;  %19550 = vmatpush3.bf16.msk.msra.mxu0 %vm22352_vm2, %v23120_v39  ;;  %v3395_v13 = vld [vmem:[#allocation2 + $0x58] sm:$0xf] }
 0x220   : > { %v29573_v39 = vld [vmem:[#allocation56_spill] sm:$0xff] }
 0x222   : > { %16810 = vmatmul.mubr.msk.f32.gmra.mrb[2].mxu0 %vm859_vm4, %v22394_v19  ;;  %v29532_v19 = vld [vmem:[#allocation28_spill] sm:$0xff] }
 0x223   : > { %16812 = vmatprep.mubr.msk.f32.mxu0 %vm859_vm4, %v22397_v20  ;;  %v19551_v20 = vpack.c.bf16 %v3395_v13, %v3394_v12  ;;  %v29579_v12 = vld [vmem:[#allocation63_spill] sm:$0xff]  ;;  %v29580_v13 = vld [vmem:[#allocation66_spill] sm:$0xff] }
 0x225   : > { %19553 = vmatprep.subr.msk.bf16.mxu0 %vm22352_vm2, %v19551_v20 }
 0x226   : > { %16813 = vmatmul.mubr.msk.f32.gmra.mrb[4].mxu0 %vm859_vm4, %v22410_v27  ;;  %v29533_v27 = vld [vmem:[#allocation65_spill] sm:$0xff] }
 0x227   : > { %16815 = vmatprep.mubr.msk.f32.mxu0 %vm859_vm4, %v22413_v28  ;;  %v29534_v28 = vld [vmem:[#allocation68_spill] sm:$0xff] }
 0x22a   : > { %16816 = vmatmul.mubr.msk.f32.gmra.mrb[6].mxu0 %vm859_vm4, %v22430_v34  ;;  %v29535_v34 = vld [vmem:[#allocation72_spill] sm:$0xff] }
 0x22b   : > { %16818 = vmatprep.mubr.msk.f32.mxu0 %vm859_vm4, %v22435_v35  ;;  %v23508_v35 = vld [vmem:[%s22359_s20 + $0x1e0] sm:$0xff] }
 0x22e   : > { %16819 = vmatmul.mubr.msk.f32.gmra.mrb[8].mxu0 %vm859_vm4, %v22450_v40  ;;  %v29539_v40 = vld [vmem:[#allocation21_spill] sm:$0xff] }
 0x22f   : > { %16821 = vmatprep.mubr.msk.f32.mxu0 %vm859_vm4, %v22453_v41  ;;  %v29540_v41 = vld [vmem:[#allocation22_spill] sm:$0xff] }
 0x232   : > { %16822 = vmatmul.mubr.msk.f32.gmra.mrb[10].mxu0 %vm859_vm4, %v22468_v46  ;;  %v29543_v46 = vld [vmem:[#allocation25_spill] sm:$0xff] }
 0x233   : > { %16824 = vmatprep.mubr.msk.f32.mxu0 %vm859_vm4, %v22471_v47  ;;  %v29544_v47 = vld [vmem:[#allocation26_spill] sm:$0xff] }
 0x236   : > { %16825 = vmatmul.mubr.msk.f32.gmra.mrb[12].mxu0 %vm859_vm4, %v22486_v52  ;;  %v29547_v52 = vld [vmem:[#allocation30_spill] sm:$0xff] }
 0x237   : > { %16827 = vmatprep.mubr.msk.f32.mxu0 %vm859_vm4, %v29532_v19  ;;  %v29581_v19 = vld [vmem:[#allocation67_spill] sm:$0xff] }
 0x23a   : > { %16828 = vmatmul.mubr.msk.f32.gmra.mrb[14].mxu0 %vm859_vm4, %v22504_v58  ;;  %v3839_v58 = vld [vmem:[#allocation2 + $0x60] sm:$0xff] }
 0x23b   : > { %16830 = vmatprep.mubr.msk.f32.mxu0 %vm859_vm4, %v22507_v59  ;;  %v3840_v59 = vld [vmem:[#allocation2 + $0x68] sm:$0xf] }
 0x23e   : > { %16831 = vmatmul.mubr.msk.f32.gmra.mrb[16].mxu0 %vm859_vm4, %v22524_v6  ;;  %v29551_v6 = vld [vmem:[#allocation34_spill] sm:$0xff] }
 0x23f   : > { %16833 = vmatprep.mubr.msk.f32.mxu0 %vm859_vm4, %v22527_v9  ;;  %v29552_v9 = vld [vmem:[#allocation35_spill] sm:$0xff] }
 0x242   : > { %16834 = vmatmul.mubr.msk.f32.gmra.mrb[18].mxu0 %vm859_vm4, %v22545_v16  ;;  %v29555_v16 = vld [vmem:[#allocation38_spill] sm:$0xff] }
 0x243   : > { %16836 = vmatprep.mubr.msk.f32.mxu0 %vm859_vm4, %v22548_v17  ;;  %v29556_v17 = vld [vmem:[#allocation39_spill] sm:$0xff] }
 0x246   : > { %16837 = vmatmul.mubr.msk.f32.gmra.mrb[20].mxu0 %vm859_vm4, %v22563_v26  ;;  %v29559_v26 = vld [vmem:[#allocation42_spill] sm:$0xff] }
 0x247   : > { %16839 = vmatprep.mubr.msk.f32.mxu0 %vm859_vm4, %v22566_v29  ;;  %v29560_v29 = vld [vmem:[#allocation43_spill] sm:$0xff] }
 0x24a   : > { %16840 = vmatmul.mubr.msk.f32.gmra.mrb[22].mxu0 %vm859_vm4, %v22581_v43  ;;  %v29563_v43 = vld [vmem:[#allocation46_spill] sm:$0xff] }
 0x24b   : > { %16842 = vmatprep.mubr.msk.f32.mxu0 %vm859_vm4, %v22584_v45  ;;  %v29564_v45 = vld [vmem:[#allocation47_spill] sm:$0xff] }
 0x24e   : > { %16843 = vmatmul.mubr.msk.f32.gmra.mrb[24].mxu0 %vm859_vm4, %v22599_v60  ;;  %v29566_v60 = vld [vmem:[#allocation49_spill] sm:$0xff] }
 0x24f   : > { %16845 = vmatprep.mubr.msk.f32.mxu0 %vm859_vm4, %v22602_v61  ;;  %v29567_v61 = vld [vmem:[#allocation50_spill] sm:$0xff] }
 0x252   : > { %16846 = vmatmul.mubr.msk.f32.gmra.mrb[26].mxu0 %vm859_vm4, %v22617_v21  ;;  %v29568_v21 = vld [vmem:[#allocation51_spill] sm:$0xff] }
 0x253   : > { %16848 = vmatprep.mubr.msk.f32.mxu0 %vm859_vm4, %v22620_v24  ;;  %v29569_v24 = vld [vmem:[#allocation52_spill] sm:$0xff] }
 0x256   : > { %16849 = vmatmul.mubr.msk.f32.gmra.mrb[28].mxu0 %vm859_vm4, %v22635_v49  ;;  %v29565_v49 = vld [vmem:[#allocation48_spill] sm:$0xff] }
 0x257   : > { %16851 = vmatprep.mubr.msk.f32.mxu0 %vm859_vm4, %v22638_v37  ;;  %v29562_v37 = vld [vmem:[#allocation45_spill] sm:$0xff] }
 0x25a   : > { %16852 = vmatmul.mubr.msk.f32.gmra.mrb[30].mxu0 %vm859_vm4, %v22653_v31  ;;  %v29561_v31 = vld [vmem:[#allocation44_spill] sm:$0xff] }
 0x25b   : > { %16854 = vmatprep.mubr.msk.f32.mxu0 %vm859_vm4, %v22656_v22  ;;  %v29558_v22 = vld [vmem:[#allocation41_spill] sm:$0xff] }
 0x25e   : > { %16855 = vmatmul.mubr.msk.f32.gmra.mrb[32].mxu0 %vm859_vm4, %v22671_v18  ;;  %v29557_v18 = vld [vmem:[#allocation40_spill] sm:$0xff] }
 0x25f   : > { %16857 = vmatprep.mubr.msk.f32.mxu0 %vm859_vm4, %v22674_v14  ;;  %v29554_v14 = vld [vmem:[#allocation37_spill] sm:$0xff] }
 0x262   : > { %16858 = vmatmul.mubr.msk.f32.gmra.mrb[34].mxu0 %vm859_vm4, %v22689_v10  ;;  %v29553_v10 = vld [vmem:[#allocation36_spill] sm:$0xff] }
 0x263   : > { %16860 = vmatprep.mubr.msk.f32.mxu0 %vm859_vm4, %v22692_v2  ;;  %v19557_v2 = vpack.c.bf16 %v3840_v59, %v3839_v58  ;;  %v2951_v58 = vrot.slane %v23508_v35, 1  ;;  %v29589_v59 = vld [vmem:[#allocation80_spill] sm:$0xff] }
 0x266   : > { %16861 = vmatmul.mubr.msk.f32.gmra.mrb[36].mxu0 %vm859_vm4, %v22707_v62  ;;  %v29550_v62 = vld [vmem:[#allocation33_spill] sm:$0xff] }
 0x267   : > { %16863 = vmatprep.mubr.msk.f32.mxu0 %vm859_vm4, %v22710_v56  ;;  %v29549_v56 = vld [vmem:[#allocation32_spill] sm:$0xff] }
 0x26a   : > { %16864 = vmatmul.mubr.msk.f32.gmra.mrb[38].mxu0 %vm859_vm4, %v22725_v54  ;;  %v29548_v54 = vld [vmem:[#allocation31_spill] sm:$0xff] }
 0x26b   : > { %16866 = vmatprep.mubr.msk.f32.mxu0 %vm859_vm4, %v22728_v50  ;;  %v29546_v50 = vld [vmem:[#allocation29_spill] sm:$0xff] }
 0x26e   : > { %16867 = vmatmul.mubr.msk.f32.gmra.mrb[40].mxu0 %vm859_vm4, %v22743_v48  ;;  %v29545_v48 = vld [vmem:[#allocation27_spill] sm:$0xff] }
 0x26f   : > { %16869 = vmatprep.mubr.msk.f32.mxu0 %vm859_vm4, %v22746_v44  ;;  %v29542_v44 = vld [vmem:[#allocation24_spill] sm:$0xff] }
 0x272   : > { %16870 = vmatmul.mubr.msk.f32.gmra.mrb[42].mxu0 %vm859_vm4, %v22761_v42  ;;  %v29541_v42 = vld [vmem:[#allocation23_spill] sm:$0xff] }
 0x273   : > { %16872 = vmatprep.mubr.msk.f32.mxu0 %vm859_vm4, %v22764_v38  ;;  %v29536_v38 = vld [vmem:[#allocation18_spill] sm:$0xff] }
 0x276   : > { %16873 = vmatmul.mubr.msk.f32.gmra.mrb[44].mxu0 %vm859_vm4, %v22779_v36  ;;  %v23511_v36 = vld [vmem:[%s22359_s20 + $0x1e8] sm:$0xff] }
 0x277   : > { %16875 = vmatprep.mubr.msk.f32.mxu0 %vm859_vm4, %v29466_v57  ;;  %v29571_v57 = vld [vmem:[#allocation54_spill] sm:$0xff] }
 0x27a   : > { %16876 = vmatmul.mubr.msk.f32.gmra.mrb[46].mxu0 %vm859_vm4, %v29467_v1  ;;  %v29572_v1 = vld [vmem:[#allocation55_spill] sm:$0xff] }
 0x27b   : > { %16878 = vmatprep.mubr.msk.f32.mxu0 %vm859_vm4, %v29533_v27  ;;  %v29583_v27 = vld [vmem:[#allocation71_spill] sm:$0xff] }
 0x27e   : > { %16879 = vmatmul.mubr.msk.f32.gmra.mrb[48].mxu0 %vm859_vm4, %v29534_v28  ;;  %v29584_v28 = vld [vmem:[#allocation74_spill] sm:$0xff] }
 0x27f   : > { %16881 = vmatprep.mubr.msk.f32.mxu0 %vm859_vm4, %v29470_v15  ;;  %v29570_v15 = vld [vmem:[#allocation53_spill] sm:$0xff] }
 0x282   : > { %16882 = vmatmul.mubr.msk.f32.gmra.mrb[50].mxu0 %vm859_vm4, %v29535_v34  ;;  %v29585_v34 = vld [vmem:[#allocation75_spill] sm:$0xff] }
 0x283   : > { %16884 = vmatprep.mubr.msk.f32.mxu0 %vm859_vm4, %v29525_v55  ;;  %v29574_v55 = vld [vmem:[#allocation57_spill] sm:$0xff] }
 0x286   : > { %16885 = vmatmul.mubr.msk.f32.gmra.mrb[52].mxu0 %vm859_vm4, %v22851_v32  ;;  %v23518_v32 = vld [vmem:[%s22359_s20 + $0x1f0] sm:$0xff] }
 0x287   : > { %16887 = vmatprep.mubr.msk.f32.mxu0 %vm859_vm4, %v29528_v8  ;;  %v29576_v8 = vld [vmem:[#allocation59_spill] sm:$0xff] }
 0x28a   : > { %16888 = vmatmul.mubr.msk.f32.gmra.mrb[54].mxu0 %vm859_vm4, %v22869_v30  ;;  %v29537_v30 = vld [vmem:[#allocation19_spill] sm:$0xff] }
 0x28b   : > { %16890 = vmatprep.mubr.msk.f32.mxu0 %vm859_vm4, %v22872_v25  ;;  %v29538_v25 = vld [vmem:[#allocation20_spill] sm:$0xff] }
 0x28e   : > { %16891 = vmatmul.mubr.msk.f32.gmra.mrb[56].mxu0 %vm859_vm4, %v23508_v35 }
 0x28f   : > { %16893 = vmatprep.mubr.msk.f32.mxu0 %vm859_vm4, %v23511_v36 }
 0x292   : > { %16894 = vmatmul.mubr.msk.f32.gmra.mrb[58].mxu0 %vm859_vm4, %v23518_v32 }
 0x293   : > { %16900 = vmatprep.mubr.msk.f32.mxu0 %vm859_vm4, %v29536_v38  ;;  %v29586_v38 = vld [vmem:[#allocation77_spill] sm:$0xff] }
 0x296   : > { %16901 = vmatmul.mubr.msk.f32.vlgmr.msra.gmra.mrb[0].mxu0 %vm859_vm4, %v29537_v30  ;;  %v29587_v30 = vld [vmem:[#allocation78_spill] sm:$0xff] }
 0x297   : > { %16903 = vmatprep.mubr.msk.f32.mxu0 %vm859_vm4, %v29538_v25  ;;  %19556 = vmatpush3.bf16.msk.msra.mxu0 %vm22352_vm2, %v19551_v20  ;;  %v29582_v20 = vld [vmem:[#allocation70_spill] sm:$0xff]  ;;  %v29588_v25 = vld [vmem:[#allocation79_spill] sm:$0xff] }
 0x298   : > { %19559 = vmatprep.subr.msk.bf16.mxu0 %vm22352_vm2, %v19557_v2 }
 0x29a   : > { %16904 = vmatmul.mubr.msk.f32.gmra.mrb[2].mxu0 %vm859_vm4, %v29539_v40 }
 0x29b   : > { %16906 = vmatprep.mubr.msk.f32.mxu0 %vm859_vm4, %v29540_v41 }
 0x29e   : > { %16907 = vmatmul.mubr.msk.f32.gmra.mrb[4].mxu0 %vm859_vm4, %v29541_v42 }
 0x29f   : > { %16909 = vmatprep.mubr.msk.f32.mxu0 %vm859_vm4, %v29542_v44 }
 0x2a2   : > { %16910 = vmatmul.mubr.msk.f32.gmra.mrb[6].mxu0 %vm859_vm4, %v29543_v46 }
 0x2a3   : > { %16912 = vmatprep.mubr.msk.f32.mxu0 %vm859_vm4, %v29544_v47 }
 0x2a6   : > { %16913 = vmatmul.mubr.msk.f32.gmra.mrb[8].mxu0 %vm859_vm4, %v29545_v48 }
 0x2a7   : > { %16915 = vmatprep.mubr.msk.f32.mxu0 %vm859_vm4, %v29546_v50 }
 0x2aa   : > { %16916 = vmatmul.mubr.msk.f32.gmra.mrb[10].mxu0 %vm859_vm4, %v29547_v52 }
 0x2ab   : > { %16918 = vmatprep.mubr.msk.f32.mxu0 %vm859_vm4, %v29548_v54 }
 0x2ae   : > { %16919 = vmatmul.mubr.msk.f32.gmra.mrb[12].mxu0 %vm859_vm4, %v29549_v56 }
 0x2af   : > { %16921 = vmatprep.mubr.msk.f32.mxu0 %vm859_vm4, %v29550_v62 }
 0x2b2   : > { %16922 = vmatmul.mubr.msk.f32.gmra.mrb[14].mxu0 %vm859_vm4, %v29551_v6 }
 0x2b3   : > { %16924 = vmatprep.mubr.msk.f32.mxu0 %vm859_vm4, %v29552_v9 }
 0x2b6   : > { %16925 = vmatmul.mubr.msk.f32.gmra.mrb[16].mxu0 %vm859_vm4, %v29553_v10 }
 0x2b7   : > { %16927 = vmatprep.mubr.msk.f32.mxu0 %vm859_vm4, %v29554_v14 }
 0x2ba   : > { %16928 = vmatmul.mubr.msk.f32.gmra.mrb[18].mxu0 %vm859_vm4, %v29555_v16 }
 0x2bb   : > { %16930 = vmatprep.mubr.msk.f32.mxu0 %vm859_vm4, %v29556_v17 }
 0x2be   : > { %16931 = vmatmul.mubr.msk.f32.gmra.mrb[20].mxu0 %vm859_vm4, %v29557_v18 }
 0x2bf   : > { %16933 = vmatprep.mubr.msk.f32.mxu0 %vm859_vm4, %v29558_v22 }
 0x2c2   : > { %16934 = vmatmul.mubr.msk.f32.gmra.mrb[22].mxu0 %vm859_vm4, %v29559_v26 }
 0x2c3   : > { %16936 = vmatprep.mubr.msk.f32.mxu0 %vm859_vm4, %v29560_v29 }
 0x2c6   : > { %16937 = vmatmul.mubr.msk.f32.gmra.mrb[24].mxu0 %vm859_vm4, %v29561_v31 }
 0x2c7   : > { %16939 = vmatprep.mubr.msk.f32.mxu0 %vm859_vm4, %v29562_v37 }
 0x2ca   : > { %16940 = vmatmul.mubr.msk.f32.gmra.mrb[26].mxu0 %vm859_vm4, %v29563_v43 }
 0x2cb   : > { %16942 = vmatprep.mubr.msk.f32.mxu0 %vm859_vm4, %v29564_v45 }
 0x2ce   : > { %16943 = vmatmul.mubr.msk.f32.gmra.mrb[28].mxu0 %vm859_vm4, %v29565_v49 }
 0x2cf   : > { %16945 = vmatprep.mubr.msk.f32.mxu0 %vm859_vm4, %v29566_v60 }
 0x2d2   : > { %16946 = vmatmul.mubr.msk.f32.gmra.mrb[30].mxu0 %vm859_vm4, %v29567_v61 }
 0x2d3   : > { %16948 = vmatprep.mubr.msk.f32.mxu0 %vm859_vm4, %v29568_v21 }
 0x2d6   : > { %16949 = vmatmul.mubr.msk.f32.gmra.mrb[32].mxu0 %vm859_vm4, %v29569_v24 }
 0x2d7   : > { %16951 = vmatprep.mubr.msk.f32.mxu0 %vm859_vm4, %v29570_v15 }
 0x2da   : > { %16952 = vmatmul.mubr.msk.f32.gmra.mrb[34].mxu0 %vm859_vm4, %v29571_v57 }
 0x2db   : > { %16954 = vmatprep.mubr.msk.f32.mxu0 %vm859_vm4, %v29572_v1 }
 0x2de   : > { %16955 = vmatmul.mubr.msk.f32.gmra.mrb[36].mxu0 %vm859_vm4, %v29573_v39 }
 0x2df   : > { %16957 = vmatprep.mubr.msk.f32.mxu0 %vm859_vm4, %v29574_v55 }
 0x2e2   : > { %16958 = vmatmul.mubr.msk.f32.gmra.mrb[38].mxu0 %vm859_vm4, %v29575_v3 }
 0x2e3   : > { %16960 = vmatprep.mubr.msk.f32.mxu0 %vm859_vm4, %v29576_v8 }
 0x2e6   : > { %16961 = vmatmul.mubr.msk.f32.gmra.mrb[40].mxu0 %vm859_vm4, %v29577_v23 }
 0x2e7   : > { %16963 = vmatprep.mubr.msk.f32.mxu0 %vm859_vm4, %v29578_v51 }
 0x2ea   : > { %16964 = vmatmul.mubr.msk.f32.gmra.mrb[42].mxu0 %vm859_vm4, %v29579_v12 }
 0x2eb   : > { %16966 = vmatprep.mubr.msk.f32.mxu0 %vm859_vm4, %v29580_v13 }
 0x2ee   : > { %16967 = vmatmul.mubr.msk.f32.gmra.mrb[44].mxu0 %vm859_vm4, %v29581_v19 }
 0x2ef   : > { %16969 = vmatprep.mubr.msk.f32.mxu0 %vm859_vm4, %v29582_v20 }
 0x2f2   : > { %16970 = vmatmul.mubr.msk.f32.gmra.mrb[46].mxu0 %vm859_vm4, %v29583_v27  ;;  %v2953_v27 = vrot.slane %v23511_v36, 1 }
 0x2f3   : > { %16972 = vmatprep.mubr.msk.f32.mxu0 %vm859_vm4, %v29584_v28  ;;  %v29590_v28 = vld [vmem:[#allocation82_spill] sm:$0xff] }
 0x2f6   : > { %16973 = vmatmul.mubr.msk.f32.gmra.mrb[48].mxu0 %vm859_vm4, %v29585_v34  ;;  %v23639_v34 = vrot.slane %v23518_v32, 1 }
 0x2f7   : > { %16975 = vmatprep.mubr.msk.f32.mxu0 %vm859_vm4, %v29586_v38  ;;  %v29592_v38 = vld [vmem:[#allocation81_spill] sm:$0xff] }
 0x2f8   : > { %29591 = vst [vmem:[#allocation17_spill] sm:$0xff] %v23639_v34  ;;  %v23643_v20 = vsel %vm739_vm3, %v29592_v38, %v2951_v58  ;;  %v29597_v38 = vld [vmem:[#allocation61_spill] sm:$0xff] }
 0x2f9   : > { %29593 = vst [vmem:[#allocation28_spill] sm:$0xff] %v23643_v20 }
 0x2fa   : > { %16976 = vmatmul.mubr.msk.f32.gmra.mrb[50].mxu0 %vm859_vm4, %v29587_v30  ;;  %v29594_v30 = vld [vmem:[#allocation83_spill] sm:$0xff] }
 0x2fb   : > { %16978 = vmatprep.mubr.msk.f32.mxu0 %vm859_vm4, %v29588_v25  ;;  %v23654_v25 = vsel %vm739_vm3, %v2953_v27, %v23639_v34 }
 0x2fc   : > { %29596 = vst [vmem:[#allocation68_spill] sm:$0xff] %v23654_v25 }
 0x2fe   : > { %16979 = vmatmul.mubr.msk.f32.gmra.mrb[52].mxu0 %vm859_vm4, %v29589_v59  ;;  %v23650_v59 = vsel %vm739_vm3, %v2951_v58, %v2953_v27  ;;  %v29599_v58 = vld [vmem:[#allocation69_spill] sm:$0xff]  ;;  %v29600_v27 = vld [vmem:[#allocation84_spill] sm:$0xff] }
 0x2ff   : > { %16981 = vmatprep.mubr.msk.f32.mxu0 %vm859_vm4, %v29590_v28  ;;  %29595 = vst [vmem:[#allocation65_spill] sm:$0xff] %v23650_v59 }
 0x302   : > { %16982 = vmatmul.mubr.msk.f32.gmra.mrb[54].mxu0 %vm859_vm4, %v29594_v30  ;;  %v29611_v30 = vld [vmem:[#allocation95_spill] sm:$0xff] }
 0x303   : > { %16984 = vmatprep.mubr.msk.f32.mxu0 %vm859_vm4, %v23643_v20  ;;  %v29598_v20 = vld [vmem:[#allocation64_spill] sm:$0xff] }
 0x306   : > { %16985 = vmatmul.mubr.msk.f32.gmra.mrb[56].mxu0 %vm859_vm4, %v23650_v59  ;;  %v29601_v59 = vld [vmem:[#allocation85_spill] sm:$0xff] }
 0x307   : > { %16987 = vmatprep.mubr.msk.f32.mxu0 %vm859_vm4, %v23654_v25  ;;  %v29602_v25 = vld [vmem:[#allocation86_spill] sm:$0xff] }
 0x30a   : > { %16988 = vmatmul.mubr.msk.f32.gmra.mrb[58].mxu0 %vm859_vm4, %v23639_v34  ;;  %v29603_v34 = vld [vmem:[#allocation87_spill] sm:$0xff] }
 0x30b   : > { %16994 = vmatprep.mubr.msk.f32.mxu0 %vm859_vm4, %v29597_v38  ;;  %v29604_v38 = vld [vmem:[#allocation88_spill] sm:$0xff] }
 0x30e   : > { %16995 = vmatmul.mubr.msk.f32.vlgmr.msra.gmra.mrb[0].mxu0 %vm859_vm4, %v29598_v20  ;;  %v29605_v20 = vld [vmem:[#allocation89_spill] sm:$0xff] }
 0x30f   : > { %16997 = vmatprep.mubr.msk.f32.mxu0 %vm859_vm4, %v29599_v58  ;;  %19562 = vmatpush3.bf16.msk.msra.mxu0 %vm22352_vm2, %v19557_v2  ;;  %v29606_v58 = vld [vmem:[#allocation90_spill] sm:$0xff]  ;;  %v29607_v2 = vld [vmem:[#allocation91_spill] sm:$0xff] }
 0x312   : > { %16998 = vmatmul.mubr.msk.f32.gmra.mrb[2].mxu0 %vm859_vm4, %v29600_v27  ;;  %v29608_v27 = vld [vmem:[#allocation92_spill] sm:$0xff] }
 0x313   : > { %17000 = vmatprep.mubr.msk.f32.mxu0 %vm859_vm4, %v29601_v59  ;;  %v29609_v59 = vld [vmem:[#allocation93_spill] sm:$0xff] }
 0x316   : > { %17001 = vmatmul.mubr.msk.f32.gmra.mrb[4].mxu0 %vm859_vm4, %v29602_v25  ;;  %v29610_v25 = vld [vmem:[#allocation94_spill] sm:$0xff] }
 0x317   : > { %17003 = vmatprep.mubr.msk.f32.mxu0 %vm859_vm4, %v29603_v34  ;;  %v4279_v34 = vld [vmem:[#allocation2 + $0x70] sm:$0xff] }
 0x31a   : > { %17004 = vmatmul.mubr.msk.f32.gmra.mrb[6].mxu0 %vm859_vm4, %v29604_v38  ;;  %v4280_v38 = vld [vmem:[#allocation2 + $0x78] sm:$0xf] }
 0x31b   : > { %17006 = vmatprep.mubr.msk.f32.mxu0 %vm859_vm4, %v29605_v20  ;;  %v19563_v20 = vpack.c.bf16 %v4280_v38, %v4279_v34  ;;  %v29618_v34 = vld [vmem:[#allocation102_spill] sm:$0xff]  ;;  %v29619_v38 = vld [vmem:[#allocation103_spill] sm:$0xff] }
 0x31d   : > { %19565 = vmatprep.subr.msk.bf16.mxu0 %vm22352_vm2, %v19563_v20 }
 0x31e   : > { %17007 = vmatmul.mubr.msk.f32.gmra.mrb[8].mxu0 %vm859_vm4, %v29606_v58  ;;  %v29612_v58 = vld [vmem:[#allocation96_spill] sm:$0xff] }
 0x31f   : > { %17009 = vmatprep.mubr.msk.f32.mxu0 %vm859_vm4, %v29607_v2  ;;  %v29613_v2 = vld [vmem:[#allocation97_spill] sm:$0xff] }
 0x322   : > { %17010 = vmatmul.mubr.msk.f32.gmra.mrb[10].mxu0 %vm859_vm4, %v29608_v27  ;;  %v29614_v27 = vld [vmem:[#allocation98_spill] sm:$0xff] }
 0x323   : > { %17012 = vmatprep.mubr.msk.f32.mxu0 %vm859_vm4, %v29609_v59  ;;  %v29615_v59 = vld [vmem:[#allocation99_spill] sm:$0xff] }
 0x326   : > { %17013 = vmatmul.mubr.msk.f32.gmra.mrb[12].mxu0 %vm859_vm4, %v29610_v25  ;;  %v29616_v25 = vld [vmem:[#allocation100_spill] sm:$0xff] }
 0x327   : > { %17015 = vmatprep.mubr.msk.f32.mxu0 %vm859_vm4, %v29611_v30  ;;  %v29617_v30 = vld [vmem:[#allocation101_spill] sm:$0xff] }
 0x32a   : > { %17016 = vmatmul.mubr.msk.f32.gmra.mrb[14].mxu0 %vm859_vm4, %v29612_v58  ;;  %v29620_v58 = vld [vmem:[#allocation104_spill] sm:$0xff] }
 0x32b   : > { %17018 = vmatprep.mubr.msk.f32.mxu0 %vm859_vm4, %v29613_v2  ;;  %v29621_v2 = vld [vmem:[#allocation105_spill] sm:$0xff] }
 0x32e   : > { %17019 = vmatmul.mubr.msk.f32.gmra.mrb[16].mxu0 %vm859_vm4, %v29614_v27  ;;  %v29622_v27 = vld [vmem:[#allocation106_spill] sm:$0xff] }
 0x32f   : > { %17021 = vmatprep.mubr.msk.f32.mxu0 %vm859_vm4, %v29615_v59  ;;  %v29623_v59 = vld [vmem:[#allocation107_spill] sm:$0xff] }
 0x332   : > { %17022 = vmatmul.mubr.msk.f32.gmra.mrb[18].mxu0 %vm859_vm4, %v29616_v25  ;;  %v29624_v25 = vld [vmem:[#allocation108_spill] sm:$0xff] }
 0x333   : > { %17024 = vmatprep.mubr.msk.f32.mxu0 %vm859_vm4, %v29617_v30  ;;  %v29625_v30 = vld [vmem:[#allocation109_spill] sm:$0xff] }
 0x336   : > { %17025 = vmatmul.mubr.msk.f32.gmra.mrb[20].mxu0 %vm859_vm4, %v29618_v34  ;;  %v29626_v34 = vld [vmem:[#allocation110_spill] sm:$0xff] }
 0x337   : > { %17027 = vmatprep.mubr.msk.f32.mxu0 %vm859_vm4, %v29619_v38  ;;  %v29627_v38 = vld [vmem:[#allocation111_spill] sm:$0xff] }
 0x33a   : > { %17028 = vmatmul.mubr.msk.f32.gmra.mrb[22].mxu0 %vm859_vm4, %v29620_v58  ;;  %v29628_v58 = vld [vmem:[#allocation112_spill] sm:$0xff] }
 0x33b   : > { %17030 = vmatprep.mubr.msk.f32.mxu0 %vm859_vm4, %v29621_v2  ;;  %v29629_v2 = vld [vmem:[#allocation113_spill] sm:$0xff] }
 0x33e   : > { %17031 = vmatmul.mubr.msk.f32.gmra.mrb[24].mxu0 %vm859_vm4, %v29622_v27  ;;  %v29630_v27 = vld [vmem:[#allocation114_spill] sm:$0xff] }
 0x33f   : > { %17033 = vmatprep.mubr.msk.f32.mxu0 %vm859_vm4, %v29623_v59  ;;  %v29631_v59 = vld [vmem:[#allocation115_spill] sm:$0xff] }
 0x342   : > { %17034 = vmatmul.mubr.msk.f32.gmra.mrb[26].mxu0 %vm859_vm4, %v29624_v25  ;;  %v29632_v25 = vld [vmem:[#allocation116_spill] sm:$0xff] }
 0x343   : > { %17036 = vmatprep.mubr.msk.f32.mxu0 %vm859_vm4, %v29625_v30  ;;  %v29633_v30 = vld [vmem:[#allocation117_spill] sm:$0xff] }
 0x346   : > { %17037 = vmatmul.mubr.msk.f32.gmra.mrb[28].mxu0 %vm859_vm4, %v29626_v34  ;;  %v29634_v34 = vld [vmem:[#allocation118_spill] sm:$0xff] }
 0x347   : > { %17039 = vmatprep.mubr.msk.f32.mxu0 %vm859_vm4, %v29627_v38  ;;  %v29635_v38 = vld [vmem:[#allocation119_spill] sm:$0xff] }
 0x34a   : > { %17040 = vmatmul.mubr.msk.f32.gmra.mrb[30].mxu0 %vm859_vm4, %v29628_v58  ;;  %v29636_v58 = vld [vmem:[#allocation120_spill] sm:$0xff] }
 0x34b   : > { %17042 = vmatprep.mubr.msk.f32.mxu0 %vm859_vm4, %v29629_v2  ;;  %v29637_v2 = vld [vmem:[#allocation121_spill] sm:$0xff] }
 0x34e   : > { %17043 = vmatmul.mubr.msk.f32.gmra.mrb[32].mxu0 %vm859_vm4, %v29630_v27  ;;  %v29638_v27 = vld [vmem:[#allocation122_spill] sm:$0xff] }
 0x34f   : > { %17045 = vmatprep.mubr.msk.f32.mxu0 %vm859_vm4, %v29631_v59  ;;  %v29639_v59 = vld [vmem:[#allocation123_spill] sm:$0xff] }
 0x352   : > { %17046 = vmatmul.mubr.msk.f32.gmra.mrb[34].mxu0 %vm859_vm4, %v29632_v25  ;;  %v29640_v25 = vld [vmem:[#allocation124_spill] sm:$0xff] }
 0x353   : > { %17048 = vmatprep.mubr.msk.f32.mxu0 %vm859_vm4, %v29633_v30  ;;  %v29641_v30 = vld [vmem:[#allocation125_spill] sm:$0xff] }
 0x356   : > { %17049 = vmatmul.mubr.msk.f32.gmra.mrb[36].mxu0 %vm859_vm4, %v29634_v34  ;;  %v29642_v34 = vld [vmem:[#allocation126_spill] sm:$0xff] }
 0x357   : > { %17051 = vmatprep.mubr.msk.f32.mxu0 %vm859_vm4, %v29635_v38  ;;  %v29643_v38 = vld [vmem:[#allocation127_spill] sm:$0xff] }
 0x35a   : > { %17052 = vmatmul.mubr.msk.f32.gmra.mrb[38].mxu0 %vm859_vm4, %v29636_v58  ;;  %v29644_v58 = vld [vmem:[#allocation128_spill] sm:$0xff] }
 0x35b   : > { %17054 = vmatprep.mubr.msk.f32.mxu0 %vm859_vm4, %v29637_v2  ;;  %v29645_v2 = vld [vmem:[#allocation129_spill] sm:$0xff] }
 0x35e   : > { %17055 = vmatmul.mubr.msk.f32.gmra.mrb[40].mxu0 %vm859_vm4, %v29638_v27  ;;  %v29646_v27 = vld [vmem:[#allocation130_spill] sm:$0xff] }
 0x35f   : > { %17057 = vmatprep.mubr.msk.f32.mxu0 %vm859_vm4, %v29639_v59 }
 0x362   : > { %17058 = vmatmul.mubr.msk.f32.gmra.mrb[42].mxu0 %vm859_vm4, %v29640_v25 }
 0x363   : > { %17060 = vmatprep.mubr.msk.f32.mxu0 %vm859_vm4, %v29641_v30 }
 0x366   : > { %17061 = vmatmul.mubr.msk.f32.gmra.mrb[44].mxu0 %vm859_vm4, %v29642_v34 }
 0x367   : > { %17063 = vmatprep.mubr.msk.f32.mxu0 %vm859_vm4, %v29643_v38  ;;  %v3396_v38 = vrot.slane %v23508_v35, 2 }
 0x36a   : > { %17064 = vmatmul.mubr.msk.f32.gmra.mrb[46].mxu0 %vm859_vm4, %v29644_v58 }
 0x36b   : > { %17066 = vmatprep.mubr.msk.f32.mxu0 %vm859_vm4, %v29645_v2  ;;  %v3398_v2 = vrot.slane %v23511_v36, 2 }
 0x36e   : > { %17067 = vmatmul.mubr.msk.f32.gmra.mrb[48].mxu0 %vm859_vm4, %v29646_v27 }
 0x36f   : > { %17069 = vmatprep.mubr.msk.f32.mxu0 %vm859_vm4, %v23350_v33  ;;  %v23779_v33 = vrot.slane %v23518_v32, 2 }
 0x371   : > { %29647 = vst [vmem:[#allocation72_spill] sm:$0xff] %v23779_v33 }
 0x372   : > { %17070 = vmatmul.mubr.msk.f32.gmra.mrb[50].mxu0 %vm859_vm4, %v23354_v63  ;;  %v23783_v63 = vsel %vm1840_vm5, %v23369_v53, %v3396_v38  ;;  %v21799_v53 = vld [vmem:[%s22359_s20 + $0x30] sm:$0xff] }
 0x373   : > { %17072 = vmatprep.mubr.msk.f32.mxu0 %vm859_vm4, %v23362_v7  ;;  %29648 = vst [vmem:[#allocation18_spill] sm:$0xff] %v23783_v63 }
 0x376   : > { %17073 = vmatmul.mubr.msk.f32.gmra.mrb[52].mxu0 %vm859_vm4, %v23366_v5  ;;  %v23790_v5 = vsel %vm1840_vm5, %v3396_v38, %v3398_v2  ;;  %v21800_v38 = vld [vmem:[%s22359_s20 + $0x38] sm:$0xff] }
 0x377   : > { %17075 = vmatprep.mubr.msk.f32.mxu0 %vm859_vm4, %v23376_v4  ;;  %29649 = vst [vmem:[#allocation19_spill] sm:$0xff] %v23790_v5  ;;  %v23794_v4 = vsel %vm1840_vm5, %v3398_v2, %v23779_v33  ;;  %v21801_v2 = vld [vmem:[%s22359_s20 + $0x40] sm:$0xff] }
 0x378   : > { %29650 = vst [vmem:[#allocation20_spill] sm:$0xff] %v23794_v4 }
 0x37a   : > { %17076 = vmatmul.mubr.msk.f32.gmra.mrb[54].mxu0 %vm859_vm4, %v23380_v11 }
 0x37b   : > { %17078 = vmatprep.mubr.msk.f32.mxu0 %vm859_vm4, %v23783_v63  ;;  %v21850_v63 = vld [vmem:[%s22359_s20 + $0x1c8] sm:$0xff] }
 0x37e   : > { %17079 = vmatmul.mubr.msk.f32.gmra.mrb[56].mxu0 %vm859_vm4, %v23790_v5  ;;  %v21808_v5 = vld [vmem:[%s22359_s20 + $0x78] sm:$0xff] }
 0x37f   : > { %17081 = vmatprep.mubr.msk.f32.mxu0 %vm859_vm4, %v23794_v4  ;;  %v21802_v4 = vld [vmem:[%s22359_s20 + $0x48] sm:$0xff] }
 0x382   : > { %17082 = vmatmul.mubr.msk.f32.gmra.mrb[58].mxu0 %vm859_vm4, %v23779_v33  ;;  %v21803_v33 = vld [vmem:[%s22359_s20 + $0x50] sm:$0xff] }
 0x383   : > { %17088 = vmatprep.mubr.msk.f32.mxu0 %vm859_vm4, %v21799_v53  ;;  %v21804_v53 = vld [vmem:[%s22359_s20 + $0x58] sm:$0xff] }
 0x386   : > { %17089 = vmatmul.mubr.msk.f32.vlgmr.msra.gmra.mrb[0].mxu0 %vm859_vm4, %v21800_v38  ;;  %v21805_v38 = vld [vmem:[%s22359_s20 + $0x60] sm:$0xff] }
 0x387   : > { %17091 = vmatprep.mubr.msk.f32.mxu0 %vm859_vm4, %v21801_v2  ;;  %19568 = vmatpush3.bf16.msk.msra.mxu0 %vm22352_vm2, %v19563_v20  ;;  %v21806_v2 = vld [vmem:[%s22359_s20 + $0x68] sm:$0xff]  ;;  %v21807_v20 = vld [vmem:[%s22359_s20 + $0x70] sm:$0xff] }
 0x38a   : > { %17092 = vmatmul.mubr.msk.f32.gmra.mrb[2].mxu0 %vm859_vm4, %v21802_v4  ;;  %v21809_v4 = vld [vmem:[%s22359_s20 + $0x80] sm:$0xff] }
 0x38b   : > { %17094 = vmatprep.mubr.msk.f32.mxu0 %vm859_vm4, %v21803_v33  ;;  %v21810_v33 = vld [vmem:[%s22359_s20 + $0x88] sm:$0xff] }
 0x38e   : > { %17095 = vmatmul.mubr.msk.f32.gmra.mrb[4].mxu0 %vm859_vm4, %v21804_v53  ;;  %v21811_v53 = vld [vmem:[%s22359_s20 + $0x90] sm:$0xff] }
 0x38f   : > { %17097 = vmatprep.mubr.msk.f32.mxu0 %vm859_vm4, %v21805_v38  ;;  %v21812_v38 = vld [vmem:[%s22359_s20 + $0x98] sm:$0xff] }
 0x392   : > { %17098 = vmatmul.mubr.msk.f32.gmra.mrb[6].mxu0 %vm859_vm4, %v21806_v2  ;;  %v4724_v2 = vld [vmem:[#allocation2 + $0x80] sm:$0xff] }
 0x393   : > { %17100 = vmatprep.mubr.msk.f32.mxu0 %vm859_vm4, %v21807_v20  ;;  %v4725_v20 = vld [vmem:[#allocation2 + $0x88] sm:$0xf] }
 0x396   : > { %17101 = vmatmul.mubr.msk.f32.gmra.mrb[8].mxu0 %vm859_vm4, %v21808_v5  ;;  %v21813_v5 = vld [vmem:[%s22359_s20 + $0xa0] sm:$0xff] }
 0x397   : > { %17103 = vmatprep.mubr.msk.f32.mxu0 %vm859_vm4, %v21809_v4  ;;  %v23834_v4 = vpack.c.bf16 %v4725_v20, %v4724_v2  ;;  %v21818_v2 = vld [vmem:[%s22359_s20 + $0xc8] sm:$0xff]  ;;  %v21819_v20 = vld [vmem:[%s22359_s20 + $0xd0] sm:$0xff] }
 0x399   : > { %19571 = vmatprep.subr.msk.bf16.mxu0 %vm22352_vm2, %v23834_v4 }
 0x39a   : > { %17104 = vmatmul.mubr.msk.f32.gmra.mrb[10].mxu0 %vm859_vm4, %v21810_v33  ;;  %v21814_v33 = vld [vmem:[%s22359_s20 + $0xa8] sm:$0xff] }
 0x39b   : > { %17106 = vmatprep.mubr.msk.f32.mxu0 %vm859_vm4, %v21811_v53  ;;  %v21815_v53 = vld [vmem:[%s22359_s20 + $0xb0] sm:$0xff] }
 0x39e   : > { %17107 = vmatmul.mubr.msk.f32.gmra.mrb[12].mxu0 %vm859_vm4, %v21812_v38  ;;  %v21816_v38 = vld [vmem:[%s22359_s20 + $0xb8] sm:$0xff] }
 0x39f   : > { %17109 = vmatprep.mubr.msk.f32.mxu0 %vm859_vm4, %v21813_v5  ;;  %v21817_v5 = vld [vmem:[%s22359_s20 + $0xc0] sm:$0xff] }
 0x3a2   : > { %17110 = vmatmul.mubr.msk.f32.gmra.mrb[14].mxu0 %vm859_vm4, %v21814_v33  ;;  %v21820_v33 = vld [vmem:[%s22359_s20 + $0xd8] sm:$0xff] }
 0x3a3   : > { %17112 = vmatprep.mubr.msk.f32.mxu0 %vm859_vm4, %v21815_v53  ;;  %v21821_v53 = vld [vmem:[%s22359_s20 + $0xe0] sm:$0xff] }
 0x3a6   : > { %17113 = vmatmul.mubr.msk.f32.gmra.mrb[16].mxu0 %vm859_vm4, %v21816_v38  ;;  %v21822_v38 = vld [vmem:[%s22359_s20 + $0xe8] sm:$0xff] }
 0x3a7   : > { %17115 = vmatprep.mubr.msk.f32.mxu0 %vm859_vm4, %v21817_v5  ;;  %v21823_v5 = vld [vmem:[%s22359_s20 + $0xf0] sm:$0xff] }
 0x3aa   : > { %17116 = vmatmul.mubr.msk.f32.gmra.mrb[18].mxu0 %vm859_vm4, %v21818_v2  ;;  %v21824_v2 = vld [vmem:[%s22359_s20 + $0xf8] sm:$0xff] }
 0x3ab   : > { %17118 = vmatprep.mubr.msk.f32.mxu0 %vm859_vm4, %v21819_v20  ;;  %v21825_v20 = vld [vmem:[%s22359_s20 + $0x100] sm:$0xff] }
 0x3ae   : > { %17119 = vmatmul.mubr.msk.f32.gmra.mrb[20].mxu0 %vm859_vm4, %v21820_v33  ;;  %v21826_v33 = vld [vmem:[%s22359_s20 + $0x108] sm:$0xff] }
 0x3af   : > { %17121 = vmatprep.mubr.msk.f32.mxu0 %vm859_vm4, %v21821_v53  ;;  %v21827_v53 = vld [vmem:[%s22359_s20 + $0x110] sm:$0xff] }
 0x3b2   : > { %17122 = vmatmul.mubr.msk.f32.gmra.mrb[22].mxu0 %vm859_vm4, %v21822_v38  ;;  %v21828_v38 = vld [vmem:[%s22359_s20 + $0x118] sm:$0xff] }
 0x3b3   : > { %17124 = vmatprep.mubr.msk.f32.mxu0 %vm859_vm4, %v21823_v5  ;;  %v21829_v5 = vld [vmem:[%s22359_s20 + $0x120] sm:$0xff] }
 0x3b6   : > { %17125 = vmatmul.mubr.msk.f32.gmra.mrb[24].mxu0 %vm859_vm4, %v21824_v2  ;;  %v21830_v2 = vld [vmem:[%s22359_s20 + $0x128] sm:$0xff] }
 0x3b7   : > { %17127 = vmatprep.mubr.msk.f32.mxu0 %vm859_vm4, %v21825_v20  ;;  %v21831_v20 = vld [vmem:[%s22359_s20 + $0x130] sm:$0xff] }
 0x3ba   : > { %17128 = vmatmul.mubr.msk.f32.gmra.mrb[26].mxu0 %vm859_vm4, %v21826_v33  ;;  %v21832_v33 = vld [vmem:[%s22359_s20 + $0x138] sm:$0xff] }
 0x3bb   : > { %17130 = vmatprep.mubr.msk.f32.mxu0 %vm859_vm4, %v21827_v53  ;;  %v21833_v53 = vld [vmem:[%s22359_s20 + $0x140] sm:$0xff] }
 0x3be   : > { %17131 = vmatmul.mubr.msk.f32.gmra.mrb[28].mxu0 %vm859_vm4, %v21828_v38  ;;  %v21834_v38 = vld [vmem:[%s22359_s20 + $0x148] sm:$0xff] }
 0x3bf   : > { %17133 = vmatprep.mubr.msk.f32.mxu0 %vm859_vm4, %v21829_v5  ;;  %v21835_v5 = vld [vmem:[%s22359_s20 + $0x150] sm:$0xff] }
 0x3c2   : > { %17134 = vmatmul.mubr.msk.f32.gmra.mrb[30].mxu0 %vm859_vm4, %v21830_v2  ;;  %v21836_v2 = vld [vmem:[%s22359_s20 + $0x158] sm:$0xff] }
 0x3c3   : > { %17136 = vmatprep.mubr.msk.f32.mxu0 %vm859_vm4, %v21831_v20  ;;  %v21837_v20 = vld [vmem:[%s22359_s20 + $0x160] sm:$0xff] }
 0x3c6   : > { %17137 = vmatmul.mubr.msk.f32.gmra.mrb[32].mxu0 %vm859_vm4, %v21832_v33  ;;  %v21838_v33 = vld [vmem:[%s22359_s20 + $0x168] sm:$0xff] }
 0x3c7   : > { %17139 = vmatprep.mubr.msk.f32.mxu0 %vm859_vm4, %v21833_v53  ;;  %v21839_v53 = vld [vmem:[%s22359_s20 + $0x170] sm:$0xff] }
 0x3ca   : > { %17140 = vmatmul.mubr.msk.f32.gmra.mrb[34].mxu0 %vm859_vm4, %v21834_v38  ;;  %v21840_v38 = vld [vmem:[%s22359_s20 + $0x178] sm:$0xff] }
 0x3cb   : > { %17142 = vmatprep.mubr.msk.f32.mxu0 %vm859_vm4, %v21835_v5  ;;  %v21841_v5 = vld [vmem:[%s22359_s20 + $0x180] sm:$0xff] }
 0x3ce   : > { %17143 = vmatmul.mubr.msk.f32.gmra.mrb[36].mxu0 %vm859_vm4, %v21836_v2  ;;  %v21842_v2 = vld [vmem:[%s22359_s20 + $0x188] sm:$0xff] }
 0x3cf   : > { %17145 = vmatprep.mubr.msk.f32.mxu0 %vm859_vm4, %v21837_v20  ;;  %v21843_v20 = vld [vmem:[%s22359_s20 + $0x190] sm:$0xff] }
 0x3d2   : > { %17146 = vmatmul.mubr.msk.f32.gmra.mrb[38].mxu0 %vm859_vm4, %v21838_v33  ;;  %v21844_v33 = vld [vmem:[%s22359_s20 + $0x198] sm:$0xff] }
 0x3d3   : > { %17148 = vmatprep.mubr.msk.f32.mxu0 %vm859_vm4, %v21839_v53  ;;  %v21845_v53 = vld [vmem:[%s22359_s20 + $0x1a0] sm:$0xff] }
 0x3d6   : > { %17149 = vmatmul.mubr.msk.f32.gmra.mrb[40].mxu0 %vm859_vm4, %v21840_v38  ;;  %v21846_v38 = vld [vmem:[%s22359_s20 + $0x1a8] sm:$0xff] }
 0x3d7   : > { %17151 = vmatprep.mubr.msk.f32.mxu0 %vm859_vm4, %v21841_v5  ;;  %v21847_v5 = vld [vmem:[%s22359_s20 + $0x1b0] sm:$0xff] }
 0x3da   : > { %17152 = vmatmul.mubr.msk.f32.gmra.mrb[42].mxu0 %vm859_vm4, %v21842_v2  ;;  %v21848_v2 = vld [vmem:[%s22359_s20 + $0x1b8] sm:$0xff] }
 0x3db   : > { %17154 = vmatprep.mubr.msk.f32.mxu0 %vm859_vm4, %v21843_v20  ;;  %v21849_v20 = vld [vmem:[%s22359_s20 + $0x1c0] sm:$0xff] }
 0x3de   : > { %17155 = vmatmul.mubr.msk.f32.gmra.mrb[44].mxu0 %vm859_vm4, %v21844_v33  ;;  %v21851_v33 = vld [vmem:[%s22359_s20 + $0x1d0] sm:$0xff] }
 0x3df   : > { %17157 = vmatprep.mubr.msk.f32.mxu0 %vm859_vm4, %v21845_v53  ;;  %v21852_v53 = vld [vmem:[%s22359_s20 + $0x1d8] sm:$0xff] }
 0x3e2   : > { %17158 = vmatmul.mubr.msk.f32.gmra.mrb[46].mxu0 %vm859_vm4, %v21846_v38  ;;  %v23924_v38 = vld [vmem:[%s22359_s20 + $0x1f8] sm:$0xff] }
 0x3e3   : > { %17160 = vmatprep.mubr.msk.f32.mxu0 %vm859_vm4, %v21847_v5  ;;  %v23927_v5 = vld [vmem:[%s22359_s20 + $0x200] sm:$0xff] }
 0x3e6   : > { %17161 = vmatmul.mubr.msk.f32.gmra.mrb[48].mxu0 %vm859_vm4, %v21848_v2  ;;  %v29694_v2 = vld [vmem:[#allocation114_spill] sm:$0xff] }
 0x3e7   : > { %17163 = vmatprep.mubr.msk.f32.mxu0 %vm859_vm4, %v21849_v20  ;;  %v29695_v20 = vld [vmem:[#allocation115_spill] sm:$0xff] }
 0x3ea   : > { %17164 = vmatmul.mubr.msk.f32.gmra.mrb[50].mxu0 %vm859_vm4, %v21850_v63  ;;  %v23934_v63 = vld [vmem:[%s22359_s20 + $0x208] sm:$0xff]  ;;  %s30118_s20 = sld [smem:[#allocation134_spill]] }
 0x3eb   : > { %17166 = vmatprep.mubr.msk.f32.mxu0 %vm859_vm4, %v21851_v33  ;;  %v29696_v33 = vld [vmem:[#allocation116_spill] sm:$0xff] }
 0x3ee   : > { %17167 = vmatmul.mubr.msk.f32.gmra.mrb[52].mxu0 %vm859_vm4, %v21852_v53  ;;  %v29697_v53 = vld [vmem:[#allocation117_spill] sm:$0xff] }
 0x3ef   : > { %17169 = vmatprep.mubr.msk.f32.mxu0 %vm859_vm4, %v23508_v35  ;;  %v29652_v35 = vld [vmem:[#allocation71_spill] sm:$0xff] }
 0x3f2   : > { %17170 = vmatmul.mubr.msk.f32.gmra.mrb[54].mxu0 %vm859_vm4, %v23511_v36  ;;  %v29653_v36 = vld [vmem:[#allocation74_spill] sm:$0xff] }
 0x3f3   : > { %17172 = vmatprep.mubr.msk.f32.mxu0 %vm859_vm4, %v23518_v32  ;;  %v29654_v32 = vld [vmem:[#allocation75_spill] sm:$0xff] }
 0x3f6   : > { %17173 = vmatmul.mubr.msk.f32.gmra.mrb[56].mxu0 %vm859_vm4, %v23924_v38 }
 0x3f7   : > { %17175 = vmatprep.mubr.msk.f32.mxu0 %vm859_vm4, %v23927_v5 }
 0x3fa   : > { %17176 = vmatmul.mubr.msk.f32.gmra.mrb[58].mxu0 %vm859_vm4, %v23934_v63 }
 0x3fb   : > { %17182 = vmatprep.mubr.msk.f32.mxu0 %vm859_vm4, %v29539_v40  ;;  %v29655_v40 = vld [vmem:[#allocation77_spill] sm:$0xff] }
 0x3fe   : > { %17183 = vmatmul.mubr.msk.f32.vlgmr.msra.gmra.mrb[0].mxu0 %vm859_vm4, %v29540_v41  ;;  %v29656_v41 = vld [vmem:[#allocation78_spill] sm:$0xff] }
 0x3ff   : > { %17185 = vmatprep.mubr.msk.f32.mxu0 %vm859_vm4, %v29541_v42  ;;  %19574 = vmatpush3.bf16.msk.msra.mxu0 %vm22352_vm2, %v23834_v4  ;;  %v29657_v42 = vld [vmem:[#allocation79_spill] sm:$0xff]  ;;  %v29693_v4 = vld [vmem:[#allocation113_spill] sm:$0xff] }
 0x402   : > { %17186 = vmatmul.mubr.msk.f32.gmra.mrb[2].mxu0 %vm859_vm4, %v29542_v44  ;;  %v29658_v44 = vld [vmem:[#allocation80_spill] sm:$0xff] }
 0x403   : > { %17188 = vmatprep.mubr.msk.f32.mxu0 %vm859_vm4, %v29543_v46  ;;  %v29659_v46 = vld [vmem:[#allocation83_spill] sm:$0xff] }
 0x406   : > { %17189 = vmatmul.mubr.msk.f32.gmra.mrb[4].mxu0 %vm859_vm4, %v29544_v47  ;;  %v4281_v47 = vrot.slane %v23924_v38, 1 }
 0x407   : > { %17191 = vmatprep.mubr.msk.f32.mxu0 %vm859_vm4, %v29545_v48  ;;  %v29660_v48 = vld [vmem:[#allocation28_spill] sm:$0xff] }
 0x40a   : > { %17192 = vmatmul.mubr.msk.f32.gmra.mrb[6].mxu0 %vm859_vm4, %v29546_v50  ;;  %v4283_v50 = vrot.slane %v23927_v5, 1 }
 0x40b   : > { %17194 = vmatprep.mubr.msk.f32.mxu0 %vm859_vm4, %v29547_v52  ;;  %v29661_v52 = vld [vmem:[#allocation65_spill] sm:$0xff] }
 0x40e   : > { %17195 = vmatmul.mubr.msk.f32.gmra.mrb[8].mxu0 %vm859_vm4, %v29548_v54  ;;  %v4285_v54 = vrot.slane %v23934_v63, 1 }
 0x40f   : > { %17197 = vmatprep.mubr.msk.f32.mxu0 %vm859_vm4, %v29549_v56  ;;  %v29662_v56 = vld [vmem:[#allocation17_spill] sm:$0xff] }
 0x412   : > { %17198 = vmatmul.mubr.msk.f32.gmra.mrb[10].mxu0 %vm859_vm4, %v29550_v62  ;;  %v4282_v62 = vsel %vm739_vm3, %v29662_v56, %v4281_v47 }
 0x413   : > { %17200 = vmatprep.mubr.msk.f32.mxu0 %vm859_vm4, %v29551_v6  ;;  %v29663_v6 = vld [vmem:[#allocation68_spill] sm:$0xff] }
 0x416   : > { %17201 = vmatmul.mubr.msk.f32.gmra.mrb[12].mxu0 %vm859_vm4, %v29552_v9  ;;  %v4284_v9 = vsel %vm739_vm3, %v4281_v47, %v4283_v50  ;;  %v29711_v47 = vld [vmem:[#allocation72_spill] sm:$0xff] }
 0x417   : > { %17203 = vmatprep.mubr.msk.f32.mxu0 %vm859_vm4, %v29553_v10  ;;  %v4286_v10 = vsel %vm739_vm3, %v4283_v50, %v4285_v54  ;;  %v29712_v50 = vld [vmem:[#allocation20_spill] sm:$0xff] }
 0x41a   : > { %17204 = vmatmul.mubr.msk.f32.gmra.mrb[14].mxu0 %vm859_vm4, %v29554_v14  ;;  %v29664_v14 = vld [vmem:[#allocation84_spill] sm:$0xff] }
 0x41b   : > { %17206 = vmatprep.mubr.msk.f32.mxu0 %vm859_vm4, %v29555_v16  ;;  %v29665_v16 = vld [vmem:[#allocation85_spill] sm:$0xff] }
 0x41e   : > { %17207 = vmatmul.mubr.msk.f32.gmra.mrb[16].mxu0 %vm859_vm4, %v29556_v17  ;;  %v29666_v17 = vld [vmem:[#allocation86_spill] sm:$0xff] }
 0x41f   : > { %17209 = vmatprep.mubr.msk.f32.mxu0 %vm859_vm4, %v29557_v18  ;;  %v29667_v18 = vld [vmem:[#allocation87_spill] sm:$0xff] }
 0x422   : > { %17210 = vmatmul.mubr.msk.f32.gmra.mrb[18].mxu0 %vm859_vm4, %v29558_v22  ;;  %v29668_v22 = vld [vmem:[#allocation88_spill] sm:$0xff] }
 0x423   : > { %17212 = vmatprep.mubr.msk.f32.mxu0 %vm859_vm4, %v29559_v26  ;;  %v29669_v26 = vld [vmem:[#allocation89_spill] sm:$0xff] }
 0x426   : > { %17213 = vmatmul.mubr.msk.f32.gmra.mrb[20].mxu0 %vm859_vm4, %v29560_v29  ;;  %v29670_v29 = vld [vmem:[#allocation90_spill] sm:$0xff] }
 0x427   : > { %17215 = vmatprep.mubr.msk.f32.mxu0 %vm859_vm4, %v29561_v31  ;;  %v29671_v31 = vld [vmem:[#allocation91_spill] sm:$0xff] }
 0x42a   : > { %17216 = vmatmul.mubr.msk.f32.gmra.mrb[22].mxu0 %vm859_vm4, %v29562_v37  ;;  %v29672_v37 = vld [vmem:[#allocation92_spill] sm:$0xff] }
 0x42b   : > { %17218 = vmatprep.mubr.msk.f32.mxu0 %vm859_vm4, %v29563_v43  ;;  %v29673_v43 = vld [vmem:[#allocation93_spill] sm:$0xff] }
 0x42e   : > { %17219 = vmatmul.mubr.msk.f32.gmra.mrb[24].mxu0 %vm859_vm4, %v29564_v45  ;;  %v29674_v45 = vld [vmem:[#allocation94_spill] sm:$0xff] }
 0x42f   : > { %17221 = vmatprep.mubr.msk.f32.mxu0 %vm859_vm4, %v29565_v49  ;;  %v29675_v49 = vld [vmem:[#allocation95_spill] sm:$0xff] }
 0x432   : > { %17222 = vmatmul.mubr.msk.f32.gmra.mrb[26].mxu0 %vm859_vm4, %v29566_v60  ;;  %v29676_v60 = vld [vmem:[#allocation96_spill] sm:$0xff] }
 0x433   : > { %17224 = vmatprep.mubr.msk.f32.mxu0 %vm859_vm4, %v29567_v61  ;;  %v29677_v61 = vld [vmem:[#allocation97_spill] sm:$0xff] }
 0x436   : > { %17225 = vmatmul.mubr.msk.f32.gmra.mrb[28].mxu0 %vm859_vm4, %v29568_v21  ;;  %v29678_v21 = vld [vmem:[#allocation98_spill] sm:$0xff] }
 0x437   : > { %17227 = vmatprep.mubr.msk.f32.mxu0 %vm859_vm4, %v29569_v24  ;;  %v29679_v24 = vld [vmem:[#allocation99_spill] sm:$0xff] }
 0x43a   : > { %17228 = vmatmul.mubr.msk.f32.gmra.mrb[30].mxu0 %vm859_vm4, %v29570_v15  ;;  %v29680_v15 = vld [vmem:[#allocation100_spill] sm:$0xff] }
 0x43b   : > { %17230 = vmatprep.mubr.msk.f32.mxu0 %vm859_vm4, %v29571_v57  ;;  %v29681_v57 = vld [vmem:[#allocation101_spill] sm:$0xff] }
 0x43e   : > { %17231 = vmatmul.mubr.msk.f32.gmra.mrb[32].mxu0 %vm859_vm4, %v29572_v1  ;;  %v29682_v1 = vld [vmem:[#allocation102_spill] sm:$0xff] }
 0x43f   : > { %17233 = vmatprep.mubr.msk.f32.mxu0 %vm859_vm4, %v29573_v39  ;;  %v29683_v39 = vld [vmem:[#allocation103_spill] sm:$0xff] }
 0x442   : > { %17234 = vmatmul.mubr.msk.f32.gmra.mrb[34].mxu0 %vm859_vm4, %v29574_v55  ;;  %v29684_v55 = vld [vmem:[#allocation104_spill] sm:$0xff] }
 0x443   : > { %17236 = vmatprep.mubr.msk.f32.mxu0 %vm859_vm4, %v29575_v3  ;;  %v29685_v3 = vld [vmem:[#allocation105_spill] sm:$0xff] }
 0x446   : > { %17237 = vmatmul.mubr.msk.f32.gmra.mrb[36].mxu0 %vm859_vm4, %v29576_v8  ;;  %v29686_v8 = vld [vmem:[#allocation106_spill] sm:$0xff] }
 0x447   : > { %17239 = vmatprep.mubr.msk.f32.mxu0 %vm859_vm4, %v29577_v23  ;;  %v29687_v23 = vld [vmem:[#allocation107_spill] sm:$0xff] }
 0x44a   : > { %17240 = vmatmul.mubr.msk.f32.gmra.mrb[38].mxu0 %vm859_vm4, %v29578_v51  ;;  %v29688_v51 = vld [vmem:[#allocation108_spill] sm:$0xff] }
 0x44b   : > { %17242 = vmatprep.mubr.msk.f32.mxu0 %vm859_vm4, %v29579_v12  ;;  %v29689_v12 = vld [vmem:[#allocation109_spill] sm:$0xff] }
 0x44e   : > { %17243 = vmatmul.mubr.msk.f32.gmra.mrb[40].mxu0 %vm859_vm4, %v29580_v13  ;;  %v29690_v13 = vld [vmem:[#allocation110_spill] sm:$0xff] }
 0x44f   : > { %17245 = vmatprep.mubr.msk.f32.mxu0 %vm859_vm4, %v29581_v19  ;;  %v29691_v19 = vld [vmem:[#allocation111_spill] sm:$0xff] }
 0x452   : > { %17246 = vmatmul.mubr.msk.f32.gmra.mrb[42].mxu0 %vm859_vm4, %v29651_v0  ;;  %v29698_v0 = vld [vmem:[#allocation118_spill] sm:$0xff] }
 0x453   : > { %17248 = vmatprep.mubr.msk.f32.mxu0 %vm859_vm4, %v29652_v35  ;;  %v29699_v35 = vld [vmem:[#allocation119_spill] sm:$0xff] }
 0x456   : > { %17249 = vmatmul.mubr.msk.f32.gmra.mrb[44].mxu0 %vm859_vm4, %v29653_v36  ;;  %v29700_v36 = vld [vmem:[#allocation120_spill] sm:$0xff] }
 0x457   : > { %17251 = vmatprep.mubr.msk.f32.mxu0 %vm859_vm4, %v29654_v32  ;;  %v29701_v32 = vld [vmem:[#allocation121_spill] sm:$0xff] }
 0x45a   : > { %17252 = vmatmul.mubr.msk.f32.gmra.mrb[46].mxu0 %vm859_vm4, %v29655_v40  ;;  %v29702_v40 = vld [vmem:[#allocation122_spill] sm:$0xff] }
 0x45b   : > { %17254 = vmatprep.mubr.msk.f32.mxu0 %vm859_vm4, %v29656_v41  ;;  %v29703_v41 = vld [vmem:[#allocation127_spill] sm:$0xff] }
 0x45e   : > { %17255 = vmatmul.mubr.msk.f32.gmra.mrb[48].mxu0 %vm859_vm4, %v29657_v42  ;;  %v29704_v42 = vld [vmem:[#allocation129_spill] sm:$0xff] }
 0x45f   : > { %17257 = vmatprep.mubr.msk.f32.mxu0 %vm859_vm4, %v29658_v44  ;;  %v4728_v44 = vrot.slane %v23927_v5, 2 }
 0x462   : > { %17258 = vmatmul.mubr.msk.f32.gmra.mrb[50].mxu0 %vm859_vm4, %v29590_v28  ;;  %v29692_v28 = vld [vmem:[#allocation112_spill] sm:$0xff] }
 0x463   : > { %17260 = vmatprep.mubr.msk.f32.mxu0 %vm859_vm4, %v29659_v46  ;;  %v29710_v46 = vld [vmem:[#allocation19_spill] sm:$0xff] }
 0x466   : > { %17261 = vmatmul.mubr.msk.f32.gmra.mrb[52].mxu0 %vm859_vm4, %v29660_v48 }
 0x467   : > { %17263 = vmatprep.mubr.msk.f32.mxu0 %vm859_vm4, %v29661_v52 }
 0x46a   : > { %17264 = vmatmul.mubr.msk.f32.gmra.mrb[54].mxu0 %vm859_vm4, %v29663_v6 }
 0x46b   : > { %17266 = vmatprep.mubr.msk.f32.mxu0 %vm859_vm4, %v4282_v62 }
 0x46e   : > { %17267 = vmatmul.mubr.msk.f32.gmra.mrb[56].mxu0 %vm859_vm4, %v4284_v9 }
 0x46f   : > { %17269 = vmatprep.mubr.msk.f32.mxu0 %vm859_vm4, %v4286_v10 }
 0x472   : > { %17270 = vmatmul.mubr.msk.f32.gmra.mrb[58].mxu0 %vm859_vm4, %v4285_v54 }
 0x473   : > { %17276 = vmatprep.mubr.msk.f32.mxu0 %vm859_vm4, %v29664_v14 }
 0x476   : > { %17277 = vmatmul.mubr.msk.f32.vlgmr.msra.gmra.mrb[0].mxu0 %vm859_vm4, %v29665_v16 }
 0x477   : > { %17279 = vmatprep.mubr.msk.f32.mxu0 %vm859_vm4, %v29666_v17 }
 0x47a   : > { %17280 = vmatmul.mubr.msk.f32.gmra.mrb[2].mxu0 %vm859_vm4, %v29667_v18 }
 0x47b   : > { %17282 = vmatprep.mubr.msk.f32.mxu0 %vm859_vm4, %v29668_v22 }
 0x47e   : > { %17283 = vmatmul.mubr.msk.f32.gmra.mrb[4].mxu0 %vm859_vm4, %v29669_v26 }
 0x47f   : > { %17285 = vmatprep.mubr.msk.f32.mxu0 %vm859_vm4, %v29670_v29 }
 0x482   : > { %17286 = vmatmul.mubr.msk.f32.gmra.mrb[6].mxu0 %vm859_vm4, %v29671_v31 }
 0x483   : > { %17288 = vmatprep.mubr.msk.f32.mxu0 %vm859_vm4, %v29672_v37 }
 0x486   : > { %17289 = vmatmul.mubr.msk.f32.gmra.mrb[8].mxu0 %vm859_vm4, %v29673_v43 }
 0x487   : > { %17291 = vmatprep.mubr.msk.f32.mxu0 %vm859_vm4, %v29674_v45 }
 0x48a   : > { %17292 = vmatmul.mubr.msk.f32.gmra.mrb[10].mxu0 %vm859_vm4, %v29675_v49 }
 0x48b   : > { %17294 = vmatprep.mubr.msk.f32.mxu0 %vm859_vm4, %v29676_v60 }
 0x48e   : > { %17295 = vmatmul.mubr.msk.f32.gmra.mrb[12].mxu0 %vm859_vm4, %v29677_v61 }
 0x48f   : > { %17297 = vmatprep.mubr.msk.f32.mxu0 %vm859_vm4, %v29678_v21 }
 0x492   : > { %17298 = vmatmul.mubr.msk.f32.gmra.mrb[14].mxu0 %vm859_vm4, %v29679_v24 }
 0x493   : > { %17300 = vmatprep.mubr.msk.f32.mxu0 %vm859_vm4, %v29680_v15 }
 0x496   : > { %17301 = vmatmul.mubr.msk.f32.gmra.mrb[16].mxu0 %vm859_vm4, %v29681_v57 }
 0x497   : > { %17303 = vmatprep.mubr.msk.f32.mxu0 %vm859_vm4, %v29682_v1 }
 0x49a   : > { %17304 = vmatmul.mubr.msk.f32.gmra.mrb[18].mxu0 %vm859_vm4, %v29683_v39 }
 0x49b   : > { %17306 = vmatprep.mubr.msk.f32.mxu0 %vm859_vm4, %v29684_v55 }
 0x49e   : > { %17307 = vmatmul.mubr.msk.f32.gmra.mrb[20].mxu0 %vm859_vm4, %v29685_v3 }
 0x49f   : > { %17309 = vmatprep.mubr.msk.f32.mxu0 %vm859_vm4, %v29686_v8 }
 0x4a2   : > { %17310 = vmatmul.mubr.msk.f32.gmra.mrb[22].mxu0 %vm859_vm4, %v29687_v23 }
 0x4a3   : > { %17312 = vmatprep.mubr.msk.f32.mxu0 %vm859_vm4, %v29688_v51 }
 0x4a6   : > { %17313 = vmatmul.mubr.msk.f32.gmra.mrb[24].mxu0 %vm859_vm4, %v29689_v12 }
 0x4a7   : > { %17315 = vmatprep.mubr.msk.f32.mxu0 %vm859_vm4, %v29690_v13 }
 0x4aa   : > { %17316 = vmatmul.mubr.msk.f32.gmra.mrb[26].mxu0 %vm859_vm4, %v29691_v19 }
 0x4ab   : > { %17318 = vmatprep.mubr.msk.f32.mxu0 %vm859_vm4, %v29692_v28 }
 0x4ae   : > { %17319 = vmatmul.mubr.msk.f32.gmra.mrb[28].mxu0 %vm859_vm4, %v29693_v4 }
 0x4af   : > { %17321 = vmatprep.mubr.msk.f32.mxu0 %vm859_vm4, %v29694_v2 }
 0x4b2   : > { %17322 = vmatmul.mubr.msk.f32.gmra.mrb[30].mxu0 %vm859_vm4, %v29695_v20 }
 0x4b3   : > { %17324 = vmatprep.mubr.msk.f32.mxu0 %vm859_vm4, %v29696_v33 }
 0x4b6   : > { %17325 = vmatmul.mubr.msk.f32.gmra.mrb[32].mxu0 %vm859_vm4, %v29697_v53 }
 0x4b7   : > { %17327 = vmatprep.mubr.msk.f32.mxu0 %vm859_vm4, %v29698_v0 }
 0x4ba   : > { %17328 = vmatmul.mubr.msk.f32.gmra.mrb[34].mxu0 %vm859_vm4, %v29699_v35 }
 0x4bb   : > { %17330 = vmatprep.mubr.msk.f32.mxu0 %vm859_vm4, %v29700_v36 }
 0x4be   : > { %17331 = vmatmul.mubr.msk.f32.gmra.mrb[36].mxu0 %vm859_vm4, %v29701_v32 }
 0x4bf   : > { %17333 = vmatprep.mubr.msk.f32.mxu0 %vm859_vm4, %v29702_v40 }
 0x4c2   : > { %17334 = vmatmul.mubr.msk.f32.gmra.mrb[38].mxu0 %vm859_vm4, %v29639_v59  ;;  %v29705_v59 = vld [vmem:[#allocation73_spill] sm:$0xff] }
 0x4c3   : > { %17336 = vmatprep.mubr.msk.f32.mxu0 %vm859_vm4, %v29640_v25  ;;  %v29706_v25 = vld [vmem:[#allocation131_spill] sm:$0xff] }
 0x4c6   : > { %17337 = vmatmul.mubr.msk.f32.gmra.mrb[40].mxu0 %vm859_vm4, %v29641_v30  ;;  %v29707_v30 = vld [vmem:[#allocation76_spill] sm:$0xff] }
 0x4c7   : > { %17339 = vmatprep.mubr.msk.f32.mxu0 %vm859_vm4, %v29642_v34  ;;  %v29708_v34 = vld [vmem:[#allocation132_spill] sm:$0xff] }
 0x4ca   : > { %17340 = vmatmul.mubr.msk.f32.gmra.mrb[42].mxu0 %vm859_vm4, %v29703_v41 }
 0x4cb   : > { %17342 = vmatprep.mubr.msk.f32.mxu0 %vm859_vm4, %v29644_v58  ;;  %v29709_v58 = vld [vmem:[#allocation18_spill] sm:$0xff] }
 0x4ce   : > { %17343 = vmatmul.mubr.msk.f32.gmra.mrb[44].mxu0 %vm859_vm4, %v29704_v42 }
 0x4cf   : > { %17345 = vmatprep.mubr.msk.f32.mxu0 %vm859_vm4, %v29646_v27  ;;  %v4726_v27 = vrot.slane %v23924_v38, 2 }
 0x4d1   : > { %v4727_v48 = vsel %vm1840_vm5, %v29711_v47, %v4726_v27 }
 0x4d2   : > { %17346 = vmatmul.mubr.msk.f32.gmra.mrb[46].mxu0 %vm859_vm4, %v29705_v59 }
 0x4d3   : > { %17348 = vmatprep.mubr.msk.f32.mxu0 %vm859_vm4, %v29706_v25 }
 0x4d6   : > { %17349 = vmatmul.mubr.msk.f32.gmra.mrb[48].mxu0 %vm859_vm4, %v23362_v7  ;;  %v4730_v7 = vrot.slane %v23934_v63, 2 }
 0x4d7   : > { %17351 = vmatprep.mubr.msk.f32.mxu0 %vm859_vm4, %v29707_v30 }
 0x4d8   : > { %v4731_v38 = vsel %vm1840_vm5, %v4728_v44, %v4730_v7 }
 0x4da   : > { %17352 = vmatmul.mubr.msk.f32.gmra.mrb[50].mxu0 %vm859_vm4, %v29708_v34 }
 0x4db   : > { %17354 = vmatprep.mubr.msk.f32.mxu0 %vm859_vm4, %v23380_v11  ;;  %v4729_v11 = vsel %vm1840_vm5, %v4726_v27, %v4728_v44 }
 0x4de   : > { %17355 = vmatmul.mubr.msk.f32.gmra.mrb[52].mxu0 %vm859_vm4, %v29709_v58 }
 0x4df   : > { %17357 = vmatprep.mubr.msk.f32.mxu0 %vm859_vm4, %v29710_v46 }
 0x4e2   : > { %17358 = vmatmul.mubr.msk.f32.gmra.mrb[54].mxu0 %vm859_vm4, %v29712_v50 }
 0x4e3   : > { %17360 = vmatprep.mubr.msk.f32.mxu0 %vm859_vm4, %v4727_v48 }
 0x4e6   : > { %17361 = vmatmul.mubr.msk.f32.gmra.mrb[56].mxu0 %vm859_vm4, %v4729_v11 }
 0x4e7   : > { %17363 = vmatprep.mubr.msk.f32.mxu0 %vm859_vm4, %v4731_v38 }
 0x4ea   : > { %17364 = vmatmul.mubr.msk.f32.gmra.mrb[58].mxu0 %vm859_vm4, %v4730_v7 }
 0x549   : > { %v24187_v5 = vpop.f32.mrb[0].mxu0 }
 0x54a   : > { %v5236_v63 = vmul.f32 %v24187_v5, %v24187_v5  ;;  %v24191_v52 = vpop.f32.mrb[1].mxu0 }
 0x54b   : > { %v5168_v54 = vadd.f32 %v24187_v5, %v24191_v52  ;;  %v5235_v56 = vmul.f32 %v24191_v52, %v24191_v52 }
 0x54d   : > { %v5295_v62 = vadd.f32 %v5236_v63, %v5235_v56  ;;  %v24197_v6 = vpop.f32.mrb[2].mxu0 }
 0x54e   : > { %v24199_v9 = vpop.f32.mrb[3].mxu0  ;;  %v5238_v16 = vmul.f32 %v24197_v6, %v24197_v6 }
 0x54f   : > { %v5169_v10 = vadd.f32 %v5168_v54, %v24199_v9  ;;  %v5237_v14 = vmul.f32 %v24199_v9, %v24199_v9 }
 0x551   : > { %v5296_v17 = vadd.f32 %v5295_v62, %v5237_v14  ;;  %v24206_v18 = vpop.f32.mrb[4].mxu0  ;;  %v5170_v22 = vadd.f32 %v24197_v6, %v5169_v10 }
 0x552   : > { %v24209_v26 = vpop.f32.mrb[5].mxu0  ;;  %v5240_v43 = vmul.f32 %v24206_v18, %v24206_v18 }
 0x553   : > { %v5171_v29 = vadd.f32 %v5170_v22, %v24209_v26  ;;  %v5239_v31 = vmul.f32 %v24209_v26, %v24209_v26  ;;  %v5297_v37 = vadd.f32 %v5296_v17, %v5238_v16 }
 0x555   : > { %v5298_v45 = vadd.f32 %v5297_v37, %v5239_v31  ;;  %v24216_v49 = vpop.f32.mrb[6].mxu0  ;;  %v5172_v60 = vadd.f32 %v24206_v18, %v5171_v29 }
 0x556   : > { %v24219_v61 = vpop.f32.mrb[7].mxu0  ;;  %v5242_v57 = vmul.f32 %v24216_v49, %v24216_v49 }
 0x557   : > { %v5173_v21 = vadd.f32 %v5172_v60, %v24219_v61  ;;  %v5241_v24 = vmul.f32 %v24219_v61, %v24219_v61  ;;  %v5299_v15 = vadd.f32 %v5298_v45, %v5240_v43 }
 0x559   : > { %v5300_v1 = vadd.f32 %v5299_v15, %v5241_v24  ;;  %v24226_v39 = vpop.f32.mrb[8].mxu0  ;;  %v5174_v55 = vadd.f32 %v24216_v49, %v5173_v21 }
 0x55a   : > { %v24229_v3 = vpop.f32.mrb[9].mxu0  ;;  %v5244_v12 = vmul.f32 %v24226_v39, %v24226_v39 }
 0x55b   : > { %v5175_v8 = vadd.f32 %v5174_v55, %v24229_v3  ;;  %v5243_v23 = vmul.f32 %v24229_v3, %v24229_v3  ;;  %v5301_v51 = vadd.f32 %v5300_v1, %v5242_v57 }
 0x55d   : > { %v5302_v13 = vadd.f32 %v5301_v51, %v5243_v23  ;;  %v24236_v19 = vpop.f32.mrb[10].mxu0  ;;  %v5176_v28 = vadd.f32 %v24226_v39, %v5175_v8 }
 0x55e   : > { %v24239_v4 = vpop.f32.mrb[11].mxu0  ;;  %v5246_v53 = vmul.f32 %v24236_v19, %v24236_v19 }
 0x55f   : > { %v5177_v2 = vadd.f32 %v5176_v28, %v24239_v4  ;;  %v5245_v20 = vmul.f32 %v24239_v4, %v24239_v4  ;;  %v5303_v33 = vadd.f32 %v5302_v13, %v5244_v12 }
 0x561   : > { %v5304_v0 = vadd.f32 %v5303_v33, %v5245_v20  ;;  %v24246_v35 = vpop.f32.mrb[12].mxu0  ;;  %v5178_v36 = vadd.f32 %v24236_v19, %v5177_v2 }
 0x562   : > { %v24249_v32 = vpop.f32.mrb[13].mxu0  ;;  %v5248_v59 = vmul.f32 %v24246_v35, %v24246_v35 }
 0x563   : > { %v5179_v40 = vadd.f32 %v5178_v36, %v24249_v32  ;;  %v5247_v41 = vmul.f32 %v24249_v32, %v24249_v32  ;;  %v5305_v42 = vadd.f32 %v5304_v0, %v5246_v53 }
 0x565   : > { %v5306_v25 = vadd.f32 %v5305_v42, %v5247_v41  ;;  %v24256_v30 = vpop.f32.mrb[14].mxu0  ;;  %v5180_v34 = vadd.f32 %v24246_v35, %v5179_v40 }
 0x566   : > { %v24259_v27 = vpop.f32.mrb[15].mxu0  ;;  %v5250_v7 = vmul.f32 %v24256_v30, %v24256_v30 }
 0x567   : > { %v5181_v58 = vadd.f32 %v5180_v34, %v24259_v27  ;;  %v5249_v44 = vmul.f32 %v24259_v27, %v24259_v27  ;;  %v5307_v46 = vadd.f32 %v5306_v25, %v5248_v59 }
 0x569   : > { %v5308_v47 = vadd.f32 %v5307_v46, %v5249_v44  ;;  %v24266_v48 = vpop.f32.mrb[16].mxu0  ;;  %v5182_v50 = vadd.f32 %v24256_v30, %v5181_v58 }
 0x56a   : > { %v24269_v11 = vpop.f32.mrb[17].mxu0  ;;  %v5252_v56 = vmul.f32 %v24266_v48, %v24266_v48 }
 0x56b   : > { %v5183_v38 = vadd.f32 %v5182_v50, %v24269_v11  ;;  %v5251_v63 = vmul.f32 %v24269_v11, %v24269_v11  ;;  %v5309_v54 = vadd.f32 %v5308_v47, %v5250_v7 }
 0x56d   : > { %v5310_v62 = vadd.f32 %v5309_v54, %v5251_v63  ;;  %v24276_v10 = vpop.f32.mrb[18].mxu0  ;;  %v5184_v14 = vadd.f32 %v24266_v48, %v5183_v38 }
 0x56e   : > { %v24279_v16 = vpop.f32.mrb[19].mxu0  ;;  %v5254_v31 = vmul.f32 %v24276_v10, %v24276_v10 }
 0x56f   : > { %v5185_v17 = vadd.f32 %v5184_v14, %v24279_v16  ;;  %v5253_v22 = vmul.f32 %v24279_v16, %v24279_v16  ;;  %v5311_v29 = vadd.f32 %v5310_v62, %v5252_v56 }
 0x571   : > { %v5312_v37 = vadd.f32 %v5311_v29, %v5253_v22  ;;  %v24286_v43 = vpop.f32.mrb[20].mxu0  ;;  %v5186_v45 = vadd.f32 %v24276_v10, %v5185_v17 }
 0x572   : > { %v24289_v60 = vpop.f32.mrb[21].mxu0  ;;  %v5256_v57 = vmul.f32 %v24286_v43, %v24286_v43 }
 0x573   : > { %v5187_v21 = vadd.f32 %v5186_v45, %v24289_v60  ;;  %v5255_v24 = vmul.f32 %v24289_v60, %v24289_v60  ;;  %v5313_v15 = vadd.f32 %v5312_v37, %v5254_v31 }
 0x575   : > { %v5314_v1 = vadd.f32 %v5313_v15, %v5255_v24  ;;  %v24296_v55 = vpop.f32.mrb[22].mxu0  ;;  %v5188_v8 = vadd.f32 %v24286_v43, %v5187_v21 }
 0x576   : > { %v24299_v23 = vpop.f32.mrb[23].mxu0  ;;  %v5258_v28 = vmul.f32 %v24296_v55, %v24296_v55 }
 0x577   : > { %v5189_v51 = vadd.f32 %v5188_v8, %v24299_v23  ;;  %v5257_v12 = vmul.f32 %v24299_v23, %v24299_v23  ;;  %v5315_v13 = vadd.f32 %v5314_v1, %v5256_v57 }
 0x579   : > { %v5316_v2 = vadd.f32 %v5315_v13, %v5257_v12  ;;  %v24306_v20 = vpop.f32.mrb[24].mxu0  ;;  %v5190_v33 = vadd.f32 %v24296_v55, %v5189_v51 }
 0x57a   : > { %v24309_v53 = vpop.f32.mrb[25].mxu0  ;;  %v5260_v41 = vmul.f32 %v24306_v20, %v24306_v20 }
 0x57b   : > { %v5191_v0 = vadd.f32 %v5190_v33, %v24309_v53  ;;  %v5259_v36 = vmul.f32 %v24309_v53, %v24309_v53  ;;  %v5317_v40 = vadd.f32 %v5316_v2, %v5258_v28 }
 0x57d   : > { %v5318_v42 = vadd.f32 %v5317_v40, %v5259_v36  ;;  %v24316_v59 = vpop.f32.mrb[26].mxu0  ;;  %v5192_v25 = vadd.f32 %v24306_v20, %v5191_v0 }
 0x57e   : > { %v24319_v34 = vpop.f32.mrb[27].mxu0  ;;  %v5262_v7 = vmul.f32 %v24316_v59, %v24316_v59 }
 0x57f   : > { %v5193_v58 = vadd.f32 %v5192_v25, %v24319_v34  ;;  %v5261_v44 = vmul.f32 %v24319_v34, %v24319_v34  ;;  %v5319_v46 = vadd.f32 %v5318_v42, %v5260_v41 }
 0x581   : > { %v5320_v47 = vadd.f32 %v5319_v46, %v5261_v44  ;;  %v24326_v50 = vpop.f32.mrb[28].mxu0  ;;  %v5194_v38 = vadd.f32 %v24316_v59, %v5193_v58 }
 0x582   : > { %v24329_v63 = vpop.f32.mrb[29].mxu0  ;;  %v5264_v14 = vmul.f32 %v24326_v50, %v24326_v50 }
 0x583   : > { %v5195_v54 = vadd.f32 %v5194_v38, %v24329_v63  ;;  %v5263_v56 = vmul.f32 %v24329_v63, %v24329_v63  ;;  %v5321_v62 = vadd.f32 %v5320_v47, %v5262_v7 }
 0x585   : > { %v5322_v17 = vadd.f32 %v5321_v62, %v5263_v56  ;;  %v24336_v22 = vpop.f32.mrb[30].mxu0  ;;  %v5196_v29 = vadd.f32 %v24326_v50, %v5195_v54 }
 0x586   : > { %v24339_v31 = vpop.f32.mrb[31].mxu0  ;;  %v5266_v24 = vmul.f32 %v24336_v22, %v24336_v22 }
 0x587   : > { %v5197_v37 = vadd.f32 %v5196_v29, %v24339_v31  ;;  %v5265_v45 = vmul.f32 %v24339_v31, %v24339_v31  ;;  %v5323_v21 = vadd.f32 %v5322_v17, %v5264_v14 }
 0x589   : > { %v5324_v15 = vadd.f32 %v5323_v21, %v5265_v45  ;;  %v24346_v57 = vpop.f32.mrb[32].mxu0  ;;  %v5198_v1 = vadd.f32 %v24336_v22, %v5197_v37 }
 0x58a   : > { %v24349_v8 = vpop.f32.mrb[33].mxu0  ;;  %v5268_v28 = vmul.f32 %v24346_v57, %v24346_v57 }
 0x58b   : > { %v5199_v51 = vadd.f32 %v5198_v1, %v24349_v8  ;;  %v5267_v12 = vmul.f32 %v24349_v8, %v24349_v8  ;;  %v5325_v13 = vadd.f32 %v5324_v15, %v5266_v24 }
 0x58d   : > { %v5326_v2 = vadd.f32 %v5325_v13, %v5267_v12  ;;  %v24356_v33 = vpop.f32.mrb[34].mxu0  ;;  %v5200_v0 = vadd.f32 %v24346_v57, %v5199_v51 }
 0x58e   : > { %v24359_v36 = vpop.f32.mrb[35].mxu0  ;;  %v5270_v25 = vmul.f32 %v24356_v33, %v24356_v33 }
 0x58f   : > { %v5201_v40 = vadd.f32 %v5200_v0, %v24359_v36  ;;  %v5269_v41 = vmul.f32 %v24359_v36, %v24359_v36  ;;  %v5327_v42 = vadd.f32 %v5326_v2, %v5268_v28 }
 0x591   : > { %v5328_v58 = vadd.f32 %v5327_v42, %v5269_v41  ;;  %v24366_v44 = vpop.f32.mrb[36].mxu0  ;;  %v5202_v46 = vadd.f32 %v24356_v33, %v5201_v40 }
 0x592   : > { %v24369_v7 = vpop.f32.mrb[37].mxu0  ;;  %v5272_v56 = vmul.f32 %v24366_v44, %v24366_v44 }
 0x593   : > { %v5203_v47 = vadd.f32 %v5202_v46, %v24369_v7  ;;  %v5271_v38 = vmul.f32 %v24369_v7, %v24369_v7  ;;  %v5329_v54 = vadd.f32 %v5328_v58, %v5270_v25 }
 0x595   : > { %v5330_v62 = vadd.f32 %v5329_v54, %v5271_v38  ;;  %v24376_v14 = vpop.f32.mrb[38].mxu0  ;;  %v5204_v17 = vadd.f32 %v24366_v44, %v5203_v47 }
 0x596   : > { %29713 = vst [vmem:[#allocation21_spill] sm:$0xff] %v24376_v14  ;;  %v24379_v29 = vpop.f32.mrb[39].mxu0  ;;  %v5274_v24 = vmul.f32 %v24376_v14, %v24376_v14 }
 0x597   : > { %29714 = vst [vmem:[#allocation22_spill] sm:$0xff] %v24379_v29  ;;  %v5205_v37 = vadd.f32 %v5204_v17, %v24379_v29  ;;  %v5273_v45 = vmul.f32 %v24379_v29, %v24379_v29  ;;  %v5331_v21 = vadd.f32 %v5330_v62, %v5272_v56 }
 0x599   : > { %v5332_v15 = vadd.f32 %v5331_v21, %v5273_v45  ;;  %v24386_v1 = vpop.f32.mrb[40].mxu0  ;;  %v5206_v51 = vadd.f32 %v24376_v14, %v5205_v37 }
 0x59a   : > { %29715 = vst [vmem:[#allocation23_spill] sm:$0xff] %v24386_v1  ;;  %v24389_v12 = vpop.f32.mrb[41].mxu0  ;;  %v5276_v0 = vmul.f32 %v24386_v1, %v24386_v1 }
 0x59b   : > { %29716 = vst [vmem:[#allocation24_spill] sm:$0xff] %v24389_v12  ;;  %v5207_v13 = vadd.f32 %v5206_v51, %v24389_v12  ;;  %v5275_v28 = vmul.f32 %v24389_v12, %v24389_v12  ;;  %v5333_v2 = vadd.f32 %v5332_v15, %v5274_v24 }
 0x59d   : > { %v5334_v40 = vadd.f32 %v5333_v2, %v5275_v28  ;;  %v24396_v41 = vpop.f32.mrb[42].mxu0  ;;  %v5208_v42 = vadd.f32 %v24386_v1, %v5207_v13 }
 0x59e   : > { %29717 = vst [vmem:[#allocation25_spill] sm:$0xff] %v24396_v41  ;;  %v24399_v25 = vpop.f32.mrb[43].mxu0  ;;  %v5278_v38 = vmul.f32 %v24396_v41, %v24396_v41 }
 0x59f   : > { %29718 = vst [vmem:[#allocation26_spill] sm:$0xff] %v24399_v25  ;;  %v5209_v58 = vadd.f32 %v5208_v42, %v24399_v25  ;;  %v5277_v46 = vmul.f32 %v24399_v25, %v24399_v25  ;;  %v5335_v47 = vadd.f32 %v5334_v40, %v5276_v0 }
 0x5a1   : > { %v5336_v54 = vadd.f32 %v5335_v47, %v5277_v46  ;;  %v24406_v56 = vpop.f32.mrb[44].mxu0  ;;  %v5210_v62 = vadd.f32 %v24396_v41, %v5209_v58 }
 0x5a2   : > { %29719 = vst [vmem:[#allocation27_spill] sm:$0xff] %v24406_v56  ;;  %v24409_v17 = vpop.f32.mrb[45].mxu0  ;;  %v5280_v24 = vmul.f32 %v24406_v56, %v24406_v56 }
 0x5a3   : > { %29720 = vst [vmem:[#allocation29_spill] sm:$0xff] %v24409_v17  ;;  %v5211_v37 = vadd.f32 %v5210_v62, %v24409_v17  ;;  %v5279_v45 = vmul.f32 %v24409_v17, %v24409_v17  ;;  %v5337_v21 = vadd.f32 %v5336_v54, %v5278_v38 }
 0x5a5   : > { %v5338_v15 = vadd.f32 %v5337_v21, %v5279_v45  ;;  %v24416_v51 = vpop.f32.mrb[46].mxu0  ;;  %v5212_v13 = vadd.f32 %v24406_v56, %v5211_v37 }
 0x5a6   : > { %29721 = vst [vmem:[#allocation30_spill] sm:$0xff] %v24416_v51  ;;  %v24419_v28 = vpop.f32.mrb[47].mxu0  ;;  %v5282_v42 = vmul.f32 %v24416_v51, %v24416_v51 }
 0x5a7   : > { %29722 = vst [vmem:[#allocation31_spill] sm:$0xff] %v24419_v28  ;;  %v5213_v2 = vadd.f32 %v5212_v13, %v24419_v28  ;;  %v5281_v0 = vmul.f32 %v24419_v28, %v24419_v28  ;;  %v5339_v40 = vadd.f32 %v5338_v15, %v5280_v24 }
 0x5a9   : > { %v5340_v58 = vadd.f32 %v5339_v40, %v5281_v0  ;;  %v24426_v46 = vpop.f32.mrb[48].mxu0  ;;  %v5214_v47 = vadd.f32 %v24416_v51, %v5213_v2 }
 0x5aa   : > { %29723 = vst [vmem:[#allocation32_spill] sm:$0xff] %v24426_v46  ;;  %v24429_v38 = vpop.f32.mrb[49].mxu0  ;;  %v5284_v45 = vmul.f32 %v24426_v46, %v24426_v46 }
 0x5ab   : > { %29724 = vst [vmem:[#allocation33_spill] sm:$0xff] %v24429_v38  ;;  %v5215_v54 = vadd.f32 %v5214_v47, %v24429_v38  ;;  %v5283_v62 = vmul.f32 %v24429_v38, %v24429_v38  ;;  %v5341_v37 = vadd.f32 %v5340_v58, %v5282_v42 }
 0x5ad   : > { %v5342_v21 = vadd.f32 %v5341_v37, %v5283_v62  ;;  %v24436_v24 = vpop.f32.mrb[50].mxu0  ;;  %v5216_v15 = vadd.f32 %v24426_v46, %v5215_v54 }
 0x5ae   : > { %29725 = vst [vmem:[#allocation34_spill] sm:$0xff] %v24436_v24  ;;  %v24439_v13 = vpop.f32.mrb[51].mxu0  ;;  %v5286_v47 = vmul.f32 %v24436_v24, %v24436_v24 }
 0x5af   : > { %29726 = vst [vmem:[#allocation35_spill] sm:$0xff] %v24439_v13  ;;  %v5217_v2 = vadd.f32 %v5216_v15, %v24439_v13  ;;  %v5285_v0 = vmul.f32 %v24439_v13, %v24439_v13  ;;  %v5343_v40 = vadd.f32 %v5342_v21, %v5284_v45 }
 0x5b1   : > { %v5344_v42 = vadd.f32 %v5343_v40, %v5285_v0  ;;  %v24446_v58 = vpop.f32.mrb[52].mxu0  ;;  %v5218_v62 = vadd.f32 %v24436_v24, %v5217_v2 }
 0x5b2   : > { %29727 = vst [vmem:[#allocation36_spill] sm:$0xff] %v24446_v58  ;;  %v24449_v37 = vpop.f32.mrb[53].mxu0  ;;  %v5288_v13 = vmul.f32 %v24446_v58, %v24446_v58 }
 0x5b3   : > { %29728 = vst [vmem:[#allocation37_spill] sm:$0xff] %v24449_v37  ;;  %v5219_v54 = vadd.f32 %v5218_v62, %v24449_v37  ;;  %v5287_v46 = vmul.f32 %v24449_v37, %v24449_v37  ;;  %v5345_v15 = vadd.f32 %v5344_v42, %v5286_v47 }
 0x5b5   : > { %v5346_v45 = vadd.f32 %v5345_v15, %v5287_v46  ;;  %v24456_v21 = vpop.f32.mrb[54].mxu0  ;;  %v5220_v0 = vadd.f32 %v24446_v58, %v5219_v54 }
 0x5b6   : > { %29729 = vst [vmem:[#allocation38_spill] sm:$0xff] %v24456_v21  ;;  %v24459_v40 = vpop.f32.mrb[55].mxu0  ;;  %v5290_v37 = vmul.f32 %v24456_v21, %v24456_v21 }
 0x5b7   : > { %29730 = vst [vmem:[#allocation39_spill] sm:$0xff] %v24459_v40  ;;  %v5221_v2 = vadd.f32 %v5220_v0, %v24459_v40  ;;  %v5289_v24 = vmul.f32 %v24459_v40, %v24459_v40  ;;  %v5347_v62 = vadd.f32 %v5346_v45, %v5288_v13 }
 0x5b9   : > { %v5348_v47 = vadd.f32 %v5347_v62, %v5289_v24  ;;  %v24466_v42 = vpop.f32.mrb[56].mxu0  ;;  %v5222_v46 = vadd.f32 %v24456_v21, %v5221_v2 }
 0x5ba   : > { %29731 = vst [vmem:[#allocation40_spill] sm:$0xff] %v24466_v42  ;;  %v24469_v15 = vpop.f32.mrb[57].mxu0  ;;  %v5292_v40 = vmul.f32 %v24466_v42, %v24466_v42 }
 0x5bb   : > { %29732 = vst [vmem:[#allocation41_spill] sm:$0xff] %v24469_v15  ;;  %v5223_v54 = vadd.f32 %v5222_v46, %v24469_v15  ;;  %v5291_v58 = vmul.f32 %v24469_v15, %v24469_v15  ;;  %v5349_v0 = vadd.f32 %v5348_v47, %v5290_v37 }
 0x5bd   : > { %v5350_v13 = vadd.f32 %v5349_v0, %v5291_v58  ;;  %v17365_v45 = vpop.f32.mrb[58].mxu0  ;;  %v5224_v38 = vadd.f32 %v24466_v42, %v5223_v54 }
 0x5be   : > { %v5294_v24 = vmul.f32 %v17365_v45, %v17365_v45  ;;  %v5099_v62 = vpop.f32.mrb[59].mxu0  ;;  %v5226_v21 = vsel %vm980_vm0, %v17365_v45, 0.0 }
 0x5bf   : > { %v5225_v51 = vadd.f32 %v5224_v38, %v5099_v62  ;;  %v5293_v28 = vmul.f32 %v5099_v62, %v5099_v62  ;;  %v5351_v2 = vadd.f32 %v5350_v13, %v5292_v40 }
 0x5c0   : > { %v5353_v17 = vsel %vm980_vm0, %v5294_v24, 0.0 }
 0x5c1   : > { %v5227_v56 = vadd.f32 %v5226_v21, %v5225_v51  ;;  %v5352_v46 = vadd.f32 %v5351_v2, %v5293_v28  ;;  %v5919_v51 = vld [vmem:[%s28972_s7 + $0x8] sm:$0xff] }
 0x5c2   : > { %6078 = vmatprep.mubr.f32.mxu1 %v5919_v51 }
 0x5c3   : > { %v5228_v15 = vrot.slane %v5227_v56, 4  ;;  %v5354_v37 = vadd.f32 %v5353_v17, %v5352_v46  ;;  %v29245_v17 = vmov 0.0|0.0  }
 0x5c4   : > { %19997 = vmatprep.subr.bf16.mxu0 %v29245_v17 }
 0x5c5   : > { %v5229_v47 = vadd.f32 %v5228_v15, %v5227_v56  ;;  %v5355_v41 = vrot.slane %v5354_v37, 4 }
 0x5c7   : > { %v5230_v25 = vrot.slane %v5229_v47, 2  ;;  %v5356_v58 = vadd.f32 %v5355_v41, %v5354_v37 }
 0x5c9   : > { %v5231_v0 = vadd.f32 %v5230_v25, %v5229_v47  ;;  %v5357_v1 = vrot.slane %v5356_v58, 2  ;;  %v5371_v25 = vlaneseq }
 0x5cb   : > { %v5232_v54 = vrot.slane %v5231_v0, 1  ;;  %v5358_v42 = vadd.f32 %v5357_v1, %v5356_v58  ;;  %v5372_v1 = vshrl.u32 %v5371_v25, 7 }
 0x5cd   : > { %v5233_v12 = vadd.f32 %v5232_v54, %v5231_v0  ;;  %v5359_v38 = vrot.slane %v5358_v42, 1  ;;  %v24486_v21 = vsub.s32 0, %v5372_v1 }
 0x5cf   : > { %v5234_v14 = vmul.f32 0.0025, %v5233_v12  ;;  %v5360_v40 = vadd.f32 %v5359_v38, %v5358_v42  ;;  %v606_v12 = vld [vmem:[%s28970_s5] sm:$0x1]  ;;  %29733 = vst [vmem:[#allocation42_spill] sm:$0xff] %v24486_v21 }
 0x5d1   : > { %v5361_v13 = vmul.f32 0.0025, %v5360_v40  ;;  %v5362_v29 = vmul.f32 %v5234_v14, %v5234_v14 }
 0x5d3   : > { %v5363_v28 = vsub.f32 %v5361_v13, %v5362_v29  ;;  %v607_v29 = vld [vmem:[%s28971_s6] sm:$0x1] }
 0x5d5   : > { %v5364_v56 = vmax.f32 %v5363_v28, 0.0 }
 0x5d7   : > { %v5365_v41 = vadd.f32 1e-05, %v5364_v56 }
 0x5d9   : > { %21791 = vrsqrt.f32 %v5365_v41 }
 0x5e3   : > { %v21792_v42 = vpop.eup %21791 }
 0x5e4   : > { %v5367_v15 = vmul.f32 %v21792_v42, %v606_v12  ;;  %v29742_v12 = vld [vmem:[#allocation22_spill] sm:$0xff]  ;;  %v29743_v42 = vld [vmem:[#allocation21_spill] sm:$0xff] }
 0x5e6   : > { %v5368_v24 = vmul.f32 %v5367_v15, %v5234_v14  ;;  %v24492_v2 = vrot.slane %v5367_v15, %v24486_v21 }
 0x5e8   : > { %v5369_v46 = vsub.f32 %v607_v29, %v5368_v24  ;;  %v5434_v37 = vmul.f32 %v24492_v2, %v5099_v62  ;;  %v5435_v47 = vmul.f32 %v17365_v45, %v24492_v2  ;;  %v24498_v58 = vmul.f32 %v24492_v2, %v24191_v52  ;;  %v29744_v29 = vld [vmem:[#allocation24_spill] sm:$0xff] }
 0x5e9   : > { %v24502_v0 = vmul.f32 %v24187_v5, %v24492_v2  ;;  %v24506_v54 = vmul.f32 %v24492_v2, %v24199_v9  ;;  %v24510_v14 = vmul.f32 %v24197_v6, %v24492_v2  ;;  %v24514_v62 = vmul.f32 %v24492_v2, %v24209_v26 }
 0x5ea   : > { %v24517_v45 = vrot.slane %v5369_v46, %v24486_v21  ;;  %v24521_v52 = vmul.f32 %v24206_v18, %v24492_v2  ;;  %v24525_v5 = vmul.f32 %v24492_v2, %v24219_v61  ;;  %v24529_v9 = vmul.f32 %v24216_v49, %v24492_v2  ;;  %v29746_v46 = vld [vmem:[#allocation26_spill] sm:$0xff]  ;;  %v29754_v21 = vld [vmem:[#allocation35_spill] sm:$0xff] }
 0x5eb   : > { %v24533_v6 = vmul.f32 %v24492_v2, %v24229_v3  ;;  %v24537_v26 = vmul.f32 %v24226_v39, %v24492_v2  ;;  %v24541_v18 = vmul.f32 %v24492_v2, %v24239_v4  ;;  %v24545_v61 = vmul.f32 %v24236_v19, %v24492_v2 }
 0x5ec   : > { %v5500_v38 = vadd.f32 %v24517_v45, %v5434_v37  ;;  %v5501_v49 = vadd.f32 %v24517_v45, %v5435_v47  ;;  %v24551_v3 = vmul.f32 %v24492_v2, %v24249_v32  ;;  %v24555_v39 = vmul.f32 %v24246_v35, %v24492_v2  ;;  %v29748_v47 = vld [vmem:[#allocation29_spill] sm:$0xff] }
 0x5ed   : > { %v24559_v4 = vmul.f32 %v24492_v2, %v24259_v27  ;;  %v24563_v19 = vmul.f32 %v24256_v30, %v24492_v2  ;;  %v24567_v40 = vmul.f32 %v24492_v2, %v24269_v11  ;;  %v24571_v32 = vmul.f32 %v24266_v48, %v24492_v2 }
 0x5ee   : > { %v5560_v13 = vmax.f32 %v5500_v38, 0.0  ;;  %v5561_v51 = vmax.f32 %v5501_v49, 0.0  ;;  %v24575_v35 = vmul.f32 %v24492_v2, %v24279_v16  ;;  %v24579_v27 = vmul.f32 %v24276_v10, %v24492_v2  ;;  %v29749_v38 = vld [vmem:[#allocation27_spill] sm:$0xff] }
 0x5ef   : > { %v24583_v30 = vmul.f32 %v24492_v2, %v24289_v60  ;;  %v24587_v11 = vmul.f32 %v24286_v43, %v24492_v2  ;;  %v24591_v48 = vmul.f32 %v24492_v2, %v24299_v23  ;;  %v24595_v16 = vmul.f32 %v24296_v55, %v24492_v2 }
 0x5f0   : > { %29734 = vst [vmem:[#allocation43_spill] sm:$0xff] %v24575_v35  ;;  %29735 = vst [vmem:[#allocation44_spill] sm:$0xff] %v24579_v27  ;;  %v24597_v28 = vrot.slane %v5560_v13, 1  ;;  %v5739_v10 = vrot.slane %v5561_v51, 1  ;;  %v5400_v56 = vmul.f32 %v24492_v2, %v24309_v53  ;;  %v5401_v60 = vmul.f32 %v24306_v20, %v24492_v2 }
 0x5f1   : > { %29736 = vst [vmem:[#allocation45_spill] sm:$0xff] %v24583_v30  ;;  %29737 = vst [vmem:[#allocation46_spill] sm:$0xff] %v24587_v11  ;;  %v5402_v43 = vmul.f32 %v24492_v2, %v24319_v34  ;;  %v5403_v23 = vmul.f32 %v24316_v59, %v24492_v2  ;;  %v5404_v41 = vmul.f32 %v24492_v2, %v24329_v63  ;;  %v29760_v30 = vld [vmem:[#allocation41_spill] sm:$0xff] }
 0x5f2   : > { %29738 = vst [vmem:[#allocation47_spill] sm:$0xff] %v24591_v48  ;;  %29739 = vst [vmem:[#allocation48_spill] sm:$0xff] %v24595_v16  ;;  %v5405_v55 = vmul.f32 %v24326_v50, %v24492_v2  ;;  %v5740_v25 = vsel %vm739_vm3, %v24597_v28, %v5739_v10  ;;  %v5406_v53 = vmul.f32 %v24492_v2, %v24339_v31  ;;  %v29758_v48 = vld [vmem:[#allocation39_spill] sm:$0xff] }
 0x5f3   : > { %29740 = vst [vmem:[#allocation49_spill] sm:$0xff] %v24597_v28  ;;  %v5407_v20 = vmul.f32 %v24336_v22, %v24492_v2  ;;  %v5408_v34 = vmul.f32 %v24492_v2, %v24349_v8  ;;  %v24619_v1 = vmax.f32 %v5560_v13, %v5740_v25  ;;  %v5409_v59 = vmul.f32 %v24346_v57, %v24492_v2  ;;  %v29750_v13 = vld [vmem:[#allocation31_spill] sm:$0xff]  ;;  %v29756_v28 = vld [vmem:[#allocation37_spill] sm:$0xff] }
 0x5f4   : > { %v5410_v50 = vmul.f32 %v24492_v2, %v24359_v36  ;;  %v5411_v63 = vmul.f32 %v24356_v33, %v24492_v2  ;;  %v5412_v31 = vmul.f32 %v24492_v2, %v24369_v7  ;;  %v5413_v22 = vmul.f32 %v24366_v44, %v24492_v2  ;;  %v29745_v36 = vld [vmem:[#allocation23_spill] sm:$0xff]  ;;  %v29747_v7 = vld [vmem:[#allocation25_spill] sm:$0xff] }
 0x5f5   : > { %29741 = vst [vmem:[#allocation50_spill] sm:$0xff] %v24619_v1  ;;  %v5414_v8 = vmul.f32 %v24492_v2, %v29742_v12  ;;  %v5415_v15 = vmul.f32 %v29743_v42, %v24492_v2  ;;  %v5416_v57 = vmul.f32 %v24492_v2, %v29744_v29  ;;  %v5417_v24 = vmul.f32 %v29745_v36, %v24492_v2  ;;  %v29751_v12 = vld [vmem:[#allocation30_spill] sm:$0xff]  ;;  %v29752_v29 = vld [vmem:[#allocation33_spill] sm:$0xff] }
 0x5f6   : > { %v5418_v33 = vmul.f32 %v24492_v2, %v29746_v46  ;;  %v5419_v37 = vmul.f32 %v29747_v7, %v24492_v2  ;;  %v5420_v44 = vmul.f32 %v24492_v2, %v29748_v47  ;;  %v5421_v49 = vmul.f32 %v29749_v38, %v24492_v2  ;;  %v29753_v46 = vld [vmem:[#allocation32_spill] sm:$0xff]  ;;  %v29755_v47 = vld [vmem:[#allocation34_spill] sm:$0xff] }
 0x5f7   : > { %v5422_v25 = vmul.f32 %v24492_v2, %v29750_v13  ;;  %v5423_v42 = vmul.f32 %v29751_v12, %v24492_v2  ;;  %v5424_v36 = vmul.f32 %v24492_v2, %v29752_v29  ;;  %v5425_v17 = vmul.f32 %v29753_v46, %v24492_v2  ;;  %v29757_v13 = vld [vmem:[#allocation36_spill] sm:$0xff]  ;;  %v29759_v29 = vld [vmem:[#allocation38_spill] sm:$0xff] }
 0x5f8   : > { %v5426_v7 = vmul.f32 %v24492_v2, %v29754_v21  ;;  %v5427_v1 = vmul.f32 %v29755_v47, %v24492_v2  ;;  %v5428_v38 = vmul.f32 %v24492_v2, %v29756_v28  ;;  %v5429_v16 = vmul.f32 %v29757_v13, %v24492_v2  ;;  %v29761_v21 = vld [vmem:[#allocation40_spill] sm:$0xff]  ;;  %v29782_v13 = vld [vmem:[#allocation45_spill] sm:$0xff] }
 0x5f9   : > { %v5430_v12 = vmul.f32 %v24492_v2, %v29758_v48  ;;  %v5431_v11 = vmul.f32 %v29759_v29, %v24492_v2  ;;  %v5432_v46 = vmul.f32 %v24492_v2, %v29760_v30  ;;  %v5433_v27 = vmul.f32 %v29761_v21, %v24492_v2  ;;  %v29783_v29 = vld [vmem:[#allocation46_spill] sm:$0xff]  ;;  %v29785_v21 = vld [vmem:[#allocation47_spill] sm:$0xff] }
 0x5fa   : > { %v24671_v35 = vmax.f32 %v5561_v51, %v5739_v10  ;;  %v24675_v28 = vadd.f32 %v24517_v45, %v24498_v58  ;;  %v24679_v47 = vadd.f32 %v24517_v45, %v24502_v0  ;;  %v24683_v48 = vadd.f32 %v24517_v45, %v24506_v54  ;;  %v29779_v51 = vld [vmem:[#allocation43_spill] sm:$0xff]  ;;  %v29781_v10 = vld [vmem:[#allocation44_spill] sm:$0xff] }
 0x5fb   : > { %v24687_v30 = vadd.f32 %v24517_v45, %v24510_v14  ;;  %v24691_v2 = vadd.f32 %v24517_v45, %v24514_v62  ;;  %v24695_v58 = vadd.f32 %v24517_v45, %v24521_v52  ;;  %v24699_v0 = vadd.f32 %v24517_v45, %v24525_v5 }
 0x5fc   : > { %29762 = vst [vmem:[#allocation51_spill] sm:$0xff] %v24671_v35  ;;  %29763 = vst [vmem:[#allocation52_spill] sm:$0xff] %v24675_v28  ;;  %v24703_v54 = vadd.f32 %v24517_v45, %v24529_v9  ;;  %v24707_v14 = vadd.f32 %v24517_v45, %v24533_v6  ;;  %v24711_v62 = vadd.f32 %v24517_v45, %v24537_v26  ;;  %v29786_v35 = vld [vmem:[#allocation48_spill] sm:$0xff] }
 0x5fd   : > { %29764 = vst [vmem:[#allocation53_spill] sm:$0xff] %v24679_v47  ;;  %29765 = vst [vmem:[#allocation54_spill] sm:$0xff] %v24683_v48  ;;  %v24715_v52 = vadd.f32 %v24517_v45, %v24541_v18  ;;  %v24719_v5 = vadd.f32 %v24517_v45, %v24545_v61  ;;  %v24723_v9 = vadd.f32 %v24517_v45, %v24551_v3 }
 0x5fe   : > { %29766 = vst [vmem:[#allocation55_spill] sm:$0xff] %v24687_v30  ;;  %29767 = vst [vmem:[#allocation56_spill] sm:$0xff] %v24691_v2  ;;  %v24727_v6 = vadd.f32 %v24517_v45, %v24555_v39  ;;  %v24731_v26 = vadd.f32 %v24517_v45, %v24559_v4  ;;  %v24735_v18 = vadd.f32 %v24517_v45, %v24563_v19 }
 0x5ff   : > { %29768 = vst [vmem:[#allocation57_spill] sm:$0xff] %v24695_v58  ;;  %29769 = vst [vmem:[#allocation58_spill] sm:$0xff] %v24699_v0  ;;  %v24739_v61 = vadd.f32 %v24517_v45, %v24567_v40  ;;  %v24743_v3 = vadd.f32 %v24517_v45, %v24571_v32  ;;  %v24747_v39 = vadd.f32 %v24517_v45, %v29779_v51 }
 0x600   : > { %29770 = vst [vmem:[#allocation59_spill] sm:$0xff] %v24703_v54  ;;  %29771 = vst [vmem:[#allocation60_spill] sm:$0xff] %v24707_v14  ;;  %v24751_v4 = vadd.f32 %v24517_v45, %v29781_v10  ;;  %v24755_v19 = vadd.f32 %v24517_v45, %v29782_v13  ;;  %v24759_v40 = vadd.f32 %v24517_v45, %v29783_v29 }
 0x601   : > { %29772 = vst [vmem:[#allocation62_spill] sm:$0xff] %v24711_v62  ;;  %29773 = vst [vmem:[#allocation63_spill] sm:$0xff] %v24715_v52  ;;  %v24763_v32 = vadd.f32 %v24517_v45, %v29785_v21  ;;  %v24767_v51 = vadd.f32 %v24517_v45, %v29786_v35  ;;  %v24773_v10 = vadd.f32 %v24517_v45, %v5401_v60 }
 0x602   : > { %29774 = vst [vmem:[#allocation66_spill] sm:$0xff] %v24719_v5  ;;  %29775 = vst [vmem:[#allocation67_spill] sm:$0xff] %v24723_v9  ;;  %v24776_v13 = vadd.f32 %v24517_v45, %v5402_v43  ;;  %v24779_v29 = vadd.f32 %v24517_v45, %v5403_v23  ;;  %v24785_v21 = vadd.f32 %v24517_v45, %v5405_v55 }
 0x603   : > { %29776 = vst [vmem:[#allocation82_spill] sm:$0xff] %v24727_v6  ;;  %29777 = vst [vmem:[#allocation81_spill] sm:$0xff] %v24731_v26  ;;  %v24788_v35 = vadd.f32 %v24517_v45, %v5406_v53  ;;  %v24794_v60 = vadd.f32 %v24517_v45, %v5408_v34  ;;  %v24797_v43 = vadd.f32 %v24517_v45, %v5409_v59 }
 0x604   : > { %29778 = vst [vmem:[#allocation61_spill] sm:$0xff] %v24735_v18  ;;  %29780 = vst [vmem:[#allocation64_spill] sm:$0xff] %v24747_v39  ;;  %v24770_v39 = vadd.f32 %v24517_v45, %v5400_v56  ;;  %v24791_v56 = vadd.f32 %v24517_v45, %v5407_v20  ;;  %v24800_v23 = vadd.f32 %v24517_v45, %v5410_v50 }
 0x605   : > { %29784 = vst [vmem:[#allocation69_spill] sm:$0xff] %v24759_v40  ;;  %29787 = vst [vmem:[#allocation123_spill] sm:$0xff] %v24767_v51  ;;  %v24782_v40 = vadd.f32 %v24517_v45, %v5404_v41  ;;  %v24803_v41 = vadd.f32 %v24517_v45, %v5411_v63  ;;  %v24806_v55 = vadd.f32 %v24517_v45, %v5412_v31 }
 0x606   : > { %29788 = vst [vmem:[#allocation124_spill] sm:$0xff] %v24770_v39  ;;  %29789 = vst [vmem:[#allocation125_spill] sm:$0xff] %v24773_v10  ;;  %v24809_v53 = vadd.f32 %v24517_v45, %v5413_v22  ;;  %v24812_v20 = vadd.f32 %v24517_v45, %v5414_v8  ;;  %v24815_v34 = vadd.f32 %v24517_v45, %v5415_v15 }
 0x607   : > { %29790 = vst [vmem:[#allocation126_spill] sm:$0xff] %v24779_v29  ;;  %29791 = vst [vmem:[#allocation128_spill] sm:$0xff] %v24782_v40  ;;  %v24818_v59 = vadd.f32 %v24517_v45, %v5416_v57  ;;  %v24821_v50 = vadd.f32 %v24517_v45, %v5417_v24  ;;  %v24824_v63 = vadd.f32 %v24517_v45, %v5418_v33 }
 0x608   : > { %29792 = vst [vmem:[#allocation130_spill] sm:$0xff] %v24785_v21  ;;  %29793 = vst [vmem:[#allocation70_spill] sm:$0xff] %v24788_v35  ;;  %v24827_v31 = vadd.f32 %v24517_v45, %v5419_v37  ;;  %v24830_v22 = vadd.f32 %v24517_v45, %v5420_v44  ;;  %v24833_v8 = vadd.f32 %v24517_v45, %v5421_v49 }
 0x609   : > { %29794 = vst [vmem:[#allocation71_spill] sm:$0xff] %v24791_v56  ;;  %29795 = vst [vmem:[#allocation74_spill] sm:$0xff] %v24794_v60  ;;  %v24836_v15 = vadd.f32 %v24517_v45, %v5422_v25  ;;  %v24839_v57 = vadd.f32 %v24517_v45, %v5423_v42  ;;  %v24842_v24 = vadd.f32 %v24517_v45, %v5424_v36 }
 0x60a   : > { %29796 = vst [vmem:[#allocation75_spill] sm:$0xff] %v24797_v43  ;;  %29797 = vst [vmem:[#allocation77_spill] sm:$0xff] %v24800_v23  ;;  %v24845_v33 = vadd.f32 %v24517_v45, %v5425_v17  ;;  %v24848_v37 = vadd.f32 %v24517_v45, %v5426_v7  ;;  %v24851_v44 = vadd.f32 %v24517_v45, %v5427_v1 }
 0x60b   : > { %29798 = vst [vmem:[#allocation78_spill] sm:$0xff] %v24803_v41  ;;  %29799 = vst [vmem:[#allocation79_spill] sm:$0xff] %v24809_v53  ;;  %v24854_v49 = vadd.f32 %v24517_v45, %v5428_v38  ;;  %v24857_v25 = vadd.f32 %v24517_v45, %v5429_v16  ;;  %v24860_v42 = vadd.f32 %v24517_v45, %v5430_v12  ;;  %v29814_v1 = vld [vmem:[#allocation64_spill] sm:$0xff]  ;;  %v29822_v12 = vmax.f32 %v24687_v30, 0.0 }
 0x60c   : > { %29800 = vst [vmem:[#allocation80_spill] sm:$0xff] %v24815_v34  ;;  %29801 = vst [vmem:[#allocation83_spill] sm:$0xff] %v24821_v50  ;;  %v24863_v36 = vadd.f32 %v24517_v45, %v5431_v11  ;;  %v24866_v17 = vadd.f32 %v24517_v45, %v5432_v46  ;;  %v24869_v7 = vadd.f32 %v24517_v45, %v5433_v27  ;;  %v29815_v52 = vld [vmem:[#allocation69_spill] sm:$0xff]  ;;  %v29820_v27 = vmax.f32 %v24679_v47, 0.0 }
 0x60d   : > { %29802 = vst [vmem:[#allocation28_spill] sm:$0xff] %v24827_v31  ;;  %29803 = vst [vmem:[#allocation65_spill] sm:$0xff] %v24833_v8  ;;  %v29816_v50 = vmov %v24854_v49  ;;  %v29817_v31 = vmov %v24860_v42  ;;  %v24943_v16 = vrot.slane %v29822_v12, 1  ;;  %v29823_v11 = vmax.f32 %v24691_v2, 0.0 }
 0x60e   : > { %29804 = vst [vmem:[#allocation17_spill] sm:$0xff] %v24839_v57  ;;  %29805 = vst [vmem:[#allocation68_spill] sm:$0xff] %v24842_v24  ;;  %v29818_v8 = vmov %v24866_v17  ;;  %v24935_v45 = vrot.slane %v29820_v27, 1  ;;  %v29824_v46 = vmax.f32 %v24695_v58, 0.0  ;;  %v29825_v47 = vmax.f32 %v24699_v0, 0.0 }
 0x60f   : > { %29806 = vst [vmem:[#allocation84_spill] sm:$0xff] %v24845_v33  ;;  %29807 = vst [vmem:[#allocation85_spill] sm:$0xff] %v24851_v44  ;;  %v29827_v30 = vmax.f32 %v24707_v14, 0.0  ;;  %v29829_v2 = vmax.f32 %v24711_v62, 0.0  ;;  %v29834_v0 = vmax.f32 %v24719_v5, 0.0  ;;  %v29838_v14 = vmax.f32 %v24727_v6, 0.0 }
 0x610   : > { %29808 = vst [vmem:[#allocation86_spill] sm:$0xff] %v24854_v49  ;;  %29809 = vst [vmem:[#allocation87_spill] sm:$0xff] %v24857_v25  ;;  %v29821_v49 = vmax.f32 %v24683_v48, 0.0  ;;  %v24955_v27 = vrot.slane %v29825_v47, 1  ;;  %v29826_v48 = vmax.f32 %v24703_v54, 0.0  ;;  %v29836_v54 = vmax.f32 %v24723_v9, 0.0 }
 0x611   : > { %29810 = vst [vmem:[#allocation88_spill] sm:$0xff] %v24860_v42  ;;  %29811 = vst [vmem:[#allocation89_spill] sm:$0xff] %v24863_v36  ;;  %v24947_v42 = vrot.slane %v29823_v11, 1  ;;  %v24963_v12 = vrot.slane %v29827_v30, 1  ;;  %v24967_v11 = vrot.slane %v29829_v2, 1  ;;  %v24975_v47 = vrot.slane %v29834_v0, 1 }
 0x612   : > { %29812 = vst [vmem:[#allocation90_spill] sm:$0xff] %v24866_v17  ;;  %29813 = vst [vmem:[#allocation91_spill] sm:$0xff] %v24869_v7  ;;  %v29819_v17 = vmax.f32 %v24675_v28, 0.0  ;;  %v24939_v38 = vrot.slane %v29821_v49, 1  ;;  %v24959_v49 = vrot.slane %v29826_v48, 1  ;;  %v29831_v28 = vld [vmem:[#allocation63_spill] sm:$0xff] }
 0x613   : > { %29828 = vst [vmem:[#allocation92_spill] sm:$0xff] %v24963_v12  ;;  %29830 = vst [vmem:[#allocation93_spill] sm:$0xff] %v24967_v11  ;;  %v29832_v58 = vmax.f32 %v29831_v28, 0.0  ;;  %v24979_v48 = vrot.slane %v29836_v54, 1  ;;  %v24983_v30 = vrot.slane %v29838_v14, 1  ;;  %v29840_v62 = vmax.f32 %v24731_v26, 0.0 }
 0x614   : > { %v24931_v24 = vrot.slane %v29819_v17, 1  ;;  %v24951_v17 = vrot.slane %v29824_v46, 1  ;;  %29835 = vst [vmem:[#allocation95_spill] sm:$0xff] %v24975_v47  ;;  %v29842_v28 = vmax.f32 %v24735_v18, 0.0  ;;  %v29844_v5 = vmax.f32 %v24739_v61, 0.0 }
 0x615   : > { %v24971_v46 = vrot.slane %v29832_v58, 1  ;;  %29837 = vst [vmem:[#allocation96_spill] sm:$0xff] %v24979_v48  ;;  %29839 = vst [vmem:[#allocation97_spill] sm:$0xff] %v24983_v30  ;;  %v24987_v2 = vrot.slane %v29840_v62, 1  ;;  %v29846_v9 = vmax.f32 %v24743_v3, 0.0  ;;  %v29847_v48 = vmax.f32 %v29814_v1, 0.0 }
 0x616   : > { %v24991_v58 = vrot.slane %v29842_v28, 1  ;;  %v24995_v0 = vrot.slane %v29844_v5, 1  ;;  %v29848_v14 = vmax.f32 %v24751_v4, 0.0  ;;  %v29849_v62 = vmax.f32 %v24755_v19, 0.0 }
 0x617   : > { %29833 = vst [vmem:[#allocation94_spill] sm:$0xff] %v24971_v46  ;;  %29841 = vst [vmem:[#allocation98_spill] sm:$0xff] %v24987_v2  ;;  %v5655_v54 = vrot.slane %v29846_v9, 1  ;;  %v25001_v6 = vrot.slane %v29847_v48, 1  ;;  %v29850_v28 = vmax.f32 %v29815_v52, 0.0  ;;  %v29851_v5 = vmax.f32 %v24763_v32, 0.0 }
 0x618   : > { %29843 = vst [vmem:[#allocation99_spill] sm:$0xff] %v24991_v58  ;;  %29845 = vst [vmem:[#allocation100_spill] sm:$0xff] %v24995_v0  ;;  %v25005_v26 = vrot.slane %v29848_v14, 1  ;;  %v5661_v18 = vrot.slane %v29849_v62, 1  ;;  %v29852_v9 = vmax.f32 %v24767_v51, 0.0  ;;  %v29853_v48 = vmax.f32 %v24770_v39, 0.0 }
 0x619   : > { %v25011_v58 = vrot.slane %v29850_v28, 1  ;;  %v25015_v2 = vrot.slane %v29851_v5, 1  ;;  %v5656_v14 = vsel %vm739_vm3, %v24995_v0, %v5655_v54  ;;  %v5658_v62 = vsel %vm739_vm3, %v5655_v54, %v25001_v6 }
 0x61a   : > { %v25019_v30 = vrot.slane %v29852_v9, 1  ;;  %v25023_v47 = vrot.slane %v29853_v48, 1  ;;  %v5662_v28 = vsel %vm739_vm3, %v25005_v26, %v5661_v18  ;;  %v29854_v5 = vmax.f32 %v24773_v10, 0.0 }
 0x61b   : > { %v5664_v9 = vsel %vm739_vm3, %v5661_v18, %v25011_v58  ;;  %v29856_v11 = vmax.f32 %v24776_v13, 0.0  ;;  %v29857_v39 = vmax.f32 %v24779_v29, 0.0  ;;  %v29858_v54 = vmax.f32 %v24782_v40, 0.0 }
 0x61c   : > { %v25033_v46 = vrot.slane %v29854_v5, 1  ;;  %v29859_v51 = vmax.f32 %v24785_v21, 0.0  ;;  %v29861_v5 = vmax.f32 %v24788_v35, 0.0  ;;  %v29863_v18 = vmax.f32 %v24791_v56, 0.0 }
 0x61d   : > { %v25039_v48 = vrot.slane %v29856_v11, 1  ;;  %v25043_v0 = vrot.slane %v29857_v39, 1  ;;  %v25047_v12 = vrot.slane %v29858_v54, 1  ;;  %v29865_v29 = vmax.f32 %v24794_v60, 0.0 }
 0x61e   : > { %29855 = vst [vmem:[#allocation101_spill] sm:$0xff] %v25033_v46  ;;  %v25051_v10 = vrot.slane %v29859_v51, 1  ;;  %v25055_v46 = vrot.slane %v29861_v5, 1  ;;  %v25059_v11 = vrot.slane %v29863_v18, 1  ;;  %v29867_v40 = vmax.f32 %v24797_v43, 0.0 }
 0x61f   : > { %v25063_v39 = vrot.slane %v29865_v29, 1  ;;  %v29869_v21 = vmax.f32 %v24800_v23, 0.0  ;;  %v29871_v35 = vmax.f32 %v24803_v41, 0.0  ;;  %v29873_v56 = vmax.f32 %v24806_v55, 0.0 }
 0x620   : > { %29860 = vst [vmem:[#allocation102_spill] sm:$0xff] %v25051_v10  ;;  %29862 = vst [vmem:[#allocation103_spill] sm:$0xff] %v25055_v46  ;;  %v25067_v54 = vrot.slane %v29867_v40, 1  ;;  %v29875_v60 = vmax.f32 %v24809_v53, 0.0  ;;  %v29877_v43 = vmax.f32 %v24812_v20, 0.0  ;;  %v29879_v23 = vmax.f32 %v24815_v34, 0.0 }
 0x621   : > { %29864 = vst [vmem:[#allocation104_spill] sm:$0xff] %v25059_v11  ;;  %29866 = vst [vmem:[#allocation105_spill] sm:$0xff] %v25063_v39  ;;  %v25071_v51 = vrot.slane %v29869_v21, 1  ;;  %v25075_v5 = vrot.slane %v29871_v35, 1  ;;  %v25079_v18 = vrot.slane %v29873_v56, 1  ;;  %v29881_v41 = vmax.f32 %v24818_v59, 0.0 }
 0x622   : > { %29868 = vst [vmem:[#allocation106_spill] sm:$0xff] %v25067_v54  ;;  %v25083_v29 = vrot.slane %v29875_v60, 1  ;;  %v25087_v40 = vrot.slane %v29877_v43, 1  ;;  %v25091_v21 = vrot.slane %v29879_v23, 1  ;;  %v29886_v53 = vmax.f32 %v24824_v63, 0.0  ;;  %v29888_v54 = vld [vmem:[#allocation28_spill] sm:$0xff] }
 0x623   : > { %29870 = vst [vmem:[#allocation107_spill] sm:$0xff] %v25071_v51  ;;  %29872 = vst [vmem:[#allocation108_spill] sm:$0xff] %v25075_v5  ;;  %v25095_v35 = vrot.slane %v29881_v41, 1  ;;  %v29883_v5 = vld [vmem:[#allocation83_spill] sm:$0xff]  ;;  %v29889_v39 = vmax.f32 %v29888_v54, 0.0  ;;  %v29891_v34 = vmax.f32 %v24830_v22, 0.0 }
 0x624   : > { %29874 = vst [vmem:[#allocation109_spill] sm:$0xff] %v25079_v18  ;;  %29876 = vst [vmem:[#allocation110_spill] sm:$0xff] %v25083_v29  ;;  %v29884_v51 = vmax.f32 %v29883_v5, 0.0  ;;  %v25103_v60 = vrot.slane %v29886_v53, 1  ;;  %v5696_v41 = vsel %vm739_vm3, %v25079_v18, %v25083_v29  ;;  %v29893_v5 = vld [vmem:[#allocation65_spill] sm:$0xff]  ;;  %v29896_v54 = vmax.f32 %v24836_v15, 0.0 }
 0x625   : > { %29878 = vst [vmem:[#allocation111_spill] sm:$0xff] %v25087_v40  ;;  %29880 = vst [vmem:[#allocation112_spill] sm:$0xff] %v25091_v21  ;;  %v25107_v43 = vrot.slane %v29889_v39, 1  ;;  %v25111_v23 = vrot.slane %v29891_v34, 1  ;;  %v29894_v11 = vmax.f32 %v29893_v5, 0.0  ;;  %v29898_v18 = vmax.f32 %v24839_v57, 0.0 }
 0x626   : > { %29882 = vst [vmem:[#allocation113_spill] sm:$0xff] %v25095_v35  ;;  %v25099_v56 = vrot.slane %v29884_v51, 1  ;;  %29887 = vst [vmem:[#allocation115_spill] sm:$0xff] %v25103_v60  ;;  %v5700_v51 = vsel %vm739_vm3, %v25087_v40, %v25091_v21  ;;  %v25125_v39 = vrot.slane %v29896_v54, 1  ;;  %v29900_v21 = vld [vmem:[#allocation68_spill] sm:$0xff]  ;;  %v29903_v40 = vmax.f32 %v24845_v33, 0.0 }
 0x627   : > { %29890 = vst [vmem:[#allocation116_spill] sm:$0xff] %v25107_v43  ;;  %29892 = vst [vmem:[#allocation117_spill] sm:$0xff] %v25111_v23  ;;  %v25121_v53 = vrot.slane %v29894_v11, 1  ;;  %v5708_v29 = vsel %vm739_vm3, %v25103_v60, %v25107_v43  ;;  %v25135_v46 = vrot.slane %v29898_v18, 1  ;;  %v29901_v5 = vmax.f32 %v29900_v21, 0.0 }
 0x628   : > { %29885 = vst [vmem:[#allocation114_spill] sm:$0xff] %v25099_v56  ;;  %29897 = vst [vmem:[#allocation119_spill] sm:$0xff] %v25125_v39  ;;  %v5704_v34 = vsel %vm739_vm3, %v25095_v35, %v25099_v56  ;;  %v25146_v10 = vrot.slane %v29903_v40, 1  ;;  %v29905_v56 = vmax.f32 %v24848_v37, 0.0  ;;  %v29907_v57 = vmax.f32 %v24851_v44, 0.0 }
 0x629   : > { %29895 = vst [vmem:[#allocation118_spill] sm:$0xff] %v25121_v53  ;;  %29899 = vst [vmem:[#allocation120_spill] sm:$0xff] %v25135_v46  ;;  %v25139_v11 = vrot.slane %v29901_v5, 1  ;;  %v5712_v54 = vsel %vm739_vm3, %v25111_v23, %v25121_v53  ;;  %v5716_v5 = vsel %vm739_vm3, %v25125_v39, %v25135_v46  ;;  %v29909_v43 = vmax.f32 %v29816_v50, 0.0 }
 0x62a   : > { %29904 = vst [vmem:[#allocation122_spill] sm:$0xff] %v25146_v10  ;;  %v25150_v35 = vrot.slane %v29905_v56, 1  ;;  %v25154_v18 = vrot.slane %v29907_v57, 1  ;;  %v29910_v33 = vmax.f32 %v24857_v25, 0.0  ;;  %v29912_v53 = vmax.f32 %v29817_v31, 0.0 }
 0x62b   : > { %29902 = vst [vmem:[#allocation121_spill] sm:$0xff] %v25139_v11  ;;  %v25161_v60 = vrot.slane %v29909_v43, 1  ;;  %v5720_v57 = vsel %vm739_vm3, %v25139_v11, %v25146_v10  ;;  %v29913_v46 = vmax.f32 %v24863_v36, 0.0  ;;  %v29914_v25 = vmax.f32 %v29818_v8, 0.0 }
 0x62c   : > { %29906 = vst [vmem:[#allocation127_spill] sm:$0xff] %v25150_v35  ;;  %29908 = vst [vmem:[#allocation129_spill] sm:$0xff] %v25154_v18  ;;  %v25165_v40 = vrot.slane %v29910_v33, 1  ;;  %v25169_v56 = vrot.slane %v29912_v53, 1  ;;  %v5724_v44 = vsel %vm739_vm3, %v25150_v35, %v25154_v18  ;;  %v29915_v39 = vmax.f32 %v24869_v7, 0.0 }
 0x62d   : > { %v25179_v43 = vrot.slane %v29913_v46, 1  ;;  %v25183_v33 = vrot.slane %v29914_v25, 1  ;;  %v29916_v10 = vmax.f32 %v24739_v61, 0.0  ;;  %v29917_v36 = vmax.f32 %v24743_v3, 0.0 }
 0x62e   : > { %29911 = vst [vmem:[#allocation73_spill] sm:$0xff] %v25165_v40  ;;  %v5728_v53 = vsel %vm739_vm3, %v25161_v60, %v25165_v40  ;;  %v25190_v23 = vrot.slane %v29915_v39, 1  ;;  %v29918_v18 = vmax.f32 %v24751_v4, 0.0  ;;  %v29919_v40 = vmax.f32 %v24755_v19, 0.0 }
 0x62f   : > { %v25194_v11 = vmax.f32 %v29916_v10, %v5656_v14  ;;  %v25198_v46 = vmax.f32 %v29917_v36, %v5658_v62  ;;  %v5732_v25 = vsel %vm739_vm3, %v25169_v56, %v25179_v43  ;;  %v29920_v39 = vmax.f32 %v24806_v55, 0.0 }
 0x630   : > { %v5820_v35 = vmax.f32 %v29918_v18, %v5662_v28  ;;  %v25207_v7 = vmax.f32 %v29919_v40, %v5664_v9  ;;  %v5736_v3 = vsel %vm739_vm3, %v25183_v33, %v25190_v23  ;;  %v29921_v10 = vmax.f32 %v24812_v20, 0.0 }
 0x631   : > { %v25211_v61 = vmax.f32 %v29920_v39, %v5696_v41  ;;  %v29922_v14 = vmax.f32 %v24818_v59, 0.0  ;;  %v29923_v19 = vmax.f32 %v24824_v63, 0.0  ;;  %v29924_v55 = vmax.f32 %v24830_v22, 0.0  ;;  %v29934_v39 = vld [vmem:[#allocation53_spill] sm:$0xff] }
 0x632   : > { %v25218_v36 = vmax.f32 %v29921_v10, %v5700_v51  ;;  %v29925_v9 = vmax.f32 %v24836_v15, 0.0  ;;  %v29926_v20 = vmax.f32 %v29900_v21, 0.0  ;;  %v29927_v59 = vmax.f32 %v24848_v37, 0.0 }
 0x633   : > { %v25222_v4 = vmax.f32 %v29922_v14, %v5704_v34  ;;  %v25226_v62 = vmax.f32 %v29923_v19, %v5708_v29  ;;  %v25230_v28 = vmax.f32 %v29924_v55, %v5712_v54  ;;  %v29928_v63 = vmax.f32 %v29816_v50, 0.0  ;;  %v29936_v14 = vld [vmem:[#allocation55_spill] sm:$0xff]  ;;  %v29938_v55 = vld [vmem:[#allocation56_spill] sm:$0xff] }
 0x634   : > { %v25234_v41 = vmax.f32 %v29925_v9, %v5716_v5  ;;  %v25238_v51 = vmax.f32 %v29926_v20, %v5720_v57  ;;  %v25242_v34 = vmax.f32 %v29927_v59, %v5724_v44  ;;  %v29929_v22 = vmax.f32 %v29817_v31, 0.0  ;;  %v29932_v57 = vld [vmem:[#allocation52_spill] sm:$0xff] }
 0x635   : > { %v25246_v29 = vmax.f32 %v29928_v63, %v5728_v53  ;;  %v29930_v15 = vmax.f32 %v29818_v8, 0.0  ;;  %v5877_v21 = vmax.f32 %v25194_v11, %v5820_v35  ;;  %v5878_v5 = vmax.f32 %v25198_v46, %v25207_v7  ;;  %v29931_v8 = vld [vmem:[#allocation51_spill] sm:$0xff] }
 0x636   : > { %v25250_v54 = vmax.f32 %v29929_v22, %v5732_v25  ;;  %v5624_v37 = vsel %vm739_vm3, %v24931_v24, %v24935_v45  ;;  %v5626_v50 = vsel %vm739_vm3, %v24935_v45, %v24939_v38  ;;  %v5630_v31 = vsel %vm739_vm3, %v24943_v16, %v24947_v42 }
 0x637   : > { %v25254_v18 = vmax.f32 %v29930_v15, %v5736_v3  ;;  %v5632_v40 = vsel %vm739_vm3, %v24947_v42, %v24951_v17  ;;  %v29933_v53 = vmax.f32 %v29932_v57, 0.0  ;;  %v29935_v24 = vmax.f32 %v29934_v39, 0.0 }
 0x638   : > { %v19575_v10 = vpack.c.bf16 %v5878_v5, %v5877_v21  ;;  %v29937_v45 = vmax.f32 %v29936_v14, 0.0  ;;  %v29939_v9 = vmax.f32 %v29938_v55, 0.0  ;;  %v5660_v59 = vsel %vm739_vm3, %v25001_v6, %v25005_v26  ;;  %v29950_v14 = vld [vmem:[#allocation123_spill] sm:$0xff] }
 0x639   : > { %v5917_v44 = vmax.f32 %v25254_v18, %v29931_v8  ;;  %v5801_v25 = vmax.f32 %v29933_v53, %v5624_v37  ;;  %v5802_v3 = vmax.f32 %v29935_v24, %v5626_v50  ;;  %v5666_v42 = vsel %vm739_vm3, %v25011_v58, %v25015_v2  ;;  %v29945_v53 = vld [vmem:[#allocation57_spill] sm:$0xff]  ;;  %v29947_v24 = vld [vmem:[#allocation58_spill] sm:$0xff]  ;;  %v5928_v8 = vld [vmem:[%s28972_s7 + $0x50] sm:$0xff] }
 0x63a   : > { %v5804_v19 = vmax.f32 %v29937_v45, %v5630_v31  ;;  %v5805_v20 = vmax.f32 %v29939_v9, %v5632_v40  ;;  %v5668_v63 = vsel %vm739_vm3, %v25015_v2, %v25019_v30  ;;  %v29940_v22 = vmax.f32 %v29814_v1, 0.0  ;;  %19576 = vmatprep.subr.bf16.mxu1 %v19575_v10  ;;  %v29943_v31 = vld [vmem:[#allocation54_spill] sm:$0xff]  ;;  %v29949_v10 = vld [vmem:[#allocation101_spill] sm:$0xff]  ;;  %v29952_v9 = vld [vmem:[#allocation92_spill] sm:$0xff] }
 0x63b   : > { %v5628_v21 = vsel %vm739_vm3, %v24939_v38, %v24943_v16  ;;  %v29941_v6 = vmax.f32 %v29815_v52, 0.0  ;;  %v29942_v58 = vmax.f32 %v24763_v32, 0.0  ;;  %v5634_v2 = vsel %vm739_vm3, %v24951_v17, %v24955_v27 }
 0x63c   : > { %v25292_v15 = vmax.f32 %v29940_v22, %v5660_v59  ;;  %v5861_v5 = vmax.f32 %v5801_v25, %v5804_v19  ;;  %v5862_v37 = vmax.f32 %v5802_v3, %v5805_v20  ;;  %v5636_v1 = vsel %vm739_vm3, %v24955_v27, %v24959_v49 }
 0x63d   : > { %v5822_v26 = vmax.f32 %v29941_v6, %v5666_v42  ;;  %v5823_v50 = vmax.f32 %v29942_v58, %v5668_v63  ;;  %v29944_v40 = vmax.f32 %v29943_v31, 0.0  ;;  %v5670_v16 = vsel %vm739_vm3, %v25019_v30, %v25023_v47  ;;  %v29953_v42 = vld [vmem:[#allocation124_spill] sm:$0xff]  ;;  %v29956_v6 = vld [vmem:[#allocation59_spill] sm:$0xff] }
 0x63e   : > { %v19577_v52 = vpack.c.bf16 %v5862_v37, %v5861_v5  ;;  %v29946_v25 = vmax.f32 %v29945_v53, 0.0  ;;  %v29948_v17 = vmax.f32 %v29947_v24, 0.0  ;;  %v5672_v27 = vsel %vm739_vm3, %v25023_v47, %v29949_v10  ;;  %v29961_v53 = vld [vmem:[#allocation125_spill] sm:$0xff] }
 0x63f   : > { %v5803_v38 = vmax.f32 %v29944_v40, %v5628_v21  ;;  %v5879_v57 = vmax.f32 %v25292_v15, %v5822_v26  ;;  %v5880_v32 = vmax.f32 %v5820_v35, %v5823_v50  ;;  %v29951_v45 = vmax.f32 %v29950_v14, 0.0  ;;  %v29955_v21 = vld [vmem:[#allocation93_spill] sm:$0xff]  ;;  %v29964_v14 = vld [vmem:[#allocation95_spill] sm:$0xff] }
 0x640   : > { %v5806_v39 = vmax.f32 %v29946_v25, %v5634_v2  ;;  %v5807_v3 = vmax.f32 %v29948_v17, %v5636_v1  ;;  %v5638_v30 = vsel %vm739_vm3, %v24959_v49, %v29952_v9  ;;  %19578 = vmatpush3.bf16.msra.mxu1 %v19577_v52  ;;  %v29954_v63 = vmax.f32 %v29953_v42, 0.0  ;;  %v29958_v1 = vld [vmem:[#allocation60_spill] sm:$0xff]  ;;  %v29960_v52 = vld [vmem:[#allocation94_spill] sm:$0xff] }
 0x641   : > { %v5824_v55 = vmax.f32 %v29951_v45, %v5670_v16  ;;  %v19579_v59 = vpack.c.bf16 %v5880_v32, %v5879_v57  ;;  %v5640_v5 = vsel %vm739_vm3, %v29952_v9, %v29955_v21  ;;  %v29957_v58 = vmax.f32 %v29956_v6, 0.0  ;;  %v29965_v45 = vld [vmem:[#allocation62_spill] sm:$0xff] }
 0x642   : > { %v5863_v35 = vmax.f32 %v5803_v38, %v5806_v39  ;;  %v5825_v22 = vmax.f32 %v29954_v63, %v5672_v27  ;;  %v5864_v37 = vmax.f32 %v5804_v19, %v5807_v3  ;;  %v29959_v31 = vmax.f32 %v29958_v1, 0.0  ;;  %v29972_v1 = vld [vmem:[#allocation128_spill] sm:$0xff] }
 0x643   : > { %v5881_v47 = vmax.f32 %v25207_v7, %v5824_v55  ;;  %v5808_v2 = vmax.f32 %v29957_v58, %v5638_v30  ;;  %19580 = vmatprep.subr.bf16.mxu1 %v19579_v59  ;;  %v5674_v38 = vsel %vm739_vm3, %v29949_v10, %v25039_v48  ;;  %v5676_v16 = vsel %vm739_vm3, %v25039_v48, %v25043_v0 }
 0x644   : > { %v5809_v40 = vmax.f32 %v29959_v31, %v5640_v5  ;;  %v5882_v49 = vmax.f32 %v5822_v26, %v5825_v22  ;;  %v5642_v7 = vsel %vm739_vm3, %v29955_v21, %v29960_v52  ;;  %v19581_v19 = vpack.c.bf16 %v5864_v37, %v5863_v35  ;;  %v29967_v35 = vld [vmem:[#allocation63_spill] sm:$0xff]  ;;  %v29969_v21 = vld [vmem:[#allocation102_spill] sm:$0xff] }
 0x645   : > { %v5865_v57 = vmax.f32 %v5805_v20, %v5808_v2  ;;  %v29962_v25 = vmax.f32 %v29961_v53, 0.0  ;;  %v29963_v26 = vmax.f32 %v24776_v13, 0.0  ;;  %v5644_v10 = vsel %vm739_vm3, %v29960_v52, %v29964_v14  ;;  %v29970_v37 = vld [vmem:[#allocation126_spill] sm:$0xff] }
 0x646   : > { %v5866_v32 = vmax.f32 %v5806_v39, %v5809_v40  ;;  %v19583_v17 = vpack.c.bf16 %v5882_v49, %v5881_v47  ;;  %v29966_v48 = vmax.f32 %v29965_v45, 0.0  ;;  %19582 = vmatpush3.bf16.msra.mxu1 %v19581_v19  ;;  %v29968_v20 = vmax.f32 %v29967_v35, 0.0  ;;  %v29974_v49 = vld [vmem:[#allocation96_spill] sm:$0xff]  ;;  %v29976_v52 = vld [vmem:[#allocation66_spill] sm:$0xff]  ;;  %v29978_v19 = vld [vmem:[#allocation67_spill] sm:$0xff] }
 0x647   : > { %v5826_v24 = vmax.f32 %v29962_v25, %v5674_v38  ;;  %v5827_v27 = vmax.f32 %v29963_v26, %v5676_v16  ;;  %v5678_v42 = vsel %vm739_vm3, %v25043_v0, %v25047_v12  ;;  %v5680_v5 = vsel %vm739_vm3, %v25047_v12, %v29969_v21  ;;  %v29975_v16 = vld [vmem:[#allocation97_spill] sm:$0xff]  ;;  %v29980_v25 = vld [vmem:[#allocation103_spill] sm:$0xff]  ;;  %v29981_v26 = vld [vmem:[#allocation104_spill] sm:$0xff] }
 0x648   : > { %v5810_v9 = vmax.f32 %v29966_v48, %v5642_v7  ;;  %v19585_v30 = vpack.c.bf16 %v5866_v32, %v5865_v57  ;;  %v5811_v39 = vmax.f32 %v29968_v20, %v5644_v10  ;;  %19584 = vmatprep.subr.bf16.mxu1 %v19583_v17  ;;  %v29971_v47 = vmax.f32 %v29970_v37, 0.0  ;;  %v29982_v45 = vld [vmem:[#allocation130_spill] sm:$0xff] }
 0x649   : > { %v5883_v59 = vmax.f32 %v5823_v50, %v5826_v24  ;;  %v5884_v13 = vmax.f32 %v5824_v55, %v5827_v27  ;;  %v29973_v50 = vmax.f32 %v29972_v1, 0.0  ;;  %v5646_v38 = vsel %vm739_vm3, %v29964_v14, %v29974_v49  ;;  %v29984_v35 = vld [vmem:[#allocation70_spill] sm:$0xff] }
 0x64a   : > { %v5867_v63 = vmax.f32 %v5807_v3, %v5810_v9  ;;  %v5828_v6 = vmax.f32 %v29971_v47, %v5678_v42  ;;  %v5868_v58 = vmax.f32 %v5808_v2, %v5811_v39  ;;  %v5648_v0 = vsel %vm739_vm3, %v29974_v49, %v29975_v16  ;;  %19586 = vmatpush3.bf16.msra.mxu1 %v19585_v30  ;;  %v29991_v49 = vld [vmem:[#allocation81_spill] sm:$0xff] }
 0x64b   : > { %v5829_v31 = vmax.f32 %v29973_v50, %v5680_v5  ;;  %v19587_v3 = vpack.c.bf16 %v5884_v13, %v5883_v59  ;;  %v29977_v7 = vmax.f32 %v29976_v52, 0.0  ;;  %v29979_v57 = vmax.f32 %v29978_v19, 0.0  ;;  %v29986_v13 = vld [vmem:[#allocation98_spill] sm:$0xff]  ;;  %v29988_v5 = vld [vmem:[#allocation105_spill] sm:$0xff]  ;;  %v29996_v19 = vld [vmem:[#allocation100_spill] sm:$0xff] }
 0x64c   : > { %v5885_v55 = vmax.f32 %v5825_v22, %v5828_v6  ;;  %v19589_v2 = vpack.c.bf16 %v5868_v58, %v5867_v63  ;;  %v5682_v17 = vsel %vm739_vm3, %v29969_v21, %v29980_v25  ;;  %v5684_v14 = vsel %vm739_vm3, %v29980_v25, %v29981_v26  ;;  %v29987_v63 = vld [vmem:[#allocation99_spill] sm:$0xff]  ;;  %v29989_v58 = vld [vmem:[#allocation82_spill] sm:$0xff] }
 0x64d   : > { %v5812_v12 = vmax.f32 %v29977_v7, %v5646_v38  ;;  %v5813_v32 = vmax.f32 %v29979_v57, %v5648_v0  ;;  %v5886_v53 = vmax.f32 %v5826_v24, %v5829_v31  ;;  %19588 = vmatprep.subr.bf16.mxu1 %v19587_v3  ;;  %v29983_v48 = vmax.f32 %v29982_v45, 0.0  ;;  %v29993_v3 = vld [vmem:[#allocation106_spill] sm:$0xff] }
 0x64e   : > { %v29985_v20 = vmax.f32 %v29984_v35, 0.0  ;;  %v5650_v24 = vsel %vm739_vm3, %v29975_v16, %v29986_v13  ;;  %v5652_v21 = vsel %vm739_vm3, %v29986_v13, %v29987_v63  ;;  %v29990_v1 = vmax.f32 %v29989_v58, 0.0  ;;  %19590 = vmatpush3.bf16.msra.mxu1 %v19589_v2  ;;  %v30007_v58 = vld [vmem:[#allocation109_spill] sm:$0xff] }
 0x64f   : > { %v5869_v10 = vmax.f32 %v5809_v40, %v5812_v12  ;;  %v5870_v22 = vmax.f32 %v5810_v9, %v5813_v32  ;;  %v5830_v59 = vmax.f32 %v29983_v48, %v5682_v17  ;;  %v19591_v30 = vpack.c.bf16 %v5886_v53, %v5885_v55  ;;  %v29994_v55 = vld [vmem:[#allocation71_spill] sm:$0xff]  ;;  %v29997_v53 = vld [vmem:[#allocation74_spill] sm:$0xff]  ;;  %v29999_v17 = vld [vmem:[#allocation61_spill] sm:$0xff] }
 0x650   : > { %v5831_v42 = vmax.f32 %v29985_v20, %v5684_v14  ;;  %v5686_v40 = vsel %vm739_vm3, %v29981_v26, %v29988_v5  ;;  %v5814_v50 = vmax.f32 %v29990_v1, %v5650_v24  ;;  %v29992_v38 = vmax.f32 %v29991_v49, 0.0  ;;  %v30001_v48 = vld [vmem:[#allocation107_spill] sm:$0xff]  ;;  %v30002_v24 = vld [vmem:[#allocation108_spill] sm:$0xff] }
 0x651   : > { %v19593_v9 = vpack.c.bf16 %v5870_v22, %v5869_v10  ;;  %v5887_v37 = vmax.f32 %v5827_v27, %v5830_v59  ;;  %v5688_v16 = vsel %vm739_vm3, %v29988_v5, %v29993_v3  ;;  %v29995_v52 = vmax.f32 %v29994_v55, 0.0  ;;  %19592 = vmatprep.subr.bf16.mxu1 %v19591_v30  ;;  %v30003_v30 = vld [vmem:[#allocation75_spill] sm:$0xff] }
 0x652   : > { %v5888_v47 = vmax.f32 %v5828_v6, %v5831_v42  ;;  %v5815_v0 = vmax.f32 %v29992_v38, %v5652_v21  ;;  %v5654_v57 = vsel %vm739_vm3, %v29987_v63, %v29996_v19  ;;  %v5871_v6 = vmax.f32 %v5811_v39, %v5814_v50  ;;  %v30008_v38 = vld [vmem:[#allocation78_spill] sm:$0xff]  ;;  %v30010_v55 = vld [vmem:[#allocation111_spill] sm:$0xff] }
 0x653   : > { %v5832_v7 = vmax.f32 %v29995_v52, %v5686_v40  ;;  %v29998_v25 = vmax.f32 %v29997_v53, 0.0  ;;  %v30000_v26 = vmax.f32 %v29999_v17, 0.0  ;;  %v5874_v45 = vmax.f32 %v5814_v50, %v25194_v11  ;;  %19594 = vmatpush3.bf16.msra.mxu1 %v19593_v9  ;;  %v30005_v40 = vld [vmem:[#allocation77_spill] sm:$0xff]  ;;  %v30011_v52 = vld [vmem:[#allocation110_spill] sm:$0xff] }
 0x654   : > { %v19595_v27 = vpack.c.bf16 %v5888_v47, %v5887_v37  ;;  %v5872_v10 = vmax.f32 %v5812_v12, %v5815_v0  ;;  %v5690_v35 = vsel %vm739_vm3, %v29993_v3, %v30001_v48  ;;  %v5692_v39 = vsel %vm739_vm3, %v30001_v48, %v30002_v24 }
 0x655   : > { %v5833_v2 = vmax.f32 %v29998_v25, %v5688_v16  ;;  %v5816_v14 = vmax.f32 %v30000_v26, %v5654_v57  ;;  %v5889_v22 = vmax.f32 %v5829_v31, %v5832_v7  ;;  %v30004_v63 = vmax.f32 %v30003_v30, 0.0  ;;  %v30015_v57 = vld [vmem:[#allocation114_spill] sm:$0xff]  ;;  %v30018_v26 = vld [vmem:[#allocation79_spill] sm:$0xff] }
 0x656   : > { %v19597_v5 = vpack.c.bf16 %v5872_v10, %v5871_v6  ;;  %v30006_v12 = vmax.f32 %v30005_v40, 0.0  ;;  %v5875_v11 = vmax.f32 %v5815_v0, %v25198_v46  ;;  %19596 = vmatprep.subr.bf16.mxu1 %v19595_v27  ;;  %v5694_v1 = vsel %vm739_vm3, %v30002_v24, %v30007_v58  ;;  %v30013_v0 = vld [vmem:[#allocation112_spill] sm:$0xff]  ;;  %v30016_v6 = vld [vmem:[#allocation117_spill] sm:$0xff]  ;;  %v30027_v40 = vld [vmem:[#allocation118_spill] sm:$0xff] }
 0x657   : > { %v5890_v20 = vmax.f32 %v5830_v59, %v5833_v2  ;;  %v5873_v13 = vmax.f32 %v5813_v32, %v5816_v14  ;;  %v5834_v21 = vmax.f32 %v30004_v63, %v5690_v35  ;;  %v5876_v37 = vmax.f32 %v5816_v14, %v25292_v15  ;;  %v30012_v15 = vld [vmem:[#allocation113_spill] sm:$0xff] }
 0x658   : > { %v5835_v31 = vmax.f32 %v30006_v12, %v5692_v39  ;;  %v30009_v9 = vmax.f32 %v30008_v38, 0.0  ;;  %v5698_v46 = vsel %vm739_vm3, %v30011_v52, %v30010_v55  ;;  %v5702_v19 = vsel %vm739_vm3, %v30013_v0, %v30012_v15  ;;  %19598 = vmatpush3.bf16.msra.mxu1 %v19597_v5  ;;  %v30024_v39 = vld [vmem:[#allocation28_spill] sm:$0xff] }
 0x659   : > { %v19599_v47 = vpack.c.bf16 %v5890_v20, %v5889_v22  ;;  %v19601_v59 = vpack.c.bf16 %v5874_v45, %v5873_v13  ;;  %v5891_v32 = vmax.f32 %v5831_v42, %v5834_v21  ;;  %v19605_v49 = vpack.c.bf16 %v5876_v37, %v5875_v11  ;;  %v30014_v42 = vld [vmem:[#allocation115_spill] sm:$0xff]  ;;  %v30020_v45 = vld [vmem:[#allocation80_spill] sm:$0xff]  ;;  %v30028_v37 = vld [vmem:[#allocation65_spill] sm:$0xff] }
 0x65a   : > { %v5892_v50 = vmax.f32 %v5832_v7, %v5835_v31  ;;  %v5836_v3 = vmax.f32 %v30009_v9, %v5694_v1  ;;  %v5894_v16 = vmax.f32 %v5834_v21, %v25211_v61  ;;  %v5706_v27 = vsel %vm739_vm3, %v30015_v57, %v30014_v42  ;;  %v30017_v7 = vld [vmem:[#allocation116_spill] sm:$0xff]  ;;  %v30022_v20 = vld [vmem:[#allocation83_spill] sm:$0xff] }
 0x65b   : > { %v5710_v53 = vsel %vm739_vm3, %v30017_v7, %v30016_v6  ;;  %v30019_v14 = vmax.f32 %v30018_v26, 0.0  ;;  %19600 = vmatprep.subr.bf16.mxu1 %v19599_v47  ;;  %v30021_v48 = vmax.f32 %v30020_v45, 0.0  ;;  %v30023_v13 = vmax.f32 %v30022_v20, 0.0  ;;  %v30026_v21 = vld [vmem:[#allocation119_spill] sm:$0xff]  ;;  %v30031_v15 = vld [vmem:[#allocation120_spill] sm:$0xff]  ;;  %v30039_v26 = vld [vmem:[#allocation73_spill] sm:$0xff] }
 0x65c   : > { %v19603_v25 = vpack.c.bf16 %v5892_v50, %v5891_v32  ;;  %v5893_v17 = vmax.f32 %v5833_v2, %v5836_v3  ;;  %v5896_v22 = vmax.f32 %v5836_v3, %v25218_v36  ;;  %v30025_v30 = vmax.f32 %v30024_v39, 0.0  ;;  %19602 = vmatpush3.bf16.msra.mxu1 %v19601_v59  ;;  %v30034_v57 = vld [vmem:[#allocation127_spill] sm:$0xff]  ;;  %v30036_v6 = vld [vmem:[#allocation84_spill] sm:$0xff] }
 0x65d   : > { %v5838_v10 = vmax.f32 %v30019_v14, %v5698_v46  ;;  %v5840_v35 = vmax.f32 %v30021_v48, %v5702_v19  ;;  %v5842_v24 = vmax.f32 %v30023_v13, %v5706_v27  ;;  %v5714_v5 = vsel %vm739_vm3, %v30027_v40, %v30026_v21  ;;  %v30030_v46 = vld [vmem:[#allocation121_spill] sm:$0xff]  ;;  %v30035_v27 = vld [vmem:[#allocation122_spill] sm:$0xff]  ;;  %v30042_v13 = vld [vmem:[#allocation87_spill] sm:$0xff] }
 0x65e   : > { %v5844_v63 = vmax.f32 %v30025_v30, %v5710_v53  ;;  %v19608_v2 = vpack.c.bf16 %v5894_v16, %v5893_v17  ;;  %v30029_v32 = vmax.f32 %v30028_v37, 0.0  ;;  %19604 = vmatprep.subr.bf16.mxu1 %v19603_v25  ;;  %v30037_v7 = vmax.f32 %v30036_v6, 0.0  ;;  %v30038_v25 = vld [vmem:[#allocation129_spill] sm:$0xff] }
 0x65f   : > { %v5895_v12 = vmax.f32 %v5835_v31, %v5838_v10  ;;  %v5898_v11 = vmax.f32 %v5838_v10, %v25222_v4  ;;  %v5897_v58 = vmax.f32 %v25211_v61, %v5840_v35  ;;  %v5899_v1 = vmax.f32 %v25218_v36, %v5842_v24  ;;  %v30045_v30 = vld [vmem:[#allocation89_spill] sm:$0xff] }
 0x660   : > { %v5846_v47 = vmax.f32 %v30029_v32, %v5714_v5  ;;  %v5900_v50 = vmax.f32 %v5840_v35, %v25226_v62  ;;  %v5901_v38 = vmax.f32 %v25222_v4, %v5844_v63  ;;  %v5902_v3 = vmax.f32 %v5842_v24, %v25230_v28  ;;  %v30032_v4 = vld [vmem:[#allocation17_spill] sm:$0xff]  ;;  %19606 = vmatpush3.bf16.msra.mxu1 %v19605_v49 }
 0x661   : > { %v19611_v9 = vpack.c.bf16 %v5896_v22, %v5895_v12  ;;  %v5904_v31 = vmax.f32 %v5844_v63, %v25234_v41  ;;  %v19614_v55 = vpack.c.bf16 %v5898_v11, %v5897_v58  ;;  %v5718_v61 = vsel %vm739_vm3, %v30031_v15, %v30030_v46  ;;  %v5918_v22 = vld [vmem:[%s28972_s7] sm:$0xff]  ;;  %v30048_v58 = vld [vmem:[#allocation91_spill] sm:$0xff]  ;;  %v5931_v15 = vld [vmem:[%s28972_s7 + $0x68] sm:$0xff] }
 0x662   : > { %v5903_v16 = vmax.f32 %v25226_v62, %v5846_v47  ;;  %v19617_v52 = vpack.c.bf16 %v5900_v50, %v5899_v1  ;;  %v5906_v36 = vmax.f32 %v5846_v47, %v25238_v51  ;;  %v19620_v0 = vpack.c.bf16 %v5902_v3, %v5901_v38  ;;  %v30040_v35 = vld [vmem:[#allocation85_spill] sm:$0xff] }
 0x663   : > { %v30033_v59 = vmax.f32 %v30032_v4, 0.0  ;;  %v5722_v62 = vsel %vm739_vm3, %v30035_v27, %v30034_v57  ;;  %v5726_v17 = vsel %vm739_vm3, %v30038_v25, %v25161_v60  ;;  %v5730_v14 = vsel %vm739_vm3, %v30039_v26, %v25169_v56  ;;  %v30047_v21 = vld [vmem:[#allocation49_spill] sm:$0xff]  ;;  %6079 = vmatmul.mubr.f32.vlgmr.msra.gmra.mrb[0].mxu1 %v5918_v22  ;;  %v5955_v57 = vld [vmem:[%s28972_s7 + $0x128] sm:$0xff]  ;;  %v5925_v22 = vld [vmem:[%s28972_s7 + $0x38] sm:$0xff] }
 0x664   : > { %v25467_v19 = vpack.c.bf16 %v5904_v31, %v5903_v16  ;;  %v5850_v53 = vmax.f32 %v30037_v7, %v5722_v62  ;;  %v5734_v10 = vsel %vm739_vm3, %v25179_v43, %v25183_v33  ;;  %v30041_v20 = vmax.f32 %v30040_v35, 0.0  ;;  %v5923_v43 = vld [vmem:[%s28972_s7 + $0x28] sm:$0xff]  ;;  %v5926_v46 = vld [vmem:[%s28972_s7 + $0x40] sm:$0xff]  ;;  %v5937_v35 = vld [vmem:[%s28972_s7 + $0x98] sm:$0xff] }
 0x665   : > { %v5848_v42 = vmax.f32 %v30033_v59, %v5718_v61  ;;  %v30043_v24 = vmax.f32 %v30042_v13, 0.0  ;;  %v30044_v56 = vmov 0.0|0.0   ;;  %v5738_v40 = vsel %vm739_vm3, %v25190_v23, %v30047_v21  ;;  %6083 = vmatprep.mubr.f32.mxu1 %v5923_v43  ;;  %v5922_v23 = vld [vmem:[%s28972_s7 + $0x20] sm:$0xff]  ;;  %v5959_v62 = vld [vmem:[%s28972_s7 + $0x148] sm:$0xff]  ;;  %v5940_v13 = vld [vmem:[%s28972_s7 + $0xb0] sm:$0xff] }
 0x666   : > { %v5852_v60 = vmax.f32 %v30041_v20, %v5726_v17  ;;  %19607 = vmatprep.subr.bf16.mxu1 %v30044_v56  ;;  %v5907_v33 = vmax.f32 %v25234_v41, %v5850_v53  ;;  %v5910_v49 = vmax.f32 %v5850_v53, %v25246_v29  ;;  %v30049_v1 = vmax.f32 %v30048_v58, 0.0  ;;  %v5934_v61 = vld [vmem:[%s28972_s7 + $0x80] sm:$0xff]  ;;  %v5963_v7 = vld [vmem:[%s28972_s7 + $0x168] sm:$0xff]  ;;  %v5936_v20 = vld [vmem:[%s28972_s7 + $0x90] sm:$0xff] }
 0x667   : > { %v5905_v45 = vmax.f32 %v25230_v28, %v5848_v42  ;;  %v5908_v48 = vmax.f32 %v5848_v42, %v25242_v34  ;;  %v5854_v39 = vmax.f32 %v30043_v24, %v5730_v14  ;;  %v30046_v28 = vmax.f32 %v30045_v30, 0.0  ;;  %19609 = vmatpush1.bf16.msra.mxu1 %v19608_v2  ;;  %v5942_v4 = vld [vmem:[%s28972_s7 + $0xc0] sm:$0xff]  ;;  %v5967_v25 = vld [vmem:[%s28972_s7 + $0x188] sm:$0xf]  ;;  %v5921_v14 = vld [vmem:[%s28972_s7 + $0x18] sm:$0xff] }
 0x668   : > { %v5909_v12 = vmax.f32 %v25238_v51, %v5852_v60  ;;  %v5912_v37 = vmax.f32 %v5852_v60, %v25250_v54  ;;  %v5858_v50 = vmax.f32 %v30049_v1, %v5738_v40  ;;  %19610 = vmatprep.subr.bf16.mxu1 %v30044_v56  ;;  %6084 = vmatmul.mubr.f32.gmra.mrb[2].mxu1 %v5922_v23  ;;  %v5946_v59 = vld [vmem:[%s28972_s7 + $0xe0] sm:$0xff]  ;;  %v29335_v26 = vmov 0.0   ;;  %v5941_v60 = vld [vmem:[%s28972_s7 + $0xb8] sm:$0xff]  ;;  %v5952_v30 = vld [vmem:[%s28972_s7 + $0x110] sm:$0xff] }
 0x669   : > { %v5856_v63 = vmax.f32 %v30046_v28, %v5734_v10  ;;  %v19626_v5 = vpack.c.bf16 %v5906_v36, %v5905_v45  ;;  %v5911_v11 = vmax.f32 %v25242_v34, %v5854_v39  ;;  %v19629_v32 = vpack.c.bf16 %v5908_v48, %v5907_v33  ;;  %v30050_v34 = vld [vmem:[#allocation50_spill] sm:$0xff]  ;;  %v5938_v36 = vld [vmem:[%s28972_s7 + $0xa0] sm:$0xff]  ;;  %v5920_v10 = vld [vmem:[%s28972_s7 + $0x10] sm:$0xff] }
 0x66a   : > { %v5914_v47 = vmax.f32 %v5854_v39, %v25254_v18  ;;  %v19632_v51 = vpack.c.bf16 %v5910_v49, %v5909_v12  ;;  %v5915_v31 = vmax.f32 %v25250_v54, %v5858_v50  ;;  %v5930_v54 = vld [vmem:[%s28972_s7 + $0x60] sm:$0xff]  ;;  %v5924_v45 = vld [vmem:[%s28972_s7 + $0x30] sm:$0xff]  ;;  %v5929_v18 = vld [vmem:[%s28972_s7 + $0x58] sm:$0xff] }
 0x66b   : > { %v5913_v41 = vmax.f32 %v25246_v29, %v5856_v63  ;;  %v19635_v38 = vpack.c.bf16 %v5912_v37, %v5911_v11  ;;  %v5916_v3 = vmax.f32 %v5856_v63, %v30050_v34  ;;  %v5927_v29 = vld [vmem:[%s28972_s7 + $0x48] sm:$0xff]  ;;  %19612 = vmatpush1.bf16.msra.mxu1 %v19611_v9  ;;  %v5950_v42 = vld [vmem:[%s28972_s7 + $0x100] sm:$0xff]  ;;  %v5932_v48 = vld [vmem:[%s28972_s7 + $0x70] sm:$0xff] }
 0x66c   : > { %6088 = vmatprep.mubr.f32.mxu1 %v5927_v29  ;;  %19613 = vmatprep.subr.bf16.mxu1 %v30044_v56  ;;  %v5935_v9 = vld [vmem:[%s28972_s7 + $0x88] sm:$0xff]  ;;  %v5954_v27 = vld [vmem:[%s28972_s7 + $0x120] sm:$0xff]  ;;  %v5945_v24 = vld [vmem:[%s28972_s7 + $0xd8] sm:$0xff] }
 0x66d   : > { %v19638_v16 = vpack.c.bf16 %v5914_v47, %v5913_v41  ;;  %v19641_v2 = vpack.c.bf16 %v5916_v3, %v5915_v31  ;;  %6089 = vmatmul.mubr.f32.gmra.mrb[4].mxu1 %v5926_v46  ;;  %v5958_v6 = vld [vmem:[%s28972_s7 + $0x140] sm:$0xff]  ;;  %v5944_v39 = vld [vmem:[%s28972_s7 + $0xd0] sm:$0xff]  ;;  %v5949_v43 = vld [vmem:[%s28972_s7 + $0xf8] sm:$0xff] }
 0x66e   : > { %6093 = vmatprep.mubr.f32.mxu1 %v5931_v15  ;;  %v5962_v53 = vld [vmem:[%s28972_s7 + $0x160] sm:$0xff]  ;;  %v5948_v33 = vld [vmem:[%s28972_s7 + $0xf0] sm:$0xff]  ;;  %v5953_v49 = vld [vmem:[%s28972_s7 + $0x118] sm:$0xff] }
 0x66f   : > { %19615 = vmatpush1.bf16.msra.mxu1 %v19614_v55  ;;  %v5939_v55 = vld [vmem:[%s28972_s7 + $0xa8] sm:$0xff]  ;;  %v5966_v17 = vld [vmem:[%s28972_s7 + $0x180] sm:$0xf]  ;;  %v5957_v28 = vld [vmem:[%s28972_s7 + $0x138] sm:$0xff] }
 0x670   : > { %19616 = vmatprep.subr.bf16.mxu1 %v30044_v56  ;;  %v5956_v63 = vld [vmem:[%s28972_s7 + $0x130] sm:$0xff]  ;;  %v5961_v21 = vld [vmem:[%s28972_s7 + $0x158] sm:$0xff] }
 0x671   : > { %6094 = vmatmul.mubr.f32.gmra.mrb[6].mxu1 %v5930_v54  ;;  %v5960_v40 = vld [vmem:[%s28972_s7 + $0x150] sm:$0xff]  ;;  %v5969_v11 = vld [vmem:[%s28972_s7 + $0x198] sm:$0xf] }
 0x672   : > { %6098 = vmatprep.mubr.f32.mxu1 %v5935_v9  ;;  %v5964_v12 = vld [vmem:[%s28972_s7 + $0x170] sm:$0xff] }
 0x673   : > { %19618 = vmatpush1.bf16.msra.mxu1 %v19617_v52  ;;  %v5943_v52 = vld [vmem:[%s28972_s7 + $0xc8] sm:$0xff]  ;;  %v5968_v37 = vld [vmem:[%s28972_s7 + $0x190] sm:$0xf] }
 0x674   : > { %19619 = vmatprep.subr.bf16.mxu1 %v30044_v56 }
 0x675   : > { %6099 = vmatmul.mubr.f32.gmra.mrb[8].mxu1 %v5934_v61 }
 0x676   : > { %6103 = vmatprep.mubr.f32.mxu1 %v5939_v55 }
 0x677   : > { %19621 = vmatpush1.bf16.msra.mxu1 %v19620_v0  ;;  %v5947_v0 = vld [vmem:[%s28972_s7 + $0xe8] sm:$0xff] }
 0x678   : > { %19622 = vmatprep.subr.bf16.mxu1 %v30044_v56 }
 0x679   : > { %6104 = vmatmul.mubr.f32.gmra.mrb[10].mxu1 %v5938_v36 }
 0x67a   : > { %6108 = vmatprep.mubr.f32.mxu1 %v5943_v52 }
 0x67b   : > { %19624 = vmatpush1.bf16.msra.mxu1 %v25467_v19  ;;  %v5951_v19 = vld [vmem:[%s28972_s7 + $0x108] sm:$0xff] }
 0x67c   : > { %19625 = vmatprep.subr.bf16.mxu1 %v30044_v56 }
 0x67d   : > { %6109 = vmatmul.mubr.f32.gmra.mrb[12].mxu1 %v5942_v4 }
 0x67e   : > { %6113 = vmatprep.mubr.f32.mxu1 %v5947_v0 }
 0x67f   : > { %19627 = vmatpush1.bf16.msra.mxu1 %v19626_v5  ;;  %v5965_v5 = vld [vmem:[%s28972_s7 + $0x178] sm:$0xff] }
 0x680   : > { %19628 = vmatprep.subr.bf16.mxu1 %v30044_v56 }
 0x681   : > { %6114 = vmatmul.mubr.f32.gmra.mrb[14].mxu1 %v5946_v59 }
 0x682   : > { %6118 = vmatprep.mubr.f32.mxu1 %v5951_v19 }
 0x683   : > { %19630 = vmatpush1.bf16.msra.mxu1 %v19629_v32  ;;  %v6274_v32 = vld [vmem:[#allocation4] sm:$0xff] }
 0x684   : > { %19631 = vmatprep.subr.bf16.mxu1 %v30044_v56 }
 0x685   : > { %6119 = vmatmul.mubr.f32.gmra.mrb[16].mxu1 %v5950_v42 }
 0x686   : > { %6123 = vmatprep.mubr.f32.mxu1 %v5955_v57 }
 0x687   : > { %19633 = vmatpush1.bf16.msra.mxu1 %v19632_v51 }
 0x688   : > { %19634 = vmatprep.subr.bf16.mxu1 %v30044_v56 }
 0x689   : > { %6124 = vmatmul.mubr.f32.gmra.mrb[18].mxu1 %v5954_v27 }
 0x68a   : > { %6128 = vmatprep.mubr.f32.mxu1 %v5959_v62 }
 0x68b   : > { %19636 = vmatpush1.bf16.msra.mxu1 %v19635_v38 }
 0x68c   : > { %19637 = vmatprep.subr.bf16.mxu1 %v30044_v56 }
 0x68d   : > { %6129 = vmatmul.mubr.f32.gmra.mrb[20].mxu1 %v5958_v6 }
 0x68e   : > { %6133 = vmatprep.mubr.f32.mxu1 %v5963_v7 }
 0x68f   : > { %19639 = vmatpush1.bf16.msra.mxu1 %v19638_v16 }
 0x690   : > { %19640 = vmatprep.subr.bf16.mxu1 %v30044_v56 }
 0x691   : > { %6134 = vmatmul.mubr.f32.gmra.mrb[22].mxu1 %v5962_v53 }
 0x692   : > { %6138 = vmatprep.mubr.f32.mxu1 %v5967_v25 }
 0x693   : > { %19642 = vmatpush1.bf16.msra.mxu1 %v19641_v2 }
 0x694   : > { %6192 = vmatprep.subr.mxu1 %v29335_v26 }
 0x695   : > { %6139 = vmatmul.mubr.f32.gmra.mrb[24].mxu1 %v5966_v17 }
 0x696   : > { %14334 = vmatprep.mubr.msk.f32.mxu1 %vm5970_vm7, %v5921_v14 }
 0x697   : > { %14333 = vmatpush1.msk.msra.mxu1 %vm6010_vm6, %v5917_v44  ;;  %v5933_v44 = vld [vmem:[%s28972_s7 + $0x78] sm:$0xff] }
 0x699   : > { %6209 = vmatmul.mubr.f32.vlgmr.msra.gmra.mrb[26].mxu1 %v5920_v10 }
 0x69a   : > { %14335 = vmatprep.mubr.msk.f32.mxu1 %vm5970_vm7, %v5925_v22 }
 0x69d   : > { %6214 = vmatmul.mubr.f32.gmra.mrb[28].mxu1 %v5924_v45 }
 0x69e   : > { %14336 = vmatprep.mubr.msk.f32.mxu1 %vm5970_vm7, %v5929_v18 }
 0x6a1   : > { %6219 = vmatmul.mubr.f32.gmra.mrb[30].mxu1 %v5928_v8 }
 0x6a2   : > { %14337 = vmatprep.mubr.msk.f32.mxu1 %vm5970_vm7, %v5933_v44 }
 0x6a5   : > { %6224 = vmatmul.mubr.f32.gmra.mrb[32].mxu1 %v5932_v48 }
 0x6a6   : > { %14338 = vmatprep.mubr.msk.f32.mxu1 %vm5970_vm7, %v5937_v35 }
 0x6a9   : > { %6229 = vmatmul.mubr.f32.gmra.mrb[34].mxu1 %v5936_v20 }
 0x6aa   : > { %14339 = vmatprep.mubr.msk.f32.mxu1 %vm5970_vm7, %v5941_v60 }
 0x6ad   : > { %6234 = vmatmul.mubr.f32.gmra.mrb[36].mxu1 %v5940_v13 }
 0x6ae   : > { %14340 = vmatprep.mubr.msk.f32.mxu1 %vm5970_vm7, %v5945_v24 }
 0x6b1   : > { %6239 = vmatmul.mubr.f32.gmra.mrb[38].mxu1 %v5944_v39 }
 0x6b2   : > { %14341 = vmatprep.mubr.msk.f32.mxu1 %vm5970_vm7, %v5949_v43 }
 0x6b5   : > { %6244 = vmatmul.mubr.f32.gmra.mrb[40].mxu1 %v5948_v33 }
 0x6b6   : > { %14342 = vmatprep.mubr.msk.f32.mxu1 %vm5970_vm7, %v5953_v49 }
 0x6b9   : > { %6249 = vmatmul.mubr.f32.gmra.mrb[42].mxu1 %v5952_v30 }
 0x6ba   : > { %14343 = vmatprep.mubr.msk.f32.mxu1 %vm5970_vm7, %v5957_v28 }
 0x6bd   : > { %6254 = vmatmul.mubr.f32.gmra.mrb[44].mxu1 %v5956_v63 }
 0x6be   : > { %14344 = vmatprep.mubr.msk.f32.mxu1 %vm5970_vm7, %v5961_v21 }
 0x6c1   : > { %6259 = vmatmul.mubr.f32.gmra.mrb[46].mxu1 %v5960_v40 }
 0x6c2   : > { %14345 = vmatprep.mubr.msk.f32.mxu1 %vm5970_vm7, %v5965_v5 }
 0x6c5   : > { %6264 = vmatmul.mubr.f32.gmra.mrb[48].mxu1 %v5964_v12 }
 0x6c6   : > { %14346 = vmatprep.mubr.msk.f32.mxu1 %vm5970_vm7, %v5969_v11 }
 0x6c9   : > { %6269 = vmatmul.mubr.f32.gmra.mrb[50].mxu1 %v5968_v37 }
 0x6ca   : > { %17392 = vmatprep.mubr.msk.f32.mxu1 %vm6302_vm8, %v6274_v32 }
 0x736   : > { %v15393_v41 = vpop.f32.mrb[0].mxu1 }
 0x737   : > { %v15394_v47 = vpop.f32.mrb[1].mxu1 }
 0x738   : > { %v15395_v58 = vadd.f32 %v15394_v47, %v15393_v41 }
 0x73b   : > { %v15396_v1 = vpop.f32.mrb[2].mxu1 }
 0x73c   : > { %v15397_v50 = vpop.f32.mrb[3].mxu1 }
 0x73d   : > { %v15398_v23 = vadd.f32 %v15397_v50, %v15396_v1 }
 0x740   : > { %v15399_v51 = vpop.f32.mrb[4].mxu1 }
 0x741   : > { %v15400_v38 = vpop.f32.mrb[5].mxu1 }
 0x742   : > { %v15401_v34 = vadd.f32 %v15400_v38, %v15399_v51 }
 0x744   : > { %v15402_v3 = vpop.f32.mrb[6].mxu1 }
 0x745   : > { %v15403_v29 = vpop.f32.mrb[7].mxu1 }
 0x746   : > { %v15404_v16 = vadd.f32 %v15403_v29, %v15402_v3 }
 0x748   : > { %v15405_v31 = vpop.f32.mrb[8].mxu1 }
 0x749   : > { %v15406_v2 = vpop.f32.mrb[9].mxu1 }
 0x74a   : > { %v15407_v46 = vadd.f32 %v15406_v2, %v15405_v31 }
 0x74c   : > { %v15408_v15 = vpop.f32.mrb[10].mxu1 }
 0x74d   : > { %v15409_v54 = vpop.f32.mrb[11].mxu1 }
 0x74e   : > { %v15410_v9 = vadd.f32 %v15409_v54, %v15408_v15 }
 0x750   : > { %v15411_v61 = vpop.f32.mrb[12].mxu1 }
 0x751   : > { %v15412_v55 = vpop.f32.mrb[13].mxu1 }
 0x752   : > { %v15413_v36 = vadd.f32 %v15412_v55, %v15411_v61 }
 0x754   : > { %v15414_v52 = vpop.f32.mrb[14].mxu1 }
 0x755   : > { %v15415_v4 = vpop.f32.mrb[15].mxu1 }
 0x756   : > { %v15416_v0 = vadd.f32 %v15415_v4, %v15414_v52  ;;  %v14377_v52 = vld [vmem:[%s28967_s2 + $0x88] sm:$0xff] }
 0x758   : > { %v15417_v59 = vpop.f32.mrb[16].mxu1 }
 0x759   : > { %v15418_v19 = vpop.f32.mrb[17].mxu1 }
 0x75a   : > { %v15419_v42 = vadd.f32 %v15418_v19, %v15417_v59  ;;  %v14378_v59 = vld [vmem:[%s28967_s2 + $0x90] sm:$0xff]  ;;  %v14379_v19 = vld [vmem:[%s28967_s2 + $0x98] sm:$0xff] }
 0x75c   : > { %v15420_v57 = vpop.f32.mrb[18].mxu1 }
 0x75d   : > { %v15421_v27 = vpop.f32.mrb[19].mxu1 }
 0x75e   : > { %v15422_v62 = vadd.f32 %v15421_v27, %v15420_v57  ;;  %v6275_v57 = vld [vmem:[#allocation4 + $0x8] sm:$0xff]  ;;  %v6276_v27 = vld [vmem:[#allocation4 + $0x10] sm:$0xff] }
 0x760   : > { %v15423_v6 = vpop.f32.mrb[20].mxu1 }
 0x761   : > { %v15424_v7 = vpop.f32.mrb[21].mxu1 }
 0x762   : > { %v15425_v53 = vadd.f32 %v15424_v7, %v15423_v6  ;;  %v14380_v6 = vld [vmem:[%s28967_s2 + $0xa0] sm:$0xff]  ;;  %v14381_v7 = vld [vmem:[%s28967_s2 + $0xa8] sm:$0xff] }
 0x764   : > { %v15426_v25 = vpop.f32.mrb[22].mxu1 }
 0x765   : > { %v15427_v17 = vpop.f32.mrb[23].mxu1 }
 0x766   : > { %v15428_v14 = vadd.f32 %v15427_v17, %v15426_v25  ;;  %v6278_v25 = vld [vmem:[#allocation4 + $0x20] sm:$0xff]  ;;  %v19675_v17 = vpack.c.bf16 %v14381_v7, %v14380_v6 }
 0x768   : > { %v15429_v10 = vpop.f32.mrb[24].mxu1 }
 0x769   : > { %v15430_v22 = vpop.f32.mrb[25].mxu1 }
 0x76a   : > { %v15431_v45 = vadd.f32 %v15430_v22, %v15429_v10  ;;  %v14383_v10 = vld [vmem:[%s28967_s2 + $0xb8] sm:$0xff] }
 0x76b   : > { %v6279_v22 = vld [vmem:[#allocation4 + $0x28] sm:$0xff] }
 0x76c   : > { %v6210_v18 = vpop.f32.mrb[26].mxu1 }
 0x76d   : > { %v6211_v8 = vadd.f32 %v15395_v58, %v6210_v18  ;;  %v6212_v44 = vpop.f32.mrb[27].mxu1 }
 0x76e   : > { %v14385_v44 = vld [vmem:[%s28967_s2 + $0xc8] sm:$0xff] }
 0x770   : > { %v6215_v48 = vpop.f32.mrb[28].mxu1 }
 0x771   : > { %v6216_v35 = vadd.f32 %v15398_v23, %v6215_v48  ;;  %v6217_v20 = vpop.f32.mrb[29].mxu1  ;;  %v6281_v48 = vld [vmem:[#allocation4 + $0x38] sm:$0xff] }
 0x773   : > { %v19643_v60 = vpack.c.bf16 %v6216_v35, %v6211_v8  ;;  %v14384_v8 = vld [vmem:[%s28967_s2 + $0xc0] sm:$0xff]  ;;  %v6282_v35 = vld [vmem:[#allocation4 + $0x40] sm:$0xff] }
 0x774   : > { %v6220_v13 = vpop.f32.mrb[30].mxu1  ;;  %v19683_v20 = vpack.c.bf16 %v14385_v44, %v14384_v8 }
 0x775   : > { %v6221_v24 = vadd.f32 %v15401_v34, %v6220_v13  ;;  %v6222_v39 = vpop.f32.mrb[31].mxu1  ;;  %19644 = vmatprep.subr.bf16.mxu1 %v19643_v60  ;;  %v14387_v13 = vld [vmem:[%s28967_s2 + $0xd8] sm:$0xff] }
 0x776   : > { %19646 = vmatpush3.bf16.msra.mxu1 %v19643_v60  ;;  %v14386_v60 = vld [vmem:[%s28967_s2 + $0xd0] sm:$0xff]  ;;  %v6284_v39 = vld [vmem:[#allocation4 + $0x50] sm:$0xff] }
 0x778   : > { %v6225_v43 = vpop.f32.mrb[32].mxu1 }
 0x779   : > { %v6226_v33 = vadd.f32 %v15404_v16, %v6225_v43  ;;  %v6227_v49 = vpop.f32.mrb[33].mxu1  ;;  %v19687_v43 = vpack.c.bf16 %v14387_v13, %v14386_v60 }
 0x77a   : > { %v6286_v49 = vld [vmem:[#allocation4 + $0x60] sm:$0xff] }
 0x77b   : > { %v19647_v30 = vpack.c.bf16 %v6226_v33, %v6221_v24  ;;  %v6283_v24 = vld [vmem:[#allocation4 + $0x48] sm:$0xff]  ;;  %v6285_v33 = vld [vmem:[#allocation4 + $0x58] sm:$0xff] }
 0x77c   : > { %v6230_v28 = vpop.f32.mrb[34].mxu1 }
 0x77d   : > { %v6231_v63 = vadd.f32 %v15407_v46, %v6230_v28  ;;  %v6232_v21 = vpop.f32.mrb[35].mxu1  ;;  %19648 = vmatprep.subr.bf16.mxu1 %v19647_v30  ;;  %v6288_v28 = vld [vmem:[#allocation4 + $0x70] sm:$0xff] }
 0x77e   : > { %19650 = vmatpush3.bf16.msra.mxu1 %v19647_v30  ;;  %v6287_v30 = vld [vmem:[#allocation4 + $0x68] sm:$0xff]  ;;  %v6290_v21 = vld [vmem:[#allocation4 + $0x80] sm:$0xff] }
 0x780   : > { %v6235_v40 = vpop.f32.mrb[36].mxu1 }
 0x781   : > { %v6236_v5 = vadd.f32 %v15410_v9, %v6235_v40  ;;  %v6237_v12 = vpop.f32.mrb[37].mxu1  ;;  %v6291_v40 = vld [vmem:[#allocation4 + $0x88] sm:$0xff] }
 0x782   : > { %v6293_v12 = vld [vmem:[#allocation4 + $0x98] sm:$0xff] }
 0x783   : > { %v19651_v11 = vpack.c.bf16 %v6236_v5, %v6231_v63  ;;  %v6289_v63 = vld [vmem:[#allocation4 + $0x78] sm:$0xff]  ;;  %v6292_v5 = vld [vmem:[#allocation4 + $0x90] sm:$0xff] }
 0x784   : > { %v6240_v37 = vpop.f32.mrb[38].mxu1 }
 0x785   : > { %v6241_v32 = vadd.f32 %v15413_v36, %v6240_v37  ;;  %v6242_v41 = vpop.f32.mrb[39].mxu1  ;;  %19652 = vmatprep.subr.bf16.mxu1 %v19651_v11  ;;  %v14376_v36 = vld [vmem:[%s28967_s2 + $0x80] sm:$0xff]  ;;  %v6295_v37 = vld [vmem:[#allocation4 + $0xa8] sm:$0xff] }
 0x786   : > { %19654 = vmatpush3.bf16.msra.mxu1 %v19651_v11  ;;  %v6294_v11 = vld [vmem:[#allocation4 + $0xa0] sm:$0xff]  ;;  %v6297_v41 = vld [vmem:[#allocation4 + $0xb8] sm:$0xff] }
 0x788   : > { %v6245_v47 = vpop.f32.mrb[40].mxu1 }
 0x789   : > { %v6246_v58 = vadd.f32 %v15416_v0, %v6245_v47  ;;  %v6247_v1 = vpop.f32.mrb[41].mxu1  ;;  %v6298_v47 = vld [vmem:[#allocation4 + $0xc0] sm:$0xff] }
 0x78a   : > { %v6300_v1 = vld [vmem:[#allocation4 + $0xd0] sm:$0xff] }
 0x78b   : > { %v19655_v50 = vpack.c.bf16 %v6246_v58, %v6241_v32  ;;  %v6296_v32 = vld [vmem:[#allocation4 + $0xb0] sm:$0xff]  ;;  %v6299_v58 = vld [vmem:[#allocation4 + $0xc8] sm:$0xff] }
 0x78c   : > { %v6250_v23 = vpop.f32.mrb[42].mxu1 }
 0x78d   : > { %v6251_v51 = vadd.f32 %v15419_v42, %v6250_v23  ;;  %v6252_v38 = vpop.f32.mrb[43].mxu1  ;;  %19656 = vmatprep.subr.bf16.mxu1 %v19655_v50  ;;  %v19667_v42 = vpack.c.bf16 %v14377_v52, %v14376_v36  ;;  %v14388_v23 = vld [vmem:[%s28967_s2 + $0xe0] sm:$0xff] }
 0x78e   : > { %19658 = vmatpush3.bf16.msra.mxu1 %v19655_v50  ;;  %v6301_v50 = vld [vmem:[#allocation4 + $0xd8] sm:$0xff] }
 0x790   : > { %v6255_v34 = vpop.f32.mrb[44].mxu1 }
 0x791   : > { %v6256_v3 = vadd.f32 %v15422_v62, %v6255_v34  ;;  %v6257_v29 = vpop.f32.mrb[45].mxu1  ;;  %v19671_v62 = vpack.c.bf16 %v14379_v19, %v14378_v59  ;;  %v14390_v34 = vld [vmem:[%s28967_s2 + $0xf0] sm:$0xff] }
 0x793   : > { %v19659_v16 = vpack.c.bf16 %v6256_v3, %v6251_v51  ;;  %v14389_v51 = vld [vmem:[%s28967_s2 + $0xe8] sm:$0xff]  ;;  %v14391_v3 = vld [vmem:[%s28967_s2 + $0xf8] sm:$0xff] }
 0x794   : > { %v6260_v31 = vpop.f32.mrb[46].mxu1  ;;  %v19691_v38 = vpack.c.bf16 %v14389_v51, %v14388_v23  ;;  %v19695_v29 = vpack.c.bf16 %v14391_v3, %v14390_v34 }
 0x795   : > { %v6261_v2 = vadd.f32 %v15425_v53, %v6260_v31  ;;  %v6262_v46 = vpop.f32.mrb[47].mxu1  ;;  %19660 = vmatprep.subr.bf16.mxu1 %v19659_v16  ;;  %v6277_v53 = vld [vmem:[#allocation4 + $0x18] sm:$0xff] }
 0x796   : > { %19662 = vmatpush3.bf16.msra.mxu1 %v19659_v16  ;;  %v6595_v16 = vld [vmem:[%s28967_s2] sm:$0xff]  ;;  %v6596_v31 = vld [vmem:[%s28967_s2 + $0x8] sm:$0xff] }
 0x798   : > { %v6265_v15 = vpop.f32.mrb[48].mxu1 }
 0x799   : > { %v6266_v54 = vadd.f32 %v15428_v14, %v6265_v15  ;;  %v6267_v9 = vpop.f32.mrb[49].mxu1  ;;  %v14382_v14 = vld [vmem:[%s28967_s2 + $0xb0] sm:$0xff] }
 0x79a   : > { %v19679_v18 = vpack.c.bf16 %v14383_v10, %v14382_v14  ;;  %v6600_v14 = vld [vmem:[%s28967_s2 + $0x28] sm:$0xff] }
 0x79b   : > { %v19663_v61 = vpack.c.bf16 %v6266_v54, %v6261_v2  ;;  %v19699_v2 = vpack.c.bf16 %v6596_v31, %v6595_v16  ;;  %v6605_v16 = vld [vmem:[%s28967_s2 + $0x50] sm:$0xff]  ;;  %v6606_v31 = vld [vmem:[%s28967_s2 + $0x58] sm:$0xff] }
 0x79c   : > { %v6270_v55 = vpop.f32.mrb[50].mxu1 }
 0x79d   : > { %v6271_v4 = vadd.f32 %v15431_v45, %v6270_v55  ;;  %19664 = vmatprep.subr.bf16.mxu1 %v19663_v61  ;;  %v6272_v0 = vpop.f32.mrb[51].mxu1  ;;  %v6280_v45 = vld [vmem:[#allocation4 + $0x30] sm:$0xff] }
 0x79e   : > { %19666 = vmatpush3.bf16.msra.mxu1 %v19663_v61  ;;  %v6598_v0 = vld [vmem:[%s28967_s2 + $0x18] sm:$0xff] }
 0x79f   : > { %17390 = vmatprep.subr.msk.mxu1 %vm980_vm0, %v6271_v4 }
 0x7a2   : > { %17391 = vmatpush3.msk.msra.mxu1 %vm980_vm0, %v6271_v4  ;;  %v6597_v4 = vld [vmem:[%s28967_s2 + $0x10] sm:$0xff] }
 0x7a3   : > { %17393 = vmatmul.mubr.msk.f32.vlgmr.msra.gmra.mrb[52].mxu1 %vm6302_vm8, %v6275_v57  ;;  %19668 = vmatprep.subr.bf16.mxu1 %v19667_v42  ;;  %v19703_v6 = vpack.c.bf16 %v6598_v0, %v6597_v4  ;;  %v19719_v0 = vpack.c.bf16 %v6606_v31, %v6605_v16 }
 0x7a4   : > { %17395 = vmatprep.mubr.msk.f32.mxu1 %vm6302_vm8, %v6276_v27  ;;  %19670 = vmatpush3.bf16.msra.mxu1 %v19667_v42 }
 0x7a5   : > { %19672 = vmatprep.subr.bf16.mxu1 %v19671_v62 }
 0x7a7   : > { %17396 = vmatmul.mubr.msk.f32.gmra.mrb[54].mxu1 %vm6302_vm8, %v6277_v53 }
 0x7a8   : > { %17398 = vmatprep.mubr.msk.f32.mxu1 %vm6302_vm8, %v6278_v25  ;;  %19674 = vmatpush3.bf16.msra.mxu1 %v19671_v62 }
 0x7a9   : > { %19676 = vmatprep.subr.bf16.mxu1 %v19675_v17 }
 0x7ab   : > { %17399 = vmatmul.mubr.msk.f32.gmra.mrb[56].mxu1 %vm6302_vm8, %v6279_v22 }
 0x7ac   : > { %17401 = vmatprep.mubr.msk.f32.mxu1 %vm6302_vm8, %v6280_v45  ;;  %19678 = vmatpush3.bf16.msra.mxu1 %v19675_v17  ;;  %v6599_v17 = vld [vmem:[%s28967_s2 + $0x20] sm:$0xff] }
 0x7ad   : > { %19680 = vmatprep.subr.bf16.mxu1 %v19679_v18 }
 0x7af   : > { %17402 = vmatmul.mubr.msk.f32.gmra.mrb[58].mxu1 %vm6302_vm8, %v6281_v48 }
 0x7b0   : > { %17404 = vmatprep.mubr.msk.f32.mxu1 %vm6302_vm8, %v6282_v35  ;;  %19682 = vmatpush3.bf16.msra.mxu1 %v19679_v18  ;;  %v19707_v35 = vpack.c.bf16 %v6600_v14, %v6599_v17 }
 0x7b1   : > { %19684 = vmatprep.subr.bf16.mxu1 %v19683_v20 }
 0x7b3   : > { %17405 = vmatmul.mubr.msk.f32.gmra.mrb[60].mxu1 %vm6302_vm8, %v6283_v24  ;;  %v6601_v24 = vld [vmem:[%s28967_s2 + $0x30] sm:$0xff] }
 0x7b4   : > { %17407 = vmatprep.mubr.msk.f32.mxu1 %vm6302_vm8, %v6284_v39  ;;  %19686 = vmatpush3.bf16.msra.mxu1 %v19683_v20  ;;  %v6602_v39 = vld [vmem:[%s28967_s2 + $0x38] sm:$0xff] }
 0x7b5   : > { %19688 = vmatprep.subr.bf16.mxu1 %v19687_v43 }
 0x7b7   : > { %17408 = vmatmul.mubr.msk.f32.gmra.mrb[62].mxu1 %vm6302_vm8, %v6285_v33 }
 0x7b8   : > { %17410 = vmatprep.mubr.msk.f32.mxu1 %vm6302_vm8, %v6286_v49  ;;  %19690 = vmatpush3.bf16.msra.mxu1 %v19687_v43 }
 0x7b9   : > { %19692 = vmatprep.subr.bf16.mxu1 %v19691_v38 }
 0x7bb   : > { %17411 = vmatmul.mubr.msk.f32.gmra.mrb[64].mxu1 %vm6302_vm8, %v6287_v30 }
 0x7bc   : > { %17413 = vmatprep.mubr.msk.f32.mxu1 %vm6302_vm8, %v6288_v28  ;;  %19694 = vmatpush3.bf16.msra.mxu1 %v19691_v38 }
 0x7bd   : > { %19696 = vmatprep.subr.bf16.mxu1 %v19695_v29 }
 0x7bf   : > { %17414 = vmatmul.mubr.msk.f32.gmra.mrb[66].mxu1 %vm6302_vm8, %v6289_v63 }
 0x7c0   : > { %17416 = vmatprep.mubr.msk.f32.mxu1 %vm6302_vm8, %v6290_v21  ;;  %19698 = vmatpush3.bf16.msra.mxu1 %v19695_v29 }
 0x7c1   : > { %19700 = vmatprep.subr.bf16.mxu1 %v19699_v2 }
 0x7c3   : > { %17417 = vmatmul.mubr.msk.f32.gmra.mrb[68].mxu1 %vm6302_vm8, %v6291_v40  ;;  %v19711_v40 = vpack.c.bf16 %v6602_v39, %v6601_v24 }
 0x7c4   : > { %17419 = vmatprep.mubr.msk.f32.mxu1 %vm6302_vm8, %v6292_v5 }
 0x7c7   : > { %17420 = vmatmul.mubr.msk.f32.gmra.mrb[70].mxu1 %vm6302_vm8, %v6293_v12 }
 0x7c8   : > { %17422 = vmatprep.mubr.msk.f32.mxu1 %vm6302_vm8, %v6294_v11 }
 0x7cb   : > { %17423 = vmatmul.mubr.msk.f32.gmra.mrb[72].mxu1 %vm6302_vm8, %v6295_v37  ;;  %v6603_v37 = vld [vmem:[%s28967_s2 + $0x40] sm:$0xff] }
 0x7cc   : > { %17425 = vmatprep.mubr.msk.f32.mxu1 %vm6302_vm8, %v6296_v32  ;;  %v6604_v32 = vld [vmem:[%s28967_s2 + $0x48] sm:$0xff] }
 0x7cd   : > { %v19715_v38 = vpack.c.bf16 %v6604_v32, %v6603_v37 }
 0x7cf   : > { %17426 = vmatmul.mubr.msk.f32.gmra.mrb[74].mxu1 %vm6302_vm8, %v6297_v41 }
 0x7d0   : > { %17428 = vmatprep.mubr.msk.f32.mxu1 %vm6302_vm8, %v6298_v47 }
 0x7d3   : > { %17429 = vmatmul.mubr.msk.f32.gmra.mrb[76].mxu1 %vm6302_vm8, %v6299_v58 }
 0x7d4   : > { %17431 = vmatprep.mubr.msk.f32.mxu1 %vm6302_vm8, %v6300_v1 }
 0x7d7   : > { %17432 = vmatmul.mubr.msk.f32.gmra.mrb[78].mxu1 %vm6302_vm8, %v6301_v50 }
 0x876   : > { %v25775_v46 = vpop.f32.mrb[52].mxu1 }
 0x877   : > { %v6653_v15 = vrot.slane %v25775_v46, 1  ;;  %v7111_v54 = vrot.slane %v25775_v46, 2  ;;  %v25779_v9 = vpop.f32.mrb[53].mxu1 }
 0x878   : > { %v6652_v61 = vrot.slane %v25779_v9, 1  ;;  %v7110_v55 = vrot.slane %v25779_v9, 2 }
 0x87a   : > { %v25783_v36 = vpop.f32.mrb[54].mxu1  ;;  %v6654_v52 = vsel %vm739_vm3, %v6652_v61, %v6653_v15  ;;  %v25793_v59 = vsel %vm1840_vm5, %v7110_v55, %v7111_v54 }
 0x87b   : > { %v6657_v19 = vrot.slane %v25783_v36, 1  ;;  %v7115_v42 = vrot.slane %v25783_v36, 2  ;;  %v25797_v57 = vpop.f32.mrb[55].mxu1  ;;  %17466 = vmatprep.mubr.f32.mxu1 %v6654_v52 }
 0x87c   : > { %v6655_v27 = vrot.slane %v25797_v57, 1  ;;  %v7113_v62 = vrot.slane %v25797_v57, 2 }
 0x87e   : > { %v25801_v7 = vpop.f32.mrb[56].mxu1  ;;  %v6656_v53 = vsel %vm739_vm3, %v6653_v15, %v6655_v27  ;;  %v25805_v25 = vsel %vm739_vm3, %v6655_v27, %v6657_v19  ;;  %v25814_v10 = vsel %vm1840_vm5, %v7111_v54, %v7113_v62  ;;  %v25817_v22 = vsel %vm1840_vm5, %v7113_v62, %v7115_v42  ;;  %v6607_v62 = vld [vmem:[%s28967_s2 + $0x60] sm:$0xff] }
 0x87f   : > { %v25819_v45 = vpop.f32.mrb[57].mxu1  ;;  %17467 = vmatmul.mubr.f32.vlgmr.msra.gmra.mrb[80].mxu1 %v6656_v53  ;;  %v6661_v18 = vrot.slane %v25801_v7, 1  ;;  %v7119_v8 = vrot.slane %v25801_v7, 2 }
 0x880   : > { %17469 = vmatprep.mubr.f32.mxu1 %v25805_v25  ;;  %v6659_v44 = vrot.slane %v25819_v45, 1  ;;  %19702 = vmatpush3.bf16.msra.mxu1 %v19699_v2  ;;  %v7117_v48 = vrot.slane %v25819_v45, 2 }
 0x881   : > { %19704 = vmatprep.subr.bf16.mxu1 %v19703_v6 }
 0x882   : > { %v25826_v20 = vpop.f32.mrb[58].mxu1  ;;  %v25829_v60 = vsel %vm739_vm3, %v6657_v19, %v6659_v44  ;;  %v25832_v13 = vsel %vm739_vm3, %v6659_v44, %v6661_v18  ;;  %v25841_v43 = vsel %vm1840_vm5, %v7115_v42, %v7117_v48  ;;  %v25844_v33 = vsel %vm1840_vm5, %v7117_v48, %v7119_v8 }
 0x883   : > { %v25846_v49 = vpop.f32.mrb[59].mxu1  ;;  %17470 = vmatmul.mubr.f32.gmra.mrb[82].mxu1 %v25829_v60  ;;  %v6665_v30 = vrot.slane %v25826_v20, 1  ;;  %v7123_v28 = vrot.slane %v25826_v20, 2 }
 0x884   : > { %17472 = vmatprep.mubr.f32.mxu1 %v25832_v13  ;;  %v6663_v63 = vrot.slane %v25846_v49, 1  ;;  %19706 = vmatpush3.bf16.msra.mxu1 %v19703_v6  ;;  %v7121_v21 = vrot.slane %v25846_v49, 2  ;;  %v6608_v6 = vld [vmem:[%s28967_s2 + $0x68] sm:$0xff] }
 0x885   : > { %19708 = vmatprep.subr.bf16.mxu1 %v19707_v35 }
 0x886   : > { %v25854_v5 = vpop.f32.mrb[60].mxu1  ;;  %v25857_v12 = vsel %vm739_vm3, %v6661_v18, %v6663_v63  ;;  %v25860_v11 = vsel %vm739_vm3, %v6663_v63, %v6665_v30  ;;  %v25869_v41 = vsel %vm1840_vm5, %v7119_v8, %v7121_v21  ;;  %v25872_v47 = vsel %vm1840_vm5, %v7121_v21, %v7123_v28  ;;  %v6610_v63 = vld [vmem:[%s28967_s2 + $0x78] sm:$0xff] }
 0x887   : > { %v25874_v58 = vpop.f32.mrb[61].mxu1  ;;  %17473 = vmatmul.mubr.f32.gmra.mrb[84].mxu1 %v25857_v12  ;;  %v6669_v1 = vrot.slane %v25854_v5, 1  ;;  %v7127_v50 = vrot.slane %v25854_v5, 2 }
 0x888   : > { %17475 = vmatprep.mubr.f32.mxu1 %v25860_v11  ;;  %v6667_v23 = vrot.slane %v25874_v58, 1  ;;  %19710 = vmatpush3.bf16.msra.mxu1 %v19707_v35  ;;  %v7125_v51 = vrot.slane %v25874_v58, 2  ;;  %v19723_v35 = vpack.c.bf16 %v6608_v6, %v6607_v62 }
 0x889   : > { %19712 = vmatprep.subr.bf16.mxu1 %v19711_v40 }
 0x88a   : > { %v25882_v34 = vpop.f32.mrb[62].mxu1  ;;  %v25885_v3 = vsel %vm739_vm3, %v6665_v30, %v6667_v23  ;;  %v25888_v29 = vsel %vm739_vm3, %v6667_v23, %v6669_v1  ;;  %v25897_v2 = vsel %vm1840_vm5, %v7123_v28, %v7125_v51  ;;  %v25900_v15 = vsel %vm1840_vm5, %v7125_v51, %v7127_v50  ;;  %v6609_v28 = vld [vmem:[%s28967_s2 + $0x70] sm:$0xff] }
 0x88b   : > { %v25902_v54 = vpop.f32.mrb[63].mxu1  ;;  %17476 = vmatmul.mubr.f32.gmra.mrb[86].mxu1 %v25885_v3  ;;  %v6673_v61 = vrot.slane %v25882_v34, 1  ;;  %v7131_v55 = vrot.slane %v25882_v34, 2  ;;  %v19727_v51 = vpack.c.bf16 %v6610_v63, %v6609_v28 }
 0x88c   : > { %17478 = vmatprep.mubr.f32.mxu1 %v25888_v29  ;;  %v6671_v52 = vrot.slane %v25902_v54, 1  ;;  %19714 = vmatpush3.bf16.msra.mxu1 %v19711_v40  ;;  %v7129_v4 = vrot.slane %v25902_v54, 2 }
 0x88d   : > { %19716 = vmatprep.subr.bf16.mxu1 %v19715_v38 }
 0x88e   : > { %v25910_v19 = vpop.f32.mrb[64].mxu1  ;;  %v25913_v42 = vsel %vm739_vm3, %v6669_v1, %v6671_v52  ;;  %v25916_v27 = vsel %vm739_vm3, %v6671_v52, %v6673_v61  ;;  %v25925_v53 = vsel %vm1840_vm5, %v7127_v50, %v7129_v4  ;;  %v25928_v17 = vsel %vm1840_vm5, %v7129_v4, %v7131_v55 }
 0x88f   : > { %30051 = vst [vmem:[#allocation131_spill] sm:$0xff] %v25913_v42  ;;  %30052 = vst [vmem:[#allocation76_spill] sm:$0xff] %v25916_v27  ;;  %v25930_v14 = vpop.f32.mrb[65].mxu1  ;;  %17479 = vmatmul.mubr.f32.gmra.mrb[88].mxu1 %v25913_v42  ;;  %v6677_v18 = vrot.slane %v25910_v19, 1  ;;  %v7135_v8 = vrot.slane %v25910_v19, 2 }
 0x890   : > { %17481 = vmatprep.mubr.f32.mxu1 %v25916_v27  ;;  %v6675_v44 = vrot.slane %v25930_v14, 1  ;;  %19718 = vmatpush3.bf16.msra.mxu1 %v19715_v38  ;;  %v7133_v48 = vrot.slane %v25930_v14, 2 }
 0x891   : > { %19720 = vmatprep.subr.bf16.mxu1 %v19719_v0 }
 0x892   : > { %v25938_v24 = vpop.f32.mrb[66].mxu1  ;;  %v25941_v39 = vsel %vm739_vm3, %v6673_v61, %v6675_v44  ;;  %v25944_v30 = vsel %vm739_vm3, %v6675_v44, %v6677_v18  ;;  %v25953_v21 = vsel %vm1840_vm5, %v7131_v55, %v7133_v48  ;;  %v25956_v40 = vsel %vm1840_vm5, %v7133_v48, %v7135_v8  ;;  %v14392_v61 = vld [vmem:[%s28967_s2 + $0x100] sm:$0xff]  ;;  %v14393_v55 = vld [vmem:[%s28967_s2 + $0x108] sm:$0xff] }
 0x893   : > { %30053 = vst [vmem:[#allocation132_spill] sm:$0xff] %v25941_v39  ;;  %30054 = vst [vmem:[#allocation18_spill] sm:$0xff] %v25944_v30  ;;  %v25958_v37 = vpop.f32.mrb[67].mxu1  ;;  %17482 = vmatmul.mubr.f32.gmra.mrb[90].mxu1 %v25941_v39  ;;  %v6681_v32 = vrot.slane %v25938_v24, 1  ;;  %v7139_v1 = vrot.slane %v25938_v24, 2 }
 0x894   : > { %30055 = vst [vmem:[#allocation19_spill] sm:$0xff] %v25953_v21  ;;  %17484 = vmatprep.mubr.f32.mxu1 %v25944_v30  ;;  %v6679_v50 = vrot.slane %v25958_v37, 1  ;;  %19722 = vmatpush3.bf16.msra.mxu1 %v19719_v0  ;;  %v7137_v23 = vrot.slane %v25958_v37, 2 }
 0x895   : > { %19724 = vmatprep.subr.bf16.mxu1 %v19723_v35 }
 0x896   : > { %v25966_v38 = vpop.f32.mrb[68].mxu1  ;;  %v25969_v16 = vsel %vm739_vm3, %v6677_v18, %v6679_v50  ;;  %v25972_v31 = vsel %vm739_vm3, %v6679_v50, %v6681_v32  ;;  %v25981_v52 = vsel %vm1840_vm5, %v7135_v8, %v7137_v23  ;;  %v25984_v4 = vsel %vm1840_vm5, %v7137_v23, %v7139_v1 }
 0x897   : > { %30056 = vst [vmem:[#allocation72_spill] sm:$0xff] %v25969_v16  ;;  %30057 = vst [vmem:[#allocation20_spill] sm:$0xff] %v25972_v31  ;;  %v25986_v0 = vpop.f32.mrb[69].mxu1  ;;  %17485 = vmatmul.mubr.f32.gmra.mrb[92].mxu1 %v25969_v16  ;;  %v6685_v62 = vrot.slane %v25966_v38, 1  ;;  %v7143_v6 = vrot.slane %v25966_v38, 2  ;;  %v19731_v8 = vpack.c.bf16 %v14393_v55, %v14392_v61 }
 0x898   : > { %17487 = vmatprep.mubr.f32.mxu1 %v25972_v31  ;;  %v6683_v18 = vrot.slane %v25986_v0, 1  ;;  %19726 = vmatpush3.bf16.msra.mxu1 %v19723_v35  ;;  %v7141_v44 = vrot.slane %v25986_v0, 2 }
 0x899   : > { %19728 = vmatprep.subr.bf16.mxu1 %v19727_v51 }
 0x89a   : > { %v25994_v48 = vpop.f32.mrb[70].mxu1  ;;  %v25997_v28 = vsel %vm739_vm3, %v6681_v32, %v6683_v18  ;;  %v26000_v63 = vsel %vm739_vm3, %v6683_v18, %v6685_v62  ;;  %v26003_v50 = vsel %vm1840_vm5, %v7139_v1, %v7141_v44  ;;  %v26006_v23 = vsel %vm1840_vm5, %v7141_v44, %v7143_v6 }
 0x89b   : > { %30058 = vst [vmem:[#allocation22_spill] sm:$0xff] %v25997_v28  ;;  %30059 = vst [vmem:[#allocation21_spill] sm:$0xff] %v26000_v63  ;;  %v26008_v26 = vpop.f32.mrb[71].mxu1  ;;  %17488 = vmatmul.mubr.f32.gmra.mrb[94].mxu1 %v25997_v28  ;;  %v6689_v35 = vrot.slane %v25994_v48, 1  ;;  %v7147_v61 = vrot.slane %v25994_v48, 2 }
 0x89c   : > { %17490 = vmatprep.mubr.f32.mxu1 %v26000_v63  ;;  %v6687_v32 = vrot.slane %v26008_v26, 1  ;;  %19730 = vmatpush3.bf16.msra.mxu1 %v19727_v51  ;;  %v7145_v55 = vrot.slane %v26008_v26, 2 }
 0x89d   : > { %19732 = vmatprep.subr.bf16.mxu1 %v19731_v8 }
 0x89e   : > { %v26016_v1 = vpop.f32.mrb[72].mxu1  ;;  %v26019_v18 = vsel %vm739_vm3, %v6685_v62, %v6687_v32  ;;  %v26022_v44 = vsel %vm739_vm3, %v6687_v32, %v6689_v35  ;;  %v26025_v56 = vsel %vm1840_vm5, %v7143_v6, %v7145_v55  ;;  %v26028_v28 = vsel %vm1840_vm5, %v7145_v55, %v7147_v61 }
 0x89f   : > { %30060 = vst [vmem:[#allocation24_spill] sm:$0xff] %v26019_v18  ;;  %30061 = vst [vmem:[#allocation23_spill] sm:$0xff] %v26022_v44  ;;  %v26030_v63 = vpop.f32.mrb[73].mxu1  ;;  %17491 = vmatmul.mubr.f32.gmra.mrb[96].mxu1 %v26019_v18  ;;  %v6693_v51 = vrot.slane %v26016_v1, 1  ;;  %v7151_v31 = vrot.slane %v26016_v1, 2 }
 0x8a0   : > { %17493 = vmatprep.mubr.f32.mxu1 %v26022_v44  ;;  %v6691_v62 = vrot.slane %v26030_v63, 1  ;;  %v7149_v32 = vrot.slane %v26030_v63, 2 }
 0x8a2   : > { %v26038_v16 = vpop.f32.mrb[74].mxu1  ;;  %v26041_v6 = vsel %vm739_vm3, %v6689_v35, %v6691_v62  ;;  %v26044_v55 = vsel %vm739_vm3, %v6691_v62, %v6693_v51  ;;  %v26047_v18 = vsel %vm1840_vm5, %v7147_v61, %v7149_v32  ;;  %v26050_v30 = vsel %vm1840_vm5, %v7149_v32, %v7151_v31 }
 0x8a3   : > { %30062 = vst [vmem:[#allocation26_spill] sm:$0xff] %v26041_v6  ;;  %30063 = vst [vmem:[#allocation25_spill] sm:$0xff] %v26044_v55  ;;  %v26052_v39 = vpop.f32.mrb[75].mxu1  ;;  %17494 = vmatmul.mubr.f32.gmra.mrb[98].mxu1 %v26041_v6  ;;  %v6697_v44 = vrot.slane %v26038_v16, 1 }
 0x8a4   : > { %17496 = vmatprep.mubr.f32.mxu1 %v26044_v55  ;;  %v6695_v35 = vrot.slane %v26052_v39, 1  ;;  %v29362_v27 = vrot.slane %v26052_v39, 2 }
 0x8a6   : > { %v26059_v62 = vpop.f32.mrb[76].mxu1  ;;  %v26062_v61 = vsel %vm739_vm3, %v6693_v51, %v6695_v35  ;;  %v26065_v32 = vsel %vm739_vm3, %v6695_v35, %v6697_v44  ;;  %v26070_v6 = vsel %vm1840_vm5, %v7151_v31, %v29362_v27  ;;  %v14394_v51 = vld [vmem:[%s28967_s2 + $0x110] sm:$0xff]  ;;  %v14395_v35 = vld [vmem:[%s28967_s2 + $0x118] sm:$0xff] }
 0x8a7   : > { %30064 = vst [vmem:[#allocation29_spill] sm:$0xff] %v26062_v61  ;;  %30065 = vst [vmem:[#allocation27_spill] sm:$0xff] %v26065_v32  ;;  %v26072_v42 = vpop.f32.mrb[77].mxu1  ;;  %17497 = vmatmul.mubr.f32.gmra.mrb[100].mxu1 %v26062_v61  ;;  %v19735_v27 = vpack.c.bf16 %v14395_v35, %v14394_v51  ;;  %v14397_v61 = vld [vmem:[%s28967_s2 + $0x128] sm:$0xff]  ;;  %v14402_v35 = vld [vmem:[%s28967_s2 + $0x150] sm:$0xff] }
 0x8a8   : > { %v29367_v55 = vrot.slane %v26072_v42, 1  ;;  %17499 = vmatprep.mubr.f32.mxu1 %v26065_v32  ;;  %v14396_v32 = vld [vmem:[%s28967_s2 + $0x120] sm:$0xff] }
 0x8aa   : > { %v26086_v31 = vsel %vm739_vm3, %v6697_v44, %v29367_v55  ;;  %v19739_v55 = vpack.c.bf16 %v14397_v61, %v14396_v32  ;;  %v26105_v51 = vpop.f32.mrb[78].mxu1  ;;  %v14401_v61 = vld [vmem:[%s28967_s2 + $0x148] sm:$0xff] }
 0x8ab   : > { %30066 = vst [vmem:[#allocation31_spill] sm:$0xff] %v26086_v31  ;;  %17500 = vmatmul.mubr.f32.gmra.mrb[102].mxu1 %v6697_v44  ;;  %v14399_v44 = vld [vmem:[%s28967_s2 + $0x138] sm:$0xff]  ;;  %v26114_v32 = vpop.f32.mrb[79].mxu1 }
 0x8ac   : > { %17534 = vmatprep.mubr.f32.mxu1 %v25779_v9  ;;  %v14398_v9 = vld [vmem:[%s28967_s2 + $0x130] sm:$0xff] }
 0x8af   : > { %17535 = vmatmul.mubr.f32.vlgmr.msra.gmra.mrb[80].mxu1 %v25775_v46  ;;  %v19743_v46 = vpack.c.bf16 %v14399_v44, %v14398_v9  ;;  %v14403_v9 = vld [vmem:[%s28967_s2 + $0x158] sm:$0xff] }
 0x8b0   : > { %17537 = vmatprep.mubr.f32.mxu1 %v25797_v57  ;;  %19734 = vmatpush3.bf16.msra.mxu1 %v19731_v8  ;;  %v14400_v8 = vld [vmem:[%s28967_s2 + $0x140] sm:$0xff]  ;;  %v19751_v44 = vpack.c.bf16 %v14403_v9, %v14402_v35  ;;  %v14407_v35 = vld [vmem:[%s28967_s2 + $0x178] sm:$0xff] }
 0x8b1   : > { %19736 = vmatprep.subr.bf16.mxu1 %v19735_v27 }
 0x8b3   : > { %17538 = vmatmul.mubr.f32.gmra.mrb[82].mxu1 %v25783_v36 }
 0x8b4   : > { %17540 = vmatprep.mubr.f32.mxu1 %v25819_v45  ;;  %19738 = vmatpush3.bf16.msra.mxu1 %v19735_v27  ;;  %v19747_v27 = vpack.c.bf16 %v14401_v61, %v14400_v8  ;;  %v14405_v8 = vld [vmem:[%s28967_s2 + $0x168] sm:$0xff] }
 0x8b5   : > { %19740 = vmatprep.subr.bf16.mxu1 %v19739_v55 }
 0x8b7   : > { %17541 = vmatmul.mubr.f32.gmra.mrb[84].mxu1 %v25801_v7 }
 0x8b8   : > { %17543 = vmatprep.mubr.f32.mxu1 %v25846_v49  ;;  %19742 = vmatpush3.bf16.msra.mxu1 %v19739_v55  ;;  %v14404_v55 = vld [vmem:[%s28967_s2 + $0x160] sm:$0xff] }
 0x8b9   : > { %19744 = vmatprep.subr.bf16.mxu1 %v19743_v46  ;;  %v19755_v61 = vpack.c.bf16 %v14405_v8, %v14404_v55  ;;  %v14409_v55 = vld [vmem:[%s28967_s2 + $0x188] sm:$0xff] }
 0x8bb   : > { %17544 = vmatmul.mubr.f32.gmra.mrb[86].mxu1 %v25826_v20 }
 0x8bc   : > { %17546 = vmatprep.mubr.f32.mxu1 %v25874_v58  ;;  %19746 = vmatpush3.bf16.msra.mxu1 %v19743_v46  ;;  %v14406_v46 = vld [vmem:[%s28967_s2 + $0x170] sm:$0xff] }
 0x8bd   : > { %19748 = vmatprep.subr.bf16.mxu1 %v19747_v27  ;;  %v19759_v9 = vpack.c.bf16 %v14407_v35, %v14406_v46  ;;  %v14412_v35 = vld [vmem:[%s28967_s2 + $0x1a0] sm:$0xff] }
 0x8bf   : > { %17547 = vmatmul.mubr.f32.gmra.mrb[88].mxu1 %v25854_v5 }
 0x8c0   : > { %17549 = vmatprep.mubr.f32.mxu1 %v25902_v54  ;;  %19750 = vmatpush3.bf16.msra.mxu1 %v19747_v27  ;;  %v14408_v27 = vld [vmem:[%s28967_s2 + $0x180] sm:$0xff] }
 0x8c1   : > { %19752 = vmatprep.subr.bf16.mxu1 %v19751_v44  ;;  %v19763_v8 = vpack.c.bf16 %v14409_v55, %v14408_v27  ;;  %v14415_v55 = vld [vmem:[%s28967_s2 + $0x1b8] sm:$0xff] }
 0x8c3   : > { %17550 = vmatmul.mubr.f32.gmra.mrb[90].mxu1 %v25882_v34 }
 0x8c4   : > { %17552 = vmatprep.mubr.f32.mxu1 %v25930_v14  ;;  %19754 = vmatpush3.bf16.msra.mxu1 %v19751_v44  ;;  %v14410_v44 = vld [vmem:[%s28967_s2 + $0x190] sm:$0xff] }
 0x8c5   : > { %19756 = vmatprep.subr.bf16.mxu1 %v19755_v61 }
 0x8c7   : > { %17553 = vmatmul.mubr.f32.gmra.mrb[92].mxu1 %v25910_v19 }
 0x8c8   : > { %17555 = vmatprep.mubr.f32.mxu1 %v25958_v37  ;;  %19758 = vmatpush3.bf16.msra.mxu1 %v19755_v61  ;;  %v14411_v61 = vld [vmem:[%s28967_s2 + $0x198] sm:$0xff] }
 0x8c9   : > { %19760 = vmatprep.subr.bf16.mxu1 %v19759_v9  ;;  %v19767_v46 = vpack.c.bf16 %v14411_v61, %v14410_v44  ;;  %v14417_v44 = vld [vmem:[%s28967_s2 + $0x1c8] sm:$0xff] }
 0x8cb   : > { %17556 = vmatmul.mubr.f32.gmra.mrb[94].mxu1 %v25938_v24 }
 0x8cc   : > { %17558 = vmatprep.mubr.f32.mxu1 %v25986_v0  ;;  %19762 = vmatpush3.bf16.msra.mxu1 %v19759_v9  ;;  %v14413_v9 = vld [vmem:[%s28967_s2 + $0x1a8] sm:$0xff] }
 0x8cd   : > { %19764 = vmatprep.subr.bf16.mxu1 %v19763_v8  ;;  %v19771_v27 = vpack.c.bf16 %v14413_v9, %v14412_v35  ;;  %v14419_v35 = vld [vmem:[%s28967_s2 + $0x1d8] sm:$0xff] }
 0x8cf   : > { %17559 = vmatmul.mubr.f32.gmra.mrb[96].mxu1 %v25966_v38 }
 0x8d0   : > { %17561 = vmatprep.mubr.f32.mxu1 %v26008_v26 }
 0x8d3   : > { %17562 = vmatmul.mubr.f32.gmra.mrb[98].mxu1 %v25994_v48 }
 0x8d4   : > { %17564 = vmatprep.mubr.f32.mxu1 %v26030_v63 }
 0x8d7   : > { %17565 = vmatmul.mubr.f32.gmra.mrb[100].mxu1 %v26016_v1 }
 0x8d8   : > { %17567 = vmatprep.mubr.f32.mxu1 %v26052_v39 }
 0x8db   : > { %17568 = vmatmul.mubr.f32.gmra.mrb[102].mxu1 %v26038_v16 }
 0x8dc   : > { %17602 = vmatprep.mubr.f32.mxu1 %v25793_v59  ;;  %v14414_v59 = vld [vmem:[%s28967_s2 + $0x1b0] sm:$0xff] }
 0x8df   : > { %17603 = vmatmul.mubr.f32.vlgmr.msra.gmra.mrb[80].mxu1 %v25814_v10  ;;  %v19775_v10 = vpack.c.bf16 %v14415_v55, %v14414_v59  ;;  %v14421_v59 = vld [vmem:[%s28967_s2 + $0x1e8] sm:$0xff] }
 0x8e0   : > { %17605 = vmatprep.mubr.f32.mxu1 %v25817_v22  ;;  %19766 = vmatpush3.bf16.msra.mxu1 %v19763_v8  ;;  %v14416_v8 = vld [vmem:[%s28967_s2 + $0x1c0] sm:$0xff] }
 0x8e1   : > { %19768 = vmatprep.subr.bf16.mxu1 %v19767_v46  ;;  %v19779_v61 = vpack.c.bf16 %v14417_v44, %v14416_v8  ;;  %v14423_v8 = vld [vmem:[%s28967_s2 + $0x1f8] sm:$0xff]  ;;  %v29372_v44 = vrot.slane %v26105_v51, 1 }
 0x8e3   : > { %17606 = vmatmul.mubr.f32.gmra.mrb[82].mxu1 %v25841_v43 }
 0x8e4   : > { %17608 = vmatprep.mubr.f32.mxu1 %v25844_v33  ;;  %19770 = vmatpush3.bf16.msra.mxu1 %v19767_v46  ;;  %v14418_v46 = vld [vmem:[%s28967_s2 + $0x1d0] sm:$0xff] }
 0x8e5   : > { %19772 = vmatprep.subr.bf16.mxu1 %v19771_v27  ;;  %v19783_v9 = vpack.c.bf16 %v14419_v35, %v14418_v46  ;;  %v29370_v46 = vrot.slane %v26105_v51, 2  ;;  %v29373_v35 = vrot.slane %v26114_v32, 1 }
 0x8e7   : > { %17609 = vmatmul.mubr.f32.gmra.mrb[84].mxu1 %v25869_v41 }
 0x8e8   : > { %17611 = vmatprep.mubr.f32.mxu1 %v25872_v47  ;;  %19774 = vmatpush3.bf16.msra.mxu1 %v19771_v27  ;;  %v14420_v27 = vld [vmem:[%s28967_s2 + $0x1e0] sm:$0xff] }
 0x8e9   : > { %19776 = vmatprep.subr.bf16.mxu1 %v19775_v10  ;;  %v19787_v55 = vpack.c.bf16 %v14421_v59, %v14420_v27  ;;  %v29371_v27 = vrot.slane %v26114_v32, 2  ;;  %v14424_v59 = vld [vmem:[%s28967_s2 + $0x200] sm:$0xff] }
 0x8eb   : > { %17612 = vmatmul.mubr.f32.gmra.mrb[86].mxu1 %v25897_v2 }
 0x8ec   : > { %17614 = vmatprep.mubr.f32.mxu1 %v25900_v15  ;;  %19778 = vmatpush3.bf16.msra.mxu1 %v19775_v10  ;;  %v14422_v10 = vld [vmem:[%s28967_s2 + $0x1f0] sm:$0xff] }
 0x8ed   : > { %19780 = vmatprep.subr.bf16.mxu1 %v19779_v61 }
 0x8ef   : > { %17615 = vmatmul.mubr.f32.gmra.mrb[88].mxu1 %v25925_v53 }
 0x8f0   : > { %17617 = vmatprep.mubr.f32.mxu1 %v25928_v17  ;;  %19782 = vmatpush3.bf16.msra.mxu1 %v19779_v61  ;;  %v19791_v61 = vpack.c.bf16 %v14423_v8, %v14422_v10  ;;  %v26236_v10 = vsel %vm1840_vm5, %v29371_v27, %v29370_v46  ;;  %v26245_v46 = vrot.slane %v26038_v16, 2 }
 0x8f1   : > { %19784 = vmatprep.subr.bf16.mxu1 %v19783_v9  ;;  %30068 = vst [vmem:[#allocation33_spill] sm:$0xff] %v26236_v10 }
 0x8f3   : > { %17618 = vmatmul.mubr.f32.gmra.mrb[90].mxu1 %v25953_v21  ;;  %v14425_v21 = vld [vmem:[%s28967_s2 + $0x208] sm:$0xff] }
 0x8f4   : > { %17620 = vmatprep.mubr.f32.mxu1 %v25956_v40  ;;  %19786 = vmatpush3.bf16.msra.mxu1 %v19783_v9  ;;  %v26229_v9 = vsel %vm739_vm3, %v29373_v35, %v29372_v44  ;;  %v19795_v8 = vpack.c.bf16 %v14425_v21, %v14424_v59  ;;  %v30069_v21 = vrot.slane %v26052_v39, 2  ;;  %v14427_v59 = vld [vmem:[%s28967_s2 + $0x218] sm:$0xff]  ;;  %v14429_v44 = vld [vmem:[%s28967_s2 + $0x228] sm:$0xff] }
 0x8f5   : > { %19788 = vmatprep.subr.bf16.mxu1 %v19787_v55  ;;  %30067 = vst [vmem:[#allocation30_spill] sm:$0xff] %v26229_v9  ;;  %v30075_v9 = vld [vmem:[#allocation20_spill] sm:$0xff] }
 0x8f7   : > { %17621 = vmatmul.mubr.f32.gmra.mrb[92].mxu1 %v25981_v52 }
 0x8f8   : > { %17623 = vmatprep.mubr.f32.mxu1 %v25984_v4  ;;  %19790 = vmatpush3.bf16.msra.mxu1 %v19787_v55  ;;  %v26253_v55 = vsel %vm1840_vm5, %v30069_v21, %v26245_v46  ;;  %v14428_v21 = vld [vmem:[%s28967_s2 + $0x220] sm:$0xff] }
 0x8f9   : > { %19792 = vmatprep.subr.bf16.mxu1 %v19791_v61  ;;  %v19803_v35 = vpack.c.bf16 %v14429_v44, %v14428_v21  ;;  %v14433_v44 = vld [vmem:[%s28967_s2 + $0x248] sm:$0xff]  ;;  %v14435_v21 = vld [vmem:[%s28967_s2 + $0x258] sm:$0xff] }
 0x8fb   : > { %17624 = vmatmul.mubr.f32.gmra.mrb[94].mxu1 %v26003_v50 }
 0x8fc   : > { %17626 = vmatprep.mubr.f32.mxu1 %v26006_v23  ;;  %19794 = vmatpush3.bf16.msra.mxu1 %v19791_v61  ;;  %v14426_v61 = vld [vmem:[%s28967_s2 + $0x210] sm:$0xff] }
 0x8fd   : > { %19796 = vmatprep.subr.bf16.mxu1 %v19795_v8  ;;  %v19799_v27 = vpack.c.bf16 %v14427_v59, %v14426_v61  ;;  %v14431_v61 = vld [vmem:[%s28967_s2 + $0x238] sm:$0xff] }
 0x8ff   : > { %17627 = vmatmul.mubr.f32.gmra.mrb[96].mxu1 %v26025_v56 }
 0x900   : > { %17629 = vmatprep.mubr.f32.mxu1 %v26028_v28 }
 0x903   : > { %17630 = vmatmul.mubr.f32.gmra.mrb[98].mxu1 %v26047_v18 }
 0x904   : > { %17632 = vmatprep.mubr.f32.mxu1 %v26050_v30 }
 0x907   : > { %17633 = vmatmul.mubr.f32.gmra.mrb[100].mxu1 %v26070_v6 }
 0x908   : > { %17635 = vmatprep.mubr.f32.mxu1 %v26253_v55 }
 0x90b   : > { %17636 = vmatmul.mubr.f32.gmra.mrb[102].mxu1 %v26245_v46 }
 0x90c   : > { %17670 = vmatprep.mubr.f32.mxu1 %v25797_v57  ;;  %v14430_v57 = vld [vmem:[%s28967_s2 + $0x230] sm:$0xff] }
 0x90f   : > { %17671 = vmatmul.mubr.f32.vlgmr.msra.gmra.mrb[80].mxu1 %v25783_v36  ;;  %v19807_v36 = vpack.c.bf16 %v14431_v61, %v14430_v57  ;;  %v14437_v61 = vld [vmem:[%s28967_s2 + $0x268] sm:$0xff] }
 0x910   : > { %17673 = vmatprep.mubr.f32.mxu1 %v25819_v45  ;;  %19798 = vmatpush3.bf16.msra.mxu1 %v19795_v8  ;;  %v14432_v8 = vld [vmem:[%s28967_s2 + $0x240] sm:$0xff] }
 0x911   : > { %19800 = vmatprep.subr.bf16.mxu1 %v19799_v27  ;;  %v19811_v59 = vpack.c.bf16 %v14433_v44, %v14432_v8  ;;  %v14439_v44 = vld [vmem:[%s28967_s2 + $0x278] sm:$0xff] }
 0x913   : > { %17674 = vmatmul.mubr.f32.gmra.mrb[82].mxu1 %v25801_v7 }
 0x914   : > { %17676 = vmatprep.mubr.f32.mxu1 %v25846_v49  ;;  %19802 = vmatpush3.bf16.msra.mxu1 %v19799_v27  ;;  %v14434_v27 = vld [vmem:[%s28967_s2 + $0x250] sm:$0xff] }
 0x915   : > { %19804 = vmatprep.subr.bf16.mxu1 %v19803_v35  ;;  %v19815_v57 = vpack.c.bf16 %v14435_v21, %v14434_v27  ;;  %v14441_v21 = vld [vmem:[%s28967_s2 + $0x288] sm:$0xff] }
 0x917   : > { %17677 = vmatmul.mubr.f32.gmra.mrb[84].mxu1 %v25826_v20 }
 0x918   : > { %17679 = vmatprep.mubr.f32.mxu1 %v25874_v58  ;;  %19806 = vmatpush3.bf16.msra.mxu1 %v19803_v35  ;;  %v14436_v35 = vld [vmem:[%s28967_s2 + $0x260] sm:$0xff] }
 0x919   : > { %19808 = vmatprep.subr.bf16.mxu1 %v19807_v36  ;;  %v19819_v8 = vpack.c.bf16 %v14437_v61, %v14436_v35  ;;  %v14443_v61 = vld [vmem:[%s28967_s2 + $0x298] sm:$0xff] }
 0x91b   : > { %17680 = vmatmul.mubr.f32.gmra.mrb[86].mxu1 %v25854_v5 }
 0x91c   : > { %17682 = vmatprep.mubr.f32.mxu1 %v25902_v54  ;;  %19810 = vmatpush3.bf16.msra.mxu1 %v19807_v36  ;;  %v14438_v36 = vld [vmem:[%s28967_s2 + $0x270] sm:$0xff] }
 0x91d   : > { %19812 = vmatprep.subr.bf16.mxu1 %v19811_v59  ;;  %v19823_v27 = vpack.c.bf16 %v14439_v44, %v14438_v36  ;;  %v14444_v36 = vld [vmem:[%s28967_s2 + $0x2a0] sm:$0xff]  ;;  %v14445_v44 = vld [vmem:[%s28967_s2 + $0x2a8] sm:$0xff] }
 0x91f   : > { %17683 = vmatmul.mubr.f32.gmra.mrb[88].mxu1 %v25882_v34 }
 0x920   : > { %17685 = vmatprep.mubr.f32.mxu1 %v25930_v14  ;;  %19814 = vmatpush3.bf16.msra.mxu1 %v19811_v59  ;;  %v14440_v59 = vld [vmem:[%s28967_s2 + $0x280] sm:$0xff] }
 0x921   : > { %19816 = vmatprep.subr.bf16.mxu1 %v19815_v57  ;;  %v19827_v35 = vpack.c.bf16 %v14441_v21, %v14440_v59  ;;  %v14447_v59 = vld [vmem:[%s28967_s2 + $0x2b8] sm:$0xff]  ;;  %v14448_v21 = vld [vmem:[%s28967_s2 + $0x2c0] sm:$0xff] }
 0x923   : > { %17686 = vmatmul.mubr.f32.gmra.mrb[90].mxu1 %v25910_v19 }
 0x924   : > { %17688 = vmatprep.mubr.f32.mxu1 %v25958_v37  ;;  %19818 = vmatpush3.bf16.msra.mxu1 %v19815_v57  ;;  %v14442_v57 = vld [vmem:[%s28967_s2 + $0x290] sm:$0xff] }
 0x925   : > { %19820 = vmatprep.subr.bf16.mxu1 %v19819_v8 }
 0x927   : > { %17689 = vmatmul.mubr.f32.gmra.mrb[92].mxu1 %v25938_v24 }
 0x928   : > { %17691 = vmatprep.mubr.f32.mxu1 %v25986_v0  ;;  %19822 = vmatpush3.bf16.msra.mxu1 %v19819_v8  ;;  %v19831_v8 = vpack.c.bf16 %v14443_v61, %v14442_v57  ;;  %v14450_v61 = vld [vmem:[%s28967_s2 + $0x2d0] sm:$0xff] }
 0x929   : > { %19824 = vmatprep.subr.bf16.mxu1 %v19823_v27 }
 0x92b   : > { %17692 = vmatmul.mubr.f32.gmra.mrb[94].mxu1 %v25966_v38 }
 0x92c   : > { %17694 = vmatprep.mubr.f32.mxu1 %v26008_v26  ;;  %19826 = vmatpush3.bf16.msra.mxu1 %v19823_v27  ;;  %v19835_v27 = vpack.c.bf16 %v14445_v44, %v14444_v36  ;;  %v30070_v36 = vld [vmem:[#allocation131_spill] sm:$0xff]  ;;  %v30071_v44 = vld [vmem:[#allocation76_spill] sm:$0xff] }
 0x92d   : > { %19828 = vmatprep.subr.bf16.mxu1 %v19827_v35 }
 0x92f   : > { %17695 = vmatmul.mubr.f32.gmra.mrb[96].mxu1 %v25994_v48 }
 0x930   : > { %17697 = vmatprep.mubr.f32.mxu1 %v26030_v63 }
 0x933   : > { %17698 = vmatmul.mubr.f32.gmra.mrb[98].mxu1 %v26016_v1 }
 0x934   : > { %17700 = vmatprep.mubr.f32.mxu1 %v26052_v39 }
 0x937   : > { %17701 = vmatmul.mubr.f32.gmra.mrb[100].mxu1 %v26038_v16 }
 0x938   : > { %17703 = vmatprep.mubr.f32.mxu1 %v26072_v42 }
 0x93b   : > { %17704 = vmatmul.mubr.f32.gmra.mrb[102].mxu1 %v26059_v62 }
 0x93c   : > { %17738 = vmatprep.mubr.f32.mxu1 %v25805_v25  ;;  %v14446_v25 = vld [vmem:[%s28967_s2 + $0x2b0] sm:$0xff] }
 0x93f   : > { %17739 = vmatmul.mubr.f32.vlgmr.msra.gmra.mrb[80].mxu1 %v25829_v60  ;;  %v19839_v60 = vpack.c.bf16 %v14447_v59, %v14446_v25  ;;  %v14453_v59 = vld [vmem:[%s28967_s2 + $0x2e8] sm:$0xff] }
 0x940   : > { %17741 = vmatprep.mubr.f32.mxu1 %v25832_v13  ;;  %19830 = vmatpush3.bf16.msra.mxu1 %v19827_v35  ;;  %v14449_v35 = vld [vmem:[%s28967_s2 + $0x2c8] sm:$0xff] }
 0x941   : > { %19832 = vmatprep.subr.bf16.mxu1 %v19831_v8  ;;  %v19843_v57 = vpack.c.bf16 %v14449_v35, %v14448_v21  ;;  %v30072_v21 = vld [vmem:[#allocation132_spill] sm:$0xff]  ;;  %v30073_v35 = vld [vmem:[#allocation18_spill] sm:$0xff] }
 0x943   : > { %17742 = vmatmul.mubr.f32.gmra.mrb[82].mxu1 %v25857_v12 }
 0x944   : > { %17744 = vmatprep.mubr.f32.mxu1 %v25860_v11  ;;  %19834 = vmatpush3.bf16.msra.mxu1 %v19831_v8  ;;  %v14451_v8 = vld [vmem:[%s28967_s2 + $0x2d8] sm:$0xff] }
 0x945   : > { %19836 = vmatprep.subr.bf16.mxu1 %v19835_v27  ;;  %v19847_v25 = vpack.c.bf16 %v14451_v8, %v14450_v61  ;;  %v14455_v61 = vld [vmem:[%s28967_s2 + $0x2f8] sm:$0xff] }
 0x946   : > { %v30074_v8 = vld [vmem:[#allocation72_spill] sm:$0xff] }
 0x947   : > { %17745 = vmatmul.mubr.f32.gmra.mrb[84].mxu1 %v25885_v3 }
 0x948   : > { %17747 = vmatprep.mubr.f32.mxu1 %v25888_v29  ;;  %19838 = vmatpush3.bf16.msra.mxu1 %v19835_v27  ;;  %v14452_v27 = vld [vmem:[%s28967_s2 + $0x2e0] sm:$0xff] }
 0x949   : > { %19840 = vmatprep.subr.bf16.mxu1 %v19839_v60  ;;  %v19851_v10 = vpack.c.bf16 %v14453_v59, %v14452_v27  ;;  %v14457_v27 = vld [vmem:[%s28967_s2 + $0x308] sm:$0xff] }
 0x94a   : > { %v30076_v59 = vld [vmem:[#allocation22_spill] sm:$0xff] }
 0x94b   : > { %17748 = vmatmul.mubr.f32.gmra.mrb[86].mxu1 %v30070_v36  ;;  %v30082_v36 = vld [vmem:[#allocation29_spill] sm:$0xff] }
 0x94c   : > { %17750 = vmatprep.mubr.f32.mxu1 %v30071_v44  ;;  %19842 = vmatpush3.bf16.msra.mxu1 %v19839_v60  ;;  %v14454_v60 = vld [vmem:[%s28967_s2 + $0x2f0] sm:$0xff]  ;;  %v30078_v44 = vld [vmem:[#allocation24_spill] sm:$0xff] }
 0x94d   : > { %19844 = vmatprep.subr.bf16.mxu1 %v19843_v57 }
 0x94f   : > { %17751 = vmatmul.mubr.f32.gmra.mrb[88].mxu1 %v30072_v21  ;;  %v19855_v21 = vpack.c.bf16 %v14455_v61, %v14454_v60  ;;  %v30080_v60 = vld [vmem:[#allocation26_spill] sm:$0xff]  ;;  %v30081_v61 = vld [vmem:[#allocation25_spill] sm:$0xff] }
 0x950   : > { %17753 = vmatprep.mubr.f32.mxu1 %v30073_v35  ;;  %19846 = vmatpush3.bf16.msra.mxu1 %v19843_v57  ;;  %v14456_v57 = vld [vmem:[%s28967_s2 + $0x300] sm:$0xff] }
 0x951   : > { %19848 = vmatprep.subr.bf16.mxu1 %v19847_v25  ;;  %v30077_v35 = vld [vmem:[#allocation21_spill] sm:$0xff] }
 0x953   : > { %17754 = vmatmul.mubr.f32.gmra.mrb[90].mxu1 %v30074_v8  ;;  %v19859_v8 = vpack.c.bf16 %v14457_v27, %v14456_v57  ;;  %v14459_v27 = vld [vmem:[%s28967_s2 + $0x318] sm:$0xff] }
 0x954   : > { %17756 = vmatprep.mubr.f32.mxu1 %v30075_v9  ;;  %19850 = vmatpush3.bf16.msra.mxu1 %v19847_v25  ;;  %v30079_v25 = vld [vmem:[#allocation23_spill] sm:$0xff]  ;;  %v26397_v9 = vrot.slane %v26059_v62, 1 }
 0x955   : > { %19852 = vmatprep.subr.bf16.mxu1 %v19851_v10 }
 0x957   : > { %17757 = vmatmul.mubr.f32.gmra.mrb[92].mxu1 %v30076_v59  ;;  %v30083_v59 = vld [vmem:[#allocation27_spill] sm:$0xff] }
 0x958   : > { %17759 = vmatprep.mubr.f32.mxu1 %v30077_v35  ;;  %19854 = vmatpush3.bf16.msra.mxu1 %v19851_v10  ;;  %v30084_v10 = vrot.slane %v26072_v42, 1 }
 0x959   : > { %19856 = vmatprep.subr.bf16.mxu1 %v19855_v21 }
 0x95a   : > { %v26406_v57 = vsel %vm739_vm3, %v30084_v10, %v26397_v9  ;;  %v14460_v10 = vld [vmem:[%s28967_s2 + $0x320] sm:$0xff] }
 0x95b   : > { %17760 = vmatmul.mubr.f32.gmra.mrb[94].mxu1 %v30078_v44  ;;  %30085 = vst [vmem:[#allocation32_spill] sm:$0xff] %v26406_v57 }
 0x95c   : > { %17762 = vmatprep.mubr.f32.mxu1 %v30079_v25  ;;  %19858 = vmatpush3.bf16.msra.mxu1 %v19855_v21  ;;  %v14458_v21 = vld [vmem:[%s28967_s2 + $0x310] sm:$0xff] }
 0x95d   : > { %19860 = vmatprep.subr.bf16.mxu1 %v19859_v8 }
 0x95f   : > { %17763 = vmatmul.mubr.f32.gmra.mrb[96].mxu1 %v30080_v60 }
 0x960   : > { %17765 = vmatprep.mubr.f32.mxu1 %v30081_v61 }
 0x963   : > { %17766 = vmatmul.mubr.f32.gmra.mrb[98].mxu1 %v30082_v36 }
 0x964   : > { %17768 = vmatprep.mubr.f32.mxu1 %v30083_v59 }
 0x967   : > { %17769 = vmatmul.mubr.f32.gmra.mrb[100].mxu1 %v26086_v31  ;;  %v19863_v31 = vpack.c.bf16 %v14459_v27, %v14458_v21  ;;  %v14463_v21 = vld [vmem:[%s28967_s2 + $0x338] sm:$0xff] }
 0x968   : > { %17771 = vmatprep.mubr.f32.mxu1 %v26406_v57  ;;  %v14461_v57 = vld [vmem:[%s28967_s2 + $0x328] sm:$0xff] }
 0x969   : > { %v19867_v59 = vpack.c.bf16 %v14461_v57, %v14460_v10  ;;  %v14465_v57 = vld [vmem:[%s28967_s2 + $0x348] sm:$0xff]  ;;  %v14467_v10 = vld [vmem:[%s28967_s2 + $0x358] sm:$0xff] }
 0x96b   : > { %17772 = vmatmul.mubr.f32.gmra.mrb[102].mxu1 %v26397_v9 }
 0x96c   : > { %17806 = vmatprep.mubr.f32.mxu1 %v25817_v22  ;;  %v14462_v22 = vld [vmem:[%s28967_s2 + $0x330] sm:$0xff] }
 0x96f   : > { %17807 = vmatmul.mubr.f32.vlgmr.msra.gmra.mrb[80].mxu1 %v25841_v43  ;;  %v19871_v43 = vpack.c.bf16 %v14463_v21, %v14462_v22  ;;  %v14469_v21 = vld [vmem:[%s28967_s2 + $0x368] sm:$0xff] }
 0x970   : > { %17809 = vmatprep.mubr.f32.mxu1 %v25844_v33  ;;  %19862 = vmatpush3.bf16.msra.mxu1 %v19859_v8  ;;  %v14464_v8 = vld [vmem:[%s28967_s2 + $0x340] sm:$0xff] }
 0x971   : > { %19864 = vmatprep.subr.bf16.mxu1 %v19863_v31  ;;  %v19875_v27 = vpack.c.bf16 %v14465_v57, %v14464_v8  ;;  %v30086_v8 = vld [vmem:[#allocation19_spill] sm:$0xff] }
 0x973   : > { %17810 = vmatmul.mubr.f32.gmra.mrb[82].mxu1 %v25869_v41 }
 0x974   : > { %17812 = vmatprep.mubr.f32.mxu1 %v25872_v47  ;;  %19866 = vmatpush3.bf16.msra.mxu1 %v19863_v31  ;;  %v14466_v31 = vld [vmem:[%s28967_s2 + $0x350] sm:$0xff] }
 0x975   : > { %19868 = vmatprep.subr.bf16.mxu1 %v19867_v59  ;;  %v19879_v22 = vpack.c.bf16 %v14467_v10, %v14466_v31  ;;  %v14471_v31 = vld [vmem:[%s28967_s2 + $0x378] sm:$0xff] }
 0x977   : > { %17813 = vmatmul.mubr.f32.gmra.mrb[84].mxu1 %v25897_v2 }
 0x978   : > { %17815 = vmatprep.mubr.f32.mxu1 %v25900_v15  ;;  %19870 = vmatpush3.bf16.msra.mxu1 %v19867_v59  ;;  %v14468_v59 = vld [vmem:[%s28967_s2 + $0x360] sm:$0xff] }
 0x979   : > { %19872 = vmatprep.subr.bf16.mxu1 %v19871_v43  ;;  %v19883_v57 = vpack.c.bf16 %v14469_v21, %v14468_v59  ;;  %v14473_v59 = vld [vmem:[%s28967_s2 + $0x388] sm:$0xff] }
 0x97b   : > { %17816 = vmatmul.mubr.f32.gmra.mrb[86].mxu1 %v25925_v53 }
 0x97c   : > { %17818 = vmatprep.mubr.f32.mxu1 %v25928_v17  ;;  %19874 = vmatpush3.bf16.msra.mxu1 %v19871_v43  ;;  %v14470_v43 = vld [vmem:[%s28967_s2 + $0x370] sm:$0xff] }
 0x97d   : > { %19876 = vmatprep.subr.bf16.mxu1 %v19875_v27  ;;  %v19887_v10 = vpack.c.bf16 %v14471_v31, %v14470_v43  ;;  %v26479_v43 = vrot.slane %v26059_v62, 2 }
 0x97f   : > { %17819 = vmatmul.mubr.f32.gmra.mrb[88].mxu1 %v30086_v8 }
 0x980   : > { %17821 = vmatprep.mubr.f32.mxu1 %v25956_v40  ;;  %19878 = vmatpush3.bf16.msra.mxu1 %v19875_v27  ;;  %v14472_v27 = vld [vmem:[%s28967_s2 + $0x380] sm:$0xff] }
 0x981   : > { %19880 = vmatprep.subr.bf16.mxu1 %v19879_v22  ;;  %v19891_v21 = vpack.c.bf16 %v14473_v59, %v14472_v27  ;;  %v14475_v27 = vld [vmem:[%s28967_s2 + $0x398] sm:$0xff]  ;;  %v14476_v59 = vld [vmem:[%s28967_s2 + $0x3a0] sm:$0xff] }
 0x983   : > { %17822 = vmatmul.mubr.f32.gmra.mrb[90].mxu1 %v25981_v52 }
 0x984   : > { %17824 = vmatprep.mubr.f32.mxu1 %v25984_v4  ;;  %19882 = vmatpush3.bf16.msra.mxu1 %v19879_v22  ;;  %v7868_v22 = vrot.slane %v26072_v42, 2 }
 0x985   : > { %19884 = vmatprep.subr.bf16.mxu1 %v19883_v57 }
 0x986   : > { %v26490_v31 = vsel %vm1840_vm5, %v7868_v22, %v26479_v43 }
 0x987   : > { %17825 = vmatmul.mubr.f32.gmra.mrb[92].mxu1 %v26003_v50  ;;  %30087 = vst [vmem:[#allocation35_spill] sm:$0xff] %v26490_v31 }
 0x988   : > { %17827 = vmatprep.mubr.f32.mxu1 %v26006_v23  ;;  %19886 = vmatpush3.bf16.msra.mxu1 %v19883_v57  ;;  %v26485_v57 = vsel %vm1840_vm5, %v26245_v46, %v7868_v22  ;;  %v14477_v22 = vld [vmem:[%s28967_s2 + $0x3a8] sm:$0xff] }
 0x989   : > { %19888 = vmatprep.subr.bf16.mxu1 %v19887_v10 }
 0x98b   : > { %17828 = vmatmul.mubr.f32.gmra.mrb[94].mxu1 %v26025_v56 }
 0x98c   : > { %17830 = vmatprep.mubr.f32.mxu1 %v26028_v28  ;;  %19890 = vmatpush3.bf16.msra.mxu1 %v19887_v10  ;;  %v14474_v10 = vld [vmem:[%s28967_s2 + $0x390] sm:$0xff] }
 0x98d   : > { %19892 = vmatprep.subr.bf16.mxu1 %v19891_v21  ;;  %v19895_v46 = vpack.c.bf16 %v14475_v27, %v14474_v10  ;;  %v14479_v10 = vld [vmem:[%s28967_s2 + $0x3b8] sm:$0xff] }
 0x98e   : > { %v14483_v27 = vld [vmem:[%s28967_s2 + $0x3d8] sm:$0xff] }
 0x98f   : > { %17831 = vmatmul.mubr.f32.gmra.mrb[96].mxu1 %v26047_v18 }
 0x990   : > { %17833 = vmatprep.mubr.f32.mxu1 %v26050_v30 }
 0x993   : > { %17834 = vmatmul.mubr.f32.gmra.mrb[98].mxu1 %v26070_v6 }
 0x994   : > { %17836 = vmatprep.mubr.f32.mxu1 %v26253_v55 }
 0x997   : > { %17837 = vmatmul.mubr.f32.gmra.mrb[100].mxu1 %v26485_v57 }
 0x998   : > { %17839 = vmatprep.mubr.f32.mxu1 %v26490_v31  ;;  %v19899_v31 = vpack.c.bf16 %v14477_v22, %v14476_v59  ;;  %v14489_v59 = vld [vmem:[%s28967_s2 + $0x408] sm:$0xff]  ;;  %v14499_v22 = vld [vmem:[%s28967_s2 + $0x458] sm:$0xff] }
 0x99b   : > { %17840 = vmatmul.mubr.f32.gmra.mrb[102].mxu1 %v26479_v43 }
 0x99c   : > { %17874 = vmatprep.mubr.f32.mxu1 %v25819_v45  ;;  %v14478_v45 = vld [vmem:[%s28967_s2 + $0x3b0] sm:$0xff] }
 0x99f   : > { %17875 = vmatmul.mubr.f32.vlgmr.msra.gmra.mrb[80].mxu1 %v25801_v7  ;;  %v19903_v7 = vpack.c.bf16 %v14479_v10, %v14478_v45  ;;  %v30090_v45 = vld [vmem:[#allocation132_spill] sm:$0xff]  ;;  %v30091_v10 = vld [vmem:[#allocation18_spill] sm:$0xff] }
 0x9a0   : > { %17877 = vmatprep.mubr.f32.mxu1 %v25846_v49  ;;  %19894 = vmatpush3.bf16.msra.mxu1 %v19891_v21  ;;  %v14480_v49 = vld [vmem:[%s28967_s2 + $0x3c0] sm:$0xff]  ;;  %v14481_v21 = vld [vmem:[%s28967_s2 + $0x3c8] sm:$0xff] }
 0x9a1   : > { %19896 = vmatprep.subr.bf16.mxu1 %v19895_v46 }
 0x9a3   : > { %17878 = vmatmul.mubr.f32.gmra.mrb[82].mxu1 %v25826_v20  ;;  %v19907_v20 = vpack.c.bf16 %v14481_v21, %v14480_v49  ;;  %v14500_v49 = vld [vmem:[%s28967_s2 + $0x460] sm:$0xff]  ;;  %v14501_v21 = vld [vmem:[%s28967_s2 + $0x468] sm:$0xff] }
 0x9a4   : > { %17880 = vmatprep.mubr.f32.mxu1 %v25874_v58  ;;  %19898 = vmatpush3.bf16.msra.mxu1 %v19895_v46  ;;  %v14482_v58 = vld [vmem:[%s28967_s2 + $0x3d0] sm:$0xff]  ;;  %v14487_v46 = vld [vmem:[%s28967_s2 + $0x3f8] sm:$0xff] }
 0x9a5   : > { %19900 = vmatprep.subr.bf16.mxu1 %v19899_v31 }
 0x9a7   : > { %17881 = vmatmul.mubr.f32.gmra.mrb[84].mxu1 %v25854_v5  ;;  %v19911_v5 = vpack.c.bf16 %v14483_v27, %v14482_v58  ;;  %v30093_v58 = vld [vmem:[#allocation20_spill] sm:$0xff]  ;;  %v19947_v27 = vpack.c.bf16 %v14501_v21, %v14500_v49 }
 0x9a8   : > { %17883 = vmatprep.mubr.f32.mxu1 %v25902_v54  ;;  %19902 = vmatpush3.bf16.msra.mxu1 %v19899_v31  ;;  %v14484_v54 = vld [vmem:[%s28967_s2 + $0x3e0] sm:$0xff]  ;;  %v14485_v31 = vld [vmem:[%s28967_s2 + $0x3e8] sm:$0xff] }
 0x9a9   : > { %19904 = vmatprep.subr.bf16.mxu1 %v19903_v7 }
 0x9ab   : > { %17884 = vmatmul.mubr.f32.gmra.mrb[86].mxu1 %v25882_v34  ;;  %v19915_v34 = vpack.c.bf16 %v14485_v31, %v14484_v54  ;;  %v14503_v54 = vld [vmem:[%s28967_s2 + $0x478] sm:$0xff]  ;;  %v30094_v31 = vld [vmem:[#allocation22_spill] sm:$0xff] }
 0x9ac   : > { %17886 = vmatprep.mubr.f32.mxu1 %v25930_v14  ;;  %19906 = vmatpush3.bf16.msra.mxu1 %v19903_v7  ;;  %v14486_v14 = vld [vmem:[%s28967_s2 + $0x3f0] sm:$0xff] }
 0x9ad   : > { %19908 = vmatprep.subr.bf16.mxu1 %v19907_v20 }
 0x9af   : > { %17887 = vmatmul.mubr.f32.gmra.mrb[88].mxu1 %v25910_v19  ;;  %v19919_v19 = vpack.c.bf16 %v14487_v46, %v14486_v14  ;;  %v30095_v14 = vmov 0.0|0.0   ;;  %v30096_v46 = vld [vmem:[#allocation27_spill] sm:$0xff] }
 0x9b0   : > { %17889 = vmatprep.mubr.f32.mxu1 %v25958_v37  ;;  %19910 = vmatpush3.bf16.msra.mxu1 %v19907_v20  ;;  %v14488_v37 = vld [vmem:[%s28967_s2 + $0x400] sm:$0xff]  ;;  %v30092_v20 = vld [vmem:[#allocation72_spill] sm:$0xff] }
 0x9b1   : > { %19912 = vmatprep.subr.bf16.mxu1 %v19911_v5 }
 0x9b3   : > { %17890 = vmatmul.mubr.f32.gmra.mrb[90].mxu1 %v25938_v24  ;;  %v19923_v24 = vpack.c.bf16 %v14489_v59, %v14488_v37 }
 0x9b4   : > { %17892 = vmatprep.mubr.f32.mxu1 %v25986_v0  ;;  %19914 = vmatpush3.bf16.msra.mxu1 %v19911_v5  ;;  %v14502_v5 = vld [vmem:[%s28967_s2 + $0x470] sm:$0xff] }
 0x9b5   : > { %19916 = vmatprep.subr.bf16.mxu1 %v19915_v34 }
 0x9b7   : > { %17893 = vmatmul.mubr.f32.gmra.mrb[92].mxu1 %v25966_v38  ;;  %v14491_v38 = vld [vmem:[%s28967_s2 + $0x418] sm:$0xff] }
 0x9b8   : > { %17895 = vmatprep.mubr.f32.mxu1 %v26008_v26  ;;  %19918 = vmatpush3.bf16.msra.mxu1 %v19915_v34  ;;  %v14490_v26 = vld [vmem:[%s28967_s2 + $0x410] sm:$0xff]  ;;  %v19951_v34 = vpack.c.bf16 %v14503_v54, %v14502_v5 }
 0x9b9   : > { %19920 = vmatprep.subr.bf16.mxu1 %v19919_v19 }
 0x9bb   : > { %17896 = vmatmul.mubr.f32.gmra.mrb[94].mxu1 %v25994_v48  ;;  %v14495_v48 = vld [vmem:[%s28967_s2 + $0x438] sm:$0xff] }
 0x9bc   : > { %17898 = vmatprep.mubr.f32.mxu1 %v26030_v63  ;;  %19922 = vmatpush3.bf16.msra.mxu1 %v19919_v19  ;;  %v14497_v63 = vld [vmem:[%s28967_s2 + $0x448] sm:$0xff]  ;;  %v30098_v19 = vld [vmem:[#allocation32_spill] sm:$0xff] }
 0x9bd   : > { %19924 = vmatprep.subr.bf16.mxu1 %v19923_v24 }
 0x9bf   : > { %17899 = vmatmul.mubr.f32.gmra.mrb[96].mxu1 %v26016_v1  ;;  %v30088_v1 = vld [vmem:[#allocation131_spill] sm:$0xff] }
 0x9c0   : > { %17901 = vmatprep.mubr.f32.mxu1 %v26052_v39  ;;  %v19927_v39 = vpack.c.bf16 %v14491_v38, %v14490_v26 }
 0x9c3   : > { %17902 = vmatmul.mubr.f32.gmra.mrb[98].mxu1 %v26038_v16  ;;  %v14493_v16 = vld [vmem:[%s28967_s2 + $0x428] sm:$0xff] }
 0x9c4   : > { %17904 = vmatprep.mubr.f32.mxu1 %v26072_v42  ;;  %v14492_v42 = vld [vmem:[%s28967_s2 + $0x420] sm:$0xff] }
 0x9c5   : > { %v19931_v0 = vpack.c.bf16 %v14493_v16, %v14492_v42 }
 0x9c7   : > { %17905 = vmatmul.mubr.f32.gmra.mrb[100].mxu1 %v26059_v62  ;;  %v30089_v62 = vld [vmem:[#allocation76_spill] sm:$0xff] }
 0x9c8   : > { %17907 = vmatprep.mubr.f32.mxu1 %v26114_v32 }
 0x9cb   : > { %17908 = vmatmul.mubr.f32.gmra.mrb[102].mxu1 %v26105_v51 }
 0x9cc   : > { %17942 = vmatprep.mubr.f32.mxu1 %v25832_v13  ;;  %v14494_v13 = vld [vmem:[%s28967_s2 + $0x430] sm:$0xff] }
 0x9cf   : > { %17943 = vmatmul.mubr.f32.vlgmr.msra.gmra.mrb[80].mxu1 %v25857_v12  ;;  %v19935_v12 = vpack.c.bf16 %v14495_v48, %v14494_v13 }
 0x9d0   : > { %17945 = vmatprep.mubr.f32.mxu1 %v25860_v11  ;;  %19926 = vmatpush3.bf16.msra.mxu1 %v19923_v24  ;;  %v14496_v11 = vld [vmem:[%s28967_s2 + $0x440] sm:$0xff] }
 0x9d1   : > { %19928 = vmatprep.subr.bf16.mxu1 %v19927_v39 }
 0x9d3   : > { %17946 = vmatmul.mubr.f32.gmra.mrb[82].mxu1 %v25885_v3  ;;  %v19939_v3 = vpack.c.bf16 %v14497_v63, %v14496_v11 }
 0x9d4   : > { %17948 = vmatprep.mubr.f32.mxu1 %v25888_v29  ;;  %19930 = vmatpush3.bf16.msra.mxu1 %v19927_v39  ;;  %v14498_v29 = vld [vmem:[%s28967_s2 + $0x450] sm:$0xff] }
 0x9d5   : > { %19932 = vmatprep.subr.bf16.mxu1 %v19931_v0  ;;  %v19943_v7 = vpack.c.bf16 %v14499_v22, %v14498_v29  ;;  %v9098_v22 = vld [vmem:[%s28974_s9 + $0x8] sm:$0xff] }
 0x9d7   : > { %17949 = vmatmul.mubr.f32.gmra.mrb[84].mxu1 %v30088_v1 }
 0x9d8   : > { %17951 = vmatprep.mubr.f32.mxu1 %v30089_v62  ;;  %19934 = vmatpush3.bf16.msra.mxu1 %v19931_v0 }
 0x9d9   : > { %19936 = vmatprep.subr.bf16.mxu1 %v19935_v12 }
 0x9db   : > { %17952 = vmatmul.mubr.f32.gmra.mrb[86].mxu1 %v30090_v45 }
 0x9dc   : > { %17954 = vmatprep.mubr.f32.mxu1 %v30091_v10  ;;  %19938 = vmatpush3.bf16.msra.mxu1 %v19935_v12 }
 0x9dd   : > { %19940 = vmatprep.subr.bf16.mxu1 %v19939_v3 }
 0x9df   : > { %17955 = vmatmul.mubr.f32.gmra.mrb[88].mxu1 %v30092_v20 }
 0x9e0   : > { %17957 = vmatprep.mubr.f32.mxu1 %v30093_v58  ;;  %19942 = vmatpush3.bf16.msra.mxu1 %v19939_v3 }
 0x9e1   : > { %19944 = vmatprep.subr.bf16.mxu1 %v19943_v7 }
 0x9e3   : > { %17958 = vmatmul.mubr.f32.gmra.mrb[90].mxu1 %v30094_v31 }
 0x9e4   : > { %17960 = vmatprep.mubr.f32.mxu1 %v30077_v35  ;;  %19946 = vmatpush3.bf16.msra.mxu1 %v19943_v7  ;;  %v30097_v35 = vld [vmem:[#allocation31_spill] sm:$0xff] }
 0x9e5   : > { %19948 = vmatprep.subr.bf16.mxu1 %v19947_v27 }
 0x9e7   : > { %17961 = vmatmul.mubr.f32.gmra.mrb[92].mxu1 %v30078_v44  ;;  %v30099_v44 = vrot.slane %v26114_v32, 1 }
 0x9e8   : > { %17963 = vmatprep.mubr.f32.mxu1 %v30079_v25  ;;  %19950 = vmatpush3.bf16.msra.mxu1 %v19947_v27 }
 0x9e9   : > { %19952 = vmatprep.subr.bf16.mxu1 %v19951_v34  ;;  %v8330_v25 = vsel %vm739_vm3, %v26397_v9, %v30099_v44 }
 0x9eb   : > { %17964 = vmatmul.mubr.f32.gmra.mrb[94].mxu1 %v30080_v60  ;;  %v30100_v60 = vld [vmem:[#allocation30_spill] sm:$0xff] }
 0x9ec   : > { %17966 = vmatprep.mubr.f32.mxu1 %v30081_v61  ;;  %19954 = vmatpush3.bf16.msra.mxu1 %v19951_v34  ;;  %v30101_v61 = vrot.slane %v26105_v51, 1 }
 0x9ed   : > { %19955 = vmatprep.subr.bf16.mxu1 %v30095_v14 }
 0x9ef   : > { %17967 = vmatmul.mubr.f32.gmra.mrb[96].mxu1 %v30082_v36 }
 0x9f0   : > { %17969 = vmatprep.mubr.f32.mxu1 %v30096_v46 }
 0x9f3   : > { %17970 = vmatmul.mubr.f32.gmra.mrb[98].mxu1 %v30097_v35 }
 0x9f4   : > { %17972 = vmatprep.mubr.f32.mxu1 %v30098_v19 }
 0x9f7   : > { %17973 = vmatmul.mubr.f32.gmra.mrb[100].mxu1 %v8330_v25 }
 0x9f8   : > { %17975 = vmatprep.mubr.f32.mxu1 %v30100_v60 }
 0x9fb   : > { %17976 = vmatmul.mubr.f32.gmra.mrb[102].mxu1 %v30101_v61 }
 0x9fc   : > { %18010 = vmatprep.mubr.f32.mxu1 %v25844_v33  ;;  %v30102_v33 = vld [vmem:[#allocation35_spill] sm:$0xff] }
 0x9ff   : > { %18011 = vmatmul.mubr.f32.vlgmr.msra.gmra.mrb[80].mxu1 %v25869_v41  ;;  %v30103_v41 = vrot.slane %v26114_v32, 2 }
 0xa00   : > { %18013 = vmatprep.mubr.f32.mxu1 %v25872_v47 }
 0xa01   : > { %v8563_v47 = vsel %vm1840_vm5, %v26479_v43, %v30103_v41 }
 0xa03   : > { %18014 = vmatmul.mubr.f32.gmra.mrb[82].mxu1 %v25897_v2  ;;  %v30105_v2 = vrot.slane %v26105_v51, 2 }
 0xa04   : > { %18016 = vmatprep.mubr.f32.mxu1 %v25900_v15 }
 0xa07   : > { %18017 = vmatmul.mubr.f32.gmra.mrb[84].mxu1 %v25925_v53 }
 0xa08   : > { %18019 = vmatprep.mubr.f32.mxu1 %v25928_v17 }
 0xa0b   : > { %18020 = vmatmul.mubr.f32.gmra.mrb[86].mxu1 %v30086_v8 }
 0xa0c   : > { %18022 = vmatprep.mubr.f32.mxu1 %v25956_v40 }
 0xa0f   : > { %18023 = vmatmul.mubr.f32.gmra.mrb[88].mxu1 %v25981_v52 }
 0xa10   : > { %18025 = vmatprep.mubr.f32.mxu1 %v25984_v4 }
 0xa13   : > { %18026 = vmatmul.mubr.f32.gmra.mrb[90].mxu1 %v26003_v50 }
 0xa14   : > { %18028 = vmatprep.mubr.f32.mxu1 %v26006_v23 }
 0xa17   : > { %18029 = vmatmul.mubr.f32.gmra.mrb[92].mxu1 %v26025_v56  ;;  %v30104_v56 = vld [vmem:[#allocation33_spill] sm:$0xff] }
 0xa18   : > { %18031 = vmatprep.mubr.f32.mxu1 %v26028_v28 }
 0xa1b   : > { %18032 = vmatmul.mubr.f32.gmra.mrb[94].mxu1 %v26047_v18 }
 0xa1c   : > { %18034 = vmatprep.mubr.f32.mxu1 %v26050_v30 }
 0xa1f   : > { %18035 = vmatmul.mubr.f32.gmra.mrb[96].mxu1 %v26070_v6 }
 0xa20   : > { %18037 = vmatprep.mubr.f32.mxu1 %v26253_v55 }
 0xa23   : > { %18038 = vmatmul.mubr.f32.gmra.mrb[98].mxu1 %v26485_v57 }
 0xa24   : > { %18040 = vmatprep.mubr.f32.mxu1 %v30102_v33 }
 0xa27   : > { %18041 = vmatmul.mubr.f32.gmra.mrb[100].mxu1 %v8563_v47 }
 0xa28   : > { %18043 = vmatprep.mubr.f32.mxu1 %v30104_v56 }
 0xa2b   : > { %18044 = vmatmul.mubr.f32.gmra.mrb[102].mxu1 %v30105_v2 }
 0xa2c   : > { %14505 = vmatprep.mubr.msk.f32.mxu1 %vm9107_vm9, %v9098_v22 }
 0xad2   : > { %v26665_v15 = vpop.f32.mrb[80].mxu1 }
 0xad3   : > { %v8810_v53 = vmul.f32 %v26665_v15, %v26665_v15  ;;  %v26669_v17 = vpop.f32.mrb[81].mxu1 }
 0xad4   : > { %v8778_v30 = vadd.f32 %v26665_v15, %v26669_v17  ;;  %v8809_v40 = vmul.f32 %v26669_v17, %v26669_v17 }
 0xad6   : > { %v8833_v52 = vadd.f32 %v8810_v53, %v8809_v40  ;;  %v26675_v4 = vpop.f32.mrb[82].mxu1 }
 0xad7   : > { %v26677_v28 = vpop.f32.mrb[83].mxu1  ;;  %v8812_v18 = vmul.f32 %v26675_v4, %v26675_v4 }
 0xad8   : > { %v8779_v50 = vadd.f32 %v8778_v30, %v26677_v28  ;;  %v8811_v23 = vmul.f32 %v26677_v28, %v26677_v28 }
 0xada   : > { %v8834_v6 = vadd.f32 %v8833_v52, %v8811_v23  ;;  %v26684_v51 = vpop.f32.mrb[84].mxu1  ;;  %v8780_v32 = vadd.f32 %v26675_v4, %v8779_v50 }
 0xadb   : > { %v26687_v9 = vpop.f32.mrb[85].mxu1  ;;  %v8814_v43 = vmul.f32 %v26684_v51, %v26684_v51 }
 0xadc   : > { %v8781_v55 = vadd.f32 %v8780_v32, %v26687_v9  ;;  %v8813_v36 = vmul.f32 %v26687_v9, %v26687_v9  ;;  %v8835_v8 = vadd.f32 %v8834_v6, %v8812_v18 }
 0xade   : > { %v8836_v57 = vadd.f32 %v8835_v8, %v8813_v36  ;;  %v26694_v37 = vpop.f32.mrb[86].mxu1  ;;  %v8782_v59 = vadd.f32 %v26684_v51, %v8781_v55 }
 0xadf   : > { %v26697_v24 = vpop.f32.mrb[87].mxu1  ;;  %v8816_v42 = vmul.f32 %v26694_v37, %v26694_v37 }
 0xae0   : > { %v8783_v26 = vadd.f32 %v8782_v59, %v26697_v24  ;;  %v8815_v38 = vmul.f32 %v26697_v24, %v26697_v24  ;;  %v8837_v39 = vadd.f32 %v8836_v57, %v8814_v43 }
 0xae2   : > { %v8838_v16 = vadd.f32 %v8837_v39, %v8815_v38  ;;  %v26704_v0 = vpop.f32.mrb[88].mxu1  ;;  %v8784_v13 = vadd.f32 %v26694_v37, %v8783_v26 }
 0xae3   : > { %v26707_v48 = vpop.f32.mrb[89].mxu1  ;;  %v8818_v1 = vmul.f32 %v26704_v0, %v26704_v0 }
 0xae4   : > { %v8785_v12 = vadd.f32 %v8784_v13, %v26707_v48  ;;  %v8817_v11 = vmul.f32 %v26707_v48, %v26707_v48  ;;  %v8839_v63 = vadd.f32 %v8838_v16, %v8816_v42 }
 0xae6   : > { %v8840_v62 = vadd.f32 %v8839_v63, %v8817_v11  ;;  %v26714_v3 = vpop.f32.mrb[90].mxu1  ;;  %v8786_v29 = vadd.f32 %v26704_v0, %v8785_v12 }
 0xae7   : > { %v26720_v45 = vpop.f32.mrb[91].mxu1  ;;  %v8820_v21 = vmul.f32 %v26714_v3, %v26714_v3 }
 0xae8   : > { %v8787_v10 = vadd.f32 %v8786_v29, %v26720_v45  ;;  %v8819_v7 = vmul.f32 %v26720_v45, %v26720_v45  ;;  %v8841_v49 = vadd.f32 %v8840_v62, %v8818_v1 }
 0xaea   : > { %v8842_v20 = vadd.f32 %v8841_v49, %v8819_v7  ;;  %v26728_v58 = vpop.f32.mrb[92].mxu1  ;;  %v8788_v27 = vadd.f32 %v26714_v3, %v8787_v10 }
 0xaeb   : > { %v26731_v5 = vpop.f32.mrb[93].mxu1  ;;  %v8822_v46 = vmul.f32 %v26728_v58, %v26728_v58 }
 0xaec   : > { %v8789_v54 = vadd.f32 %v8788_v27, %v26731_v5  ;;  %v8821_v31 = vmul.f32 %v26731_v5, %v26731_v5  ;;  %v8843_v34 = vadd.f32 %v8842_v20, %v8820_v21 }
 0xaee   : > { %v8844_v35 = vadd.f32 %v8843_v34, %v8821_v31  ;;  %v26738_v19 = vpop.f32.mrb[94].mxu1  ;;  %v8790_v44 = vadd.f32 %v26728_v58, %v8789_v54 }
 0xaef   : > { %v26741_v25 = vpop.f32.mrb[95].mxu1  ;;  %v8824_v41 = vmul.f32 %v26738_v19, %v26738_v19 }
 0xaf0   : > { %v8791_v60 = vadd.f32 %v8790_v44, %v26741_v25  ;;  %v8823_v61 = vmul.f32 %v26741_v25, %v26741_v25  ;;  %v8845_v33 = vadd.f32 %v8844_v35, %v8822_v46 }
 0xaf2   : > { %v8846_v47 = vadd.f32 %v8845_v33, %v8823_v61  ;;  %v26748_v56 = vpop.f32.mrb[96].mxu1  ;;  %v8792_v2 = vadd.f32 %v26738_v19, %v8791_v60 }
 0xaf3   : > { %v26751_v53 = vpop.f32.mrb[97].mxu1  ;;  %v8826_v50 = vmul.f32 %v26748_v56, %v26748_v56 }
 0xaf4   : > { %v8793_v30 = vadd.f32 %v8792_v2, %v26751_v53  ;;  %v8825_v40 = vmul.f32 %v26751_v53, %v26751_v53  ;;  %v8847_v52 = vadd.f32 %v8846_v47, %v8824_v41 }
 0xaf6   : > { %v8848_v23 = vadd.f32 %v8847_v52, %v8825_v40  ;;  %v26758_v18 = vpop.f32.mrb[98].mxu1  ;;  %v8794_v6 = vadd.f32 %v26748_v56, %v8793_v30 }
 0xaf7   : > { %v26761_v32 = vpop.f32.mrb[99].mxu1  ;;  %v8828_v43 = vmul.f32 %v26758_v18, %v26758_v18 }
 0xaf8   : > { %v8795_v55 = vadd.f32 %v8794_v6, %v26761_v32  ;;  %v8827_v36 = vmul.f32 %v26761_v32, %v26761_v32  ;;  %v8849_v8 = vadd.f32 %v8848_v23, %v8826_v50 }
 0xafa   : > { %v8850_v57 = vadd.f32 %v8849_v8, %v8827_v36  ;;  %v18042_v59 = vpop.f32.mrb[100].mxu1  ;;  %v8796_v26 = vadd.f32 %v26758_v18, %v8795_v55  ;;  %v21853_v36 = vld [vmem:[%s28970_s5] sm:$0x1] }
 0xafb   : > { %v8735_v38 = vpop.f32.mrb[101].mxu1  ;;  %v8830_v13 = vmul.f32 %v18042_v59, %v18042_v59 }
 0xafc   : > { %v8797_v39 = vadd.f32 %v8796_v26, %v8735_v38  ;;  %v8829_v42 = vmul.f32 %v8735_v38, %v8735_v38  ;;  %v8851_v16 = vadd.f32 %v8850_v57, %v8828_v43  ;;  %v30106_v57 = vld [vmem:[#allocation42_spill] sm:$0xff] }
 0xafe   : > { %v8852_v12 = vadd.f32 %v8851_v16, %v8829_v42  ;;  %v18045_v11 = vpop.f32.mrb[102].mxu1  ;;  %v8798_v63 = vadd.f32 %v18042_v59, %v8797_v39  ;;  %v21854_v39 = vld [vmem:[%s28971_s6] sm:$0x1] }
 0xaff   : > { %v8832_v1 = vmul.f32 %v18045_v11, %v18045_v11  ;;  %v8745_v62 = vpop.f32.mrb[103].mxu1  ;;  %v8800_v7 = vsel %vm980_vm0, %v18045_v11, 0.0 }
 0xb00   : > { %v8799_v29 = vadd.f32 %v8798_v63, %v8745_v62  ;;  %v8831_v22 = vmul.f32 %v8745_v62, %v8745_v62  ;;  %v8853_v10 = vadd.f32 %v8852_v12, %v8830_v13 }
 0xb01   : > { %v8855_v20 = vsel %vm980_vm0, %v8832_v1, 0.0 }
 0xb02   : > { %v8801_v49 = vadd.f32 %v8800_v7, %v8799_v29  ;;  %v8854_v21 = vadd.f32 %v8853_v10, %v8831_v22 }
 0xb04   : > { %v8802_v27 = vrot.slane %v8801_v49, 4  ;;  %v8856_v54 = vadd.f32 %v8855_v20, %v8854_v21 }
 0xb06   : > { %v8803_v31 = vadd.f32 %v8802_v27, %v8801_v49  ;;  %v8857_v34 = vrot.slane %v8856_v54, 4 }
 0xb08   : > { %v8804_v46 = vrot.slane %v8803_v31, 2  ;;  %v8858_v35 = vadd.f32 %v8857_v34, %v8856_v54 }
 0xb0a   : > { %v8805_v44 = vadd.f32 %v8804_v46, %v8803_v31  ;;  %v8859_v60 = vrot.slane %v8858_v35, 2 }
 0xb0c   : > { %v8806_v61 = vrot.slane %v8805_v44, 1  ;;  %v8860_v33 = vadd.f32 %v8859_v60, %v8858_v35 }
 0xb0e   : > { %v8807_v41 = vadd.f32 %v8806_v61, %v8805_v44  ;;  %v8861_v47 = vrot.slane %v8860_v33, 1 }
 0xb10   : > { %v8808_v2 = vmul.f32 0.0069444445, %v8807_v41  ;;  %v8862_v30 = vadd.f32 %v8861_v47, %v8860_v33 }
 0xb12   : > { %v8863_v40 = vmul.f32 0.0069444445, %v8862_v30  ;;  %v8864_v52 = vmul.f32 %v8808_v2, %v8808_v2 }
 0xb14   : > { %v8865_v50 = vsub.f32 %v8863_v40, %v8864_v52 }
 0xb16   : > { %v8866_v23 = vmax.f32 %v8865_v50, 0.0 }
 0xb18   : > { %v8867_v6 = vadd.f32 1e-05, %v8866_v23 }
 0xb1a   : > { %21793 = vrsqrt.f32 %v8867_v6 }
 0xb24   : > { %v21794_v55 = vpop.eup %21793 }
 0xb25   : > { %v8869_v8 = vmul.f32 %v21853_v36, %v21794_v55 }
 0xb27   : > { %v8870_v43 = vmul.f32 %v8869_v8, %v8808_v2  ;;  %v26775_v26 = vrot.slane %v8869_v8, %v30106_v57 }
 0xb29   : > { %v8871_v42 = vsub.f32 %v21854_v39, %v8870_v43  ;;  %v8898_v16 = vmul.f32 %v26775_v26, %v8735_v38  ;;  %v8899_v13 = vmul.f32 %v18042_v59, %v26775_v26  ;;  %v8900_v12 = vmul.f32 %v26775_v26, %v8745_v62 }
 0xb2a   : > { %v8901_v63 = vmul.f32 %v18045_v11, %v26775_v26  ;;  %v8878_v1 = vmul.f32 %v26775_v26, %v26669_v17  ;;  %v8879_v29 = vmul.f32 %v26665_v15, %v26775_v26  ;;  %v8880_v22 = vmul.f32 %v26775_v26, %v26677_v28 }
 0xb2b   : > { %v26791_v10 = vrot.slane %v8871_v42, %v30106_v57  ;;  %v8881_v38 = vmul.f32 %v26675_v4, %v26775_v26  ;;  %v8882_v59 = vmul.f32 %v26775_v26, %v26687_v9  ;;  %v8883_v11 = vmul.f32 %v26684_v51, %v26775_v26 }
 0xb2c   : > { %v8884_v17 = vmul.f32 %v26775_v26, %v26697_v24  ;;  %v8885_v15 = vmul.f32 %v26694_v37, %v26775_v26  ;;  %v8886_v28 = vmul.f32 %v26775_v26, %v26707_v48  ;;  %v8887_v62 = vmul.f32 %v26704_v0, %v26775_v26 }
 0xb2d   : > { %v8928_v4 = vadd.f32 %v26791_v10, %v8898_v16  ;;  %v26809_v7 = vadd.f32 %v26791_v10, %v8899_v13  ;;  %v8930_v9 = vadd.f32 %v26791_v10, %v8900_v12  ;;  %v26813_v51 = vadd.f32 %v26791_v10, %v8901_v63 }
 0xb2e   : > { %v8908_v24 = vadd.f32 %v26791_v10, %v8878_v1  ;;  %v8909_v37 = vadd.f32 %v26791_v10, %v8879_v29  ;;  %v8910_v49 = vadd.f32 %v26791_v10, %v8880_v22  ;;  %v8911_v48 = vadd.f32 %v26791_v10, %v8881_v38 }
 0xb2f   : > { %v8952_v21 = vmax.f32 %v8928_v4, 0.0  ;;  %v8953_v0 = vmax.f32 %v26809_v7, 0.0  ;;  %v8954_v20 = vmax.f32 %v8930_v9, 0.0  ;;  %v8955_v27 = vmax.f32 %v26813_v51, 0.0 }
 0xb30   : > { %v8912_v54 = vadd.f32 %v26791_v10, %v8882_v59  ;;  %v8932_v31 = vmax.f32 %v8908_v24, 0.0  ;;  %v8933_v34 = vmax.f32 %v8909_v37, 0.0  ;;  %v8934_v46 = vmax.f32 %v8910_v49, 0.0 }
 0xb31   : > { %v26822_v35 = vrot.slane %v8952_v21, 1  ;;  %v26826_v44 = vrot.slane %v8953_v0, 1  ;;  %v26828_v60 = vrot.slane %v8954_v20, 1  ;;  %v26832_v61 = vrot.slane %v8955_v27, 1 }
 0xb32   : > { %v8935_v33 = vmax.f32 %v8911_v48, 0.0  ;;  %v8936_v41 = vmax.f32 %v8912_v54, 0.0  ;;  %v8980_v47 = vrot.slane %v8932_v31, 1  ;;  %v8981_v2 = vrot.slane %v8933_v34, 1 }
 0xb33   : > { %v9022_v30 = vsel %vm739_vm3, %v26822_v35, %v26826_v44  ;;  %v9026_v40 = vsel %vm739_vm3, %v26828_v60, %v26832_v61  ;;  %v8983_v52 = vrot.slane %v8934_v46, 1  ;;  %v8913_v50 = vadd.f32 %v26791_v10, %v8883_v11 }
 0xb34   : > { %v26841_v23 = vmax.f32 %v8952_v21, %v9022_v30  ;;  %v26843_v6 = vmax.f32 %v8954_v20, %v9026_v40  ;;  %v8982_v55 = vsel %vm739_vm3, %v8980_v47, %v8981_v2  ;;  %v8985_v36 = vrot.slane %v8935_v33, 1 }
 0xb35   : > { %v8984_v8 = vsel %vm739_vm3, %v8981_v2, %v8983_v52  ;;  %v8987_v43 = vrot.slane %v8936_v41, 1  ;;  %v9051_v39 = vmax.f32 %v8932_v31, %v8982_v55  ;;  %v8914_v42 = vadd.f32 %v26791_v10, %v8884_v17 }
 0xb36   : > { %v9095_v16 = vmax.f32 %v26841_v23, %v26843_v6  ;;  %v8986_v13 = vsel %vm739_vm3, %v8983_v52, %v8985_v36  ;;  %v9052_v12 = vmax.f32 %v8933_v34, %v8984_v8  ;;  %v8937_v63 = vmax.f32 %v8913_v50, 0.0  ;;  %v9099_v6 = vld [vmem:[%s28974_s9 + $0x10] sm:$0xff] }
 0xb37   : > { %v8988_v1 = vsel %vm739_vm3, %v8985_v36, %v8987_v43  ;;  %v9053_v29 = vmax.f32 %v8934_v46, %v8986_v13  ;;  %v8938_v22 = vmax.f32 %v8914_v42, 0.0  ;;  %v8915_v38 = vadd.f32 %v26791_v10, %v8885_v15 }
 0xb38   : > { %v9054_v59 = vmax.f32 %v8935_v33, %v8988_v1  ;;  %v8989_v11 = vrot.slane %v8937_v63, 1  ;;  %v8916_v4 = vadd.f32 %v26791_v10, %v8886_v28  ;;  %v8888_v17 = vmul.f32 %v26775_v26, %v26720_v45 }
 0xb39   : > { %v9075_v9 = vmax.f32 %v9051_v39, %v9053_v29  ;;  %v8991_v24 = vrot.slane %v8938_v22, 1  ;;  %v8939_v37 = vmax.f32 %v8915_v38, 0.0  ;;  %v8917_v49 = vadd.f32 %v26791_v10, %v8887_v62 }
 0xb3a   : > { %v9076_v48 = vmax.f32 %v9052_v12, %v9054_v59  ;;  %v8990_v21 = vsel %vm739_vm3, %v8987_v43, %v8989_v11  ;;  %v8940_v20 = vmax.f32 %v8916_v4, 0.0  ;;  %v8918_v54 = vadd.f32 %v26791_v10, %v8888_v17 }
 0xb3b   : > { %v8992_v15 = vsel %vm739_vm3, %v8989_v11, %v8991_v24  ;;  %v9055_v31 = vmax.f32 %v8936_v41, %v8990_v21  ;;  %v8993_v34 = vrot.slane %v8939_v37, 1  ;;  %v8941_v46 = vmax.f32 %v8917_v49, 0.0 }
 0xb3c   : > { %v19956_v28 = vpack.c.bf16 %v9076_v48, %v9075_v9  ;;  %v9056_v33 = vmax.f32 %v8937_v63, %v8992_v15  ;;  %v8995_v47 = vrot.slane %v8940_v20, 1  ;;  %v8942_v45 = vmax.f32 %v8918_v54, 0.0 }
 0xb3d   : > { %v9077_v2 = vmax.f32 %v9053_v29, %v9055_v31  ;;  %v8994_v30 = vsel %vm739_vm3, %v8991_v24, %v8993_v34  ;;  %v8997_v40 = vrot.slane %v8941_v46, 1  ;;  %v8889_v62 = vmul.f32 %v26714_v3, %v26775_v26 }
 0xb3e   : > { %19957 = vmatpush1.bf16.msra.mxu1 %v19956_v28  ;;  %v9078_v52 = vmax.f32 %v9054_v59, %v9056_v33  ;;  %v8996_v50 = vsel %vm739_vm3, %v8993_v34, %v8995_v47  ;;  %v9057_v55 = vmax.f32 %v8938_v22, %v8994_v30  ;;  %v8999_v36 = vrot.slane %v8942_v45, 1 }
 0xb3f   : > { %19958 = vmatprep.subr.bf16.mxu1 %v30095_v14  ;;  %v9058_v41 = vmax.f32 %v8939_v37, %v8996_v50  ;;  %v8998_v8 = vsel %vm739_vm3, %v8995_v47, %v8997_v40  ;;  %v8890_v43 = vmul.f32 %v26775_v26, %v26731_v5  ;;  %v8919_v39 = vadd.f32 %v26791_v10, %v8889_v62 }
 0xb40   : > { %v19959_v42 = vpack.c.bf16 %v9078_v52, %v9077_v2  ;;  %v9079_v13 = vmax.f32 %v9055_v31, %v9057_v55  ;;  %v9000_v3 = vsel %vm739_vm3, %v8997_v40, %v8999_v36  ;;  %v9059_v12 = vmax.f32 %v8940_v20, %v8998_v8 }
 0xb41   : > { %v9080_v63 = vmax.f32 %v9056_v33, %v9058_v41  ;;  %v9060_v1 = vmax.f32 %v8941_v46, %v9000_v3  ;;  %v8920_v29 = vadd.f32 %v26791_v10, %v8890_v43  ;;  %v8943_v22 = vmax.f32 %v8919_v39, 0.0 }
 0xb42   : > { %19960 = vmatpush1.bf16.msra.mxu1 %v19959_v42  ;;  %v9081_v38 = vmax.f32 %v9057_v55, %v9059_v12  ;;  %v8891_v59 = vmul.f32 %v26728_v58, %v26775_v26  ;;  %v8892_v5 = vmul.f32 %v26775_v26, %v26741_v25  ;;  %v8893_v11 = vmul.f32 %v26738_v19, %v26775_v26 }
 0xb43   : > { %19961 = vmatprep.subr.bf16.mxu1 %v30095_v14  ;;  %v19962_v4 = vpack.c.bf16 %v9080_v63, %v9079_v13  ;;  %v9082_v17 = vmax.f32 %v9058_v41, %v9060_v1  ;;  %v8944_v9 = vmax.f32 %v8920_v29, 0.0  ;;  %v9001_v24 = vrot.slane %v8943_v22, 1 }
 0xb44   : > { %v8921_v37 = vadd.f32 %v26791_v10, %v8891_v59  ;;  %v8922_v49 = vadd.f32 %v26791_v10, %v8892_v5  ;;  %v8894_v48 = vmul.f32 %v26775_v26, %v26751_v53  ;;  %v8923_v58 = vadd.f32 %v26791_v10, %v8893_v11 }
 0xb45   : > { %v19965_v21 = vpack.c.bf16 %v9082_v17, %v9081_v38  ;;  %v9002_v25 = vsel %vm739_vm3, %v8999_v36, %v9001_v24  ;;  %v9003_v20 = vrot.slane %v8944_v9, 1  ;;  %v8895_v19 = vmul.f32 %v26748_v56, %v26775_v26 }
 0xb46   : > { %19963 = vmatpush1.bf16.msra.mxu1 %v19962_v4  ;;  %v9061_v54 = vmax.f32 %v8942_v45, %v9002_v25  ;;  %v8945_v15 = vmax.f32 %v8921_v37, 0.0  ;;  %v8946_v31 = vmax.f32 %v8922_v49, 0.0  ;;  %v8924_v34 = vadd.f32 %v26791_v10, %v8894_v48 }
 0xb47   : > { %19964 = vmatprep.subr.bf16.mxu1 %v30095_v14  ;;  %v9004_v46 = vsel %vm739_vm3, %v9001_v24, %v9003_v20  ;;  %v8947_v53 = vmax.f32 %v8923_v58, 0.0  ;;  %v8896_v28 = vmul.f32 %v26775_v26, %v26761_v32  ;;  %v8925_v33 = vadd.f32 %v26791_v10, %v8895_v19 }
 0xb48   : > { %v9062_v47 = vmax.f32 %v8943_v22, %v9004_v46  ;;  %v9083_v2 = vmax.f32 %v9059_v12, %v9061_v54  ;;  %v9005_v30 = vrot.slane %v8945_v15, 1  ;;  %v9007_v56 = vrot.slane %v8946_v31, 1  ;;  %v9101_v46 = vld [vmem:[%s28974_s9 + $0x20] sm:$0xff] }
 0xb49   : > { %v8948_v40 = vmax.f32 %v8924_v34, 0.0  ;;  %v9009_v45 = vrot.slane %v8947_v53, 1  ;;  %v8926_v62 = vadd.f32 %v26791_v10, %v8896_v28  ;;  %v8949_v52 = vmax.f32 %v8925_v33, 0.0  ;;  %v9103_v28 = vld [vmem:[%s28974_s9 + $0x30] sm:$0xff]  ;;  %v9106_v33 = vld [vmem:[%s28974_s9 + $0x48] sm:$0xf] }
 0xb4a   : > { %19966 = vmatpush1.bf16.msra.mxu1 %v19965_v21  ;;  %v9084_v50 = vmax.f32 %v9060_v1, %v9062_v47  ;;  %v9006_v55 = vsel %vm739_vm3, %v9003_v20, %v9005_v30  ;;  %v9008_v36 = vsel %vm739_vm3, %v9005_v30, %v9007_v56  ;;  %v8897_v32 = vmul.f32 %v26758_v18, %v26775_v26  ;;  %v14531_v30 = vld [vmem:[%s28968_s3 + $0x80] sm:$0xff] }
 0xb4b   : > { %19967 = vmatprep.subr.bf16.mxu1 %v30095_v14  ;;  %v9063_v41 = vmax.f32 %v8944_v9, %v9006_v55  ;;  %v9064_v8 = vmax.f32 %v8945_v15, %v9008_v36  ;;  %v9010_v43 = vsel %vm739_vm3, %v9007_v56, %v9009_v45  ;;  %v9011_v39 = vrot.slane %v8948_v40, 1  ;;  %v14532_v56 = vld [vmem:[%s28968_s3 + $0x88] sm:$0xff] }
 0xb4c   : > { %v19968_v42 = vpack.c.bf16 %v9084_v50, %v9083_v2  ;;  %v9065_v13 = vmax.f32 %v8946_v31, %v9010_v43  ;;  %v8950_v3 = vmax.f32 %v8926_v62, 0.0  ;;  %v9013_v12 = vrot.slane %v8949_v52, 1  ;;  %v9216_v2 = vld [vmem:[#allocation6] sm:$0xff]  ;;  %v14534_v62 = vld [vmem:[%s28968_s3 + $0x98] sm:$0xff]  ;;  %v14535_v50 = vld [vmem:[%s28968_s3 + $0xa0] sm:$0xff] }
 0xb4d   : > { %v9085_v63 = vmax.f32 %v9061_v54, %v9063_v41  ;;  %v9086_v1 = vmax.f32 %v9062_v47, %v9064_v8  ;;  %v9012_v29 = vsel %vm739_vm3, %v9009_v45, %v9011_v39  ;;  %v8927_v22 = vadd.f32 %v26791_v10, %v8897_v32  ;;  %v9105_v47 = vld [vmem:[%s28974_s9 + $0x40] sm:$0xf]  ;;  %v14533_v45 = vld [vmem:[%s28968_s3 + $0x90] sm:$0xff]  ;;  %v14536_v55 = vld [vmem:[%s28968_s3 + $0xa8] sm:$0xff] }
 0xb4e   : > { %19969 = vmatpush1.bf16.msra.mxu1 %v19968_v42  ;;  %v9066_v38 = vmax.f32 %v8947_v53, %v9012_v29  ;;  %v9087_v18 = vmax.f32 %v9063_v41, %v9065_v13  ;;  %v9014_v26 = vsel %vm739_vm3, %v9011_v39, %v9013_v12  ;;  %v9015_v59 = vrot.slane %v8950_v3, 1  ;;  %v9104_v53 = vld [vmem:[%s28974_s9 + $0x38] sm:$0xff]  ;;  %v14537_v32 = vld [vmem:[%s28968_s3 + $0xb0] sm:$0xff]  ;;  %v14539_v43 = vld [vmem:[%s28968_s3 + $0xc0] sm:$0xff] }
 0xb4f   : > { %19970 = vmatprep.subr.bf16.mxu1 %v30095_v14  ;;  %v19971_v5 = vpack.c.bf16 %v9086_v1, %v9085_v63  ;;  %v9067_v11 = vmax.f32 %v8948_v40, %v9014_v26  ;;  %v8951_v4 = vmax.f32 %v8927_v22, 0.0  ;;  %v9024_v17 = vsel %vm739_vm3, %v26826_v44, %v26828_v60  ;;  %v14538_v41 = vld [vmem:[%s28968_s3 + $0xb8] sm:$0xff]  ;;  %v14540_v39 = vld [vmem:[%s28968_s3 + $0xc8] sm:$0xff]  ;;  %v14543_v63 = vld [vmem:[%s28968_s3 + $0xe0] sm:$0xff] }
 0xb50   : > { %v9088_v9 = vmax.f32 %v9064_v8, %v9066_v38  ;;  %v9016_v24 = vsel %vm739_vm3, %v9013_v12, %v9015_v59  ;;  %v9072_v10 = vmax.f32 %v8953_v0, %v9024_v17  ;;  %v9074_v37 = vmax.f32 %v8955_v27, %v26832_v61  ;;  %v14544_v1 = vld [vmem:[%s28968_s3 + $0xe8] sm:$0xff] }
 0xb51   : > { %v9068_v49 = vmax.f32 %v8949_v52, %v9016_v24  ;;  %v9089_v48 = vmax.f32 %v9065_v13, %v9067_v11  ;;  %v9017_v58 = vrot.slane %v8951_v4, 1  ;;  %v19998_v40 = vpack.c.bf16 %v14532_v56, %v14531_v30  ;;  %v14541_v13 = vld [vmem:[%s28968_s3 + $0xd0] sm:$0xff]  ;;  %v9465_v24 = vld [vmem:[%s28968_s3] sm:$0xff] }
 0xb52   : > { %19972 = vmatpush1.bf16.msra.mxu1 %v19971_v5  ;;  %v19974_v21 = vpack.c.bf16 %v9088_v9, %v9087_v18  ;;  %v9096_v25 = vmax.f32 %v9072_v10, %v9074_v37  ;;  %v20001_v52 = vpack.c.bf16 %v14534_v62, %v14533_v45  ;;  %v20004_v36 = vpack.c.bf16 %v14536_v55, %v14535_v50  ;;  %v9228_v30 = vld [vmem:[#allocation6 + $0x60] sm:$0xff]  ;;  %v9477_v56 = vld [vmem:[%s28968_s3 + $0x60] sm:$0xff]  ;;  %v9229_v45 = vld [vmem:[#allocation6 + $0x68] sm:$0xff] }
 0xb53   : > { %19973 = vmatprep.subr.bf16.mxu1 %v30095_v14  ;;  %v9090_v20 = vmax.f32 %v9066_v38, %v9068_v49  ;;  %v9018_v44 = vsel %vm739_vm3, %v9015_v59, %v9017_v58  ;;  %v9020_v60 = vsel %vm739_vm3, %v9017_v58, %v26822_v35  ;;  %v9097_v35 = vld [vmem:[%s28974_s9] sm:$0xff]  ;;  %19999 = vmatpush3.bf16.msra.mxu0 %v19998_v40  ;;  %v9478_v40 = vld [vmem:[%s28968_s3 + $0x68] sm:$0xff]  ;;  %v9479_v50 = vld [vmem:[%s28968_s3 + $0x70] sm:$0xff] }
 0xb54   : > { %v9069_v7 = vmax.f32 %v8950_v3, %v9018_v44  ;;  %v9070_v0 = vmax.f32 %v8951_v4, %v9020_v60  ;;  %v19986_v51 = vpack.c.bf16 %v9096_v25, %v9095_v16  ;;  %v9102_v16 = vld [vmem:[%s28974_s9 + $0x28] sm:$0xff]  ;;  %20000 = vmatprep.subr.bf16.mxu0 %v30095_v14  ;;  %v20007_v8 = vpack.c.bf16 %v14538_v41, %v14537_v32  ;;  %v14542_v3 = vld [vmem:[%s28968_s3 + $0xd8] sm:$0xff]  ;;  %v9467_v25 = vld [vmem:[%s28968_s3 + $0x10] sm:$0xff] }
 0xb55   : > { %v19977_v27 = vpack.c.bf16 %v9090_v20, %v9089_v48  ;;  %v20010_v42 = vpack.c.bf16 %v14540_v39, %v14539_v43  ;;  %v20013_v12 = vpack.c.bf16 %v14542_v3, %v14541_v13  ;;  %v20016_v29 = vpack.c.bf16 %v14544_v1, %v14543_v63  ;;  %v9217_v48 = vld [vmem:[#allocation6 + $0x8] sm:$0xff]  ;;  %v9219_v44 = vld [vmem:[#allocation6 + $0x18] sm:$0xff]  ;;  %v9232_v41 = vld [vmem:[#allocation6 + $0x80] sm:$0xff] }
 0xb56   : > { %19975 = vmatpush1.bf16.msra.mxu1 %v19974_v21  ;;  %v9091_v61 = vmax.f32 %v9067_v11, %v9069_v7  ;;  %v9092_v19 = vmax.f32 %v9068_v49, %v9070_v0  ;;  %v9093_v54 = vmax.f32 %v9069_v7, %v26841_v23  ;;  %v9094_v15 = vmax.f32 %v9070_v0, %v9072_v10  ;;  %v9100_v23 = vld [vmem:[%s28974_s9 + $0x18] sm:$0xff]  ;;  %v9466_v10 = vld [vmem:[%s28968_s3 + $0x8] sm:$0xff]  ;;  %v9218_v21 = vld [vmem:[#allocation6 + $0x10] sm:$0xff] }
 0xb57   : > { %19976 = vmatprep.subr.bf16.mxu1 %v30095_v14  ;;  %20002 = vmatpush3.bf16.msra.mxu0 %v20001_v52  ;;  %v20022_v58 = vpack.c.bf16 %v9466_v10, %v9465_v24  ;;  %v9468_v20 = vld [vmem:[%s28968_s3 + $0x18] sm:$0xff]  ;;  %v9220_v7 = vld [vmem:[#allocation6 + $0x20] sm:$0xff]  ;;  %v9469_v0 = vld [vmem:[%s28968_s3 + $0x20] sm:$0xff]  ;;  %v20040_v62 = vpack.c.bf16 %v9478_v40, %v9477_v56  ;;  %v30107_v3 = vmov 0.0  }
 0xb58   : > { %v19980_v31 = vpack.c.bf16 %v9092_v19, %v9091_v61  ;;  %v19983_v34 = vpack.c.bf16 %v9094_v15, %v9093_v54  ;;  %20003 = vmatprep.subr.bf16.mxu0 %v30095_v14  ;;  %v20025_v60 = vpack.c.bf16 %v9468_v20, %v9467_v25  ;;  %v9222_v19 = vld [vmem:[#allocation6 + $0x30] sm:$0xff]  ;;  %v9471_v54 = vld [vmem:[%s28968_s3 + $0x30] sm:$0xff]  ;;  %v9472_v15 = vld [vmem:[%s28968_s3 + $0x38] sm:$0xff]  ;;  %18118 = vmatprep.mubr.msk.f32.mxu0 %vm22062_vm12, %v30107_v3 }
 0xb59   : > { %v9230_v52 = vld [vmem:[#allocation6 + $0x70] sm:$0xff]  ;;  %v9480_v55 = vld [vmem:[%s28968_s3 + $0x78] sm:$0xff]  ;;  %v9235_v39 = vld [vmem:[#allocation6 + $0x98] sm:$0xff] }
 0xb5a   : > { %19978 = vmatpush1.bf16.msra.mxu1 %v19977_v27  ;;  %v9221_v27 = vld [vmem:[#allocation6 + $0x28] sm:$0xff]  ;;  %v20043_v32 = vpack.c.bf16 %v9480_v55, %v9479_v50  ;;  %v9234_v43 = vld [vmem:[#allocation6 + $0x90] sm:$0xff]  ;;  %v14548_v1 = vld [vmem:[%s28968_s3 + $0x108] sm:$0xff] }
 0xb5b   : > { %19979 = vmatprep.subr.bf16.mxu1 %v30095_v14  ;;  %20005 = vmatpush3.bf16.msra.mxu0 %v20004_v36  ;;  %v9231_v36 = vld [vmem:[#allocation6 + $0x78] sm:$0xff]  ;;  %v14546_v13 = vld [vmem:[%s28968_s3 + $0xf8] sm:$0xff]  ;;  %v14547_v63 = vld [vmem:[%s28968_s3 + $0x100] sm:$0xff] }
 0xb5c   : > { %20006 = vmatprep.subr.bf16.mxu0 %v30095_v14  ;;  %v14551_v10 = vld [vmem:[%s28968_s3 + $0x120] sm:$0xff] }
 0xb5e   : > { %19981 = vmatpush1.bf16.msra.mxu1 %v19980_v31  ;;  %v9223_v31 = vld [vmem:[#allocation6 + $0x38] sm:$0xff] }
 0xb5f   : > { %19982 = vmatprep.subr.bf16.mxu1 %v30095_v14  ;;  %20008 = vmatpush3.bf16.msra.mxu0 %v20007_v8  ;;  %v9233_v8 = vld [vmem:[#allocation6 + $0x88] sm:$0xff] }
 0xb60   : > { %20009 = vmatprep.subr.bf16.mxu0 %v30095_v14 }
 0xb62   : > { %19984 = vmatpush1.bf16.msra.mxu1 %v19983_v34  ;;  %v20031_v34 = vpack.c.bf16 %v9472_v15, %v9471_v54 }
 0xb63   : > { %19985 = vmatprep.subr.bf16.mxu1 %v30095_v14  ;;  %20011 = vmatpush3.bf16.msra.mxu0 %v20010_v42  ;;  %v14545_v42 = vld [vmem:[%s28968_s3 + $0xf0] sm:$0xff] }
 0xb64   : > { %20012 = vmatprep.subr.bf16.mxu0 %v30095_v14 }
 0xb66   : > { %19988 = vmatpush1.bf16.msk.msra.mxu1 %vm19987_vm10, %v19986_v51  ;;  %v9470_v51 = vld [vmem:[%s28968_s3 + $0x28] sm:$0xff] }
 0xb67   : > { %20014 = vmatpush3.bf16.msra.mxu0 %v20013_v12  ;;  %v20028_v61 = vpack.c.bf16 %v9470_v51, %v9469_v0  ;;  %v20019_v12 = vpack.c.bf16 %v14546_v13, %v14545_v42  ;;  %v14553_v51 = vld [vmem:[%s28968_s3 + $0x130] sm:$0xff] }
 0xb68   : > { %20015 = vmatprep.subr.bf16.mxu0 %v30095_v14 }
 0xb69   : > { %9191 = vmatmul.mubr.f32.vlgmr.msra.gmra.mrb[104].mxu1 %v9097_v35  ;;  %v9224_v35 = vld [vmem:[#allocation6 + $0x40] sm:$0xff] }
 0xb6a   : > { %14506 = vmatprep.mubr.msk.f32.mxu1 %vm9107_vm9, %v9100_v23  ;;  %v9473_v23 = vld [vmem:[%s28968_s3 + $0x40] sm:$0xff] }
 0xb6b   : > { %20017 = vmatpush3.bf16.msra.mxu0 %v20016_v29  ;;  %v20046_v29 = vpack.c.bf16 %v14548_v1, %v14547_v63 }
 0xb6c   : > { %20018 = vmatprep.subr.bf16.mxu0 %v30095_v14 }
 0xb6d   : > { %9196 = vmatmul.mubr.f32.gmra.mrb[106].mxu1 %v9099_v6  ;;  %v9474_v6 = vld [vmem:[%s28968_s3 + $0x48] sm:$0xff] }
 0xb6e   : > { %14507 = vmatprep.mubr.msk.f32.mxu1 %vm9107_vm9, %v9102_v16  ;;  %v9225_v16 = vld [vmem:[#allocation6 + $0x48] sm:$0xff] }
 0xb6f   : > { %20020 = vmatpush3.bf16.msra.mxu0 %v20019_v12 }
 0xb71   : > { %9201 = vmatmul.mubr.f32.gmra.mrb[108].mxu1 %v9101_v46  ;;  %v20034_v46 = vpack.c.bf16 %v9474_v6, %v9473_v23 }
 0xb72   : > { %14508 = vmatprep.mubr.msk.f32.mxu1 %vm9107_vm9, %v9104_v53  ;;  %v9226_v53 = vld [vmem:[#allocation6 + $0x50] sm:$0xff] }
 0xb75   : > { %9206 = vmatmul.mubr.f32.gmra.mrb[110].mxu1 %v9103_v28  ;;  %v9475_v28 = vld [vmem:[%s28968_s3 + $0x50] sm:$0xff] }
 0xb76   : > { %14509 = vmatprep.mubr.msk.f32.mxu1 %vm9107_vm9, %v9106_v33  ;;  %v9476_v33 = vld [vmem:[%s28968_s3 + $0x58] sm:$0xff] }
 0xb79   : > { %9211 = vmatmul.mubr.f32.gmra.mrb[112].mxu1 %v9105_v47  ;;  %v9227_v47 = vld [vmem:[#allocation6 + $0x58] sm:$0xff] }
 0xb7a   : > { %18056 = vmatprep.mubr.msk.f32.mxu1 %vm9236_vm11, %v9216_v2  ;;  %v20037_v2 = vpack.c.bf16 %v9476_v33, %v9475_v28  ;;  %v14556_v28 = vld [vmem:[%s28968_s3 + $0x148] sm:$0xff] }
 0xc3c   : > { %v9192_v22 = vpop.f32.mrb[104].mxu1 }
 0xc3d   : > { %v9194_v38 = vpop.f32.mrb[105].mxu1 }
 0xc3e   : > { %v14549_v38 = vld [vmem:[%s28968_s3 + $0x110] sm:$0xff] }
 0xc40   : > { %v9197_v18 = vpop.f32.mrb[106].mxu1 }
 0xc41   : > { %v19989_v26 = vpack.c.bf16 %v9197_v18, %v9192_v22  ;;  %v9199_v59 = vpop.f32.mrb[107].mxu1  ;;  %v14550_v18 = vld [vmem:[%s28968_s3 + $0x118] sm:$0xff] }
 0xc43   : > { %19990 = vmatprep.subr.bf16.mxu1 %v19989_v26 }
 0xc44   : > { %v9202_v5 = vpop.f32.mrb[108].mxu1  ;;  %19992 = vmatpush3.bf16.msra.mxu1 %v19989_v26 }
 0xc45   : > { %v9204_v11 = vpop.f32.mrb[109].mxu1 }
 0xc48   : > { %v9207_v4 = vpop.f32.mrb[110].mxu1 }
 0xc49   : > { %v19993_v17 = vpack.c.bf16 %v9207_v4, %v9202_v5  ;;  %v9209_v9 = vpop.f32.mrb[111].mxu1 }
 0xc4b   : > { %19994 = vmatprep.subr.bf16.mxu1 %v19993_v17 }
 0xc4c   : > { %19996 = vmatpush3.bf16.msra.mxu1 %v19993_v17  ;;  %v9212_v37 = vpop.f32.mrb[112].mxu1  ;;  %v20049_v17 = vpack.c.bf16 %v14550_v18, %v14549_v38  ;;  %v14559_v38 = vld [vmem:[%s28968_s3 + $0x160] sm:$0xff]  ;;  %v14560_v18 = vld [vmem:[%s28968_s3 + $0x168] sm:$0xff] }
 0xc4d   : > { %v9214_v49 = vpop.f32.mrb[113].mxu1  ;;  %18054 = vmatprep.subr.msk.mxu1 %vm980_vm0, %v9212_v37 }
 0xc50   : > { %18055 = vmatpush3.msk.msra.mxu1 %vm980_vm0, %v9212_v37  ;;  %v14552_v37 = vld [vmem:[%s28968_s3 + $0x128] sm:$0xff]  ;;  %vm12772_vm0 = vcmask 1044480  }
 0xc51   : > { %18057 = vmatmul.mubr.msk.f32.vlgmr.msra.gmra.mrb[114].mxu1 %vm9236_vm11, %v9217_v48  ;;  %20021 = vmatprep.subr.bf16.mxu1 %v30095_v14 }
 0xc52   : > { %18059 = vmatprep.mubr.msk.f32.mxu1 %vm9236_vm11, %v9218_v21  ;;  %20023 = vmatpush3.bf16.msra.mxu1 %v20022_v58 }
 0xc53   : > { %20024 = vmatprep.subr.bf16.mxu1 %v30095_v14 }
 0xc55   : > { %18060 = vmatmul.mubr.msk.f32.gmra.mrb[116].mxu1 %vm9236_vm11, %v9219_v44  ;;  %v20052_v44 = vpack.c.bf16 %v14552_v37, %v14551_v10  ;;  %v20064_v10 = vpack.c.bf16 %v14560_v18, %v14559_v38 }
 0xc56   : > { %18062 = vmatprep.mubr.msk.f32.mxu1 %vm9236_vm11, %v9220_v7  ;;  %20026 = vmatpush3.bf16.msra.mxu1 %v20025_v60 }
 0xc57   : > { %20027 = vmatprep.subr.bf16.mxu1 %v30095_v14 }
 0xc59   : > { %18063 = vmatmul.mubr.msk.f32.gmra.mrb[118].mxu1 %vm9236_vm11, %v9221_v27  ;;  %v14554_v27 = vld [vmem:[%s28968_s3 + $0x138] sm:$0xff] }
 0xc5a   : > { %18065 = vmatprep.mubr.msk.f32.mxu1 %vm9236_vm11, %v9222_v19  ;;  %20029 = vmatpush3.bf16.msra.mxu1 %v20028_v61  ;;  %v20055_v23 = vpack.c.bf16 %v14554_v27, %v14553_v51 }
 0xc5b   : > { %20030 = vmatprep.subr.bf16.mxu1 %v30095_v14 }
 0xc5d   : > { %18066 = vmatmul.mubr.msk.f32.gmra.mrb[120].mxu1 %vm9236_vm11, %v9223_v31 }
 0xc5e   : > { %18068 = vmatprep.mubr.msk.f32.mxu1 %vm9236_vm11, %v9224_v35  ;;  %20032 = vmatpush3.bf16.msra.mxu1 %v20031_v34 }
 0xc5f   : > { %20033 = vmatprep.subr.bf16.mxu1 %v30095_v14 }
 0xc61   : > { %18069 = vmatmul.mubr.msk.f32.gmra.mrb[122].mxu1 %vm9236_vm11, %v9225_v16 }
 0xc62   : > { %18071 = vmatprep.mubr.msk.f32.mxu1 %vm9236_vm11, %v9226_v53  ;;  %20035 = vmatpush3.bf16.msra.mxu1 %v20034_v46  ;;  %v14555_v53 = vld [vmem:[%s28968_s3 + $0x140] sm:$0xff] }
 0xc63   : > { %20036 = vmatprep.subr.bf16.mxu1 %v30095_v14 }
 0xc65   : > { %18072 = vmatmul.mubr.msk.f32.gmra.mrb[124].mxu1 %vm9236_vm11, %v9227_v47 }
 0xc66   : > { %18074 = vmatprep.mubr.msk.f32.mxu1 %vm9236_vm11, %v9228_v30  ;;  %20038 = vmatpush3.bf16.msra.mxu1 %v20037_v2 }
 0xc67   : > { %20039 = vmatprep.subr.bf16.mxu1 %v30095_v14 }
 0xc69   : > { %18075 = vmatmul.mubr.msk.f32.gmra.mrb[126].mxu1 %vm9236_vm11, %v9229_v45 }
 0xc6a   : > { %18077 = vmatprep.mubr.msk.f32.mxu1 %vm9236_vm11, %v9230_v52  ;;  %20041 = vmatpush3.bf16.msra.mxu1 %v20040_v62  ;;  %v20058_v62 = vpack.c.bf16 %v14556_v28, %v14555_v53 }
 0xc6b   : > { %20042 = vmatprep.subr.bf16.mxu1 %v30095_v14 }
 0xc6d   : > { %18078 = vmatmul.mubr.msk.f32.gmra.mrb[128].mxu1 %vm9236_vm11, %v9231_v36  ;;  %v14557_v36 = vld [vmem:[%s28968_s3 + $0x150] sm:$0xff] }
 0xc6e   : > { %18080 = vmatprep.mubr.msk.f32.mxu1 %vm9236_vm11, %v9232_v41  ;;  %20044 = vmatpush3.bf16.msra.mxu1 %v20043_v32  ;;  %v14558_v32 = vld [vmem:[%s28968_s3 + $0x158] sm:$0xff] }
 0xc6f   : > { %20045 = vmatprep.subr.bf16.mxu1 %v30095_v14  ;;  %v20061_v63 = vpack.c.bf16 %v14558_v32, %v14557_v36 }
 0xc71   : > { %18081 = vmatmul.mubr.msk.f32.gmra.mrb[130].mxu1 %vm9236_vm11, %v9233_v8 }
 0xc72   : > { %18083 = vmatprep.mubr.msk.f32.mxu1 %vm9236_vm11, %v9234_v43 }
 0xc75   : > { %18084 = vmatmul.mubr.msk.f32.gmra.mrb[132].mxu1 %vm9236_vm11, %v9235_v39 }
 0xc76   : > { %18195 = vmatprep.mubr.msk.f32.mxu1 %vm22062_vm12, %v30107_v3 }
 0xd24   : > { %v18058_v22 = vpop.f32.mrb[114].mxu1 }
 0xd25   : > { %v9515_v26 = vrot.slane %v18058_v22, 1  ;;  %v9858_v59 = vrot.slane %v18058_v22, 2  ;;  %v9366_v5 = vpop.f32.mrb[115].mxu1 }
 0xd26   : > { %v9514_v11 = vrot.slane %v9366_v5, 1  ;;  %v9857_v4 = vrot.slane %v9366_v5, 2  ;;  %18196 = vmatmul.mubr.f32.vlgmr.msra.gmra.mrb[134].mxu1 %v9366_v5 }
 0xd27   : > { %18198 = vmatprep.mubr.msk.f32.mxu1 %vm22062_vm12, %v30107_v3  ;;  %20047 = vmatpush3.bf16.msra.mxu1 %v20046_v29 }
 0xd28   : > { %v27109_v9 = vpop.f32.mrb[116].mxu1  ;;  %v9516_v24 = vsel %vm739_vm3, %v9514_v11, %v9515_v26  ;;  %20048 = vmatprep.subr.bf16.mxu1 %v30095_v14  ;;  %v27120_v49 = vsel %vm1840_vm5, %v9857_v4, %v9858_v59 }
 0xd29   : > { %v9519_v48 = vrot.slane %v27109_v9, 1  ;;  %v9862_v58 = vrot.slane %v27109_v9, 2  ;;  %v27124_v21 = vpop.f32.mrb[117].mxu1  ;;  %18119 = vmatmul.mubr.f32.vlgmr.msra.gmra.mrb[60].mxu0 %v9516_v24 }
 0xd2a   : > { %v9517_v25 = vrot.slane %v27124_v21, 1  ;;  %v9860_v20 = vrot.slane %v27124_v21, 2  ;;  %18199 = vmatmul.mubr.f32.gmra.mrb[136].mxu1 %v18058_v22  ;;  %18121 = vmatprep.mubr.msk.f32.mxu0 %vm22062_vm12, %v30107_v3 }
 0xd2b   : > { %18201 = vmatprep.mubr.msk.f32.mxu1 %vm22062_vm12, %v30107_v3  ;;  %20050 = vmatpush3.bf16.msra.mxu1 %v20049_v17 }
 0xd2c   : > { %v27132_v60 = vpop.f32.mrb[118].mxu1  ;;  %v9518_v7 = vsel %vm739_vm3, %v9515_v26, %v9517_v25  ;;  %v27136_v0 = vsel %vm739_vm3, %v9517_v25, %v9519_v48  ;;  %20051 = vmatprep.subr.bf16.mxu1 %v30095_v14  ;;  %v27146_v61 = vsel %vm1840_vm5, %v9858_v59, %v9860_v20  ;;  %v27149_v19 = vsel %vm1840_vm5, %v9860_v20, %v9862_v58  ;;  %v14561_v25 = vld [vmem:[%s28968_s3 + $0x170] sm:$0xff]  ;;  %v14562_v20 = vld [vmem:[%s28968_s3 + $0x178] sm:$0xff] }
 0xd2d   : > { %v27151_v54 = vpop.f32.mrb[119].mxu1  ;;  %18122 = vmatmul.mubr.f32.gmra.mrb[62].mxu0 %v9518_v7  ;;  %v9523_v15 = vrot.slane %v27132_v60, 1  ;;  %v9866_v31 = vrot.slane %v27132_v60, 2 }
 0xd2e   : > { %18202 = vmatmul.mubr.f32.gmra.mrb[138].mxu1 %v27124_v21  ;;  %18124 = vmatprep.mubr.msk.f32.mxu0 %vm22062_vm12, %v30107_v3  ;;  %v9521_v34 = vrot.slane %v27151_v54, 1  ;;  %v9864_v35 = vrot.slane %v27151_v54, 2 }
 0xd2f   : > { %18204 = vmatprep.mubr.msk.f32.mxu1 %vm22062_vm12, %v30107_v3  ;;  %20053 = vmatpush3.bf16.msra.mxu1 %v20052_v44 }
 0xd30   : > { %v27162_v6 = vpop.f32.mrb[120].mxu1  ;;  %v27165_v16 = vsel %vm739_vm3, %v9519_v48, %v9521_v34  ;;  %v27168_v46 = vsel %vm739_vm3, %v9521_v34, %v9523_v15  ;;  %20054 = vmatprep.subr.bf16.mxu1 %v30095_v14  ;;  %v27178_v33 = vsel %vm1840_vm5, %v9862_v58, %v9864_v35  ;;  %v27181_v47 = vsel %vm1840_vm5, %v9864_v35, %v9866_v31 }
 0xd31   : > { %18125 = vmatmul.mubr.f32.gmra.mrb[64].mxu0 %v27136_v0  ;;  %v27184_v2 = vpop.f32.mrb[121].mxu1  ;;  %v9527_v30 = vrot.slane %v27162_v6, 1  ;;  %v9870_v56 = vrot.slane %v27162_v6, 2  ;;  %v20067_v35 = vpack.c.bf16 %v14562_v20, %v14561_v25  ;;  %v14563_v25 = vld [vmem:[%s28968_s3 + $0x180] sm:$0xff]  ;;  %v14564_v20 = vld [vmem:[%s28968_s3 + $0x188] sm:$0xff] }
 0xd32   : > { %18205 = vmatmul.mubr.f32.gmra.mrb[140].mxu1 %v27109_v9  ;;  %18127 = vmatprep.mubr.msk.f32.mxu0 %vm22062_vm12, %v30107_v3  ;;  %v9525_v40 = vrot.slane %v27184_v2, 1  ;;  %v9868_v45 = vrot.slane %v27184_v2, 2 }
 0xd33   : > { %18207 = vmatprep.mubr.msk.f32.mxu1 %vm22062_vm12, %v30107_v3  ;;  %20056 = vmatpush3.bf16.msra.mxu1 %v20055_v23 }
 0xd34   : > { %v27195_v52 = vpop.f32.mrb[122].mxu1  ;;  %v27198_v50 = vsel %vm739_vm3, %v9523_v15, %v9525_v40  ;;  %v27201_v55 = vsel %vm739_vm3, %v9525_v40, %v9527_v30  ;;  %20057 = vmatprep.subr.bf16.mxu1 %v30095_v14  ;;  %v27211_v41 = vsel %vm1840_vm5, %v9866_v31, %v9868_v45  ;;  %v27214_v8 = vsel %vm1840_vm5, %v9868_v45, %v9870_v56 }
 0xd35   : > { %18128 = vmatmul.mubr.f32.gmra.mrb[66].mxu0 %v27165_v16  ;;  %v27217_v43 = vpop.f32.mrb[123].mxu1  ;;  %v9531_v39 = vrot.slane %v27195_v52, 1  ;;  %v9874_v42 = vrot.slane %v27195_v52, 2 }
 0xd36   : > { %18208 = vmatmul.mubr.f32.gmra.mrb[142].mxu1 %v27151_v54  ;;  %18130 = vmatprep.mubr.msk.f32.mxu0 %vm22062_vm12, %v30107_v3  ;;  %v9529_v13 = vrot.slane %v27217_v43, 1  ;;  %v9872_v12 = vrot.slane %v27217_v43, 2 }
 0xd37   : > { %18210 = vmatprep.mubr.msk.f32.mxu1 %vm22062_vm12, %v30107_v3  ;;  %20059 = vmatpush3.bf16.msra.mxu1 %v20058_v62 }
 0xd38   : > { %v27228_v1 = vpop.f32.mrb[124].mxu1  ;;  %v27231_v29 = vsel %vm739_vm3, %v9527_v30, %v9529_v13  ;;  %v27234_v22 = vsel %vm739_vm3, %v9529_v13, %v9531_v39  ;;  %20060 = vmatprep.subr.bf16.mxu1 %v30095_v14  ;;  %v27244_v26 = vsel %vm1840_vm5, %v9870_v56, %v9872_v12  ;;  %v27247_v59 = vsel %vm1840_vm5, %v9872_v12, %v9874_v42 }
 0xd39   : > { %18131 = vmatmul.mubr.f32.gmra.mrb[68].mxu0 %v27168_v46  ;;  %v27250_v5 = vpop.f32.mrb[125].mxu1  ;;  %v9535_v11 = vrot.slane %v27228_v1, 1  ;;  %v9878_v4 = vrot.slane %v27228_v1, 2 }
 0xd3a   : > { %18211 = vmatmul.mubr.f32.gmra.mrb[144].mxu1 %v27132_v60  ;;  %18133 = vmatprep.mubr.msk.f32.mxu0 %vm22062_vm12, %v30107_v3  ;;  %v9533_v17 = vrot.slane %v27250_v5, 1  ;;  %v9876_v24 = vrot.slane %v27250_v5, 2 }
 0xd3b   : > { %18213 = vmatprep.mubr.msk.f32.mxu1 %vm22062_vm12, %v30107_v3  ;;  %20062 = vmatpush3.bf16.msra.mxu1 %v20061_v63 }
 0xd3c   : > { %v27261_v37 = vpop.f32.mrb[126].mxu1  ;;  %v27264_v48 = vsel %vm739_vm3, %v9531_v39, %v9533_v17  ;;  %v27267_v58 = vsel %vm739_vm3, %v9533_v17, %v9535_v11  ;;  %20063 = vmatprep.subr.bf16.mxu1 %v30095_v14  ;;  %v27277_v44 = vsel %vm1840_vm5, %v9874_v42, %v9876_v24  ;;  %v27280_v7 = vsel %vm1840_vm5, %v9876_v24, %v9878_v4 }
 0xd3d   : > { %18134 = vmatmul.mubr.f32.gmra.mrb[70].mxu0 %v27198_v50  ;;  %v27283_v51 = vpop.f32.mrb[127].mxu1  ;;  %v9539_v27 = vrot.slane %v27261_v37, 1  ;;  %v9882_v15 = vrot.slane %v27261_v37, 2 }
 0xd3e   : > { %18214 = vmatmul.mubr.f32.gmra.mrb[146].mxu1 %v27184_v2  ;;  %18136 = vmatprep.mubr.msk.f32.mxu0 %vm22062_vm12, %v30107_v3  ;;  %v9537_v31 = vrot.slane %v27283_v51, 1  ;;  %v9880_v34 = vrot.slane %v27283_v51, 2 }
 0xd3f   : > { %18216 = vmatprep.mubr.msk.f32.mxu1 %vm22062_vm12, %v30107_v3  ;;  %20065 = vmatpush3.bf16.msra.mxu1 %v20064_v10 }
 0xd40   : > { %v27294_v23 = vpop.f32.mrb[128].mxu1  ;;  %v27297_v53 = vsel %vm739_vm3, %v9535_v11, %v9537_v31  ;;  %v27300_v28 = vsel %vm739_vm3, %v9537_v31, %v9539_v27  ;;  %20066 = vmatprep.subr.bf16.mxu1 %v30095_v14  ;;  %v27304_v30 = vsel %vm1840_vm5, %v9878_v4, %v9880_v34  ;;  %v27307_v56 = vsel %vm1840_vm5, %v9880_v34, %v9882_v15  ;;  %v14566_v31 = vld [vmem:[%s28968_s3 + $0x198] sm:$0xff] }
 0xd41   : > { %18137 = vmatmul.mubr.f32.gmra.mrb[72].mxu0 %v27201_v55  ;;  %v9543_v40 = vrot.slane %v27294_v23, 1  ;;  %v9886_v45 = vrot.slane %v27294_v23, 2  ;;  %v27312_v62 = vpop.f32.mrb[129].mxu1 }
 0xd42   : > { %18217 = vmatmul.mubr.f32.gmra.mrb[148].mxu1 %v27162_v6  ;;  %18139 = vmatprep.mubr.msk.f32.mxu0 %vm22062_vm12, %v30107_v3  ;;  %v9541_v36 = vrot.slane %v27312_v62, 1  ;;  %v9884_v32 = vrot.slane %v27312_v62, 2 }
 0xd43   : > { %18219 = vmatprep.mubr.msk.f32.mxu1 %vm22062_vm12, %v30107_v3  ;;  %20068 = vmatpush3.bf16.msra.mxu1 %v20067_v35  ;;  %v14567_v35 = vld [vmem:[%s28968_s3 + $0x1a0] sm:$0xff] }
 0xd44   : > { %v27321_v39 = vpop.f32.mrb[130].mxu1  ;;  %v27324_v42 = vsel %vm739_vm3, %v9539_v27, %v9541_v36  ;;  %v27327_v13 = vsel %vm739_vm3, %v9541_v36, %v9543_v40  ;;  %20069 = vmatprep.subr.bf16.mxu1 %v30095_v14  ;;  %v27331_v12 = vsel %vm1840_vm5, %v9882_v15, %v9884_v32  ;;  %v27334_v63 = vsel %vm1840_vm5, %v9884_v32, %v9886_v45  ;;  %v14565_v15 = vld [vmem:[%s28968_s3 + $0x190] sm:$0xff]  ;;  %v14570_v36 = vld [vmem:[%s28968_s3 + $0x1b8] sm:$0xff]  ;;  %v14571_v32 = vld [vmem:[%s28968_s3 + $0x1c0] sm:$0xff] }
 0xd45   : > { %18140 = vmatmul.mubr.f32.gmra.mrb[74].mxu0 %v27231_v29  ;;  %v27337_v38 = vpop.f32.mrb[131].mxu1  ;;  %v20070_v27 = vpack.c.bf16 %v14564_v20, %v14563_v25  ;;  %v20073_v34 = vpack.c.bf16 %v14566_v31, %v14565_v15  ;;  %v14572_v25 = vld [vmem:[%s28968_s3 + $0x1c8] sm:$0xff]  ;;  %v14574_v15 = vld [vmem:[%s28968_s3 + $0x1d8] sm:$0xff] }
 0xd46   : > { %18220 = vmatmul.mubr.f32.gmra.mrb[150].mxu1 %v27217_v43  ;;  %18142 = vmatprep.mubr.msk.f32.mxu0 %vm22062_vm12, %v30107_v3  ;;  %v10249_v18 = vrot.slane %v27337_v38, 1  ;;  %v10427_v11 = vrot.slane %v27337_v38, 2  ;;  %v20082_v20 = vpack.c.bf16 %v14572_v25, %v14571_v32  ;;  %v14577_v32 = vld [vmem:[%s28968_s3 + $0x1f0] sm:$0xff]  ;;  %v14578_v25 = vld [vmem:[%s28968_s3 + $0x1f8] sm:$0xff] }
 0xd47   : > { %18222 = vmatprep.mubr.msk.f32.mxu1 %vm22062_vm12, %v30107_v3 }
 0xd48   : > { %v27349_v4 = vsel %vm739_vm3, %v9543_v40, %v10249_v18  ;;  %v27354_v17 = vsel %vm1840_vm5, %v9886_v45, %v10427_v11  ;;  %v27372_v24 = vpop.f32.mrb[132].mxu1  ;;  %v14568_v40 = vld [vmem:[%s28968_s3 + $0x1a8] sm:$0xff]  ;;  %v14569_v45 = vld [vmem:[%s28968_s3 + $0x1b0] sm:$0xff] }
 0xd49   : > { %18143 = vmatmul.mubr.f32.gmra.mrb[76].mxu0 %v27234_v22  ;;  %v27376_v10 = vpop.f32.mrb[133].mxu1 }
 0xd4a   : > { %18223 = vmatmul.mubr.f32.gmra.mrb[152].mxu1 %v27195_v52  ;;  %18145 = vmatprep.mubr.msk.f32.mxu0 %vm22062_vm12, %v30107_v3 }
 0xd4b   : > { %18225 = vmatprep.mubr.msk.f32.mxu1 %vm22062_vm12, %v30107_v3 }
 0xd4d   : > { %18146 = vmatmul.mubr.f32.gmra.mrb[78].mxu0 %v27264_v48 }
 0xd4e   : > { %18226 = vmatmul.mubr.f32.gmra.mrb[154].mxu1 %v27250_v5  ;;  %18148 = vmatprep.mubr.msk.f32.mxu0 %vm22062_vm12, %v30107_v3 }
 0xd4f   : > { %18228 = vmatprep.mubr.msk.f32.mxu1 %vm22062_vm12, %v30107_v3 }
 0xd51   : > { %18149 = vmatmul.mubr.f32.gmra.mrb[80].mxu0 %v27267_v58 }
 0xd52   : > { %18229 = vmatmul.mubr.f32.gmra.mrb[156].mxu1 %v27228_v1  ;;  %18151 = vmatprep.mubr.msk.f32.mxu0 %vm22062_vm12, %v30107_v3 }
 0xd53   : > { %18231 = vmatprep.mubr.msk.f32.mxu1 %vm22062_vm12, %v30107_v3 }
 0xd55   : > { %18152 = vmatmul.mubr.f32.gmra.mrb[82].mxu0 %v27297_v53 }
 0xd56   : > { %18232 = vmatmul.mubr.f32.gmra.mrb[158].mxu1 %v27283_v51  ;;  %18154 = vmatprep.mubr.msk.f32.mxu0 %vm22062_vm12, %v30107_v3 }
 0xd57   : > { %18234 = vmatprep.mubr.msk.f32.mxu1 %vm22062_vm12, %v30107_v3 }
 0xd59   : > { %18155 = vmatmul.mubr.f32.gmra.mrb[84].mxu0 %v27300_v28 }
 0xd5a   : > { %18235 = vmatmul.mubr.f32.gmra.mrb[160].mxu1 %v27261_v37  ;;  %18157 = vmatprep.mubr.msk.f32.mxu0 %vm22062_vm12, %v30107_v3 }
 0xd5b   : > { %18237 = vmatprep.mubr.msk.f32.mxu1 %vm22062_vm12, %v30107_v3 }
 0xd5d   : > { %18158 = vmatmul.mubr.f32.gmra.mrb[86].mxu0 %v27324_v42 }
 0xd5e   : > { %18238 = vmatmul.mubr.f32.gmra.mrb[162].mxu1 %v27312_v62  ;;  %18160 = vmatprep.mubr.msk.f32.mxu0 %vm22062_vm12, %v30107_v3 }
 0xd5f   : > { %18272 = vmatprep.mubr.msk.f32.mxu1 %vm22062_vm12, %v30107_v3 }
 0xd61   : > { %18161 = vmatmul.mubr.f32.gmra.mrb[88].mxu0 %v27327_v13 }
 0xd62   : > { %18273 = vmatmul.mubr.f32.vlgmr.msra.gmra.mrb[134].mxu1 %v27120_v49  ;;  %v20076_v49 = vpack.c.bf16 %v14568_v40, %v14567_v35  ;;  %v14576_v35 = vld [vmem:[%s28968_s3 + $0x1e8] sm:$0xff]  ;;  %v10251_v40 = vrot.slane %v27321_v39, 1 }
 0xd63   : > { %18275 = vmatprep.mubr.msk.f32.mxu1 %vm22062_vm12, %v30107_v3  ;;  %20071 = vmatpush3.bf16.msra.mxu1 %v20070_v27  ;;  %v14573_v27 = vld [vmem:[%s28968_s3 + $0x1d0] sm:$0xff] }
 0xd64   : > { %20072 = vmatprep.subr.bf16.mxu1 %v30095_v14  ;;  %v20085_v31 = vpack.c.bf16 %v14574_v15, %v14573_v27 }
 0xd66   : > { %18276 = vmatmul.mubr.f32.gmra.mrb[136].mxu1 %v27146_v61  ;;  %v20079_v61 = vpack.c.bf16 %v14570_v36, %v14569_v45  ;;  %v10779_v45 = vrot.slane %v27376_v10, 1  ;;  %v10957_v36 = vrot.slane %v27376_v10, 2 }
 0xd67   : > { %18278 = vmatprep.mubr.msk.f32.mxu1 %vm22062_vm12, %v30107_v3  ;;  %20074 = vmatpush3.bf16.msra.mxu1 %v20073_v34  ;;  %v14575_v34 = vld [vmem:[%s28968_s3 + $0x1e0] sm:$0xff] }
 0xd68   : > { %20075 = vmatprep.subr.bf16.mxu1 %v30095_v14  ;;  %v27484_v15 = vsel %vm739_vm3, %v10251_v40, %v10779_v45 }
 0xd6a   : > { %18279 = vmatmul.mubr.f32.gmra.mrb[138].mxu1 %v27149_v19 }
 0xd6b   : > { %18281 = vmatprep.mubr.msk.f32.mxu1 %vm22062_vm12, %v30107_v3  ;;  %20077 = vmatpush3.bf16.msra.mxu1 %v20076_v49  ;;  %v10429_v49 = vrot.slane %v27321_v39, 2 }
 0xd6c   : > { %20078 = vmatprep.subr.bf16.mxu1 %v30095_v14 }
 0xd6d   : > { %v27481_v27 = vsel %vm1840_vm5, %v10427_v11, %v10429_v49  ;;  %v10959_v11 = vrot.slane %v27372_v24, 2 }
 0xd6e   : > { %18282 = vmatmul.mubr.f32.gmra.mrb[140].mxu1 %v27178_v33 }
 0xd6f   : > { %18284 = vmatprep.mubr.msk.f32.mxu1 %vm22062_vm12, %v30107_v3  ;;  %20080 = vmatpush3.bf16.msra.mxu1 %v20079_v61  ;;  %v20088_v61 = vpack.c.bf16 %v14576_v35, %v14575_v34  ;;  %v20091_v34 = vpack.c.bf16 %v14578_v25, %v14577_v32  ;;  %v14579_v35 = vld [vmem:[%s28968_s3 + $0x200] sm:$0xff]  ;;  %v14581_v32 = vld [vmem:[%s28968_s3 + $0x210] sm:$0xff]  ;;  %v14582_v25 = vld [vmem:[%s28968_s3 + $0x218] sm:$0xff] }
 0xd70   : > { %20081 = vmatprep.subr.bf16.mxu1 %v30095_v14 }
 0xd72   : > { %18285 = vmatmul.mubr.f32.gmra.mrb[142].mxu1 %v27181_v47 }
 0xd73   : > { %18287 = vmatprep.mubr.msk.f32.mxu1 %vm22062_vm12, %v30107_v3  ;;  %20083 = vmatpush3.bf16.msra.mxu1 %v20082_v20  ;;  %v27476_v20 = vsel %vm739_vm3, %v10249_v18, %v10251_v40  ;;  %v10781_v18 = vrot.slane %v27372_v24, 1  ;;  %v14580_v40 = vld [vmem:[%s28968_s3 + $0x208] sm:$0xff] }
 0xd74   : > { %20084 = vmatprep.subr.bf16.mxu1 %v30095_v14  ;;  %v20094_v24 = vpack.c.bf16 %v14580_v40, %v14579_v35  ;;  %v14587_v35 = vld [vmem:[%s28968_s3 + $0x240] sm:$0xff]  ;;  %v14588_v40 = vld [vmem:[%s28968_s3 + $0x248] sm:$0xff] }
 0xd76   : > { %18288 = vmatmul.mubr.f32.gmra.mrb[144].mxu1 %v27211_v41 }
 0xd77   : > { %18290 = vmatprep.mubr.msk.f32.mxu1 %vm22062_vm12, %v30107_v3  ;;  %20086 = vmatpush3.bf16.msra.mxu1 %v20085_v31  ;;  %v27487_v31 = vsel %vm1840_vm5, %v10429_v49, %v10957_v36  ;;  %v27525_v49 = vsel %vm739_vm3, %v10779_v45, %v10781_v18  ;;  %v20097_v45 = vpack.c.bf16 %v14582_v25, %v14581_v32  ;;  %v14585_v18 = vld [vmem:[%s28968_s3 + $0x230] sm:$0xff]  ;;  %v14590_v25 = vld [vmem:[%s28968_s3 + $0x258] sm:$0xff] }
 0xd78   : > { %20087 = vmatprep.subr.bf16.mxu1 %v30095_v14  ;;  %v14589_v32 = vld [vmem:[%s28968_s3 + $0x250] sm:$0xff] }
 0xd7a   : > { %18291 = vmatmul.mubr.f32.gmra.mrb[146].mxu1 %v27214_v8 }
 0xd7b   : > { %18293 = vmatprep.mubr.msk.f32.mxu1 %vm22062_vm12, %v30107_v3  ;;  %20089 = vmatpush3.bf16.msra.mxu1 %v20088_v61  ;;  %v27528_v61 = vsel %vm1840_vm5, %v10957_v36, %v10959_v11  ;;  %v14583_v36 = vld [vmem:[%s28968_s3 + $0x220] sm:$0xff]  ;;  %v14586_v11 = vld [vmem:[%s28968_s3 + $0x238] sm:$0xff] }
 0xd7c   : > { %20090 = vmatprep.subr.bf16.mxu1 %v30095_v14 }
 0xd7e   : > { %18294 = vmatmul.mubr.f32.gmra.mrb[148].mxu1 %v27244_v26 }
 0xd7f   : > { %18296 = vmatprep.mubr.msk.f32.mxu1 %vm22062_vm12, %v30107_v3  ;;  %20092 = vmatpush3.bf16.msra.mxu1 %v20091_v34  ;;  %v14584_v34 = vld [vmem:[%s28968_s3 + $0x228] sm:$0xff] }
 0xd80   : > { %20093 = vmatprep.subr.bf16.mxu1 %v30095_v14 }
 0xd82   : > { %18297 = vmatmul.mubr.f32.gmra.mrb[150].mxu1 %v27247_v59 }
 0xd83   : > { %18299 = vmatprep.mubr.msk.f32.mxu1 %vm22062_vm12, %v30107_v3 }
 0xd86   : > { %18300 = vmatmul.mubr.f32.gmra.mrb[152].mxu1 %v27277_v44 }
 0xd87   : > { %18302 = vmatprep.mubr.msk.f32.mxu1 %vm22062_vm12, %v30107_v3 }
 0xd8a   : > { %18303 = vmatmul.mubr.f32.gmra.mrb[154].mxu1 %v27280_v7 }
 0xd8b   : > { %18305 = vmatprep.mubr.msk.f32.mxu1 %vm22062_vm12, %v30107_v3 }
 0xd8e   : > { %18306 = vmatmul.mubr.f32.gmra.mrb[156].mxu1 %v27304_v30 }
 0xd8f   : > { %18308 = vmatprep.mubr.msk.f32.mxu1 %vm22062_vm12, %v30107_v3 }
 0xd92   : > { %18309 = vmatmul.mubr.f32.gmra.mrb[158].mxu1 %v27307_v56 }
 0xd93   : > { %18311 = vmatprep.mubr.msk.f32.mxu1 %vm22062_vm12, %v30107_v3 }
 0xd96   : > { %18312 = vmatmul.mubr.f32.gmra.mrb[160].mxu1 %v27331_v12 }
 0xd97   : > { %18314 = vmatprep.mubr.msk.f32.mxu1 %vm22062_vm12, %v30107_v3 }
 0xd9a   : > { %18315 = vmatmul.mubr.f32.gmra.mrb[162].mxu1 %v27334_v63 }
 0xd9b   : > { %18349 = vmatprep.mubr.msk.f32.mxu1 %vm22062_vm12, %v30107_v3 }
 0xd9e   : > { %18350 = vmatmul.mubr.f32.vlgmr.msra.gmra.mrb[134].mxu1 %v27124_v21  ;;  %v20100_v21 = vpack.c.bf16 %v14584_v34, %v14583_v36  ;;  %v14591_v36 = vld [vmem:[%s28968_s3 + $0x260] sm:$0xff]  ;;  %v14592_v34 = vld [vmem:[%s28968_s3 + $0x268] sm:$0xff] }
 0xd9f   : > { %18352 = vmatprep.mubr.msk.f32.mxu1 %vm22062_vm12, %v30107_v3  ;;  %20095 = vmatpush3.bf16.msra.mxu1 %v20094_v24  ;;  %v20106_v24 = vpack.c.bf16 %v14588_v40, %v14587_v35  ;;  %v14595_v35 = vld [vmem:[%s28968_s3 + $0x280] sm:$0xff]  ;;  %v14596_v40 = vld [vmem:[%s28968_s3 + $0x288] sm:$0xff] }
 0xda0   : > { %20096 = vmatprep.subr.bf16.mxu1 %v30095_v14 }
 0xda2   : > { %18353 = vmatmul.mubr.f32.gmra.mrb[136].mxu1 %v27109_v9  ;;  %v20103_v9 = vpack.c.bf16 %v14586_v11, %v14585_v18  ;;  %v14593_v18 = vld [vmem:[%s28968_s3 + $0x270] sm:$0xff]  ;;  %v14594_v11 = vld [vmem:[%s28968_s3 + $0x278] sm:$0xff] }
 0xda3   : > { %18355 = vmatprep.mubr.msk.f32.mxu1 %vm22062_vm12, %v30107_v3  ;;  %20098 = vmatpush3.bf16.msra.mxu1 %v20097_v45  ;;  %v20109_v45 = vpack.c.bf16 %v14590_v25, %v14589_v32  ;;  %v14597_v32 = vld [vmem:[%s28968_s3 + $0x290] sm:$0xff]  ;;  %v14598_v25 = vld [vmem:[%s28968_s3 + $0x298] sm:$0xff] }
 0xda4   : > { %20099 = vmatprep.subr.bf16.mxu1 %v30095_v14 }
 0xda6   : > { %18356 = vmatmul.mubr.f32.gmra.mrb[138].mxu1 %v27151_v54 }
 0xda7   : > { %18358 = vmatprep.mubr.msk.f32.mxu1 %vm22062_vm12, %v30107_v3  ;;  %20101 = vmatpush3.bf16.msra.mxu1 %v20100_v21  ;;  %v20112_v21 = vpack.c.bf16 %v14592_v34, %v14591_v36  ;;  %v14599_v36 = vld [vmem:[%s28968_s3 + $0x2a0] sm:$0xff]  ;;  %v14600_v34 = vld [vmem:[%s28968_s3 + $0x2a8] sm:$0xff] }
 0xda8   : > { %20102 = vmatprep.subr.bf16.mxu1 %v30095_v14 }
 0xdaa   : > { %18359 = vmatmul.mubr.f32.gmra.mrb[140].mxu1 %v27132_v60 }
 0xdab   : > { %18361 = vmatprep.mubr.msk.f32.mxu1 %vm22062_vm12, %v30107_v3  ;;  %20104 = vmatpush3.bf16.msra.mxu1 %v20103_v9  ;;  %v20115_v9 = vpack.c.bf16 %v14594_v11, %v14593_v18  ;;  %v14602_v18 = vld [vmem:[%s28968_s3 + $0x2b8] sm:$0xff]  ;;  %v14603_v11 = vld [vmem:[%s28968_s3 + $0x2c0] sm:$0xff] }
 0xdac   : > { %20105 = vmatprep.subr.bf16.mxu1 %v30095_v14 }
 0xdae   : > { %18362 = vmatmul.mubr.f32.gmra.mrb[142].mxu1 %v27184_v2 }
 0xdaf   : > { %18364 = vmatprep.mubr.msk.f32.mxu1 %vm22062_vm12, %v30107_v3  ;;  %20107 = vmatpush3.bf16.msra.mxu1 %v20106_v24  ;;  %v20118_v24 = vpack.c.bf16 %v14596_v40, %v14595_v35  ;;  %v14605_v40 = vld [vmem:[%s28968_s3 + $0x2d0] sm:$0xff] }
 0xdb0   : > { %20108 = vmatprep.subr.bf16.mxu1 %v30095_v14 }
 0xdb2   : > { %18365 = vmatmul.mubr.f32.gmra.mrb[144].mxu1 %v27162_v6 }
 0xdb3   : > { %18367 = vmatprep.mubr.msk.f32.mxu1 %vm22062_vm12, %v30107_v3  ;;  %20110 = vmatpush3.bf16.msra.mxu1 %v20109_v45  ;;  %v20121_v45 = vpack.c.bf16 %v14598_v25, %v14597_v32  ;;  %v14607_v25 = vld [vmem:[%s28968_s3 + $0x2e0] sm:$0xff] }
 0xdb4   : > { %20111 = vmatprep.subr.bf16.mxu1 %v30095_v14 }
 0xdb6   : > { %18368 = vmatmul.mubr.f32.gmra.mrb[146].mxu1 %v27217_v43 }
 0xdb7   : > { %18370 = vmatprep.mubr.msk.f32.mxu1 %vm22062_vm12, %v30107_v3  ;;  %20113 = vmatpush3.bf16.msra.mxu1 %v20112_v21  ;;  %v14601_v21 = vld [vmem:[%s28968_s3 + $0x2b0] sm:$0xff] }
 0xdb8   : > { %20114 = vmatprep.subr.bf16.mxu1 %v30095_v14 }
 0xdba   : > { %18371 = vmatmul.mubr.f32.gmra.mrb[148].mxu1 %v27195_v52 }
 0xdbb   : > { %18373 = vmatprep.mubr.msk.f32.mxu1 %vm22062_vm12, %v30107_v3  ;;  %20116 = vmatpush3.bf16.msra.mxu1 %v20115_v9  ;;  %v14604_v9 = vld [vmem:[%s28968_s3 + $0x2c8] sm:$0xff] }
 0xdbc   : > { %20117 = vmatprep.subr.bf16.mxu1 %v30095_v14  ;;  %v20130_v35 = vpack.c.bf16 %v14604_v9, %v14603_v11 }
 0xdbe   : > { %18374 = vmatmul.mubr.f32.gmra.mrb[150].mxu1 %v27250_v5 }
 0xdbf   : > { %18376 = vmatprep.mubr.msk.f32.mxu1 %vm22062_vm12, %v30107_v3 }
 0xdc2   : > { %18377 = vmatmul.mubr.f32.gmra.mrb[152].mxu1 %v27228_v1 }
 0xdc3   : > { %18379 = vmatprep.mubr.msk.f32.mxu1 %vm22062_vm12, %v30107_v3 }
 0xdc6   : > { %18380 = vmatmul.mubr.f32.gmra.mrb[154].mxu1 %v27283_v51 }
 0xdc7   : > { %18382 = vmatprep.mubr.msk.f32.mxu1 %vm22062_vm12, %v30107_v3 }
 0xdca   : > { %18383 = vmatmul.mubr.f32.gmra.mrb[156].mxu1 %v27261_v37 }
 0xdcb   : > { %18385 = vmatprep.mubr.msk.f32.mxu1 %vm22062_vm12, %v30107_v3 }
 0xdce   : > { %18386 = vmatmul.mubr.f32.gmra.mrb[158].mxu1 %v27312_v62 }
 0xdcf   : > { %18388 = vmatprep.mubr.msk.f32.mxu1 %vm22062_vm12, %v30107_v3 }
 0xdd2   : > { %18389 = vmatmul.mubr.f32.gmra.mrb[160].mxu1 %v27294_v23 }
 0xdd3   : > { %18391 = vmatprep.mubr.msk.f32.mxu1 %vm22062_vm12, %v30107_v3 }
 0xdd6   : > { %18392 = vmatmul.mubr.f32.gmra.mrb[162].mxu1 %v27337_v38 }
 0xdd7   : > { %18426 = vmatprep.mubr.msk.f32.mxu1 %vm22062_vm12, %v30107_v3 }
 0xdda   : > { %18427 = vmatmul.mubr.f32.vlgmr.msra.gmra.mrb[134].mxu1 %v27136_v0  ;;  %v20124_v0 = vpack.c.bf16 %v14600_v34, %v14599_v36  ;;  %v14609_v34 = vld [vmem:[%s28968_s3 + $0x2f0] sm:$0xff] }
 0xddb   : > { %18429 = vmatprep.mubr.msk.f32.mxu1 %vm22062_vm12, %v30107_v3  ;;  %20119 = vmatpush3.bf16.msra.mxu1 %v20118_v24  ;;  %v14606_v24 = vld [vmem:[%s28968_s3 + $0x2d8] sm:$0xff] }
 0xddc   : > { %20120 = vmatprep.subr.bf16.mxu1 %v30095_v14  ;;  %v20133_v32 = vpack.c.bf16 %v14606_v24, %v14605_v40 }
 0xdde   : > { %18430 = vmatmul.mubr.f32.gmra.mrb[136].mxu1 %v27165_v16  ;;  %v20127_v16 = vpack.c.bf16 %v14602_v18, %v14601_v21 }
 0xddf   : > { %18432 = vmatprep.mubr.msk.f32.mxu1 %vm22062_vm12, %v30107_v3  ;;  %20122 = vmatpush3.bf16.msra.mxu1 %v20121_v45  ;;  %v14608_v45 = vld [vmem:[%s28968_s3 + $0x2e8] sm:$0xff] }
 0xde0   : > { %20123 = vmatprep.subr.bf16.mxu1 %v30095_v14  ;;  %v20136_v36 = vpack.c.bf16 %v14608_v45, %v14607_v25 }
 0xde2   : > { %18433 = vmatmul.mubr.f32.gmra.mrb[138].mxu1 %v27168_v46 }
 0xde3   : > { %18435 = vmatprep.mubr.msk.f32.mxu1 %vm22062_vm12, %v30107_v3  ;;  %20125 = vmatpush3.bf16.msra.mxu1 %v20124_v0  ;;  %v14610_v0 = vld [vmem:[%s28968_s3 + $0x2f8] sm:$0xff] }
 0xde4   : > { %20126 = vmatprep.subr.bf16.mxu1 %v30095_v14  ;;  %v20139_v21 = vpack.c.bf16 %v14610_v0, %v14609_v34  ;;  %v14611_v34 = vld [vmem:[%s28968_s3 + $0x300] sm:$0xff]  ;;  %v14612_v0 = vld [vmem:[%s28968_s3 + $0x308] sm:$0xff] }
 0xde6   : > { %18436 = vmatmul.mubr.f32.gmra.mrb[140].mxu1 %v27198_v50 }
 0xde7   : > { %18438 = vmatprep.mubr.msk.f32.mxu1 %vm22062_vm12, %v30107_v3  ;;  %20128 = vmatpush3.bf16.msra.mxu1 %v20127_v16 }
 0xde8   : > { %20129 = vmatprep.subr.bf16.mxu1 %v30095_v14 }
 0xdea   : > { %18439 = vmatmul.mubr.f32.gmra.mrb[142].mxu1 %v27201_v55 }
 0xdeb   : > { %18441 = vmatprep.mubr.msk.f32.mxu1 %vm22062_vm12, %v30107_v3  ;;  %20131 = vmatpush3.bf16.msra.mxu1 %v20130_v35 }
 0xdec   : > { %20132 = vmatprep.subr.bf16.mxu1 %v30095_v14 }
 0xdee   : > { %18442 = vmatmul.mubr.f32.gmra.mrb[144].mxu1 %v27231_v29 }
 0xdef   : > { %18444 = vmatprep.mubr.msk.f32.mxu1 %vm22062_vm12, %v30107_v3  ;;  %20134 = vmatpush3.bf16.msra.mxu1 %v20133_v32 }
 0xdf0   : > { %20135 = vmatprep.subr.bf16.mxu1 %v30095_v14 }
 0xdf2   : > { %18445 = vmatmul.mubr.f32.gmra.mrb[146].mxu1 %v27234_v22 }
 0xdf3   : > { %18447 = vmatprep.mubr.msk.f32.mxu1 %vm22062_vm12, %v30107_v3  ;;  %20137 = vmatpush3.bf16.msra.mxu1 %v20136_v36 }
 0xdf4   : > { %20138 = vmatprep.subr.bf16.mxu1 %v30095_v14 }
 0xdf6   : > { %18448 = vmatmul.mubr.f32.gmra.mrb[148].mxu1 %v27264_v48 }
 0xdf7   : > { %18450 = vmatprep.mubr.msk.f32.mxu1 %vm22062_vm12, %v30107_v3  ;;  %20140 = vmatpush3.bf16.msra.mxu1 %v20139_v21 }
 0xdf8   : > { %20141 = vmatprep.subr.bf16.mxu1 %v30095_v14 }
 0xdfa   : > { %18451 = vmatmul.mubr.f32.gmra.mrb[150].mxu1 %v27267_v58 }
 0xdfb   : > { %18453 = vmatprep.mubr.msk.f32.mxu1 %vm22062_vm12, %v30107_v3 }
 0xdfc   : > { %v27710_v18 = vpop.f32.mrb[60].mxu0 }
 0xdfd   : > { %v18120_v16 = vpop.f32.mrb[61].mxu0 }
 0xdfe   : > { %18454 = vmatmul.mubr.f32.gmra.mrb[152].mxu1 %v27297_v53  ;;  %v20142_v16 = vpack.c.bf16 %v14612_v0, %v14611_v34  ;;  %v14615_v34 = vld [vmem:[%s28968_s3 + $0x320] sm:$0xff]  ;;  %v14616_v0 = vld [vmem:[%s28968_s3 + $0x328] sm:$0xff] }
 0xdff   : > { %18456 = vmatprep.mubr.msk.f32.mxu1 %vm22062_vm12, %v30107_v3 }
 0xe00   : > { %v27715_v11 = vpop.f32.mrb[62].mxu0 }
 0xe01   : > { %v18123_v9 = vpop.f32.mrb[63].mxu0 }
 0xe02   : > { %18457 = vmatmul.mubr.f32.gmra.mrb[154].mxu1 %v27300_v28 }
 0xe03   : > { %18459 = vmatprep.mubr.msk.f32.mxu1 %vm22062_vm12, %v30107_v3 }
 0xe04   : > { %v27720_v35 = vpop.f32.mrb[64].mxu0 }
 0xe05   : > { %v18126_v40 = vpop.f32.mrb[65].mxu0 }
 0xe06   : > { %18460 = vmatmul.mubr.f32.gmra.mrb[156].mxu1 %v27324_v42  ;;  %v14613_v40 = vld [vmem:[%s28968_s3 + $0x310] sm:$0xff] }
 0xe07   : > { %18462 = vmatprep.mubr.msk.f32.mxu1 %vm22062_vm12, %v30107_v3 }
 0xe08   : > { %v27725_v24 = vpop.f32.mrb[66].mxu0 }
 0xe09   : > { %v18129_v32 = vpop.f32.mrb[67].mxu0 }
 0xe0a   : > { %18463 = vmatmul.mubr.f32.gmra.mrb[158].mxu1 %v27327_v13  ;;  %v14614_v32 = vld [vmem:[%s28968_s3 + $0x318] sm:$0xff] }
 0xe0b   : > { %18465 = vmatprep.mubr.msk.f32.mxu1 %vm22062_vm12, %v30107_v3 }
 0xe0c   : > { %v27730_v25 = vpop.f32.mrb[68].mxu0 }
 0xe0d   : > { %v18132_v45 = vpop.f32.mrb[69].mxu0 }
 0xe0e   : > { %18466 = vmatmul.mubr.f32.gmra.mrb[160].mxu1 %v27349_v4 }
 0xe0f   : > { %18468 = vmatprep.mubr.msk.f32.mxu1 %vm22062_vm12, %v30107_v3 }
 0xe10   : > { %v27735_v36 = vpop.f32.mrb[70].mxu0 }
 0xe11   : > { %v18135_v21 = vpop.f32.mrb[71].mxu0 }
 0xe12   : > { %18469 = vmatmul.mubr.f32.gmra.mrb[162].mxu1 %v27476_v20  ;;  %v20145_v21 = vpack.c.bf16 %v14614_v32, %v14613_v40  ;;  %v14617_v40 = vld [vmem:[%s28968_s3 + $0x330] sm:$0xff]  ;;  %v14618_v32 = vld [vmem:[%s28968_s3 + $0x338] sm:$0xff] }
 0xe13   : > { %18503 = vmatprep.mubr.msk.f32.mxu1 %vm22062_vm12, %v30107_v3 }
 0xe14   : > { %v27746_v9 = vpop.f32.mrb[72].mxu0 }
 0xe15   : > { %v18138_v45 = vpop.f32.mrb[73].mxu0 }
 0xe16   : > { %18504 = vmatmul.mubr.f32.vlgmr.msra.gmra.mrb[134].mxu1 %v27149_v19  ;;  %v20148_v19 = vpack.c.bf16 %v14616_v0, %v14615_v34  ;;  %v14619_v34 = vld [vmem:[%s28968_s3 + $0x340] sm:$0xff]  ;;  %v14620_v0 = vld [vmem:[%s28968_s3 + $0x348] sm:$0xff] }
 0xe17   : > { %18506 = vmatprep.mubr.msk.f32.mxu1 %vm22062_vm12, %v30107_v3  ;;  %20143 = vmatpush3.bf16.msra.mxu1 %v20142_v16 }
 0xe18   : > { %v27757_v57 = vpop.f32.mrb[74].mxu0  ;;  %20144 = vmatprep.subr.bf16.mxu1 %v30095_v14 }
 0xe19   : > { %v18141_v45 = vpop.f32.mrb[75].mxu0 }
 0xe1a   : > { %18507 = vmatmul.mubr.f32.gmra.mrb[136].mxu1 %v27178_v33  ;;  %v20151_v33 = vpack.c.bf16 %v14618_v32, %v14617_v40  ;;  %v14621_v32 = vld [vmem:[%s28968_s3 + $0x350] sm:$0xff] }
 0xe1b   : > { %18509 = vmatprep.mubr.msk.f32.mxu1 %vm22062_vm12, %v30107_v3  ;;  %20146 = vmatpush3.bf16.msra.mxu1 %v20145_v21 }
 0xe1c   : > { %v27769_v16 = vpop.f32.mrb[76].mxu0  ;;  %20147 = vmatprep.subr.bf16.mxu1 %v30095_v14 }
 0xe1d   : > { %v18144_v45 = vpop.f32.mrb[77].mxu0 }
 0xe1e   : > { %18510 = vmatmul.mubr.f32.gmra.mrb[138].mxu1 %v27181_v47 }
 0xe1f   : > { %18512 = vmatprep.mubr.msk.f32.mxu1 %vm22062_vm12, %v30107_v3  ;;  %20149 = vmatpush3.bf16.msra.mxu1 %v20148_v19  ;;  %v20154_v19 = vpack.c.bf16 %v14620_v0, %v14619_v34  ;;  %v14623_v0 = vld [vmem:[%s28968_s3 + $0x360] sm:$0xff] }
 0xe20   : > { %v27781_v21 = vpop.f32.mrb[78].mxu0  ;;  %20150 = vmatprep.subr.bf16.mxu1 %v30095_v14 }
 0xe21   : > { %30108 = vst [vmem:[#allocation34_spill] sm:$0xff] %v27781_v21  ;;  %v18147_v45 = vpop.f32.mrb[79].mxu0  ;;  %v14622_v21 = vld [vmem:[%s28968_s3 + $0x358] sm:$0xff] }
 0xe22   : > { %18513 = vmatmul.mubr.f32.gmra.mrb[140].mxu1 %v27211_v41 }
 0xe23   : > { %18515 = vmatprep.mubr.msk.f32.mxu1 %vm22062_vm12, %v30107_v3  ;;  %20152 = vmatpush3.bf16.msra.mxu1 %v20151_v33  ;;  %v20157_v33 = vpack.c.bf16 %v14622_v21, %v14621_v32  ;;  %v14625_v32 = vld [vmem:[%s28968_s3 + $0x370] sm:$0xff] }
 0xe24   : > { %v27793_v40 = vpop.f32.mrb[80].mxu0  ;;  %20153 = vmatprep.subr.bf16.mxu1 %v30095_v14 }
 0xe25   : > { %30109 = vst [vmem:[#allocation37_spill] sm:$0xff] %v27793_v40  ;;  %v18150_v45 = vpop.f32.mrb[81].mxu0  ;;  %v14624_v40 = vld [vmem:[%s28968_s3 + $0x368] sm:$0xff] }
 0xe26   : > { %18516 = vmatmul.mubr.f32.gmra.mrb[142].mxu1 %v27214_v8  ;;  %v20160_v21 = vpack.c.bf16 %v14624_v40, %v14623_v0 }
 0xe27   : > { %18518 = vmatprep.mubr.msk.f32.mxu1 %vm22062_vm12, %v30107_v3  ;;  %20155 = vmatpush3.bf16.msra.mxu1 %v20154_v19 }
 0xe28   : > { %v27805_v34 = vpop.f32.mrb[82].mxu0  ;;  %20156 = vmatprep.subr.bf16.mxu1 %v30095_v14 }
 0xe29   : > { %30110 = vst [vmem:[#allocation36_spill] sm:$0xff] %v27805_v34  ;;  %v18153_v45 = vpop.f32.mrb[83].mxu0  ;;  %v14626_v34 = vld [vmem:[%s28968_s3 + $0x378] sm:$0xff] }
 0xe2a   : > { %18519 = vmatmul.mubr.f32.gmra.mrb[144].mxu1 %v27244_v26  ;;  %v20163_v40 = vpack.c.bf16 %v14626_v34, %v14625_v32  ;;  %v14627_v34 = vld [vmem:[%s28968_s3 + $0x380] sm:$0xff] }
 0xe2b   : > { %18521 = vmatprep.mubr.msk.f32.mxu1 %vm22062_vm12, %v30107_v3  ;;  %20158 = vmatpush3.bf16.msra.mxu1 %v20157_v33 }
 0xe2c   : > { %v27817_v19 = vpop.f32.mrb[84].mxu0  ;;  %20159 = vmatprep.subr.bf16.mxu1 %v30095_v14 }
 0xe2d   : > { %30111 = vst [vmem:[#allocation39_spill] sm:$0xff] %v27817_v19  ;;  %v18156_v45 = vpop.f32.mrb[85].mxu0 }
 0xe2e   : > { %18522 = vmatmul.mubr.f32.gmra.mrb[146].mxu1 %v27247_v59 }
 0xe2f   : > { %18524 = vmatprep.mubr.msk.f32.mxu1 %vm22062_vm12, %v30107_v3  ;;  %20161 = vmatpush3.bf16.msra.mxu1 %v20160_v21  ;;  %v14628_v21 = vld [vmem:[%s28968_s3 + $0x388] sm:$0xff] }
 0xe30   : > { %v27829_v33 = vpop.f32.mrb[86].mxu0  ;;  %20162 = vmatprep.subr.bf16.mxu1 %v30095_v14  ;;  %v20166_v32 = vpack.c.bf16 %v14628_v21, %v14627_v34  ;;  %v14631_v34 = vld [vmem:[%s28968_s3 + $0x3a0] sm:$0xff]  ;;  %v14632_v21 = vld [vmem:[%s28968_s3 + $0x3a8] sm:$0xff] }
 0xe31   : > { %v18159_v0 = vpop.f32.mrb[87].mxu0 }
 0xe32   : > { %18525 = vmatmul.mubr.f32.gmra.mrb[148].mxu1 %v27277_v44  ;;  %v14630_v0 = vld [vmem:[%s28968_s3 + $0x398] sm:$0xff] }
 0xe33   : > { %18527 = vmatprep.mubr.msk.f32.mxu1 %vm22062_vm12, %v30107_v3  ;;  %20164 = vmatpush3.bf16.msra.mxu1 %v20163_v40  ;;  %v14629_v40 = vld [vmem:[%s28968_s3 + $0x390] sm:$0xff] }
 0xe34   : > { %v27835_v19 = vpop.f32.mrb[88].mxu0  ;;  %20165 = vmatprep.subr.bf16.mxu1 %v30095_v14 }
 0xe35   : > { %v18162_v45 = vpop.f32.mrb[89].mxu0 }
 0xe36   : > { %18528 = vmatmul.mubr.f32.gmra.mrb[150].mxu1 %v27280_v7  ;;  %v20169_v45 = vpack.c.bf16 %v14630_v0, %v14629_v40  ;;  %v14634_v40 = vld [vmem:[%s28968_s3 + $0x3b8] sm:$0xff]  ;;  %v14635_v0 = vld [vmem:[%s28968_s3 + $0x3c0] sm:$0xff] }
 0xe37   : > { %18530 = vmatprep.mubr.msk.f32.mxu1 %vm22062_vm12, %v30107_v3 }
 0xe3a   : > { %18531 = vmatmul.mubr.f32.gmra.mrb[152].mxu1 %v27304_v30 }
 0xe3b   : > { %18533 = vmatprep.mubr.msk.f32.mxu1 %vm22062_vm12, %v30107_v3 }
 0xe3e   : > { %18534 = vmatmul.mubr.f32.gmra.mrb[154].mxu1 %v27307_v56 }
 0xe3f   : > { %18536 = vmatprep.mubr.msk.f32.mxu1 %vm22062_vm12, %v30107_v3 }
 0xe42   : > { %18537 = vmatmul.mubr.f32.gmra.mrb[156].mxu1 %v27331_v12 }
 0xe43   : > { %18539 = vmatprep.mubr.msk.f32.mxu1 %vm22062_vm12, %v30107_v3 }
 0xe46   : > { %18540 = vmatmul.mubr.f32.gmra.mrb[158].mxu1 %v27334_v63 }
 0xe47   : > { %18542 = vmatprep.mubr.msk.f32.mxu1 %vm22062_vm12, %v30107_v3 }
 0xe4a   : > { %18543 = vmatmul.mubr.f32.gmra.mrb[160].mxu1 %v27354_v17 }
 0xe4b   : > { %18545 = vmatprep.mubr.msk.f32.mxu1 %vm22062_vm12, %v30107_v3 }
 0xe4e   : > { %18546 = vmatmul.mubr.f32.gmra.mrb[162].mxu1 %v27481_v27 }
 0xe4f   : > { %18580 = vmatprep.mubr.msk.f32.mxu1 %vm22062_vm12, %v30107_v3 }
 0xe52   : > { %18581 = vmatmul.mubr.f32.vlgmr.msra.gmra.mrb[134].mxu1 %v27151_v54  ;;  %v20172_v54 = vpack.c.bf16 %v14632_v21, %v14631_v34  ;;  %v14637_v34 = vld [vmem:[%s28968_s3 + $0x3d0] sm:$0xff]  ;;  %v14638_v21 = vld [vmem:[%s28968_s3 + $0x3d8] sm:$0xff] }
 0xe53   : > { %18583 = vmatprep.mubr.msk.f32.mxu1 %vm22062_vm12, %v30107_v3  ;;  %20167 = vmatpush3.bf16.msra.mxu1 %v20166_v32  ;;  %v14633_v32 = vld [vmem:[%s28968_s3 + $0x3b0] sm:$0xff] }
 0xe54   : > { %20168 = vmatprep.subr.bf16.mxu1 %v30095_v14 }
 0xe56   : > { %18584 = vmatmul.mubr.f32.gmra.mrb[136].mxu1 %v27132_v60  ;;  %v20175_v60 = vpack.c.bf16 %v14634_v40, %v14633_v32  ;;  %v14640_v32 = vld [vmem:[%s28968_s3 + $0x3e8] sm:$0xff]  ;;  %v14641_v40 = vld [vmem:[%s28968_s3 + $0x3f0] sm:$0xff] }
 0xe57   : > { %18586 = vmatprep.mubr.msk.f32.mxu1 %vm22062_vm12, %v30107_v3  ;;  %20170 = vmatpush3.bf16.msra.mxu1 %v20169_v45  ;;  %v14636_v45 = vld [vmem:[%s28968_s3 + $0x3c8] sm:$0xff] }
 0xe58   : > { %20171 = vmatprep.subr.bf16.mxu1 %v30095_v14 }
 0xe5a   : > { %18587 = vmatmul.mubr.f32.gmra.mrb[138].mxu1 %v27184_v2  ;;  %v20178_v2 = vpack.c.bf16 %v14636_v45, %v14635_v0  ;;  %v14650_v0 = vld [vmem:[%s28968_s3 + $0x438] sm:$0xff]  ;;  %v14651_v45 = vld [vmem:[%s28968_s3 + $0x440] sm:$0xff] }
 0xe5b   : > { %18589 = vmatprep.mubr.msk.f32.mxu1 %vm22062_vm12, %v30107_v3  ;;  %20173 = vmatpush3.bf16.msra.mxu1 %v20172_v54  ;;  %v14639_v54 = vld [vmem:[%s28968_s3 + $0x3e0] sm:$0xff] }
 0xe5c   : > { %20174 = vmatprep.subr.bf16.mxu1 %v30095_v14 }
 0xe5e   : > { %18590 = vmatmul.mubr.f32.gmra.mrb[140].mxu1 %v27162_v6  ;;  %v20181_v6 = vpack.c.bf16 %v14638_v21, %v14637_v34  ;;  %v14653_v34 = vld [vmem:[%s28968_s3 + $0x450] sm:$0xff]  ;;  %v14654_v21 = vld [vmem:[%s28968_s3 + $0x458] sm:$0xff] }
 0xe5f   : > { %18592 = vmatprep.mubr.msk.f32.mxu1 %vm22062_vm12, %v30107_v3  ;;  %20176 = vmatpush3.bf16.msra.mxu1 %v20175_v60  ;;  %v14642_v60 = vld [vmem:[%s28968_s3 + $0x3f8] sm:$0xff] }
 0xe60   : > { %20177 = vmatprep.subr.bf16.mxu1 %v30095_v14 }
 0xe62   : > { %18593 = vmatmul.mubr.f32.gmra.mrb[142].mxu1 %v27217_v43  ;;  %v20184_v43 = vpack.c.bf16 %v14640_v32, %v14639_v54  ;;  %v14656_v54 = vld [vmem:[%s28968_s3 + $0x468] sm:$0xff]  ;;  %v14657_v32 = vld [vmem:[%s28968_s3 + $0x470] sm:$0xff] }
 0xe63   : > { %18595 = vmatprep.mubr.msk.f32.mxu1 %vm22062_vm12, %v30107_v3  ;;  %20179 = vmatpush3.bf16.msra.mxu1 %v20178_v2  ;;  %v14652_v2 = vld [vmem:[%s28968_s3 + $0x448] sm:$0xff] }
 0xe64   : > { %20180 = vmatprep.subr.bf16.mxu1 %v30095_v14 }
 0xe66   : > { %18596 = vmatmul.mubr.f32.gmra.mrb[144].mxu1 %v27195_v52  ;;  %v20187_v52 = vpack.c.bf16 %v14642_v60, %v14641_v40 }
 0xe67   : > { %18598 = vmatprep.mubr.msk.f32.mxu1 %vm22062_vm12, %v30107_v3  ;;  %20182 = vmatpush3.bf16.msra.mxu1 %v20181_v6  ;;  %v14655_v6 = vld [vmem:[%s28968_s3 + $0x460] sm:$0xff] }
 0xe68   : > { %20183 = vmatprep.subr.bf16.mxu1 %v30095_v14 }
 0xe6a   : > { %18599 = vmatmul.mubr.f32.gmra.mrb[146].mxu1 %v27250_v5  ;;  %v14644_v5 = vld [vmem:[%s28968_s3 + $0x408] sm:$0xff] }
 0xe6b   : > { %18601 = vmatprep.mubr.msk.f32.mxu1 %vm22062_vm12, %v30107_v3  ;;  %20185 = vmatpush3.bf16.msra.mxu1 %v20184_v43  ;;  %v14658_v43 = vld [vmem:[%s28968_s3 + $0x478] sm:$0xff] }
 0xe6c   : > { %20186 = vmatprep.subr.bf16.mxu1 %v30095_v14 }
 0xe6e   : > { %18602 = vmatmul.mubr.f32.gmra.mrb[148].mxu1 %v27228_v1  ;;  %v14643_v1 = vld [vmem:[%s28968_s3 + $0x400] sm:$0xff] }
 0xe6f   : > { %18604 = vmatprep.mubr.msk.f32.mxu1 %vm22062_vm12, %v30107_v3  ;;  %20188 = vmatpush3.bf16.msra.mxu1 %v20187_v52 }
 0xe70   : > { %20189 = vmatprep.subr.bf16.mxu1 %v30095_v14 }
 0xe72   : > { %18605 = vmatmul.mubr.f32.gmra.mrb[150].mxu1 %v27283_v51  ;;  %v14645_v51 = vld [vmem:[%s28968_s3 + $0x410] sm:$0xff] }
 0xe73   : > { %18607 = vmatprep.mubr.msk.f32.mxu1 %vm22062_vm12, %v30107_v3 }
 0xe76   : > { %18608 = vmatmul.mubr.f32.gmra.mrb[152].mxu1 %v27261_v37  ;;  %v20190_v37 = vpack.c.bf16 %v14644_v5, %v14643_v1 }
 0xe77   : > { %18610 = vmatprep.mubr.msk.f32.mxu1 %vm22062_vm12, %v30107_v3 }
 0xe7a   : > { %18611 = vmatmul.mubr.f32.gmra.mrb[154].mxu1 %v27312_v62 }
 0xe7b   : > { %18613 = vmatprep.mubr.msk.f32.mxu1 %vm22062_vm12, %v30107_v3 }
 0xe7e   : > { %18614 = vmatmul.mubr.f32.gmra.mrb[156].mxu1 %v27294_v23  ;;  %v14646_v23 = vld [vmem:[%s28968_s3 + $0x418] sm:$0xff] }
 0xe7f   : > { %18616 = vmatprep.mubr.msk.f32.mxu1 %vm22062_vm12, %v30107_v3  ;;  %v20193_v62 = vpack.c.bf16 %v14646_v23, %v14645_v51 }
 0xe82   : > { %18617 = vmatmul.mubr.f32.gmra.mrb[158].mxu1 %v27337_v38  ;;  %v14648_v38 = vld [vmem:[%s28968_s3 + $0x428] sm:$0xff] }
 0xe83   : > { %18619 = vmatprep.mubr.msk.f32.mxu1 %vm22062_vm12, %v30107_v3 }
 0xe86   : > { %18620 = vmatmul.mubr.f32.gmra.mrb[160].mxu1 %v27321_v39  ;;  %v14647_v39 = vld [vmem:[%s28968_s3 + $0x420] sm:$0xff] }
 0xe87   : > { %18622 = vmatprep.mubr.msk.f32.mxu1 %vm22062_vm12, %v30107_v3 }
 0xe8a   : > { %18623 = vmatmul.mubr.f32.gmra.mrb[162].mxu1 %v27376_v10  ;;  %v14649_v10 = vld [vmem:[%s28968_s3 + $0x430] sm:$0xff] }
 0xe8b   : > { %18657 = vmatprep.mubr.msk.f32.mxu1 %vm22062_vm12, %v30107_v3 }
 0xe8e   : > { %18658 = vmatmul.mubr.f32.vlgmr.msra.gmra.mrb[134].mxu1 %v27168_v46  ;;  %v20196_v46 = vpack.c.bf16 %v14648_v38, %v14647_v39 }
 0xe8f   : > { %18660 = vmatprep.mubr.msk.f32.mxu1 %vm22062_vm12, %v30107_v3  ;;  %20191 = vmatpush3.bf16.msra.mxu1 %v20190_v37 }
 0xe90   : > { %20192 = vmatprep.subr.bf16.mxu1 %v30095_v14 }
 0xe92   : > { %18661 = vmatmul.mubr.f32.gmra.mrb[136].mxu1 %v27198_v50  ;;  %v20199_v50 = vpack.c.bf16 %v14650_v0, %v14649_v10 }
 0xe93   : > { %18663 = vmatprep.mubr.msk.f32.mxu1 %vm22062_vm12, %v30107_v3  ;;  %20194 = vmatpush3.bf16.msra.mxu1 %v20193_v62 }
 0xe94   : > { %20195 = vmatprep.subr.bf16.mxu1 %v30095_v14 }
 0xe96   : > { %18664 = vmatmul.mubr.f32.gmra.mrb[138].mxu1 %v27201_v55  ;;  %v20202_v55 = vpack.c.bf16 %v14652_v2, %v14651_v45 }
 0xe97   : > { %18666 = vmatprep.mubr.msk.f32.mxu1 %vm22062_vm12, %v30107_v3  ;;  %20197 = vmatpush3.bf16.msra.mxu1 %v20196_v46 }
 0xe98   : > { %20198 = vmatprep.subr.bf16.mxu1 %v30095_v14 }
 0xe9a   : > { %18667 = vmatmul.mubr.f32.gmra.mrb[140].mxu1 %v27231_v29  ;;  %v20205_v29 = vpack.c.bf16 %v14654_v21, %v14653_v34 }
 0xe9b   : > { %18669 = vmatprep.mubr.msk.f32.mxu1 %vm22062_vm12, %v30107_v3  ;;  %20200 = vmatpush3.bf16.msra.mxu1 %v20199_v50 }
 0xe9c   : > { %20201 = vmatprep.subr.bf16.mxu1 %v30095_v14 }
 0xe9e   : > { %18670 = vmatmul.mubr.f32.gmra.mrb[142].mxu1 %v27234_v22  ;;  %v20208_v22 = vpack.c.bf16 %v14656_v54, %v14655_v6  ;;  %v30113_v54 = vld [vmem:[#allocation34_spill] sm:$0xff] }
 0xe9f   : > { %18672 = vmatprep.mubr.msk.f32.mxu1 %vm22062_vm12, %v30107_v3  ;;  %20203 = vmatpush3.bf16.msra.mxu1 %v20202_v55 }
 0xea0   : > { %20204 = vmatprep.subr.bf16.mxu1 %v30095_v14 }
 0xea2   : > { %18673 = vmatmul.mubr.f32.gmra.mrb[144].mxu1 %v27264_v48  ;;  %v20211_v48 = vpack.c.bf16 %v14658_v43, %v14657_v32 }
 0xea3   : > { %18675 = vmatprep.mubr.msk.f32.mxu1 %vm22062_vm12, %v30107_v3  ;;  %20206 = vmatpush3.bf16.msra.mxu1 %v20205_v29 }
 0xea4   : > { %20207 = vmatprep.subr.bf16.mxu1 %v30095_v14 }
 0xea6   : > { %18676 = vmatmul.mubr.f32.gmra.mrb[146].mxu1 %v27267_v58 }
 0xea7   : > { %18678 = vmatprep.mubr.msk.f32.mxu1 %vm22062_vm12, %v30107_v3  ;;  %20209 = vmatpush3.bf16.msra.mxu1 %v20208_v22 }
 0xea8   : > { %20210 = vmatprep.subr.bf16.mxu1 %v30095_v14 }
 0xeaa   : > { %18679 = vmatmul.mubr.f32.gmra.mrb[148].mxu1 %v27297_v53 }
 0xeab   : > { %18681 = vmatprep.mubr.msk.f32.mxu1 %vm22062_vm12, %v30107_v3  ;;  %20212 = vmatpush3.bf16.msra.mxu1 %v20211_v48 }
 0xeac   : > { %20537 = vmatprep.subr.bf16.mxu1 %v30095_v14 }
 0xeae   : > { %18682 = vmatmul.mubr.f32.gmra.mrb[150].mxu1 %v27300_v28 }
 0xeaf   : > { %18684 = vmatprep.mubr.msk.f32.mxu1 %vm22062_vm12, %v30107_v3 }
 0xeb2   : > { %18685 = vmatmul.mubr.f32.gmra.mrb[152].mxu1 %v27324_v42 }
 0xeb3   : > { %18687 = vmatprep.mubr.msk.f32.mxu1 %vm22062_vm12, %v30107_v3 }
 0xeb6   : > { %18688 = vmatmul.mubr.f32.gmra.mrb[154].mxu1 %v27327_v13 }
 0xeb7   : > { %18690 = vmatprep.mubr.msk.f32.mxu1 %vm22062_vm12, %v30107_v3 }
 0xeba   : > { %18691 = vmatmul.mubr.f32.gmra.mrb[156].mxu1 %v27349_v4  ;;  %v11327_v4 = vld [vmem:[%s30112_s0] sm:$0xff] }
 0xebb   : > { %18693 = vmatprep.mubr.msk.f32.mxu1 %vm22062_vm12, %v30107_v3  ;;  %18805 = vmatprep.mubr.msk.f32.mxu0 %vm11329_vm13, %v11327_v4 }
 0xebe   : > { %18694 = vmatmul.mubr.f32.gmra.mrb[158].mxu1 %v27476_v20 }
 0xebf   : > { %18696 = vmatprep.mubr.msk.f32.mxu1 %vm22062_vm12, %v30107_v3 }
 0xec2   : > { %18697 = vmatmul.mubr.f32.gmra.mrb[160].mxu1 %v27484_v15 }
 0xec3   : > { %18699 = vmatprep.mubr.msk.f32.mxu1 %vm22062_vm12, %v30107_v3 }
 0xec6   : > { %18700 = vmatmul.mubr.f32.gmra.mrb[162].mxu1 %v27525_v49 }
 0xec7   : > { %18734 = vmatprep.mubr.msk.f32.mxu1 %vm22062_vm12, %v30107_v3 }
 0xeca   : > { %18735 = vmatmul.mubr.f32.vlgmr.msra.gmra.mrb[134].mxu1 %v27181_v47 }
 0xecb   : > { %18737 = vmatprep.mubr.msk.f32.mxu1 %vm22062_vm12, %v30107_v3 }
 0xece   : > { %18738 = vmatmul.mubr.f32.gmra.mrb[136].mxu1 %v27211_v41 }
 0xecf   : > { %18740 = vmatprep.mubr.msk.f32.mxu1 %vm22062_vm12, %v30107_v3 }
 0xed2   : > { %18741 = vmatmul.mubr.f32.gmra.mrb[138].mxu1 %v27214_v8 }
 0xed3   : > { %18743 = vmatprep.mubr.msk.f32.mxu1 %vm22062_vm12, %v30107_v3 }
 0xed6   : > { %18744 = vmatmul.mubr.f32.gmra.mrb[140].mxu1 %v27244_v26 }
 0xed7   : > { %18746 = vmatprep.mubr.msk.f32.mxu1 %vm22062_vm12, %v30107_v3 }
 0xeda   : > { %18747 = vmatmul.mubr.f32.gmra.mrb[142].mxu1 %v27247_v59 }
 0xedb   : > { %18749 = vmatprep.mubr.msk.f32.mxu1 %vm22062_vm12, %v30107_v3 }
 0xede   : > { %18750 = vmatmul.mubr.f32.gmra.mrb[144].mxu1 %v27277_v44 }
 0xedf   : > { %18752 = vmatprep.mubr.msk.f32.mxu1 %vm22062_vm12, %v30107_v3 }
 0xee2   : > { %18753 = vmatmul.mubr.f32.gmra.mrb[146].mxu1 %v27280_v7 }
 0xee3   : > { %18755 = vmatprep.mubr.msk.f32.mxu1 %vm22062_vm12, %v30107_v3 }
 0xee6   : > { %18756 = vmatmul.mubr.f32.gmra.mrb[148].mxu1 %v27304_v30 }
 0xee7   : > { %18758 = vmatprep.mubr.msk.f32.mxu1 %vm22062_vm12, %v30107_v3 }
 0xeea   : > { %18759 = vmatmul.mubr.f32.gmra.mrb[150].mxu1 %v27307_v56 }
 0xeeb   : > { %18761 = vmatprep.mubr.msk.f32.mxu1 %vm22062_vm12, %v30107_v3 }
 0xeee   : > { %18762 = vmatmul.mubr.f32.gmra.mrb[152].mxu1 %v27331_v12 }
 0xeef   : > { %18764 = vmatprep.mubr.msk.f32.mxu1 %vm22062_vm12, %v30107_v3 }
 0xef2   : > { %18765 = vmatmul.mubr.f32.gmra.mrb[154].mxu1 %v27334_v63 }
 0xef3   : > { %18767 = vmatprep.mubr.msk.f32.mxu1 %vm22062_vm12, %v30107_v3 }
 0xef6   : > { %18768 = vmatmul.mubr.f32.gmra.mrb[156].mxu1 %v27354_v17 }
 0xef7   : > { %18770 = vmatprep.mubr.msk.f32.mxu1 %vm22062_vm12, %v30107_v3 }
 0xefa   : > { %18771 = vmatmul.mubr.f32.gmra.mrb[158].mxu1 %v27481_v27 }
 0xefb   : > { %18773 = vmatprep.mubr.msk.f32.mxu1 %vm22062_vm12, %v30107_v3 }
 0xefe   : > { %18774 = vmatmul.mubr.f32.gmra.mrb[160].mxu1 %v27487_v31 }
 0xeff   : > { %18776 = vmatprep.mubr.msk.f32.mxu1 %vm22062_vm12, %v30107_v3 }
 0xf02   : > { %18777 = vmatmul.mubr.f32.gmra.mrb[162].mxu1 %v27528_v61 }
 0xf03   : > { %19238 = vmatprep.mubr.msk.f32.mxu1 %vm22062_vm12, %v30107_v3 }
 0xf9d   : > { %v11029_v47 = vpop.f32.mrb[134].mxu1 }
 0xf9e   : > { %v28107_v41 = vadd.f32 %v11029_v47, %v27710_v18  ;;  %v18736_v8 = vpop.f32.mrb[135].mxu1 }
 0xf9f   : > { %v30114_v8 = vld [vmem:[#allocation37_spill] sm:$0xff] }
 0xfa0   : > { %v11139_v30 = vmul.f32 %v28107_v41, %v28107_v41 }
 0xfa1   : > { %v11034_v26 = vpop.f32.mrb[136].mxu1 }
 0xfa2   : > { %v28110_v59 = vadd.f32 %v11034_v26, %v27715_v11  ;;  %v18739_v58 = vpop.f32.mrb[137].mxu1 }
 0xfa4   : > { %v11140_v28 = vmul.f32 %v28110_v59, %v28110_v59  ;;  %v11118_v42 = vadd.f32 %v28110_v59, %v28107_v41 }
 0xfa5   : > { %v11039_v44 = vpop.f32.mrb[138].mxu1 }
 0xfa6   : > { %v28113_v7 = vadd.f32 %v11039_v44, %v27720_v35  ;;  %v18742_v53 = vpop.f32.mrb[139].mxu1  ;;  %v11154_v17 = vadd.f32 %v11140_v28, %v11139_v30 }
 0xfa8   : > { %v11141_v13 = vmul.f32 %v28113_v7, %v28113_v7  ;;  %v11119_v20 = vadd.f32 %v28113_v7, %v11118_v42 }
 0xfa9   : > { %v11044_v56 = vpop.f32.mrb[140].mxu1 }
 0xfaa   : > { %v28124_v12 = vadd.f32 %v11044_v56, %v27725_v24  ;;  %v18745_v63 = vpop.f32.mrb[141].mxu1  ;;  %v11155_v31 = vadd.f32 %v11154_v17, %v11141_v13  ;;  %v30115_v56 = vld [vmem:[#allocation36_spill] sm:$0xff] }
 0xfac   : > { %v11142_v27 = vmul.f32 %v28124_v12, %v28124_v12  ;;  %v11120_v49 = vadd.f32 %v28124_v12, %v11119_v20 }
 0xfad   : > { %v11049_v15 = vpop.f32.mrb[142].mxu1 }
 0xfae   : > { %v28135_v61 = vadd.f32 %v11049_v15, %v27730_v25  ;;  %v18748_v18 = vpop.f32.mrb[143].mxu1  ;;  %v11156_v11 = vadd.f32 %v11155_v31, %v11142_v27  ;;  %v30116_v27 = vld [vmem:[#allocation39_spill] sm:$0xff] }
 0xfb0   : > { %v11121_v35 = vadd.f32 %v28135_v61, %v11120_v49  ;;  %v11143_v24 = vmul.f32 %v28135_v61, %v28135_v61 }
 0xfb1   : > { %v11054_v40 = vpop.f32.mrb[144].mxu1 }
 0xfb2   : > { %v11157_v60 = vadd.f32 %v11156_v11, %v11143_v24  ;;  %v28141_v52 = vadd.f32 %v11054_v40, %v27735_v36  ;;  %v18751_v1 = vpop.f32.mrb[145].mxu1 }
 0xfb4   : > { %v11122_v5 = vadd.f32 %v28141_v52, %v11121_v35  ;;  %v11144_v37 = vmul.f32 %v28141_v52, %v28141_v52 }
 0xfb5   : > { %v11059_v25 = vpop.f32.mrb[146].mxu1 }
 0xfb6   : > { %v11158_v51 = vadd.f32 %v11157_v60, %v11144_v37  ;;  %v28147_v23 = vadd.f32 %v11059_v25, %v27746_v9  ;;  %v18754_v62 = vpop.f32.mrb[147].mxu1 }
 0xfb8   : > { %v11123_v39 = vadd.f32 %v28147_v23, %v11122_v5  ;;  %v11145_v38 = vmul.f32 %v28147_v23, %v28147_v23 }
 0xfb9   : > { %v11064_v46 = vpop.f32.mrb[148].mxu1 }
 0xfba   : > { %v11159_v36 = vadd.f32 %v11158_v51, %v11145_v38  ;;  %v28153_v10 = vadd.f32 %v11064_v46, %v27757_v57  ;;  %v18757_v0 = vpop.f32.mrb[149].mxu1 }
 0xfbc   : > { %v11124_v50 = vadd.f32 %v28153_v10, %v11123_v39  ;;  %v11146_v45 = vmul.f32 %v28153_v10, %v28153_v10 }
 0xfbd   : > { %v11069_v2 = vpop.f32.mrb[150].mxu1 }
 0xfbe   : > { %v11160_v9 = vadd.f32 %v11159_v36, %v11146_v45  ;;  %v28159_v55 = vadd.f32 %v11069_v2, %v27769_v16  ;;  %v18760_v34 = vpop.f32.mrb[151].mxu1 }
 0xfc0   : > { %v11125_v21 = vadd.f32 %v28159_v55, %v11124_v50  ;;  %v11147_v29 = vmul.f32 %v28159_v55, %v28159_v55 }
 0xfc1   : > { %v11074_v6 = vpop.f32.mrb[152].mxu1 }
 0xfc2   : > { %v11161_v57 = vadd.f32 %v11160_v9, %v11147_v29  ;;  %v28165_v22 = vadd.f32 %v11074_v6, %v30113_v54  ;;  %v18763_v32 = vpop.f32.mrb[153].mxu1 }
 0xfc4   : > { %v11126_v43 = vadd.f32 %v28165_v22, %v11125_v21  ;;  %v11148_v48 = vmul.f32 %v28165_v22, %v28165_v22 }
 0xfc5   : > { %v11079_v47 = vpop.f32.mrb[154].mxu1 }
 0xfc6   : > { %v11162_v16 = vadd.f32 %v11161_v57, %v11148_v48  ;;  %v28171_v26 = vadd.f32 %v11079_v47, %v30114_v8  ;;  %v18766_v58 = vpop.f32.mrb[155].mxu1 }
 0xfc8   : > { %v11127_v44 = vadd.f32 %v28171_v26, %v11126_v43  ;;  %v11149_v53 = vmul.f32 %v28171_v26, %v28171_v26 }
 0xfc9   : > { %v11084_v28 = vpop.f32.mrb[156].mxu1 }
 0xfca   : > { %v11163_v30 = vadd.f32 %v11162_v16, %v11149_v53  ;;  %v20764_v42 = vadd.f32 %v11084_v28, %v30115_v56  ;;  %v18769_v13 = vpop.f32.mrb[157].mxu1  ;;  %v21855_v16 = vld [vmem:[%s28970_s5] sm:$0x1] }
 0xfcb   : > { %v21856_v28 = vld [vmem:[%s28971_s6] sm:$0x1] }
 0xfcc   : > { %v11128_v63 = vadd.f32 %v20764_v42, %v11127_v44  ;;  %v11150_v4 = vmul.f32 %v20764_v42, %v20764_v42  ;;  %v30117_v44 = vld [vmem:[#allocation42_spill] sm:$0xff] }
 0xfcd   : > { %v11089_v17 = vpop.f32.mrb[158].mxu1 }
 0xfce   : > { %v11164_v20 = vadd.f32 %v11163_v30, %v11150_v4  ;;  %v20765_v15 = vadd.f32 %v11089_v17, %v30116_v27  ;;  %v18772_v31 = vpop.f32.mrb[159].mxu1 }
 0xfd0   : > { %v11129_v49 = vadd.f32 %v20765_v15, %v11128_v63  ;;  %v11151_v18 = vmul.f32 %v20765_v15, %v20765_v15 }
 0xfd1   : > { %v11094_v11 = vpop.f32.mrb[160].mxu1 }
 0xfd2   : > { %v11165_v35 = vadd.f32 %v11164_v20, %v11151_v18  ;;  %v28179_v24 = vadd.f32 %v11094_v11, %v27829_v33  ;;  %v18775_v40 = vpop.f32.mrb[161].mxu1 }
 0xfd4   : > { %v11130_v60 = vadd.f32 %v28179_v24, %v11129_v49  ;;  %v11152_v1 = vmul.f32 %v28179_v24, %v28179_v24 }
 0xfd5   : > { %v11099_v5 = vpop.f32.mrb[162].mxu1 }
 0xfd6   : > { %v11166_v37 = vadd.f32 %v11165_v35, %v11152_v1  ;;  %v20767_v25 = vadd.f32 %v11099_v5, %v27835_v19  ;;  %v18778_v51 = vpop.f32.mrb[163].mxu1 }
 0xfd8   : > { %v11131_v62 = vadd.f32 %v20767_v25, %v11130_v60  ;;  %v11153_v39 = vmul.f32 %v20767_v25, %v20767_v25 }
 0xfda   : > { %v11132_v38 = vrot.slane %v11131_v62, 4  ;;  %v11167_v46 = vadd.f32 %v11166_v37, %v11153_v39 }
 0xfdc   : > { %v11133_v36 = vadd.f32 %v11132_v38, %v11131_v62  ;;  %v11168_v0 = vrot.slane %v11167_v46, 4 }
 0xfde   : > { %v11134_v50 = vrot.slane %v11133_v36, 2  ;;  %v11169_v33 = vadd.f32 %v11168_v0, %v11167_v46 }
 0xfe0   : > { %v11135_v45 = vadd.f32 %v11134_v50, %v11133_v36  ;;  %v11170_v2 = vrot.slane %v11169_v33, 2 }
 0xfe2   : > { %v11136_v9 = vrot.slane %v11135_v45, 1  ;;  %v11171_v34 = vadd.f32 %v11170_v2, %v11169_v33 }
 0xfe4   : > { %v11137_v21 = vadd.f32 %v11136_v9, %v11135_v45  ;;  %v11172_v29 = vrot.slane %v11171_v34, 1 }
 0xfe6   : > { %v11138_v6 = vmul.f32 0.015625, %v11137_v21  ;;  %v11173_v57 = vadd.f32 %v11172_v29, %v11171_v34 }
 0xfe8   : > { %v11174_v54 = vmul.f32 0.015625, %v11173_v57  ;;  %v11175_v32 = vmul.f32 %v11138_v6, %v11138_v6 }
 0xfea   : > { %v11176_v19 = vsub.f32 %v11174_v54, %v11175_v32 }
 0xfec   : > { %v11177_v43 = vmax.f32 %v11176_v19, 0.0 }
 0xfee   : > { %v11178_v48 = vadd.f32 1e-05, %v11177_v43 }
 0xff0   : > { %21795 = vrsqrt.f32 %v11178_v48 }
 0xffa   : > { %v21796_v47 = vpop.eup %21795 }
 0xffb   : > { %v11180_v8 = vmul.f32 %v21855_v16, %v21796_v47 }
 0xffd   : > { %v11181_v58 = vmul.f32 %v11180_v8, %v11138_v6  ;;  %v28189_v53 = vrot.slane %v11180_v8, %v30117_v44 }
 0xfff   : > { %v11182_v30 = vsub.f32 %v21856_v28, %v11181_v58  ;;  %v11203_v56 = vmul.f32 %v20767_v25, %v28189_v53  ;;  %v11189_v13 = vmul.f32 %v28107_v41, %v28189_v53  ;;  %v11190_v63 = vmul.f32 %v28110_v59, %v28189_v53 }
0x1000   : > { %v11191_v4 = vmul.f32 %v28113_v7, %v28189_v53  ;;  %v11192_v17 = vmul.f32 %v28124_v12, %v28189_v53  ;;  %v11193_v20 = vmul.f32 %v28135_v61, %v28189_v53  ;;  %v11194_v27 = vmul.f32 %v28141_v52, %v28189_v53 }
0x1001   : > { %v28208_v31 = vrot.slane %v11182_v30, %v30117_v44  ;;  %v11195_v41 = vmul.f32 %v28147_v23, %v28189_v53  ;;  %v11196_v59 = vmul.f32 %v28153_v10, %v28189_v53  ;;  %v11197_v7 = vmul.f32 %v28159_v55, %v28189_v53 }
0x1002   : > { %v11198_v12 = vmul.f32 %v28165_v22, %v28189_v53  ;;  %v11199_v61 = vmul.f32 %v28171_v26, %v28189_v53  ;;  %v11200_v52 = vmul.f32 %v20764_v42, %v28189_v53  ;;  %v11201_v49 = vmul.f32 %v20765_v15, %v28189_v53 }
0x1003   : > { %v28223_v18 = vadd.f32 %v28208_v31, %v11203_v56  ;;  %v11210_v23 = vadd.f32 %v28208_v31, %v11189_v13  ;;  %v11211_v10 = vadd.f32 %v28208_v31, %v11190_v63  ;;  %v11212_v11 = vadd.f32 %v28208_v31, %v11191_v4 }
0x1004   : > { %v11213_v55 = vadd.f32 %v28208_v31, %v11192_v17  ;;  %v11214_v22 = vadd.f32 %v28208_v31, %v11193_v20  ;;  %v11215_v35 = vadd.f32 %v28208_v31, %v11194_v27  ;;  %v11216_v26 = vadd.f32 %v28208_v31, %v11195_v41 }
0x1005   : > { %v11225_v42 = vmax.f32 %v11210_v23, 0.0  ;;  %v11226_v40 = vmax.f32 %v11211_v10, 0.0  ;;  %v11227_v15 = vmax.f32 %v11212_v11, 0.0  ;;  %v11239_v25 = vmax.f32 %v28223_v18, 0.0  ;;  %v11328_v18 = vld [vmem:[%s30112_s0 + $0x8] sm:$0xff] }
0x1006   : > { %v11228_v60 = vmax.f32 %v11213_v55, 0.0  ;;  %v11229_v1 = vmax.f32 %v11214_v22, 0.0  ;;  %v11230_v5 = vmax.f32 %v11215_v35, 0.0  ;;  %v11231_v37 = vmax.f32 %v11216_v26, 0.0 }
0x1007   : > { %v11255_v51 = vrot.slane %v11225_v42, 1  ;;  %v11256_v62 = vrot.slane %v11226_v40, 1  ;;  %v11258_v39 = vrot.slane %v11227_v15, 1  ;;  %v11217_v45 = vadd.f32 %v28208_v31, %v11196_v59 }
0x1008   : > { %v11260_v38 = vrot.slane %v11228_v60, 1  ;;  %v11262_v46 = vrot.slane %v11229_v1, 1  ;;  %v11264_v36 = vrot.slane %v11230_v5, 1  ;;  %v11266_v0 = vrot.slane %v11231_v37, 1 }
0x1009   : > { %v11257_v50 = vsel %vm739_vm3, %v11255_v51, %v11256_v62  ;;  %v11259_v33 = vsel %vm739_vm3, %v11256_v62, %v11258_v39  ;;  %v11218_v2 = vadd.f32 %v28208_v31, %v11197_v7  ;;  %v11232_v48 = vmax.f32 %v11217_v45, 0.0 }
0x100a   : > { %v11261_v9 = vsel %vm739_vm3, %v11258_v39, %v11260_v38  ;;  %v11263_v34 = vsel %vm739_vm3, %v11260_v38, %v11262_v46  ;;  %v11299_v21 = vmax.f32 %v11225_v42, %v11257_v50  ;;  %v11300_v29 = vmax.f32 %v11226_v40, %v11259_v33 }
0x100b   : > { %v11301_v6 = vmax.f32 %v11227_v15, %v11261_v9  ;;  %v11302_v57 = vmax.f32 %v11228_v60, %v11263_v34  ;;  %v11265_v54 = vsel %vm739_vm3, %v11262_v46, %v11264_v36  ;;  %v11267_v32 = vsel %vm739_vm3, %v11264_v36, %v11266_v0 }
0x100c   : > { %v11303_v19 = vmax.f32 %v11229_v1, %v11265_v54  ;;  %v11304_v43 = vmax.f32 %v11230_v5, %v11267_v32  ;;  %v11233_v47 = vmax.f32 %v11218_v2, 0.0  ;;  %v11219_v58 = vadd.f32 %v28208_v31, %v11198_v12 }
0x100d   : > { %v11314_v16 = vmax.f32 %v11299_v21, %v11301_v6  ;;  %v11315_v8 = vmax.f32 %v11300_v29, %v11302_v57  ;;  %v11220_v28 = vadd.f32 %v28208_v31, %v11199_v61  ;;  %v11268_v13 = vrot.slane %v11232_v48, 1 }
0x100e   : > { %v11316_v30 = vmax.f32 %v11301_v6, %v11303_v19  ;;  %v11317_v56 = vmax.f32 %v11302_v57, %v11304_v43  ;;  %v11270_v63 = vrot.slane %v11233_v47, 1  ;;  %v11234_v17 = vmax.f32 %v11219_v58, 0.0  ;;  %v14672_v58 = vld [vmem:[%s30118_s20 + $0x90] sm:$0xff] }
0x100f   : > { %v20213_v4 = vpack.c.bf16 %v11315_v8, %v11314_v16  ;;  %v11235_v20 = vmax.f32 %v11220_v28, 0.0  ;;  %v11221_v27 = vadd.f32 %v28208_v31, %v11200_v52  ;;  %v11269_v59 = vsel %vm739_vm3, %v11266_v0, %v11268_v13  ;;  %v14673_v28 = vld [vmem:[%s30118_s20 + $0x98] sm:$0xff] }
0x1010   : > { %v20217_v41 = vpack.c.bf16 %v11317_v56, %v11316_v30  ;;  %v11271_v7 = vsel %vm739_vm3, %v11268_v13, %v11270_v63  ;;  %v11222_v23 = vadd.f32 %v28208_v31, %v11201_v49  ;;  %v11305_v12 = vmax.f32 %v11231_v37, %v11269_v59  ;;  %v11415_v30 = vld [vmem:[#allocation7 + $0x8] sm:$0xff]  ;;  %v11416_v56 = vld [vmem:[#allocation7 + $0x10] sm:$0xff] }
0x1011   : > { %20214 = vmatprep.subr.bf16.mxu0 %v20213_v4  ;;  %v11306_v10 = vmax.f32 %v11232_v48, %v11271_v7  ;;  %v11272_v61 = vrot.slane %v11234_v17, 1  ;;  %v11274_v11 = vrot.slane %v11235_v20, 1  ;;  %v11236_v55 = vmax.f32 %v11221_v27, 0.0  ;;  %v14677_v59 = vld [vmem:[%s30118_s20 + $0xb8] sm:$0xff] }
0x1012   : > { %20216 = vmatpush3.bf16.msra.mxu0 %v20213_v4  ;;  %v11237_v22 = vmax.f32 %v11222_v23, 0.0  ;;  %v11202_v35 = vmul.f32 %v28179_v24, %v28189_v53  ;;  %v11318_v52 = vmax.f32 %v11303_v19, %v11305_v12  ;;  %v11282_v5 = vrot.slane %v11239_v25, 1  ;;  %v14670_v19 = vld [vmem:[%s30118_s20 + $0x80] sm:$0xff]  ;;  %v14675_v4 = vld [vmem:[%s30118_s20 + $0xa8] sm:$0xff]  ;;  %v11419_v7 = vld [vmem:[#allocation7 + $0x28] sm:$0xff] }
0x1013   : > { %20218 = vmatprep.subr.bf16.mxu0 %v20217_v41  ;;  %v11319_v26 = vmax.f32 %v11304_v43, %v11306_v10  ;;  %v11273_v42 = vsel %vm739_vm3, %v11270_v63, %v11272_v61  ;;  %v11275_v40 = vsel %vm739_vm3, %v11272_v61, %v11274_v11  ;;  %v11276_v60 = vrot.slane %v11236_v55, 1  ;;  %v14671_v43 = vld [vmem:[%s30118_s20 + $0x88] sm:$0xff]  ;;  %v14674_v63 = vld [vmem:[%s30118_s20 + $0xa0] sm:$0xff] }
0x1014   : > { %v11307_v15 = vmax.f32 %v11233_v47, %v11273_v42  ;;  %v11308_v49 = vmax.f32 %v11234_v17, %v11275_v40  ;;  %v11278_v1 = vrot.slane %v11237_v22, 1  ;;  %v11223_v51 = vadd.f32 %v28208_v31, %v11202_v35  ;;  %v11417_v17 = vld [vmem:[#allocation7 + $0x18] sm:$0xff]  ;;  %v11420_v23 = vld [vmem:[#allocation7 + $0x30] sm:$0xff]  ;;  %v14681_v35 = vld [vmem:[%s30118_s20 + $0xd8] sm:$0xff] }
0x1015   : > { %v20221_v37 = vpack.c.bf16 %v11319_v26, %v11318_v52  ;;  %v11277_v53 = vsel %vm739_vm3, %v11274_v11, %v11276_v60  ;;  %v11313_v2 = vmax.f32 %v11239_v25, %v11282_v5  ;;  %v11414_v25 = vld [vmem:[#allocation7] sm:$0xff]  ;;  %v20241_v8 = vpack.c.bf16 %v14671_v43, %v14670_v19  ;;  %v14679_v61 = vld [vmem:[%s30118_s20 + $0xc8] sm:$0xff]  ;;  %v14682_v26 = vld [vmem:[%s30118_s20 + $0xe0] sm:$0xff] }
0x1016   : > { %20220 = vmatpush3.bf16.msra.mxu0 %v20217_v41  ;;  %v11320_v62 = vmax.f32 %v11305_v12, %v11307_v15  ;;  %v11321_v24 = vmax.f32 %v11306_v10, %v11308_v49  ;;  %v11279_v39 = vsel %vm739_vm3, %v11276_v60, %v11278_v1  ;;  %v11309_v38 = vmax.f32 %v11235_v20, %v11277_v53  ;;  %v11418_v20 = vld [vmem:[#allocation7 + $0x20] sm:$0xff]  ;;  %v14678_v10 = vld [vmem:[%s30118_s20 + $0xc0] sm:$0xff]  ;;  %v11421_v11 = vld [vmem:[#allocation7 + $0x38] sm:$0xff] }
0x1017   : > { %20222 = vmatprep.subr.bf16.mxu0 %v20221_v37  ;;  %v11310_v46 = vmax.f32 %v11236_v55, %v11279_v39  ;;  %v11238_v36 = vmax.f32 %v11223_v51, 0.0  ;;  %v20245_v13 = vpack.c.bf16 %v14673_v28, %v14672_v58  ;;  %v20249_v27 = vpack.c.bf16 %v14675_v4, %v14674_v63  ;;  %v14676_v41 = vld [vmem:[%s30118_s20 + $0xb0] sm:$0xff]  ;;  %v14683_v42 = vld [vmem:[%s30118_s20 + $0xe8] sm:$0xff]  ;;  %v11559_v58 = vld [vmem:[%s30118_s20 + $0x38] sm:$0xff] }
0x1018   : > { %v20225_v0 = vpack.c.bf16 %v11321_v24, %v11320_v62  ;;  %v11322_v50 = vmax.f32 %v11307_v15, %v11309_v38  ;;  %v20253_v12 = vpack.c.bf16 %v14677_v59, %v14676_v41  ;;  %v20257_v55 = vpack.c.bf16 %v14679_v61, %v14678_v10  ;;  %v14684_v15 = vld [vmem:[%s30118_s20 + $0xf0] sm:$0xff]  ;;  %v11563_v59 = vld [vmem:[%s30118_s20 + $0x58] sm:$0xff] }
0x1019   : > { %v11323_v33 = vmax.f32 %v11308_v49, %v11310_v46  ;;  %v11280_v45 = vrot.slane %v11238_v36, 1  ;;  %v20265_v40 = vpack.c.bf16 %v14683_v42, %v14682_v26  ;;  %v14685_v49 = vld [vmem:[%s30118_s20 + $0xf8] sm:$0xff]  ;;  %v11562_v41 = vld [vmem:[%s30118_s20 + $0x50] sm:$0xff] }
0x101a   : > { %20224 = vmatpush3.bf16.msra.mxu0 %v20221_v37  ;;  %v20269_v60 = vpack.c.bf16 %v14685_v49, %v14684_v15  ;;  %v11566_v61 = vld [vmem:[%s30118_s20 + $0x70] sm:$0xff]  ;;  %v14689_v42 = vld [vmem:[%s30118_s20 + $0x118] sm:$0xff]  ;;  %v14690_v15 = vld [vmem:[%s30118_s20 + $0x120] sm:$0xff] }
0x101b   : > { %20226 = vmatprep.subr.bf16.mxu0 %v20225_v0  ;;  %v20229_v31 = vpack.c.bf16 %v11323_v33, %v11322_v50  ;;  %v11281_v9 = vsel %vm739_vm3, %v11278_v1, %v11280_v45  ;;  %v11283_v34 = vsel %vm739_vm3, %v11280_v45, %v11282_v5  ;;  %v11552_v1 = vld [vmem:[%s30118_s20] sm:$0xff]  ;;  %v11553_v5 = vld [vmem:[%s30118_s20 + $0x8] sm:$0xff]  ;;  %v11555_v50 = vld [vmem:[%s30118_s20 + $0x18] sm:$0xff] }
0x101c   : > { %v11311_v21 = vmax.f32 %v11237_v22, %v11281_v9  ;;  %v11312_v29 = vmax.f32 %v11238_v36, %v11283_v34  ;;  %v14680_v22 = vld [vmem:[%s30118_s20 + $0xd0] sm:$0xff]  ;;  %v20273_v37 = vpack.c.bf16 %v11553_v5, %v11552_v1  ;;  %v14691_v49 = vld [vmem:[%s30118_s20 + $0x128] sm:$0xff]  ;;  %v14693_v5 = vld [vmem:[%s30118_s20 + $0x138] sm:$0xff] }
0x101d   : > { %v20261_v52 = vpack.c.bf16 %v14681_v35, %v14680_v22  ;;  %v14686_v22 = vld [vmem:[%s30118_s20 + $0x100] sm:$0xff]  ;;  %v14687_v35 = vld [vmem:[%s30118_s20 + $0x108] sm:$0xff]  ;;  %v14688_v26 = vld [vmem:[%s30118_s20 + $0x110] sm:$0xff] }
0x101e   : > { %20228 = vmatpush3.bf16.msra.mxu0 %v20225_v0  ;;  %v11324_v6 = vmax.f32 %v11309_v38, %v11311_v21  ;;  %v11325_v57 = vmax.f32 %v11310_v46, %v11312_v29  ;;  %v11326_v54 = vmax.f32 %v11311_v21, %v11313_v2  ;;  %v11554_v0 = vld [vmem:[%s30118_s20 + $0x10] sm:$0xff] }
0x101f   : > { %20230 = vmatprep.subr.bf16.mxu0 %v20229_v31  ;;  %v20277_v21 = vpack.c.bf16 %v11555_v50, %v11554_v0  ;;  %v14692_v1 = vld [vmem:[%s30118_s20 + $0x130] sm:$0xff]  ;;  %v14698_v0 = vld [vmem:[%s30118_s20 + $0x160] sm:$0xff]  ;;  %v14699_v50 = vld [vmem:[%s30118_s20 + $0x168] sm:$0xff] }
0x1020   : > { %v20233_v32 = vpack.c.bf16 %v11325_v57, %v11324_v6  ;;  %v11556_v6 = vld [vmem:[%s30118_s20 + $0x20] sm:$0xff]  ;;  %v11557_v57 = vld [vmem:[%s30118_s20 + $0x28] sm:$0xff] }
0x1022   : > { %20232 = vmatpush3.bf16.msra.mxu0 %v20229_v31 }
0x1023   : > { %20234 = vmatprep.subr.bf16.mxu0 %v20233_v32 }
0x1026   : > { %20236 = vmatpush3.bf16.msra.mxu0 %v20233_v32 }
0x1027   : > { %18803 = vmatprep.subr.msk.mxu0 %vm739_vm3, %v11326_v54 }
0x102a   : > { %18804 = vmatpush3.msk.msra.mxu0 %vm739_vm3, %v11326_v54 }
0x102b   : > { %18806 = vmatmul.mubr.msk.f32.vlgmr.msra.gmra.mrb[90].mxu0 %vm11329_vm13, %v11328_v18 }
0x102c   : > { %18812 = vmatprep.mubr.msk.f32.mxu0 %vm11422_vm14, %v11414_v25 }
0x10fe   : > { %v18807_v48 = vpop.f32.mrb[90].mxu0 }
0x10ff   : > { %v11405_v47 = vpop.f32.mrb[91].mxu0 }
0x1100   : > { %v20237_v16 = vpack.c.bf16 %v18807_v48, %v11405_v47 }
0x1102   : > { %20238 = vmatprep.subr.bf16.mxu0 %v20237_v16 }
0x1103   : > { %20240 = vmatpush3.bf16.msra.mxu0 %v20237_v16  ;;  %v20281_v16 = vpack.c.bf16 %v11557_v57, %v11556_v6  ;;  %v14704_v57 = vld [vmem:[%s30118_s20 + $0x190] sm:$0xff] }
0x1104   : > { %20242 = vmatprep.subr.bf16.mxu0 %v20241_v8 }
0x1106   : > { %18813 = vmatmul.mubr.msk.f32.vlgmr.msra.gmra.mrb[92].mxu0 %vm11422_vm14, %v11415_v30 }
0x1107   : > { %18815 = vmatprep.mubr.msk.f32.mxu0 %vm11422_vm14, %v11416_v56  ;;  %20244 = vmatpush3.bf16.msra.mxu0 %v20241_v8  ;;  %v11558_v8 = vld [vmem:[%s30118_s20 + $0x30] sm:$0xff] }
0x1108   : > { %20246 = vmatprep.subr.bf16.mxu0 %v20245_v13  ;;  %v20285_v4 = vpack.c.bf16 %v11559_v58, %v11558_v8  ;;  %v14706_v8 = vld [vmem:[%s30118_s20 + $0x1a0] sm:$0xff]  ;;  %v14707_v58 = vld [vmem:[%s30118_s20 + $0x1a8] sm:$0xff] }
0x110a   : > { %18816 = vmatmul.mubr.msk.f32.gmra.mrb[94].mxu0 %vm11422_vm14, %v11417_v17  ;;  %v11560_v17 = vld [vmem:[%s30118_s20 + $0x40] sm:$0xff] }
0x110b   : > { %18818 = vmatprep.mubr.msk.f32.mxu0 %vm11422_vm14, %v11418_v20  ;;  %20248 = vmatpush3.bf16.msra.mxu0 %v20245_v13  ;;  %v11561_v20 = vld [vmem:[%s30118_s20 + $0x48] sm:$0xff] }
0x110c   : > { %20250 = vmatprep.subr.bf16.mxu0 %v20249_v27 }
0x110e   : > { %18819 = vmatmul.mubr.msk.f32.gmra.mrb[96].mxu0 %vm11422_vm14, %v11419_v7  ;;  %v20293_v7 = vpack.c.bf16 %v11563_v59, %v11562_v41 }
0x110f   : > { %18821 = vmatprep.mubr.msk.f32.mxu0 %vm11422_vm14, %v11420_v23  ;;  %20252 = vmatpush3.bf16.msra.mxu0 %v20249_v27  ;;  %v20289_v27 = vpack.c.bf16 %v11561_v20, %v11560_v17  ;;  %v11564_v23 = vld [vmem:[%s30118_s20 + $0x60] sm:$0xff]  ;;  %v20345_v17 = vpack.c.bf16 %v14707_v58, %v14706_v8  ;;  %v14708_v20 = vld [vmem:[%s30118_s20 + $0x1b0] sm:$0xff]  ;;  %v14737_v8 = vld [vmem:[%s30118_s20 + $0x298] sm:$0xff] }
0x1110   : > { %20254 = vmatprep.subr.bf16.mxu0 %v20253_v12 }
0x1112   : > { %18822 = vmatmul.mubr.msk.f32.gmra.mrb[98].mxu0 %vm11422_vm14, %v11421_v11  ;;  %v11567_v11 = vld [vmem:[%s30118_s20 + $0x78] sm:$0xff] }
0x1113   : > { %20256 = vmatpush3.bf16.msra.mxu0 %v20253_v12  ;;  %v11565_v12 = vld [vmem:[%s30118_s20 + $0x68] sm:$0xff] }
0x1114   : > { %20258 = vmatprep.subr.bf16.mxu0 %v20257_v55  ;;  %v20297_v10 = vpack.c.bf16 %v11565_v12, %v11564_v23  ;;  %v14711_v23 = vld [vmem:[%s30118_s20 + $0x1c8] sm:$0xff]  ;;  %v14712_v12 = vld [vmem:[%s30118_s20 + $0x1d0] sm:$0xff] }
0x1117   : > { %20260 = vmatpush3.bf16.msra.mxu0 %v20257_v55  ;;  %v20301_v55 = vpack.c.bf16 %v11567_v11, %v11566_v61  ;;  %v14714_v11 = vld [vmem:[%s30118_s20 + $0x1e0] sm:$0xff] }
0x1118   : > { %20262 = vmatprep.subr.bf16.mxu0 %v20261_v52 }
0x111b   : > { %20264 = vmatpush3.bf16.msra.mxu0 %v20261_v52  ;;  %v20305_v52 = vpack.c.bf16 %v14687_v35, %v14686_v22  ;;  %v14716_v22 = vld [vmem:[%s30118_s20 + $0x1f0] sm:$0xff]  ;;  %v14717_v35 = vld [vmem:[%s30118_s20 + $0x1f8] sm:$0xff] }
0x111c   : > { %20266 = vmatprep.subr.bf16.mxu0 %v20265_v40 }
0x111f   : > { %20268 = vmatpush3.bf16.msra.mxu0 %v20265_v40  ;;  %v20309_v40 = vpack.c.bf16 %v14689_v42, %v14688_v26  ;;  %v14718_v26 = vld [vmem:[%s30118_s20 + $0x200] sm:$0xff]  ;;  %v14719_v42 = vld [vmem:[%s30118_s20 + $0x208] sm:$0xff] }
0x1120   : > { %20270 = vmatprep.subr.bf16.mxu0 %v20269_v60 }
0x1123   : > { %20272 = vmatpush3.bf16.msra.mxu0 %v20269_v60  ;;  %v20313_v60 = vpack.c.bf16 %v14691_v49, %v14690_v15  ;;  %v14720_v15 = vld [vmem:[%s30118_s20 + $0x210] sm:$0xff]  ;;  %v14721_v49 = vld [vmem:[%s30118_s20 + $0x218] sm:$0xff] }
0x1124   : > { %20274 = vmatprep.subr.bf16.mxu0 %v20273_v37 }
0x11d9   : > { %v28328_v51 = vpop.f32.mrb[92].mxu0 }
0x11da   : > { %v11592_v62 = vrot.slane %v28328_v51, 1  ;;  %v11816_v24 = vrot.slane %v28328_v51, 2  ;;  %v11513_v53 = vpop.f32.mrb[93].mxu0 }
0x11db   : > { %v11591_v39 = vrot.slane %v11513_v53, 1  ;;  %v11815_v38 = vrot.slane %v11513_v53, 2 }
0x11dd   : > { %v28332_v46 = vpop.f32.mrb[94].mxu0  ;;  %v11593_v36 = vsel %vm739_vm3, %v11591_v39, %v11592_v62  ;;  %v28342_v33 = vsel %vm1840_vm5, %v11815_v38, %v11816_v24  ;;  %v14696_v39 = vld [vmem:[%s30118_s20 + $0x150] sm:$0xff]  ;;  %v14697_v38 = vld [vmem:[%s30118_s20 + $0x158] sm:$0xff] }
0x11de   : > { %v28344_v45 = vpop.f32.mrb[95].mxu0  ;;  %18856 = vmatprep.mubr.f32.mxu0 %v11593_v36  ;;  %v11596_v2 = vrot.slane %v28332_v46, 1  ;;  %v11820_v31 = vrot.slane %v28332_v46, 2  ;;  %v20325_v36 = vpack.c.bf16 %v14697_v38, %v14696_v39  ;;  %v14726_v39 = vld [vmem:[%s30118_s20 + $0x240] sm:$0xff]  ;;  %v14727_v38 = vld [vmem:[%s30118_s20 + $0x248] sm:$0xff] }
0x11df   : > { %v11594_v9 = vrot.slane %v28344_v45, 1  ;;  %v11818_v34 = vrot.slane %v28344_v45, 2 }
0x11e1   : > { %v28351_v29 = vsel %vm739_vm3, %v11592_v62, %v11594_v9  ;;  %v28359_v54 = vpop.f32.mrb[96].mxu0  ;;  %v28362_v32 = vsel %vm739_vm3, %v11594_v9, %v11596_v2  ;;  %v28365_v18 = vsel %vm1840_vm5, %v11816_v24, %v11818_v34  ;;  %v28368_v25 = vsel %vm1840_vm5, %v11818_v34, %v11820_v31  ;;  %v14694_v62 = vld [vmem:[%s30118_s20 + $0x140] sm:$0xff]  ;;  %v14695_v24 = vld [vmem:[%s30118_s20 + $0x148] sm:$0xff] }
0x11e2   : > { %18857 = vmatmul.mubr.f32.vlgmr.msra.gmra.mrb[100].mxu0 %v28351_v29  ;;  %v28371_v19 = vpop.f32.mrb[97].mxu0  ;;  %v28374_v43 = vrot.slane %v28359_v54, 1  ;;  %v14702_v34 = vld [vmem:[%s30118_s20 + $0x180] sm:$0xff] }
0x11e3   : > { %20276 = vmatpush3.bf16.msra.mxu0 %v20273_v37  ;;  %18859 = vmatprep.mubr.f32.mxu0 %v28362_v32  ;;  %v11598_v48 = vrot.slane %v28371_v19, 1  ;;  %v11822_v47 = vrot.slane %v28371_v19, 2  ;;  %v20317_v37 = vpack.c.bf16 %v14693_v5, %v14692_v1  ;;  %v14722_v1 = vld [vmem:[%s30118_s20 + $0x220] sm:$0xff]  ;;  %v14723_v5 = vld [vmem:[%s30118_s20 + $0x228] sm:$0xff] }
0x11e4   : > { %20278 = vmatprep.subr.bf16.mxu0 %v20277_v21 }
0x11e5   : > { %v28386_v28 = vsel %vm739_vm3, %v11596_v2, %v11598_v48  ;;  %v28390_v30 = vsel %vm739_vm3, %v11598_v48, %v28374_v43  ;;  %v28392_v56 = vpop.f32.mrb[98].mxu0  ;;  %v28397_v13 = vsel %vm1840_vm5, %v11820_v31, %v11822_v47  ;;  %v14700_v2 = vld [vmem:[%s30118_s20 + $0x170] sm:$0xff]  ;;  %v14701_v31 = vld [vmem:[%s30118_s20 + $0x178] sm:$0xff] }
0x11e6   : > { %18860 = vmatmul.mubr.f32.gmra.mrb[102].mxu0 %v28386_v28  ;;  %v28400_v63 = vpop.f32.mrb[99].mxu0  ;;  %v20333_v9 = vpack.c.bf16 %v14701_v31, %v14700_v2  ;;  %v14705_v48 = vld [vmem:[%s30118_s20 + $0x198] sm:$0xff]  ;;  %v14730_v2 = vld [vmem:[%s30118_s20 + $0x260] sm:$0xff] }
0x11e7   : > { %20280 = vmatpush3.bf16.msra.mxu0 %v20277_v21  ;;  %18862 = vmatprep.mubr.f32.mxu0 %v28390_v30  ;;  %v14703_v21 = vld [vmem:[%s30118_s20 + $0x188] sm:$0xff] }
0x11e8   : > { %20282 = vmatprep.subr.bf16.mxu0 %v20281_v16  ;;  %v20337_v6 = vpack.c.bf16 %v14703_v21, %v14702_v34  ;;  %v14733_v34 = vld [vmem:[%s30118_s20 + $0x278] sm:$0xff] }
0x11ea   : > { %18863 = vmatmul.mubr.f32.gmra.mrb[104].mxu0 %v28374_v43 }
0x11eb   : > { %20284 = vmatpush3.bf16.msra.mxu0 %v20281_v16  ;;  %18897 = vmatprep.mubr.f32.mxu0 %v11513_v53  ;;  %v20321_v53 = vpack.c.bf16 %v14695_v24, %v14694_v62  ;;  %v20341_v16 = vpack.c.bf16 %v14705_v48, %v14704_v57  ;;  %v14724_v62 = vld [vmem:[%s30118_s20 + $0x230] sm:$0xff]  ;;  %v14725_v24 = vld [vmem:[%s30118_s20 + $0x238] sm:$0xff]  ;;  %v14735_v57 = vld [vmem:[%s30118_s20 + $0x288] sm:$0xff] }
0x11ec   : > { %20286 = vmatprep.subr.bf16.mxu0 %v20285_v4 }
0x11ef   : > { %20288 = vmatpush3.bf16.msra.mxu0 %v20285_v4  ;;  %v28502_v4 = vrot.slane %v28359_v54, 2 }
0x11f0   : > { %20290 = vmatprep.subr.bf16.mxu0 %v20289_v27 }
0x11f1   : > { %v28516_v41 = vsel %vm1840_vm5, %v11822_v47, %v28502_v4 }
0x11f3   : > { %20292 = vmatpush3.bf16.msra.mxu0 %v20289_v27  ;;  %v14709_v27 = vld [vmem:[%s30118_s20 + $0x1b8] sm:$0xff] }
0x11f4   : > { %20294 = vmatprep.subr.bf16.mxu0 %v20293_v7  ;;  %v20349_v59 = vpack.c.bf16 %v14709_v27, %v14708_v20  ;;  %v14739_v20 = vld [vmem:[%s30118_s20 + $0x2a8] sm:$0xff]  ;;  %v28618_v27 = vrot.slane %v28400_v63, 1 }
0x11f7   : > { %20296 = vmatpush3.bf16.msra.mxu0 %v20293_v7  ;;  %v14710_v7 = vld [vmem:[%s30118_s20 + $0x1c0] sm:$0xff] }
0x11f8   : > { %20298 = vmatprep.subr.bf16.mxu0 %v20297_v10  ;;  %v20353_v47 = vpack.c.bf16 %v14711_v23, %v14710_v7  ;;  %v14740_v7 = vld [vmem:[%s30118_s20 + $0x2b0] sm:$0xff]  ;;  %v14741_v23 = vld [vmem:[%s30118_s20 + $0x2b8] sm:$0xff] }
0x11fb   : > { %20300 = vmatpush3.bf16.msra.mxu0 %v20297_v10  ;;  %v14713_v10 = vld [vmem:[%s30118_s20 + $0x1d8] sm:$0xff] }
0x11fc   : > { %20302 = vmatprep.subr.bf16.mxu0 %v20301_v55  ;;  %v20357_v61 = vpack.c.bf16 %v14713_v10, %v14712_v12  ;;  %v20413_v12 = vpack.c.bf16 %v14741_v23, %v14740_v7  ;;  %v14742_v10 = vld [vmem:[%s30118_s20 + $0x2c0] sm:$0xff]  ;;  %v14771_v7 = vld [vmem:[%s30118_s20 + $0x3a8] sm:$0xff] }
0x11ff   : > { %20304 = vmatpush3.bf16.msra.mxu0 %v20301_v55 }
0x1200   : > { %20306 = vmatprep.subr.bf16.mxu0 %v20305_v52 }
0x1202   : > { %18898 = vmatmul.mubr.f32.vlgmr.msra.gmra.mrb[100].mxu0 %v28328_v51 }
0x1203   : > { %18900 = vmatprep.mubr.f32.mxu0 %v28344_v45  ;;  %20308 = vmatpush3.bf16.msra.mxu0 %v20305_v52  ;;  %v20365_v52 = vpack.c.bf16 %v14717_v35, %v14716_v22  ;;  %v14746_v22 = vld [vmem:[%s30118_s20 + $0x2e0] sm:$0xff] }
0x1204   : > { %20310 = vmatprep.subr.bf16.mxu0 %v20309_v40 }
0x1206   : > { %18901 = vmatmul.mubr.f32.gmra.mrb[102].mxu0 %v28332_v46 }
0x1207   : > { %20312 = vmatpush3.bf16.msra.mxu0 %v20309_v40  ;;  %18903 = vmatprep.mubr.f32.mxu0 %v28371_v19  ;;  %v20369_v40 = vpack.c.bf16 %v14719_v42, %v14718_v26  ;;  %v14749_v26 = vld [vmem:[%s30118_s20 + $0x2f8] sm:$0xff] }
0x1208   : > { %20314 = vmatprep.subr.bf16.mxu0 %v20313_v60 }
0x120a   : > { %18904 = vmatmul.mubr.f32.gmra.mrb[104].mxu0 %v28359_v54 }
0x120b   : > { %20316 = vmatpush3.bf16.msra.mxu0 %v20313_v60  ;;  %18938 = vmatprep.mubr.f32.mxu0 %v28342_v33  ;;  %v20329_v33 = vpack.c.bf16 %v14699_v50, %v14698_v0  ;;  %v20373_v60 = vpack.c.bf16 %v14721_v49, %v14720_v15  ;;  %v14728_v0 = vld [vmem:[%s30118_s20 + $0x250] sm:$0xff]  ;;  %v14729_v50 = vld [vmem:[%s30118_s20 + $0x258] sm:$0xff]  ;;  %v14751_v15 = vld [vmem:[%s30118_s20 + $0x308] sm:$0xff] }
0x120c   : > { %20318 = vmatprep.subr.bf16.mxu0 %v20317_v37 }
0x120f   : > { %20320 = vmatpush3.bf16.msra.mxu0 %v20317_v37  ;;  %v20377_v37 = vpack.c.bf16 %v14723_v5, %v14722_v1  ;;  %v14753_v1 = vld [vmem:[%s30118_s20 + $0x318] sm:$0xff] }
0x1210   : > { %20322 = vmatprep.subr.bf16.mxu0 %v20321_v53 }
0x1213   : > { %20324 = vmatpush3.bf16.msra.mxu0 %v20321_v53  ;;  %v20381_v53 = vpack.c.bf16 %v14725_v24, %v14724_v62  ;;  %v14755_v62 = vld [vmem:[%s30118_s20 + $0x328] sm:$0xff]  ;;  %v28680_v24 = vrot.slane %v28400_v63, 2 }
0x1214   : > { %20326 = vmatprep.subr.bf16.mxu0 %v20325_v36 }
0x1217   : > { %20328 = vmatpush3.bf16.msra.mxu0 %v20325_v36  ;;  %v20385_v36 = vpack.c.bf16 %v14727_v38, %v14726_v39  ;;  %v14756_v39 = vld [vmem:[%s30118_s20 + $0x330] sm:$0xff]  ;;  %v14757_v38 = vld [vmem:[%s30118_s20 + $0x338] sm:$0xff] }
0x1218   : > { %20330 = vmatprep.subr.bf16.mxu0 %v20329_v33 }
0x121b   : > { %20332 = vmatpush3.bf16.msra.mxu0 %v20329_v33  ;;  %v20389_v33 = vpack.c.bf16 %v14729_v50, %v14728_v0  ;;  %v20445_v0 = vpack.c.bf16 %v14757_v38, %v14756_v39  ;;  %v14758_v50 = vld [vmem:[%s30118_s20 + $0x340] sm:$0xff]  ;;  %v14791_v38 = vld [vmem:[%s30118_s20 + $0x448] sm:$0xff] }
0x121c   : > { %20334 = vmatprep.subr.bf16.mxu0 %v20333_v9 }
0x121f   : > { %20336 = vmatpush3.bf16.msra.mxu0 %v20333_v9  ;;  %v14732_v9 = vld [vmem:[%s30118_s20 + $0x270] sm:$0xff] }
0x1220   : > { %20338 = vmatprep.subr.bf16.mxu0 %v20337_v6  ;;  %v20397_v21 = vpack.c.bf16 %v14733_v34, %v14732_v9  ;;  %v14762_v9 = vld [vmem:[%s30118_s20 + $0x360] sm:$0xff] }
0x1222   : > { %18939 = vmatmul.mubr.f32.vlgmr.msra.gmra.mrb[100].mxu0 %v28365_v18 }
0x1223   : > { %18941 = vmatprep.mubr.f32.mxu0 %v28368_v25  ;;  %20340 = vmatpush3.bf16.msra.mxu0 %v20337_v6  ;;  %v14734_v6 = vld [vmem:[%s30118_s20 + $0x280] sm:$0xff] }
0x1224   : > { %20342 = vmatprep.subr.bf16.mxu0 %v20341_v16  ;;  %v20401_v48 = vpack.c.bf16 %v14735_v57, %v14734_v6  ;;  %v14765_v6 = vld [vmem:[%s30118_s20 + $0x378] sm:$0xff] }
0x1226   : > { %18942 = vmatmul.mubr.f32.gmra.mrb[102].mxu0 %v28397_v13 }
0x1227   : > { %18944 = vmatprep.mubr.f32.mxu0 %v28516_v41  ;;  %20344 = vmatpush3.bf16.msra.mxu0 %v20341_v16  ;;  %v14736_v16 = vld [vmem:[%s30118_s20 + $0x290] sm:$0xff] }
0x1228   : > { %20346 = vmatprep.subr.bf16.mxu0 %v20345_v17  ;;  %v20405_v58 = vpack.c.bf16 %v14737_v8, %v14736_v16  ;;  %v14767_v16 = vld [vmem:[%s30118_s20 + $0x388] sm:$0xff] }
0x122a   : > { %18945 = vmatmul.mubr.f32.gmra.mrb[104].mxu0 %v28502_v4 }
0x122b   : > { %20348 = vmatpush3.bf16.msra.mxu0 %v20345_v17  ;;  %18979 = vmatprep.mubr.f32.mxu0 %v28328_v51  ;;  %v14715_v51 = vld [vmem:[%s30118_s20 + $0x1e8] sm:$0xff]  ;;  %v14738_v17 = vld [vmem:[%s30118_s20 + $0x2a0] sm:$0xff] }
0x122c   : > { %20350 = vmatprep.subr.bf16.mxu0 %v20349_v59  ;;  %v20361_v55 = vpack.c.bf16 %v14715_v51, %v14714_v11  ;;  %v14744_v11 = vld [vmem:[%s30118_s20 + $0x2d0] sm:$0xff]  ;;  %v14745_v51 = vld [vmem:[%s30118_s20 + $0x2d8] sm:$0xff] }
0x122f   : > { %20352 = vmatpush3.bf16.msra.mxu0 %v20349_v59  ;;  %v20409_v59 = vpack.c.bf16 %v14739_v20, %v14738_v17  ;;  %v14769_v17 = vld [vmem:[%s30118_s20 + $0x398] sm:$0xff] }
0x1230   : > { %20354 = vmatprep.subr.bf16.mxu0 %v20353_v47 }
0x1233   : > { %20356 = vmatpush3.bf16.msra.mxu0 %v20353_v47  ;;  %v28632_v47 = vsel %vm739_vm3, %v28374_v43, %v28618_v27 }
0x1234   : > { %20358 = vmatprep.subr.bf16.mxu0 %v20357_v61 }
0x1237   : > { %20360 = vmatpush3.bf16.msra.mxu0 %v20357_v61  ;;  %v14743_v61 = vld [vmem:[%s30118_s20 + $0x2c8] sm:$0xff] }
0x1238   : > { %20362 = vmatprep.subr.bf16.mxu0 %v20361_v55  ;;  %v20417_v43 = vpack.c.bf16 %v14743_v61, %v14742_v10  ;;  %v14773_v10 = vld [vmem:[%s30118_s20 + $0x3b8] sm:$0xff]  ;;  %v14775_v61 = vld [vmem:[%s30118_s20 + $0x3c8] sm:$0xff] }
0x123b   : > { %20364 = vmatpush3.bf16.msra.mxu0 %v20361_v55  ;;  %v20421_v55 = vpack.c.bf16 %v14745_v51, %v14744_v11  ;;  %v14778_v51 = vld [vmem:[%s30118_s20 + $0x3e0] sm:$0xff] }
0x123c   : > { %20366 = vmatprep.subr.bf16.mxu0 %v20365_v52 }
0x123f   : > { %20368 = vmatpush3.bf16.msra.mxu0 %v20365_v52  ;;  %v14748_v52 = vld [vmem:[%s30118_s20 + $0x2f0] sm:$0xff] }
0x1240   : > { %20370 = vmatprep.subr.bf16.mxu0 %v20369_v40  ;;  %v20429_v42 = vpack.c.bf16 %v14749_v26, %v14748_v52  ;;  %v14782_v52 = vld [vmem:[%s30118_s20 + $0x400] sm:$0xff]  ;;  %v14783_v26 = vld [vmem:[%s30118_s20 + $0x408] sm:$0xff] }
0x1242   : > { %18980 = vmatmul.mubr.f32.vlgmr.msra.gmra.mrb[100].mxu0 %v28344_v45 }
0x1243   : > { %18982 = vmatprep.mubr.f32.mxu0 %v28332_v46  ;;  %20372 = vmatpush3.bf16.msra.mxu0 %v20369_v40  ;;  %v14750_v40 = vld [vmem:[%s30118_s20 + $0x300] sm:$0xff] }
0x1244   : > { %20374 = vmatprep.subr.bf16.mxu0 %v20373_v60  ;;  %v20433_v49 = vpack.c.bf16 %v14751_v15, %v14750_v40  ;;  %v14784_v40 = vld [vmem:[%s30118_s20 + $0x410] sm:$0xff]  ;;  %v14785_v15 = vld [vmem:[%s30118_s20 + $0x418] sm:$0xff] }
0x1246   : > { %18983 = vmatmul.mubr.f32.gmra.mrb[102].mxu0 %v28371_v19 }
0x1247   : > { %18985 = vmatprep.mubr.f32.mxu0 %v28359_v54  ;;  %20376 = vmatpush3.bf16.msra.mxu0 %v20373_v60  ;;  %v14752_v60 = vld [vmem:[%s30118_s20 + $0x310] sm:$0xff] }
0x1248   : > { %20378 = vmatprep.subr.bf16.mxu0 %v20377_v37  ;;  %v20437_v5 = vpack.c.bf16 %v14753_v1, %v14752_v60  ;;  %v14786_v60 = vld [vmem:[%s30118_s20 + $0x420] sm:$0xff]  ;;  %v14787_v1 = vld [vmem:[%s30118_s20 + $0x428] sm:$0xff] }
0x124a   : > { %18986 = vmatmul.mubr.f32.gmra.mrb[104].mxu0 %v28400_v63 }
0x124b   : > { %20380 = vmatpush3.bf16.msra.mxu0 %v20377_v37  ;;  %19020 = vmatprep.mubr.f32.mxu0 %v28351_v29  ;;  %v14731_v29 = vld [vmem:[%s30118_s20 + $0x268] sm:$0xff]  ;;  %v14754_v37 = vld [vmem:[%s30118_s20 + $0x320] sm:$0xff] }
0x124c   : > { %20382 = vmatprep.subr.bf16.mxu0 %v20381_v53  ;;  %v20393_v31 = vpack.c.bf16 %v14731_v29, %v14730_v2  ;;  %v14760_v2 = vld [vmem:[%s30118_s20 + $0x350] sm:$0xff]  ;;  %v14761_v29 = vld [vmem:[%s30118_s20 + $0x358] sm:$0xff] }
0x124f   : > { %20384 = vmatpush3.bf16.msra.mxu0 %v20381_v53  ;;  %v20441_v53 = vpack.c.bf16 %v14755_v62, %v14754_v37  ;;  %v20505_v37 = vpack.c.bf16 %v14787_v1, %v14786_v60  ;;  %v14788_v62 = vld [vmem:[%s30118_s20 + $0x430] sm:$0xff] }
0x1250   : > { %20386 = vmatprep.subr.bf16.mxu0 %v20385_v36 }
0x1253   : > { %20388 = vmatpush3.bf16.msra.mxu0 %v20385_v36  ;;  %v28694_v36 = vsel %vm1840_vm5, %v28502_v4, %v28680_v24 }
0x1254   : > { %20390 = vmatprep.subr.bf16.mxu0 %v20389_v33 }
0x1257   : > { %20392 = vmatpush3.bf16.msra.mxu0 %v20389_v33  ;;  %v14759_v33 = vld [vmem:[%s30118_s20 + $0x348] sm:$0xff] }
0x1258   : > { %20394 = vmatprep.subr.bf16.mxu0 %v20393_v31  ;;  %v20449_v4 = vpack.c.bf16 %v14759_v33, %v14758_v50  ;;  %v14794_v33 = vld [vmem:[%s30118_s20 + $0x460] sm:$0xff] }
0x125b   : > { %20396 = vmatpush3.bf16.msra.mxu0 %v20393_v31  ;;  %v20453_v31 = vpack.c.bf16 %v14761_v29, %v14760_v2  ;;  %v14796_v2 = vld [vmem:[%s30118_s20 + $0x470] sm:$0xff]  ;;  %v14797_v29 = vld [vmem:[%s30118_s20 + $0x478] sm:$0xff] }
0x125c   : > { %20398 = vmatprep.subr.bf16.mxu0 %v20397_v21 }
0x125f   : > { %20400 = vmatpush3.bf16.msra.mxu0 %v20397_v21  ;;  %v14764_v21 = vld [vmem:[%s30118_s20 + $0x370] sm:$0xff] }
0x1260   : > { %20402 = vmatprep.subr.bf16.mxu0 %v20401_v48  ;;  %v20461_v57 = vpack.c.bf16 %v14765_v6, %v14764_v21  ;;  %v12852_v21 = vld [vmem:[#allocation10] sm:$0xff]  ;;  %v12853_v6 = vld [vmem:[#allocation10 + $0x8] sm:$0xff] }
0x1262   : > { %19021 = vmatmul.mubr.f32.vlgmr.msra.gmra.mrb[100].mxu0 %v28362_v32 }
0x1263   : > { %19023 = vmatprep.mubr.f32.mxu0 %v28386_v28  ;;  %20404 = vmatpush3.bf16.msra.mxu0 %v20401_v48  ;;  %v14766_v48 = vld [vmem:[%s30118_s20 + $0x380] sm:$0xff] }
0x1264   : > { %20406 = vmatprep.subr.bf16.mxu0 %v20405_v58  ;;  %v20465_v8 = vpack.c.bf16 %v14767_v16, %v14766_v48  ;;  %v20538_v48 = vpack.c.bf16 %v12853_v6, %v12852_v21 }
0x1266   : > { %19024 = vmatmul.mubr.f32.gmra.mrb[102].mxu0 %v28390_v30  ;;  %20539 = vmatpush3.bf16.msra.mxu1 %v20538_v48 }
0x1267   : > { %19026 = vmatprep.mubr.f32.mxu0 %v28632_v47  ;;  %20408 = vmatpush3.bf16.msra.mxu0 %v20405_v58  ;;  %v14768_v58 = vld [vmem:[%s30118_s20 + $0x390] sm:$0xff] }
0x1268   : > { %20410 = vmatprep.subr.bf16.mxu0 %v20409_v59  ;;  %v20469_v20 = vpack.c.bf16 %v14769_v17, %v14768_v58  ;;  %20540 = vmatprep.subr.bf16.mxu1 %v30095_v14  ;;  %v12860_v17 = vld [vmem:[#allocation10 + $0x40] sm:$0xff] }
0x126a   : > { %19027 = vmatmul.mubr.f32.gmra.mrb[104].mxu0 %v28618_v27 }
0x126b   : > { %20412 = vmatpush3.bf16.msra.mxu0 %v20409_v59  ;;  %19061 = vmatprep.mubr.f32.mxu0 %v28365_v18  ;;  %v14747_v18 = vld [vmem:[%s30118_s20 + $0x2e8] sm:$0xff]  ;;  %v14770_v59 = vld [vmem:[%s30118_s20 + $0x3a0] sm:$0xff] }
0x126c   : > { %20414 = vmatprep.subr.bf16.mxu0 %v20413_v12  ;;  %v20425_v35 = vpack.c.bf16 %v14747_v18, %v14746_v22  ;;  %v20473_v23 = vpack.c.bf16 %v14771_v7, %v14770_v59  ;;  %v14780_v22 = vld [vmem:[%s30118_s20 + $0x3f0] sm:$0xff]  ;;  %v14781_v18 = vld [vmem:[%s30118_s20 + $0x3f8] sm:$0xff] }
0x126d   : > { %v12862_v7 = vld [vmem:[#allocation10 + $0x50] sm:$0xff] }
0x126f   : > { %20416 = vmatpush3.bf16.msra.mxu0 %v20413_v12  ;;  %v14772_v12 = vld [vmem:[%s30118_s20 + $0x3b0] sm:$0xff] }
0x1270   : > { %20418 = vmatprep.subr.bf16.mxu0 %v20417_v43 }
0x1273   : > { %20420 = vmatpush3.bf16.msra.mxu0 %v20417_v43  ;;  %v14777_v43 = vld [vmem:[%s30118_s20 + $0x3d8] sm:$0xff] }
0x1274   : > { %20422 = vmatprep.subr.bf16.mxu0 %v20421_v55 }
0x1277   : > { %20424 = vmatpush3.bf16.msra.mxu0 %v20421_v55 }
0x1278   : > { %20426 = vmatprep.subr.bf16.mxu0 %v20425_v35 }
0x127b   : > { %20428 = vmatpush3.bf16.msra.mxu0 %v20425_v35  ;;  %v20493_v35 = vpack.c.bf16 %v14781_v18, %v14780_v22 }
0x127c   : > { %20430 = vmatprep.subr.bf16.mxu0 %v20429_v42 }
0x127f   : > { %20432 = vmatpush3.bf16.msra.mxu0 %v20429_v42  ;;  %v20497_v42 = vpack.c.bf16 %v14783_v26, %v14782_v52 }
0x1280   : > { %20434 = vmatprep.subr.bf16.mxu0 %v20433_v49 }
0x1282   : > { %19062 = vmatmul.mubr.f32.vlgmr.msra.gmra.mrb[100].mxu0 %v28368_v25 }
0x1283   : > { %19064 = vmatprep.mubr.f32.mxu0 %v28397_v13  ;;  %20436 = vmatpush3.bf16.msra.mxu0 %v20433_v49  ;;  %v20501_v49 = vpack.c.bf16 %v14785_v15, %v14784_v40 }
0x1284   : > { %20438 = vmatprep.subr.bf16.mxu0 %v20437_v5 }
0x1286   : > { %19065 = vmatmul.mubr.f32.gmra.mrb[102].mxu0 %v28516_v41 }
0x1287   : > { %19067 = vmatprep.mubr.f32.mxu0 %v28694_v36  ;;  %20440 = vmatpush3.bf16.msra.mxu0 %v20437_v5  ;;  %v12432_v5 = vrot.slane %v28392_v56, 1 }
0x1288   : > { %20442 = vmatprep.subr.bf16.mxu0 %v20441_v53 }
0x1289   : > { %v12433_v39 = vsel %vm739_vm3, %v28618_v27, %v12432_v5  ;;  %v14792_v27 = vld [vmem:[%s30118_s20 + $0x450] sm:$0xff] }
0x128a   : > { %19068 = vmatmul.mubr.f32.gmra.mrb[104].mxu0 %v28680_v24 }
0x128b   : > { %20444 = vmatpush3.bf16.msra.mxu0 %v20441_v53  ;;  %19102 = vmatprep.mubr.f32.mxu0 %v28344_v45  ;;  %v14763_v45 = vld [vmem:[%s30118_s20 + $0x368] sm:$0xff]  ;;  %v14789_v53 = vld [vmem:[%s30118_s20 + $0x438] sm:$0xff] }
0x128c   : > { %20446 = vmatprep.subr.bf16.mxu0 %v20445_v0  ;;  %v20457_v34 = vpack.c.bf16 %v14763_v45, %v14762_v9  ;;  %v12554_v9 = vrot.slane %v28392_v56, 2 }
0x128e   : > { %v12555_v45 = vsel %vm1840_vm5, %v28680_v24, %v12554_v9  ;;  %v12858_v24 = vld [vmem:[#allocation10 + $0x30] sm:$0xff] }
0x128f   : > { %20448 = vmatpush3.bf16.msra.mxu0 %v20445_v0  ;;  %v14793_v0 = vld [vmem:[%s30118_s20 + $0x458] sm:$0xff] }
0x1290   : > { %20450 = vmatprep.subr.bf16.mxu0 %v20449_v4  ;;  %v20517_v50 = vpack.c.bf16 %v14793_v0, %v14792_v27 }
0x1293   : > { %20452 = vmatpush3.bf16.msra.mxu0 %v20449_v4 }
0x1294   : > { %20454 = vmatprep.subr.bf16.mxu0 %v20453_v31 }
0x1297   : > { %20456 = vmatpush3.bf16.msra.mxu0 %v20453_v31  ;;  %v20525_v31 = vpack.c.bf16 %v14797_v29, %v14796_v2 }
0x1298   : > { %20458 = vmatprep.subr.bf16.mxu0 %v20457_v34 }
0x129b   : > { %20460 = vmatpush3.bf16.msra.mxu0 %v20457_v34  ;;  %v12763_v34 = vld [vmem:[#allocation9] sm:$0xff] }
0x129c   : > { %20462 = vmatprep.subr.bf16.mxu0 %v20461_v57 }
0x129f   : > { %20464 = vmatpush3.bf16.msra.mxu0 %v20461_v57  ;;  %v12854_v57 = vld [vmem:[#allocation10 + $0x10] sm:$0xff] }
0x12a0   : > { %20466 = vmatprep.subr.bf16.mxu0 %v20465_v8 }
0x12a2   : > { %19103 = vmatmul.mubr.f32.vlgmr.msra.gmra.mrb[100].mxu0 %v28332_v46  ;;  %v20477_v46 = vpack.c.bf16 %v14773_v10, %v14772_v12  ;;  %v12864_v10 = vld [vmem:[#allocation10 + $0x60] sm:$0xff] }
0x12a3   : > { %19105 = vmatprep.mubr.f32.mxu0 %v28371_v19  ;;  %20468 = vmatpush3.bf16.msra.mxu0 %v20465_v8  ;;  %v14774_v19 = vld [vmem:[%s30118_s20 + $0x3c0] sm:$0xff]  ;;  %v12859_v8 = vld [vmem:[#allocation10 + $0x38] sm:$0xff] }
0x12a4   : > { %20470 = vmatprep.subr.bf16.mxu0 %v20469_v20  ;;  %v20547_v58 = vpack.c.bf16 %v12859_v8, %v12858_v24  ;;  %v21858_v8 = vld [vmem:[%s28971_s6] sm:$0x1] }
0x12a6   : > { %19106 = vmatmul.mubr.f32.gmra.mrb[102].mxu0 %v28359_v54  ;;  %v20481_v54 = vpack.c.bf16 %v14775_v61, %v14774_v19  ;;  %v12866_v61 = vld [vmem:[#allocation10 + $0x70] sm:$0xff] }
0x12a7   : > { %19108 = vmatprep.mubr.f32.mxu0 %v28400_v63  ;;  %20472 = vmatpush3.bf16.msra.mxu0 %v20469_v20  ;;  %v14776_v63 = vld [vmem:[%s30118_s20 + $0x3d0] sm:$0xff]  ;;  %v12861_v20 = vld [vmem:[#allocation10 + $0x48] sm:$0xff] }
0x12a8   : > { %20474 = vmatprep.subr.bf16.mxu0 %v20473_v23  ;;  %v20485_v11 = vpack.c.bf16 %v14777_v43, %v14776_v63  ;;  %v20550_v59 = vpack.c.bf16 %v12861_v20, %v12860_v17 }
0x12aa   : > { %19109 = vmatmul.mubr.f32.gmra.mrb[104].mxu0 %v28392_v56  ;;  %v12855_v56 = vld [vmem:[#allocation10 + $0x18] sm:$0xff] }
0x12ab   : > { %20476 = vmatpush3.bf16.msra.mxu0 %v20473_v23  ;;  %19143 = vmatprep.mubr.f32.mxu0 %v28362_v32  ;;  %v14779_v32 = vld [vmem:[%s30118_s20 + $0x3e8] sm:$0xff]  ;;  %v12863_v23 = vld [vmem:[#allocation10 + $0x58] sm:$0xff] }
0x12ac   : > { %20478 = vmatprep.subr.bf16.mxu0 %v20477_v46  ;;  %v20489_v55 = vpack.c.bf16 %v14779_v32, %v14778_v51  ;;  %v20553_v12 = vpack.c.bf16 %v12863_v23, %v12862_v7 }
0x12af   : > { %20480 = vmatpush3.bf16.msra.mxu0 %v20477_v46  ;;  %v12865_v46 = vld [vmem:[#allocation10 + $0x68] sm:$0xff] }
0x12b0   : > { %20482 = vmatprep.subr.bf16.mxu0 %v20481_v54  ;;  %v20556_v19 = vpack.c.bf16 %v12865_v46, %v12864_v10 }
0x12b3   : > { %20484 = vmatpush3.bf16.msra.mxu0 %v20481_v54  ;;  %v12867_v54 = vld [vmem:[#allocation10 + $0x78] sm:$0xff] }
0x12b4   : > { %20486 = vmatprep.subr.bf16.mxu0 %v20485_v11  ;;  %v20559_v63 = vpack.c.bf16 %v12867_v54, %v12866_v61 }
0x12b7   : > { %20488 = vmatpush3.bf16.msra.mxu0 %v20485_v11 }
0x12b8   : > { %20490 = vmatprep.subr.bf16.mxu0 %v20489_v55 }
0x12bb   : > { %20492 = vmatpush3.bf16.msra.mxu0 %v20489_v55 }
0x12bc   : > { %20494 = vmatprep.subr.bf16.mxu0 %v20493_v35 }
0x12bf   : > { %20496 = vmatpush3.bf16.msra.mxu0 %v20493_v35 }
0x12c0   : > { %20498 = vmatprep.subr.bf16.mxu0 %v20497_v42 }
0x12c2   : > { %19144 = vmatmul.mubr.f32.vlgmr.msra.gmra.mrb[100].mxu0 %v28386_v28  ;;  %v20509_v28 = vpack.c.bf16 %v14789_v53, %v14788_v62 }
0x12c3   : > { %19146 = vmatprep.mubr.f32.mxu0 %v28390_v30  ;;  %20500 = vmatpush3.bf16.msra.mxu0 %v20497_v42  ;;  %v14790_v30 = vld [vmem:[%s30118_s20 + $0x440] sm:$0xff] }
0x12c4   : > { %20502 = vmatprep.subr.bf16.mxu0 %v20501_v49 }
0x12c6   : > { %19147 = vmatmul.mubr.f32.gmra.mrb[102].mxu0 %v28632_v47  ;;  %v20513_v47 = vpack.c.bf16 %v14791_v38, %v14790_v30 }
0x12c7   : > { %19149 = vmatprep.mubr.f32.mxu0 %v12433_v39  ;;  %20504 = vmatpush3.bf16.msra.mxu0 %v20501_v49 }
0x12c8   : > { %20506 = vmatprep.subr.bf16.mxu0 %v20505_v37 }
0x12ca   : > { %19150 = vmatmul.mubr.f32.gmra.mrb[104].mxu0 %v12432_v5 }
0x12cb   : > { %20508 = vmatpush3.bf16.msra.mxu0 %v20505_v37  ;;  %19184 = vmatprep.mubr.f32.mxu0 %v28368_v25  ;;  %v14795_v25 = vld [vmem:[%s30118_s20 + $0x468] sm:$0xff] }
0x12cc   : > { %20510 = vmatprep.subr.bf16.mxu0 %v20509_v28  ;;  %v20521_v4 = vpack.c.bf16 %v14795_v25, %v14794_v33 }
0x12cf   : > { %20512 = vmatpush3.bf16.msra.mxu0 %v20509_v28 }
0x12d0   : > { %20514 = vmatprep.subr.bf16.mxu0 %v20513_v47 }
0x12d3   : > { %20516 = vmatpush3.bf16.msra.mxu0 %v20513_v47 }
0x12d4   : > { %20518 = vmatprep.subr.bf16.mxu0 %v20517_v50 }
0x12d7   : > { %20520 = vmatpush3.bf16.msra.mxu0 %v20517_v50 }
0x12d8   : > { %20522 = vmatprep.subr.bf16.mxu0 %v20521_v4 }
0x12db   : > { %20524 = vmatpush3.bf16.msra.mxu0 %v20521_v4 }
0x12dc   : > { %20526 = vmatprep.subr.bf16.mxu0 %v20525_v31 }
0x12df   : > { %20528 = vmatpush3.bf16.msra.mxu0 %v20525_v31 }
0x12e2   : > { %19185 = vmatmul.mubr.f32.vlgmr.msra.gmra.mrb[100].mxu0 %v28397_v13  ;;  %v20541_v13 = vpack.c.bf16 %v12855_v56, %v12854_v57 }
0x12e3   : > { %19187 = vmatprep.mubr.f32.mxu0 %v28516_v41  ;;  %v12856_v41 = vld [vmem:[#allocation10 + $0x20] sm:$0xff] }
0x12e4   : > { %20542 = vmatpush3.bf16.msra.mxu1 %v20541_v13 }
0x12e5   : > { %20543 = vmatprep.subr.bf16.mxu1 %v30095_v14 }
0x12e6   : > { %19188 = vmatmul.mubr.f32.gmra.mrb[102].mxu0 %v28694_v36  ;;  %v12857_v36 = vld [vmem:[#allocation10 + $0x28] sm:$0xff] }
0x12e7   : > { %19190 = vmatprep.mubr.f32.mxu0 %v12555_v45  ;;  %v20544_v16 = vpack.c.bf16 %v12857_v36, %v12856_v41  ;;  %v21857_v41 = vld [vmem:[%s28970_s5] sm:$0x1] }
0x12e9   : > { %20545 = vmatpush3.bf16.msra.mxu1 %v20544_v16 }
0x12ea   : > { %19191 = vmatmul.mubr.f32.gmra.mrb[104].mxu0 %v12554_v9  ;;  %20546 = vmatprep.subr.bf16.mxu1 %v30095_v14 }
0x12eb   : > { %19203 = vmatprep.mubr.msk.f32.mxu0 %vm12765_vm15, %v12763_v34 }
0x12ed   : > { %20548 = vmatpush3.bf16.msra.mxu1 %v20547_v58 }
0x12ee   : > { %20549 = vmatprep.subr.bf16.mxu1 %v30095_v14 }
0x12f1   : > { %20551 = vmatpush3.bf16.msra.mxu1 %v20550_v59 }
0x12f2   : > { %20552 = vmatprep.subr.bf16.mxu1 %v30095_v14 }
0x12f5   : > { %20554 = vmatpush3.bf16.msra.mxu1 %v20553_v12 }
0x12f6   : > { %20555 = vmatprep.subr.bf16.mxu1 %v30095_v14 }
0x12f9   : > { %20557 = vmatpush3.bf16.msra.mxu1 %v20556_v19 }
0x12fa   : > { %20558 = vmatprep.subr.bf16.mxu1 %v30095_v14 }
0x12fd   : > { %20560 = vmatpush3.bf16.msra.mxu1 %v20559_v63 }
0x12fe   : > { %20561 = vmatprep.subr.bf16.mxu1 %v30095_v14 }
0x13b5   : > { %v19186_v43 = vpop.f32.mrb[100].mxu0 }
0x13b6   : > { %v12673_v11 = vmul.f32 %v19186_v43, %v19186_v43  ;;  %v12624_v51 = vpop.f32.mrb[101].mxu0 }
0x13b7   : > { %v12659_v32 = vadd.f32 %v19186_v43, %v12624_v51  ;;  %v12672_v55 = vmul.f32 %v12624_v51, %v12624_v51 }
0x13b9   : > { %v12678_v22 = vadd.f32 %v12673_v11, %v12672_v55  ;;  %v19189_v18 = vpop.f32.mrb[102].mxu0 }
0x13ba   : > { %v12634_v35 = vpop.f32.mrb[103].mxu0  ;;  %v12675_v42 = vmul.f32 %v19189_v18, %v19189_v18 }
0x13bb   : > { %v12660_v52 = vadd.f32 %v12659_v32, %v12634_v35  ;;  %v12674_v26 = vmul.f32 %v12634_v35, %v12634_v35 }
0x13bd   : > { %v12679_v40 = vadd.f32 %v12678_v22, %v12674_v26  ;;  %v19192_v15 = vpop.f32.mrb[104].mxu0  ;;  %v12661_v49 = vadd.f32 %v19189_v18, %v12660_v52 }
0x13be   : > { %v12677_v60 = vmul.f32 %v19192_v15, %v19192_v15  ;;  %v12644_v1 = vpop.f32.mrb[105].mxu0  ;;  %v12663_v53 = vsel %vm1840_vm5, %v19192_v15, 0.0 }
0x13bf   : > { %v12662_v5 = vadd.f32 %v12661_v49, %v12644_v1  ;;  %v12676_v37 = vmul.f32 %v12644_v1, %v12644_v1  ;;  %v12680_v62 = vadd.f32 %v12679_v40, %v12675_v42 }
0x13c0   : > { %v12682_v30 = vsel %vm1840_vm5, %v12677_v60, 0.0 }
0x13c1   : > { %v12664_v39 = vadd.f32 %v12663_v53, %v12662_v5  ;;  %v12681_v28 = vadd.f32 %v12680_v62, %v12676_v37 }
0x13c3   : > { %v12665_v38 = vrot.slane %v12664_v39, 4  ;;  %v12683_v47 = vadd.f32 %v12682_v30, %v12681_v28 }
0x13c5   : > { %v12666_v27 = vadd.f32 %v12665_v38, %v12664_v39  ;;  %v12684_v0 = vrot.slane %v12683_v47, 4 }
0x13c7   : > { %v12667_v50 = vrot.slane %v12666_v27, 2  ;;  %v12685_v33 = vadd.f32 %v12684_v0, %v12683_v47 }
0x13c9   : > { %v12668_v25 = vadd.f32 %v12667_v50, %v12666_v27  ;;  %v12686_v4 = vrot.slane %v12685_v33, 2 }
0x13cb   : > { %v12669_v2 = vrot.slane %v12668_v25, 1  ;;  %v12687_v29 = vadd.f32 %v12686_v4, %v12685_v33  ;;  %v12764_v4 = vld [vmem:[#allocation9 + $0x8] sm:$0x1] }
0x13cd   : > { %v12670_v31 = vadd.f32 %v12669_v2, %v12668_v25  ;;  %v12688_v9 = vrot.slane %v12687_v29, 1  ;;  %v12940_v2 = vld [vmem:[#allocation10 + $0x80] sm:$0xff] }
0x13cf   : > { %v12671_v45 = vmul.f32 0.027777778, %v12670_v31  ;;  %v12689_v34 = vadd.f32 %v12688_v9, %v12687_v29  ;;  %v12941_v29 = vld [vmem:[#allocation10 + $0x88] sm:$0xff] }
0x13d0   : > { %v20562_v31 = vpack.c.bf16 %v12941_v29, %v12940_v2  ;;  %v13128_v2 = vld [vmem:[#allocation10 + $0x1b8] sm:$0xff] }
0x13d1   : > { %v12690_v21 = vmul.f32 0.027777778, %v12689_v34  ;;  %v12691_v6 = vmul.f32 %v12671_v45, %v12671_v45  ;;  %v12943_v34 = vld [vmem:[#allocation10 + $0x98] sm:$0xff] }
0x13d3   : > { %v12692_v57 = vsub.f32 %v12690_v21, %v12691_v6 }
0x13d5   : > { %v12693_v48 = vmax.f32 %v12692_v57, 0.0  ;;  %v12944_v57 = vld [vmem:[#allocation10 + $0xa0] sm:$0xff] }
0x13d7   : > { %v12694_v56 = vadd.f32 1e-05, %v12693_v48  ;;  %v12945_v48 = vld [vmem:[#allocation10 + $0xa8] sm:$0xff] }
0x13d9   : > { %21797 = vrsqrt.f32 %v12694_v56  ;;  %v20568_v56 = vpack.c.bf16 %v12945_v48, %v12944_v57  ;;  %v13132_v57 = vld [vmem:[#allocation10 + $0x1d8] sm:$0xff] }
0x13e3   : > { %v21798_v13 = vpop.eup %21797 }
0x13e4   : > { %v12696_v36 = vmul.f32 %v21857_v41, %v21798_v13  ;;  %v12946_v13 = vld [vmem:[#allocation10 + $0xb0] sm:$0xff]  ;;  %v12947_v41 = vld [vmem:[#allocation10 + $0xb8] sm:$0xff] }
0x13e6   : > { %v12697_v16 = vmul.f32 %v12696_v36, %v12671_v45  ;;  %v12703_v24 = vrot.slane %v12696_v36, %v30117_v44  ;;  %v12942_v45 = vld [vmem:[#allocation10 + $0x90] sm:$0xff]  ;;  %v20571_v36 = vpack.c.bf16 %v12947_v41, %v12946_v13  ;;  %v13134_v13 = vld [vmem:[#allocation10 + $0x1e8] sm:$0xff] }
0x13e7   : > { %v20565_v6 = vpack.c.bf16 %v12943_v34, %v12942_v45  ;;  %v13130_v45 = vld [vmem:[#allocation10 + $0x1c8] sm:$0xff] }
0x13e8   : > { %v12698_v58 = vsub.f32 %v21858_v8, %v12697_v16  ;;  %v12709_v17 = vmul.f32 %v12703_v24, %v12644_v1  ;;  %v12705_v20 = vmul.f32 %v12703_v24, %v12624_v51  ;;  %v12706_v59 = vmul.f32 %v19186_v43, %v12703_v24  ;;  %v12948_v16 = vld [vmem:[#allocation10 + $0xc0] sm:$0xff] }
0x13e9   : > { %v12707_v7 = vmul.f32 %v12703_v24, %v12634_v35  ;;  %v12708_v23 = vmul.f32 %v19189_v18, %v12703_v24  ;;  %v12710_v12 = vmul.f32 %v19192_v15, %v12703_v24  ;;  %v12949_v24 = vld [vmem:[#allocation10 + $0xc8] sm:$0xff] }
0x13ea   : > { %v12715_v10 = vrot.slane %v12698_v58, %v30117_v44  ;;  %v20574_v8 = vpack.c.bf16 %v12949_v24, %v12948_v16  ;;  %v12950_v58 = vld [vmem:[#allocation10 + $0xd0] sm:$0xff]  ;;  %v13136_v16 = vld [vmem:[#allocation10 + $0x1f8] sm:$0xff] }
0x13ec   : > { %v12721_v46 = vadd.f32 %v12715_v10, %v12709_v17  ;;  %v12717_v19 = vadd.f32 %v12715_v10, %v12705_v20  ;;  %v12718_v61 = vadd.f32 %v12715_v10, %v12706_v59  ;;  %v12719_v54 = vadd.f32 %v12715_v10, %v12707_v7  ;;  %v12951_v17 = vld [vmem:[#allocation10 + $0xd8] sm:$0xff]  ;;  %v12952_v59 = vld [vmem:[#allocation10 + $0xe0] sm:$0xff]  ;;  %v12953_v7 = vld [vmem:[#allocation10 + $0xe8] sm:$0xff] }
0x13ed   : > { %v12720_v63 = vadd.f32 %v12715_v10, %v12708_v23  ;;  %v12722_v11 = vadd.f32 %v12715_v10, %v12710_v12  ;;  %v20577_v20 = vpack.c.bf16 %v12951_v17, %v12950_v58  ;;  %v20580_v23 = vpack.c.bf16 %v12953_v7, %v12952_v59  ;;  %v12954_v12 = vld [vmem:[#allocation10 + $0xf0] sm:$0xff]  ;;  %v12955_v10 = vld [vmem:[#allocation10 + $0xf8] sm:$0xff]  ;;  %v13212_v58 = vld [vmem:[#allocation10 + $0x208] sm:$0xff] }
0x13ee   : > { %v12727_v32 = vmax.f32 %v12721_v46, 0.0  ;;  %v12723_v55 = vmax.f32 %v12717_v19, 0.0  ;;  %v12724_v22 = vmax.f32 %v12718_v61, 0.0  ;;  %v12725_v52 = vmax.f32 %v12719_v54, 0.0  ;;  %v13031_v19 = vld [vmem:[#allocation10 + $0x100] sm:$0xff]  ;;  %v13032_v61 = vld [vmem:[#allocation10 + $0x108] sm:$0xff] }
0x13ef   : > { %v12726_v26 = vmax.f32 %v12720_v63, 0.0  ;;  %v12728_v42 = vmax.f32 %v12722_v11, 0.0  ;;  %v20583_v46 = vpack.c.bf16 %v12955_v10, %v12954_v12  ;;  %v20586_v54 = vpack.c.bf16 %v13032_v61, %v13031_v19  ;;  %v13033_v11 = vld [vmem:[#allocation10 + $0x110] sm:$0xff]  ;;  %v13214_v7 = vld [vmem:[#allocation10 + $0x218] sm:$0xff]  ;;  %v13215_v12 = vld [vmem:[#allocation10 + $0x220] sm:$0xff] }
0x13f0   : > { %v12742_v40 = vrot.slane %v12727_v32, 1  ;;  %v12735_v51 = vrot.slane %v12723_v55, 1  ;;  %v12736_v43 = vrot.slane %v12724_v22, 1  ;;  %v12738_v35 = vrot.slane %v12725_v52, 1  ;;  %v13213_v59 = vld [vmem:[#allocation10 + $0x210] sm:$0xff]  ;;  %v13216_v10 = vld [vmem:[#allocation10 + $0x228] sm:$0xff] }
0x13f1   : > { %v12740_v18 = vrot.slane %v12726_v26, 1  ;;  %v12744_v15 = vrot.slane %v12728_v42, 1  ;;  %v13217_v19 = vld [vmem:[#allocation10 + $0x230] sm:$0xff]  ;;  %v13218_v61 = vld [vmem:[#allocation10 + $0x238] sm:$0xff] }
0x13f2   : > { %v12737_v44 = vsel %vm739_vm3, %v12735_v51, %v12736_v43  ;;  %v12739_v49 = vsel %vm739_vm3, %v12736_v43, %v12738_v35  ;;  %v13039_v43 = vld [vmem:[#allocation10 + $0x140] sm:$0xff] }
0x13f3   : > { %v12741_v60 = vsel %vm739_vm3, %v12738_v35, %v12740_v18  ;;  %v12752_v1 = vmax.f32 %v12723_v55, %v12737_v44  ;;  %v12753_v5 = vmax.f32 %v12724_v22, %v12739_v49  ;;  %v12743_v37 = vsel %vm739_vm3, %v12740_v18, %v12742_v40  ;;  %v13035_v22 = vld [vmem:[#allocation10 + $0x120] sm:$0xff]  ;;  %v13040_v35 = vld [vmem:[#allocation10 + $0x148] sm:$0xff]  ;;  %v13042_v44 = vld [vmem:[#allocation10 + $0x158] sm:$0xff] }
0x13f4   : > { %v12754_v62 = vmax.f32 %v12725_v52, %v12741_v60  ;;  %v12745_v53 = vsel %vm739_vm3, %v12742_v40, %v12744_v15  ;;  %v12755_v39 = vmax.f32 %v12726_v26, %v12743_v37  ;;  %v12757_v28 = vmax.f32 %v12728_v42, %v12744_v15  ;;  %v13036_v52 = vld [vmem:[#allocation10 + $0x128] sm:$0xff]  ;;  %v13037_v42 = vld [vmem:[#allocation10 + $0x130] sm:$0xff]  ;;  %v13038_v40 = vld [vmem:[#allocation10 + $0x138] sm:$0xff] }
0x13f5   : > { %v12758_v30 = vmax.f32 %v12752_v1, %v12753_v5  ;;  %v12756_v38 = vmax.f32 %v12727_v32, %v12745_v53  ;;  %v13034_v32 = vld [vmem:[#allocation10 + $0x118] sm:$0xff]  ;;  %v20592_v26 = vpack.c.bf16 %v13036_v52, %v13035_v22  ;;  %v20595_v51 = vpack.c.bf16 %v13038_v40, %v13037_v42  ;;  %v13041_v15 = vld [vmem:[#allocation10 + $0x150] sm:$0xff]  ;;  %v13043_v60 = vld [vmem:[#allocation10 + $0x160] sm:$0xff] }
0x13f6   : > { %v12759_v47 = vmax.f32 %v12753_v5, %v12754_v62  ;;  %v12760_v27 = vmax.f32 %v12754_v62, %v12755_v39  ;;  %v20589_v55 = vpack.c.bf16 %v13034_v32, %v13033_v11  ;;  %v20598_v18 = vpack.c.bf16 %v13040_v35, %v13039_v43  ;;  %v13044_v1 = vld [vmem:[#allocation10 + $0x168] sm:$0xff]  ;;  %v13045_v37 = vld [vmem:[#allocation10 + $0x170] sm:$0xff]  ;;  %v13046_v62 = vld [vmem:[#allocation10 + $0x178] sm:$0xff] }
0x13f7   : > { %v12761_v0 = vmax.f32 %v12755_v39, %v12756_v38  ;;  %v12762_v50 = vmax.f32 %v12756_v38, %v12757_v28  ;;  %v20601_v49 = vpack.c.bf16 %v13042_v44, %v13041_v15  ;;  %v20604_v5 = vpack.c.bf16 %v13044_v1, %v13043_v60  ;;  %v13121_v39 = vld [vmem:[#allocation10 + $0x180] sm:$0xff]  ;;  %v13122_v28 = vld [vmem:[#allocation10 + $0x188] sm:$0xff]  ;;  %v13222_v22 = vld [vmem:[#allocation10 + $0x258] sm:$0xff] }
0x13f8   : > { %v20529_v33 = vpack.c.bf16 %v12759_v47, %v12758_v30  ;;  %v20607_v53 = vpack.c.bf16 %v13046_v62, %v13045_v37  ;;  %v20610_v30 = vpack.c.bf16 %v13122_v28, %v13121_v39  ;;  %v13123_v47 = vld [vmem:[#allocation10 + $0x190] sm:$0xff]  ;;  %v13220_v11 = vld [vmem:[#allocation10 + $0x248] sm:$0xff]  ;;  %v13226_v43 = vld [vmem:[#allocation10 + $0x278] sm:$0xff] }
0x13f9   : > { %v20533_v25 = vpack.c.bf16 %v12761_v0, %v12760_v27  ;;  %v13124_v27 = vld [vmem:[#allocation10 + $0x198] sm:$0xff]  ;;  %v13224_v42 = vld [vmem:[#allocation10 + $0x268] sm:$0xff]  ;;  %v13303_v60 = vld [vmem:[#allocation10 + $0x290] sm:$0xff] }
0x13fa   : > { %20530 = vmatprep.subr.bf16.mxu0 %v20529_v33  ;;  %v20613_v0 = vpack.c.bf16 %v13124_v27, %v13123_v47  ;;  %v13302_v15 = vld [vmem:[#allocation10 + $0x288] sm:$0xff]  ;;  %v13304_v1 = vld [vmem:[#allocation10 + $0x298] sm:$0xff]  ;;  %v13305_v37 = vld [vmem:[#allocation10 + $0x2a0] sm:$0xff] }
0x13fb   : > { %20532 = vmatpush3.bf16.msra.mxu0 %v20529_v33  ;;  %v13126_v33 = vld [vmem:[#allocation10 + $0x1a8] sm:$0xff]  ;;  %v13307_v39 = vld [vmem:[#allocation10 + $0x2b0] sm:$0xff]  ;;  %v13308_v28 = vld [vmem:[#allocation10 + $0x2b8] sm:$0xff] }
0x13fc   : > { %20534 = vmatprep.subr.bf16.mxu0 %v20533_v25  ;;  %v13306_v62 = vld [vmem:[#allocation10 + $0x2a8] sm:$0xff] }
0x13fd   : > { %v13310_v47 = vld [vmem:[#allocation10 + $0x2c8] sm:$0xff] }
0x13ff   : > { %20536 = vmatpush3.bf16.msra.mxu0 %v20533_v25 }
0x1400   : > { %19201 = vmatprep.subr.msk.mxu0 %vm12772_vm0, %v12762_v50 }
0x1403   : > { %19202 = vmatpush3.msk.msra.mxu0 %vm12772_vm0, %v12762_v50  ;;  %v13125_v50 = vld [vmem:[#allocation10 + $0x1a0] sm:$0xff] }
0x1404   : > { %19204 = vmatmul.mubr.msk.f32.vlgmr.msra.gmra.mrb[106].mxu0 %vm12765_vm15, %v12764_v4  ;;  %v20616_v25 = vpack.c.bf16 %v13126_v33, %v13125_v50  ;;  %v13127_v4 = vld [vmem:[#allocation10 + $0x1b0] sm:$0xff]  ;;  %v13312_v50 = vld [vmem:[#allocation10 + $0x2d8] sm:$0xff] }
0x1405   : > { %v20619_v29 = vpack.c.bf16 %v13128_v2, %v13127_v4  ;;  %v13314_v4 = vld [vmem:[#allocation10 + $0x2e8] sm:$0xff] }
0x14d7   : > { %v28863_v9 = vpop.f32.mrb[106].mxu0 }
0x14d8   : > { %v28865_v21 = vpop.f32.mrb[107].mxu0 }
0x14d9   : > { %19239 = vmatmul.mubr.f32.vlgmr.msra.gmra.mrb[164].mxu1 %v28865_v21  ;;  %v12957_v63 = vrot.slane %v28865_v21, 1  ;;  %v13047_v38 = vrot.slane %v28865_v21, 2 }
0x14da   : > { %20563 = vmatpush3.bf16.msra.mxu1 %v20562_v31  ;;  %19273 = vmatprep.mubr.msk.f32.mxu1 %vm22062_vm12, %v30107_v3  ;;  %v13129_v31 = vld [vmem:[#allocation10 + $0x1c0] sm:$0xff] }
0x14db   : > { %20564 = vmatprep.subr.bf16.mxu1 %v30095_v14  ;;  %v20622_v34 = vpack.c.bf16 %v13130_v45, %v13129_v31  ;;  %v13316_v31 = vld [vmem:[#allocation10 + $0x2f8] sm:$0xff] }
0x14de   : > { %20566 = vmatpush3.bf16.msra.mxu1 %v20565_v6  ;;  %v13131_v6 = vld [vmem:[#allocation10 + $0x1d0] sm:$0xff] }
0x14df   : > { %20567 = vmatprep.subr.bf16.mxu1 %v30095_v14  ;;  %v20625_v48 = vpack.c.bf16 %v13132_v57, %v13131_v6  ;;  %v13392_v6 = vld [vmem:[#allocation10 + $0x308] sm:$0xff] }
0x14e2   : > { %20569 = vmatpush3.bf16.msra.mxu1 %v20568_v56  ;;  %v13133_v56 = vld [vmem:[#allocation10 + $0x1e0] sm:$0xff] }
0x14e3   : > { %20570 = vmatprep.subr.bf16.mxu1 %v30095_v14  ;;  %v20628_v41 = vpack.c.bf16 %v13134_v13, %v13133_v56  ;;  %v13393_v56 = vld [vmem:[#allocation10 + $0x310] sm:$0xff]  ;;  %v13394_v13 = vld [vmem:[#allocation10 + $0x318] sm:$0xff] }
0x14e6   : > { %20572 = vmatpush3.bf16.msra.mxu1 %v20571_v36  ;;  %v13135_v36 = vld [vmem:[#allocation10 + $0x1f0] sm:$0xff] }
0x14e7   : > { %20573 = vmatprep.subr.bf16.mxu1 %v30095_v14  ;;  %v20631_v24 = vpack.c.bf16 %v13136_v16, %v13135_v36  ;;  %v13395_v36 = vld [vmem:[#allocation10 + $0x320] sm:$0xff]  ;;  %v13396_v16 = vld [vmem:[#allocation10 + $0x328] sm:$0xff] }
0x14ea   : > { %20575 = vmatpush3.bf16.msra.mxu1 %v20574_v8  ;;  %v13211_v8 = vld [vmem:[#allocation10 + $0x200] sm:$0xff] }
0x14eb   : > { %20576 = vmatprep.subr.bf16.mxu1 %v30095_v14  ;;  %v20634_v17 = vpack.c.bf16 %v13212_v58, %v13211_v8  ;;  %v13397_v8 = vld [vmem:[#allocation10 + $0x330] sm:$0xff]  ;;  %v13398_v58 = vld [vmem:[#allocation10 + $0x338] sm:$0xff] }
0x14ee   : > { %20578 = vmatpush3.bf16.msra.mxu1 %v20577_v20  ;;  %v13137_v20 = vrot.slane %v28865_v21, 3 }
0x14ef   : > { %20579 = vmatprep.subr.bf16.mxu1 %v30095_v14 }
0x14f2   : > { %20581 = vmatpush3.bf16.msra.mxu1 %v20580_v23  ;;  %v20637_v23 = vpack.c.bf16 %v13214_v7, %v13213_v59  ;;  %v13400_v59 = vld [vmem:[#allocation10 + $0x348] sm:$0xff] }
0x14f3   : > { %20582 = vmatprep.subr.bf16.mxu1 %v30095_v14 }
0x14f6   : > { %20584 = vmatpush3.bf16.msra.mxu1 %v20583_v46  ;;  %v20640_v46 = vpack.c.bf16 %v13216_v10, %v13215_v12  ;;  %v13402_v12 = vld [vmem:[#allocation10 + $0x358] sm:$0xff] }
0x14f7   : > { %20585 = vmatprep.subr.bf16.mxu1 %v30095_v14 }
0x14f9   : > { %19274 = vmatmul.mubr.f32.vlgmr.msra.gmra.mrb[164].mxu1 %v12957_v63  ;;  %v13219_v63 = vld [vmem:[#allocation10 + $0x240] sm:$0xff] }
0x14fa   : > { %20587 = vmatpush3.bf16.msra.mxu1 %v20586_v54  ;;  %19308 = vmatprep.mubr.msk.f32.mxu1 %vm22062_vm12, %v30107_v3  ;;  %v20643_v54 = vpack.c.bf16 %v13218_v61, %v13217_v19  ;;  %v20646_v32 = vpack.c.bf16 %v13220_v11, %v13219_v63  ;;  %v13404_v19 = vld [vmem:[#allocation10 + $0x368] sm:$0xff]  ;;  %v13406_v63 = vld [vmem:[#allocation10 + $0x378] sm:$0xff] }
0x14fb   : > { %20588 = vmatprep.subr.bf16.mxu1 %v30095_v14 }
0x14fe   : > { %20590 = vmatpush3.bf16.msra.mxu1 %v20589_v55  ;;  %v13221_v55 = vld [vmem:[#allocation10 + $0x250] sm:$0xff] }
0x14ff   : > { %20591 = vmatprep.subr.bf16.mxu1 %v30095_v14  ;;  %v20649_v52 = vpack.c.bf16 %v13222_v22, %v13221_v55  ;;  %v13482_v55 = vld [vmem:[#allocation10 + $0x388] sm:$0xff] }
0x1502   : > { %20593 = vmatpush3.bf16.msra.mxu1 %v20592_v26  ;;  %v13223_v26 = vld [vmem:[#allocation10 + $0x260] sm:$0xff] }
0x1503   : > { %20594 = vmatprep.subr.bf16.mxu1 %v30095_v14  ;;  %v20652_v40 = vpack.c.bf16 %v13224_v42, %v13223_v26  ;;  %v13483_v26 = vld [vmem:[#allocation10 + $0x390] sm:$0xff]  ;;  %v13484_v42 = vld [vmem:[#allocation10 + $0x398] sm:$0xff] }
0x1506   : > { %20596 = vmatpush3.bf16.msra.mxu1 %v20595_v51  ;;  %v13225_v51 = vld [vmem:[#allocation10 + $0x270] sm:$0xff] }
0x1507   : > { %20597 = vmatprep.subr.bf16.mxu1 %v30095_v14  ;;  %v20655_v35 = vpack.c.bf16 %v13226_v43, %v13225_v51  ;;  %v13485_v51 = vld [vmem:[#allocation10 + $0x3a0] sm:$0xff]  ;;  %v13486_v43 = vld [vmem:[#allocation10 + $0x3a8] sm:$0xff] }
0x150a   : > { %20599 = vmatpush3.bf16.msra.mxu1 %v20598_v18  ;;  %v13301_v18 = vld [vmem:[#allocation10 + $0x280] sm:$0xff] }
0x150b   : > { %20600 = vmatprep.subr.bf16.mxu1 %v30095_v14  ;;  %v20658_v44 = vpack.c.bf16 %v13302_v15, %v13301_v18  ;;  %v13487_v18 = vld [vmem:[#allocation10 + $0x3b0] sm:$0xff]  ;;  %v13488_v15 = vld [vmem:[#allocation10 + $0x3b8] sm:$0xff] }
0x150e   : > { %20602 = vmatpush3.bf16.msra.mxu1 %v20601_v49  ;;  %v13227_v49 = vrot.slane %v28865_v21, 4 }
0x150f   : > { %20603 = vmatprep.subr.bf16.mxu1 %v30095_v14 }
0x1512   : > { %20605 = vmatpush3.bf16.msra.mxu1 %v20604_v5  ;;  %v20661_v5 = vpack.c.bf16 %v13304_v1, %v13303_v60  ;;  %v13490_v60 = vld [vmem:[#allocation10 + $0x3c8] sm:$0xff] }
0x1513   : > { %20606 = vmatprep.subr.bf16.mxu1 %v30095_v14 }
0x1516   : > { %20608 = vmatpush3.bf16.msra.mxu1 %v20607_v53  ;;  %v20664_v53 = vpack.c.bf16 %v13306_v62, %v13305_v37  ;;  %v13492_v37 = vld [vmem:[#allocation10 + $0x3d8] sm:$0xff] }
0x1517   : > { %20609 = vmatprep.subr.bf16.mxu1 %v30095_v14 }
0x1519   : > { %19309 = vmatmul.mubr.f32.vlgmr.msra.gmra.mrb[164].mxu1 %v13047_v38  ;;  %v13309_v38 = vld [vmem:[#allocation10 + $0x2c0] sm:$0xff] }
0x151a   : > { %20611 = vmatpush3.bf16.msra.mxu1 %v20610_v30  ;;  %19343 = vmatprep.mubr.msk.f32.mxu1 %vm22062_vm12, %v30107_v3  ;;  %v20667_v30 = vpack.c.bf16 %v13308_v28, %v13307_v39  ;;  %v20670_v27 = vpack.c.bf16 %v13310_v47, %v13309_v38  ;;  %v13494_v39 = vld [vmem:[#allocation10 + $0x3e8] sm:$0xff]  ;;  %v13496_v38 = vld [vmem:[#allocation10 + $0x3f8] sm:$0xff] }
0x151b   : > { %20612 = vmatprep.subr.bf16.mxu1 %v30095_v14 }
0x151e   : > { %20614 = vmatpush3.bf16.msra.mxu1 %v20613_v0  ;;  %v13311_v0 = vld [vmem:[#allocation10 + $0x2d0] sm:$0xff] }
0x151f   : > { %20615 = vmatprep.subr.bf16.mxu1 %v30095_v14  ;;  %v20673_v33 = vpack.c.bf16 %v13312_v50, %v13311_v0  ;;  %v13572_v0 = vld [vmem:[#allocation10 + $0x408] sm:$0xff] }
0x1522   : > { %20617 = vmatpush3.bf16.msra.mxu1 %v20616_v25  ;;  %v13313_v25 = vld [vmem:[#allocation10 + $0x2e0] sm:$0xff] }
0x1523   : > { %20618 = vmatprep.subr.bf16.mxu1 %v30095_v14  ;;  %v20676_v2 = vpack.c.bf16 %v13314_v4, %v13313_v25  ;;  %v13573_v25 = vld [vmem:[#allocation10 + $0x410] sm:$0xff]  ;;  %v13574_v4 = vld [vmem:[#allocation10 + $0x418] sm:$0xff] }
0x1526   : > { %20620 = vmatpush3.bf16.msra.mxu1 %v20619_v29  ;;  %v13315_v29 = vld [vmem:[#allocation10 + $0x2f0] sm:$0xff] }
0x1527   : > { %20621 = vmatprep.subr.bf16.mxu1 %v30095_v14  ;;  %v20679_v45 = vpack.c.bf16 %v13316_v31, %v13315_v29  ;;  %v13575_v29 = vld [vmem:[#allocation10 + $0x420] sm:$0xff]  ;;  %v13576_v31 = vld [vmem:[#allocation10 + $0x428] sm:$0xff] }
0x152a   : > { %20623 = vmatpush3.bf16.msra.mxu1 %v20622_v34  ;;  %v13391_v34 = vld [vmem:[#allocation10 + $0x300] sm:$0xff] }
0x152b   : > { %20624 = vmatprep.subr.bf16.mxu1 %v30095_v14  ;;  %v20682_v57 = vpack.c.bf16 %v13392_v6, %v13391_v34  ;;  %v13577_v34 = vld [vmem:[#allocation10 + $0x430] sm:$0xff] }
0x152e   : > { %20626 = vmatpush3.bf16.msra.mxu1 %v20625_v48  ;;  %v13317_v48 = vrot.slane %v28865_v21, 5 }
0x152f   : > { %20627 = vmatprep.subr.bf16.mxu1 %v30095_v14 }
0x1532   : > { %20629 = vmatpush3.bf16.msra.mxu1 %v20628_v41  ;;  %v20685_v41 = vpack.c.bf16 %v13394_v13, %v13393_v56  ;;  %v13582_v13 = vld [vmem:[#allocation10 + $0x458] sm:$0xff] }
0x1533   : > { %20630 = vmatprep.subr.bf16.mxu1 %v30095_v14 }
0x1536   : > { %20632 = vmatpush3.bf16.msra.mxu1 %v20631_v24  ;;  %v20688_v24 = vpack.c.bf16 %v13396_v16, %v13395_v36  ;;  %v13583_v36 = vld [vmem:[#allocation10 + $0x460] sm:$0xff]  ;;  %v13584_v16 = vld [vmem:[#allocation10 + $0x468] sm:$0xff] }
0x1537   : > { %20633 = vmatprep.subr.bf16.mxu1 %v30095_v14 }
0x1539   : > { %19344 = vmatmul.mubr.f32.vlgmr.msra.gmra.mrb[164].mxu1 %v13137_v20  ;;  %v13399_v20 = vld [vmem:[#allocation10 + $0x340] sm:$0xff] }
0x153a   : > { %20635 = vmatpush3.bf16.msra.mxu1 %v20634_v17  ;;  %19378 = vmatprep.mubr.msk.f32.mxu1 %vm22062_vm12, %v30107_v3  ;;  %v20691_v17 = vpack.c.bf16 %v13398_v58, %v13397_v8  ;;  %v20694_v7 = vpack.c.bf16 %v13400_v59, %v13399_v20  ;;  %v13585_v8 = vld [vmem:[#allocation10 + $0x470] sm:$0xff]  ;;  %v13586_v58 = vld [vmem:[#allocation10 + $0x478] sm:$0xff]  ;;  %v12851_v20 = vld [vmem:[%s30119_s16] sm:$0x1] }
0x153b   : > { %20636 = vmatprep.subr.bf16.mxu1 %v30095_v14 }
0x153e   : > { %20638 = vmatpush3.bf16.msra.mxu1 %v20637_v23  ;;  %v13401_v23 = vld [vmem:[#allocation10 + $0x350] sm:$0xff] }
0x153f   : > { %20639 = vmatprep.subr.bf16.mxu1 %v30095_v14  ;;  %v20697_v10 = vpack.c.bf16 %v13402_v12, %v13401_v23 }
0x1542   : > { %20641 = vmatpush3.bf16.msra.mxu1 %v20640_v46  ;;  %v13403_v46 = vld [vmem:[#allocation10 + $0x360] sm:$0xff] }
0x1543   : > { %20642 = vmatprep.subr.bf16.mxu1 %v30095_v14  ;;  %v20700_v61 = vpack.c.bf16 %v13404_v19, %v13403_v46 }
0x1546   : > { %20644 = vmatpush3.bf16.msra.mxu1 %v20643_v54  ;;  %v13405_v54 = vld [vmem:[#allocation10 + $0x370] sm:$0xff] }
0x1547   : > { %20645 = vmatprep.subr.bf16.mxu1 %v30095_v14  ;;  %v20703_v11 = vpack.c.bf16 %v13406_v63, %v13405_v54 }
0x154a   : > { %20647 = vmatpush3.bf16.msra.mxu1 %v20646_v32  ;;  %v13481_v32 = vld [vmem:[#allocation10 + $0x380] sm:$0xff] }
0x154b   : > { %20648 = vmatprep.subr.bf16.mxu1 %v30095_v14  ;;  %v20706_v22 = vpack.c.bf16 %v13482_v55, %v13481_v32 }
0x154e   : > { %20650 = vmatpush3.bf16.msra.mxu1 %v20649_v52  ;;  %v13407_v52 = vrot.slane %v28865_v21, 6 }
0x154f   : > { %20651 = vmatprep.subr.bf16.mxu1 %v30095_v14 }
0x1552   : > { %20653 = vmatpush3.bf16.msra.mxu1 %v20652_v40  ;;  %v20709_v40 = vpack.c.bf16 %v13484_v42, %v13483_v26 }
0x1553   : > { %20654 = vmatprep.subr.bf16.mxu1 %v30095_v14 }
0x1556   : > { %20656 = vmatpush3.bf16.msra.mxu1 %v20655_v35  ;;  %v20712_v35 = vpack.c.bf16 %v13486_v43, %v13485_v51 }
0x1557   : > { %20657 = vmatprep.subr.bf16.mxu1 %v30095_v14 }
0x1559   : > { %19379 = vmatmul.mubr.f32.vlgmr.msra.gmra.mrb[164].mxu1 %v13227_v49  ;;  %v13489_v49 = vld [vmem:[#allocation10 + $0x3c0] sm:$0xff] }
0x155a   : > { %20659 = vmatpush3.bf16.msra.mxu1 %v20658_v44  ;;  %19413 = vmatprep.mubr.msk.f32.mxu1 %vm22062_vm12, %v30107_v3  ;;  %v20715_v44 = vpack.c.bf16 %v13488_v15, %v13487_v18  ;;  %v20718_v1 = vpack.c.bf16 %v13490_v60, %v13489_v49 }
0x155b   : > { %20660 = vmatprep.subr.bf16.mxu1 %v30095_v14 }
0x155e   : > { %20662 = vmatpush3.bf16.msra.mxu1 %v20661_v5  ;;  %v13491_v5 = vld [vmem:[#allocation10 + $0x3d0] sm:$0xff] }
0x155f   : > { %20663 = vmatprep.subr.bf16.mxu1 %v30095_v14  ;;  %v20721_v62 = vpack.c.bf16 %v13492_v37, %v13491_v5 }
0x1562   : > { %20665 = vmatpush3.bf16.msra.mxu1 %v20664_v53  ;;  %v13493_v53 = vld [vmem:[#allocation10 + $0x3e0] sm:$0xff] }
0x1563   : > { %20666 = vmatprep.subr.bf16.mxu1 %v30095_v14  ;;  %v20724_v28 = vpack.c.bf16 %v13494_v39, %v13493_v53 }
0x1566   : > { %20668 = vmatpush3.bf16.msra.mxu1 %v20667_v30  ;;  %v13495_v30 = vld [vmem:[#allocation10 + $0x3f0] sm:$0xff] }
0x1567   : > { %20669 = vmatprep.subr.bf16.mxu1 %v30095_v14  ;;  %v20727_v47 = vpack.c.bf16 %v13496_v38, %v13495_v30 }
0x156a   : > { %20671 = vmatpush3.bf16.msra.mxu1 %v20670_v27  ;;  %v13571_v27 = vld [vmem:[#allocation10 + $0x400] sm:$0xff] }
0x156b   : > { %20672 = vmatprep.subr.bf16.mxu1 %v30095_v14  ;;  %v20730_v50 = vpack.c.bf16 %v13572_v0, %v13571_v27 }
0x156e   : > { %20674 = vmatpush3.bf16.msra.mxu1 %v20673_v33  ;;  %v13497_v33 = vrot.slane %v28865_v21, 7  ;;  %v13578_v21 = vld [vmem:[#allocation10 + $0x438] sm:$0xff] }
0x156f   : > { %20675 = vmatprep.subr.bf16.mxu1 %v30095_v14  ;;  %v20739_v6 = vpack.c.bf16 %v13578_v21, %v13577_v34 }
0x1572   : > { %20677 = vmatpush3.bf16.msra.mxu1 %v20676_v2  ;;  %v20733_v2 = vpack.c.bf16 %v13574_v4, %v13573_v25 }
0x1573   : > { %20678 = vmatprep.subr.bf16.mxu1 %v30095_v14 }
0x1576   : > { %20680 = vmatpush3.bf16.msra.mxu1 %v20679_v45  ;;  %v20736_v45 = vpack.c.bf16 %v13576_v31, %v13575_v29 }
0x1577   : > { %20681 = vmatprep.subr.bf16.mxu1 %v30095_v14 }
0x1579   : > { %19414 = vmatmul.mubr.f32.vlgmr.msra.gmra.mrb[164].mxu1 %v13317_v48  ;;  %v13580_v48 = vld [vmem:[#allocation10 + $0x448] sm:$0xff] }
0x157a   : > { %20683 = vmatpush3.bf16.msra.mxu1 %v20682_v57  ;;  %19448 = vmatprep.mubr.msk.f32.mxu1 %vm22062_vm12, %v30107_v3  ;;  %v13579_v57 = vld [vmem:[#allocation10 + $0x440] sm:$0xff] }
0x157b   : > { %20684 = vmatprep.subr.bf16.mxu1 %v30095_v14  ;;  %v20742_v56 = vpack.c.bf16 %v13580_v48, %v13579_v57 }
0x157e   : > { %20686 = vmatpush3.bf16.msra.mxu1 %v20685_v41 }
0x157f   : > { %20687 = vmatprep.subr.bf16.mxu1 %v30095_v14 }
0x1582   : > { %20689 = vmatpush3.bf16.msra.mxu1 %v20688_v24  ;;  %v20748_v24 = vpack.c.bf16 %v13584_v16, %v13583_v36 }
0x1583   : > { %20690 = vmatprep.subr.bf16.mxu1 %v30095_v14 }
0x1586   : > { %20692 = vmatpush3.bf16.msra.mxu1 %v20691_v17  ;;  %v20751_v17 = vpack.c.bf16 %v13586_v58, %v13585_v8 }
0x1587   : > { %20693 = vmatprep.subr.bf16.mxu1 %v30095_v14 }
0x158a   : > { %20695 = vmatpush3.bf16.msra.mxu1 %v20694_v7 }
0x158b   : > { %20696 = vmatprep.subr.bf16.mxu1 %v30095_v14 }
0x158e   : > { %20698 = vmatpush3.bf16.msra.mxu1 %v20697_v10 }
0x158f   : > { %20699 = vmatprep.subr.bf16.mxu1 %v30095_v14 }
0x1592   : > { %20701 = vmatpush3.bf16.msra.mxu1 %v20700_v61 }
0x1593   : > { %20702 = vmatprep.subr.bf16.mxu1 %v30095_v14 }
0x1596   : > { %20704 = vmatpush3.bf16.msra.mxu1 %v20703_v11 }
0x1597   : > { %20705 = vmatprep.subr.bf16.mxu1 %v30095_v14 }
0x1599   : > { %19449 = vmatmul.mubr.f32.vlgmr.msra.gmra.mrb[164].mxu1 %v13407_v52 }
0x159a   : > { %20707 = vmatpush3.bf16.msra.mxu1 %v20706_v22  ;;  %19483 = vmatprep.mubr.msk.f32.mxu1 %vm22062_vm12, %v30107_v3 }
0x159b   : > { %20708 = vmatprep.subr.bf16.mxu1 %v30095_v14 }
0x159e   : > { %20710 = vmatpush3.bf16.msra.mxu1 %v20709_v40 }
0x159f   : > { %20711 = vmatprep.subr.bf16.mxu1 %v30095_v14 }
0x15a2   : > { %20713 = vmatpush3.bf16.msra.mxu1 %v20712_v35 }
0x15a3   : > { %20714 = vmatprep.subr.bf16.mxu1 %v30095_v14 }
0x15a6   : > { %20716 = vmatpush3.bf16.msra.mxu1 %v20715_v44 }
0x15a7   : > { %20717 = vmatprep.subr.bf16.mxu1 %v30095_v14 }
0x15aa   : > { %20719 = vmatpush3.bf16.msra.mxu1 %v20718_v1 }
0x15ab   : > { %20720 = vmatprep.subr.bf16.mxu1 %v30095_v14 }
0x15ae   : > { %20722 = vmatpush3.bf16.msra.mxu1 %v20721_v62 }
0x15af   : > { %20723 = vmatprep.subr.bf16.mxu1 %v30095_v14 }
0x15b2   : > { %20725 = vmatpush3.bf16.msra.mxu1 %v20724_v28 }
0x15b3   : > { %20726 = vmatprep.subr.bf16.mxu1 %v30095_v14 }
0x15b6   : > { %20728 = vmatpush3.bf16.msra.mxu1 %v20727_v47 }
0x15b7   : > { %20729 = vmatprep.subr.bf16.mxu1 %v30095_v14 }
0x15b9   : > { %19484 = vmatmul.mubr.f32.vlgmr.msra.gmra.mrb[164].mxu1 %v13497_v33 }
0x15ba   : > { %20731 = vmatpush3.bf16.msra.mxu1 %v20730_v50  ;;  %19518 = vmatprep.mubr.msk.f32.mxu1 %vm22062_vm12, %v30107_v3  ;;  %v13581_v3 = vld [vmem:[#allocation10 + $0x450] sm:$0xff] }
0x15bb   : > { %20732 = vmatprep.subr.bf16.mxu1 %v30095_v14  ;;  %v20745_v41 = vpack.c.bf16 %v13582_v13, %v13581_v3 }
0x15be   : > { %20734 = vmatpush3.bf16.msra.mxu1 %v20733_v2 }
0x15bf   : > { %20735 = vmatprep.subr.bf16.mxu1 %v30095_v14 }
0x15c2   : > { %20737 = vmatpush3.bf16.msra.mxu1 %v20736_v45 }
0x15c3   : > { %20738 = vmatprep.subr.bf16.mxu1 %v30095_v14 }
0x15c6   : > { %20740 = vmatpush3.bf16.msra.mxu1 %v20739_v6 }
0x15c7   : > { %20741 = vmatprep.subr.bf16.mxu1 %v30095_v14 }
0x15ca   : > { %20743 = vmatpush3.bf16.msra.mxu1 %v20742_v56 }
0x15cb   : > { %20744 = vmatprep.subr.bf16.mxu1 %v30095_v14 }
0x15ce   : > { %20746 = vmatpush3.bf16.msra.mxu1 %v20745_v41 }
0x15cf   : > { %20747 = vmatprep.subr.bf16.mxu1 %v30095_v14 }
0x15d2   : > { %20749 = vmatpush3.bf16.msra.mxu1 %v20748_v24 }
0x15d3   : > { %20750 = vmatprep.subr.bf16.mxu1 %v30095_v14 }
0x15d6   : > { %20752 = vmatpush3.bf16.msra.mxu1 %v20751_v17 }
0x15d9   : > { %19519 = vmatmul.mubr.f32.vlgmr.msra.gmra.mrb[164].mxu1 %v28863_v9 }
0x16ac   : > { %v13653_v59 = vpop.f32.mrb[164].mxu1 }
0x16ad   : > { %v20768_v7 = vadd.f32 %v13653_v59, %v12851_v20  ;;  %v19520_v23 = vpop.f32.mrb[165].mxu1 }
0x16af   : > { %13658 = vst [vmem:[%s605_s18] sm:$0x1] %v20768_v7 }
0x16b0 PF: > { %s30121_s30 = sld [smem:[#allocation16_spill]] }
0x16b6   : > { %s30_s21 = sadd.s32 1, %s30121_s30  }
0x16b7   : > { %p27_p9 = scmp.ge.s32.totalorder %s30_s21, 4  }
0x16b9   :  { %29 = sbr.rel (!%p27_p9) target bundleno = 10 (0xa), region = 179 }
0x16c0   :  { %13676 = vsyncpa [#allocation3], 1 }
0x16c1   :  { %13678 = vsyncpa [#allocation3 + $0x1], 1 }
0x16c2   :  { %13679 = vsyncpa [#allocation5], 1 }
0x16c3   :  { %13680 = vsyncpa [#allocation8], 1 }
0x16c4   :  { %13681 = vsyncpa [#allocation11], 1 }

</bundles_post_ra>
